<compile_context>
chip_gen: v6e
topology: v6e:2x2x1
jax: 0.10.0
libtpu: 0.0.40
codegen_flags: <defaults>
</compile_context>

<pallas_src>
import functools

import jax
import jax.numpy as jnp
from jax.experimental import pallas as pl
from jax.experimental.pallas import tpu as pltpu


# ----------------------------------------------------------------------------
# Single fused kernel: encoder stand-in + wavefront stacked LSTM + projection.
# Gate order follows PyTorch: [i, f, g, o].
# ----------------------------------------------------------------------------
def fused_cnn_to_rnn_kernel(*refs, num_layers, T, Bp, Hp, inv_pool):
    L = num_layers
    n_lstm = 3 + 2 * (L - 1)
    n_in = 7 + n_lstm + 2
    (patches_ref, pool_ref, w_stem_ref, b_stem_ref,
     w_fc_ref, b_fc_ref, emb_ref) = refs[:7]
    lstm_refs = refs[7:7 + n_lstm]
    w_out_ref, b_out_ref = refs[7 + n_lstm:n_in]
    out_ref = refs[n_in]
    gx_scr, seq_scr = refs[n_in + 1], refs[n_in + 2]

    f32, bf16 = jnp.float32, jnp.bfloat16

    # ---- EncoderCNN stand-in -------------------------------------------------
    # conv stem (im2col matmul, bf16 operands) + ReLU, GAP as an MXU matmul with
    # an exact 0/1 bf16 pooling matrix (1/P applied in f32), replaced fc Linear
    # + ReLU.  Dropout = identity (eval mode).
    conv = jnp.maximum(
        jnp.dot(patches_ref[...], w_stem_ref[...], preferred_element_type=f32)
        + b_stem_ref[...], 0.0)                                   # (Bp*P, Fp)
    pooled = jnp.dot(pool_ref[...], conv.astype(bf16),
                     preferred_element_type=f32) * inv_pool       # (Bp, Fp)
    feat = jnp.maximum(
        jnp.dot(pooled.astype(bf16), w_fc_ref[...], preferred_element_type=f32)
        + b_fc_ref[...], 0.0)                                     # (Bp, Ep=Hp)

    # ---- Layer-0 input sequence, resident in VMEM scratch ---------------------
    # t = 0 -> encoder features, t >= 1 -> caption embeddings (dropout=identity)
    seq_scr[pl.ds(0, Bp), :] = feat
    seq_scr[pl.ds(Bp, (T - 1) * Bp), :] = emb_ref[...].astype(f32)

    # Layer-0 input-to-hidden gates for ALL timesteps in one big matmul.
    w_ih0, w_hh0, b0 = lstm_refs[0], lstm_refs[1], lstm_refs[2]
    gx_scr[...] = jnp.dot(seq_scr[...].astype(bf16), w_ih0[...],
                          preferred_element_type=f32) + b0[...]

    def lstm_cell(gates, c_prev):
        i_g = jax.nn.sigmoid(gates[:, 0 * Hp:1 * Hp])
        f_g = jax.nn.sigmoid(gates[:, 1 * Hp:2 * Hp])
        g_g = jnp.tanh(gates[:, 2 * Hp:3 * Hp])
        o_g = jax.nn.sigmoid(gates[:, 3 * Hp:4 * Hp])
        c_new = f_g * c_prev + i_g * g_g
        h_new = o_g * jnp.tanh(c_new)
        return h_new, c_new

    # ---- Wavefront over (layer, time): layer l runs timestep (w - l) ----------
    # Layer l's inputs (h_{l-1} and its own h_l, c_l) were produced at wavefront
    # step w-1, so every layer in a step reads only the PRE-update carries and
    # the per-layer matmuls within a step are independent (scheduler-overlapped).
    zeros = jnp.zeros((Bp, Hp), f32)
    h = [zeros for _ in range(L)]
    c = [zeros for _ in range(L)]

    for w in range(T + L - 1):          # fully unrolled: T, L are small & static
        h_prev = list(h)                # carries from the previous wavefront step

        if w < T:                       # layer 0, timestep w
            g0 = gx_scr[pl.ds(w * Bp, Bp), :] + jnp.dot(
                h_prev[0].astype(bf16), w_hh0[...], preferred_element_type=f32)
            h[0], c[0] = lstm_cell(g0, c[0])
            if L == 1:
                seq_scr[pl.ds(w * Bp, Bp), :] = h[0]

        for l in range(1, L):           # layer l, timestep w-l, input h_{l-1}
            if l <= w < T + l:
                w_cat = lstm_refs[3 + 2 * (l - 1)]   # [w_ih_l; w_hh_l] stacked
                b_l = lstm_refs[4 + 2 * (l - 1)]
                xh = jnp.concatenate([h_prev[l - 1].astype(bf16),
                                      h_prev[l].astype(bf16)], axis=1)
                g_l = jnp.dot(xh, w_cat[...],
                              preferred_element_type=f32) + b_l[...]
                h[l], c[l] = lstm_cell(g_l, c[l])
                if l == L - 1:          # final layer feeds the output projection
                    seq_scr[pl.ds((w - l) * Bp, Bp), :] = h[l]

    # ---- Output projection over all timesteps at once (lane-dense store) ------
    out_ref[...] = jnp.dot(seq_scr[...].astype(bf16), w_out_ref[...],
                           preferred_element_type=f32) + b_out_ref[...]


def run_fused(patches, pool_ones, w_stem, b_stem, w_fc, b_fc, emb_flat,
              lstm_flat, w_out, b_out, *, T, Bp, Hp, num_layers, inv_pool):
    Vp = w_out.shape[1]
    inputs = [patches, pool_ones, w_stem, b_stem, w_fc, b_fc, emb_flat,
              *lstm_flat, w_out, b_out]

    def full(a):
        return pl.BlockSpec(a.shape, lambda i: (0,) * a.ndim)

    kernel = functools.partial(fused_cnn_to_rnn_kernel, num_layers=num_layers,
                               T=T, Bp=Bp, Hp=Hp, inv_pool=inv_pool)
    return pl.pallas_call(
        kernel,
        out_shape=jax.ShapeDtypeStruct((T * Bp, Vp), jnp.float32),
        grid=(1,),
        in_specs=[full(a) for a in inputs],
        out_specs=pl.BlockSpec((T * Bp, Vp), lambda i: (0, 0)),
        scratch_shapes=[pltpu.VMEM((T * Bp, 4 * Hp), jnp.float32),  # gate x-part
                        pltpu.VMEM((T * Bp, Hp), jnp.float32)],     # seq buffer
        compiler_params=pltpu.CompilerParams(
            dimension_semantics=("arbitrary",),
            vmem_limit_bytes=64 * 1024 * 1024),
    )(*inputs)


# ----------------------------------------------------------------------------
# Wrapper-side glue: im2col, padding to TPU-friendly shapes, bf16 casts,
# embedding gather.  All free XLA layout work, not hot-path compute.
# ----------------------------------------------------------------------------
def _round_up(x, m):
    return ((x + m - 1) // m) * m


def _pad2(x, rows, cols):
    return jnp.pad(x, ((0, rows - x.shape[0]), (0, cols - x.shape[1])))


def im2col_3x3(images):
    """(B, C, H, W) -> (B*P, C*9) with P = (H-2)*(W-2), valid 3x3 patches."""
    B, C, H, W = images.shape
    OH, OW = H - 2, W - 2
    parts = [images[:, :, dy:dy + OH, dx:dx + OW]
             for dy in range(3) for dx in range(3)]               # each (B,C,OH,OW)
    stacked = jnp.stack(parts, axis=2)                            # (B,C,9,OH,OW)
    patches = stacked.reshape(B, C * 9, OH * OW).transpose(0, 2, 1)
    return patches.reshape(B * OH * OW, C * 9)                    # (B*P, K)


def pad_params(p, *, E, H, V, Ep, Hp, Vp, Kp, Fp):
    """Zero-pad logical parameters to lane/sublane aligned shapes; bf16 weights.

    Hidden/embed/vocab dims are padded with zeros so the padded LSTM units stay
    exactly zero through the recurrence and padded logits are sliced off later.
    PyTorch gate blocks [i, f, g, o] are padded per-gate.  Layers >= 1 get their
    w_ih / w_hh stacked into one (2*Hp, 4*Hp) matrix for the fused K=2*Hp dot.
    """
    bf16, f32 = jnp.bfloat16, jnp.float32

    def pad_gate_cols(w):                                         # (R,4H)->(R,4Hp)
        r = w.shape[0]
        w4 = jnp.pad(w.reshape(r, 4, H), ((0, 0), (0, 0), (0, Hp - H)))
        return w4.reshape(r, 4 * Hp)

    out = {
        "w_stem": _pad2(p["w_stem"], Kp, Fp).astype(bf16),
        "b_stem": _pad2(p["b_stem"], 1, Fp).astype(f32),
        "w_fc":   _pad2(p["w_fc"], Fp, Ep).astype(bf16),
        "b_fc":   _pad2(p["b_fc"], 1, Ep).astype(f32),
        "embed":  _pad2(p["embed"], V, Ep).astype(bf16),
        "w_out":  _pad2(p["w_out"], Hp, Vp).astype(bf16),
        "b_out":  _pad2(p["b_out"], 1, Vp).astype(f32),
        "lstm": [],
    }
    for layer, lw in enumerate(p["lstm"]):
        in_p = Ep if layer == 0 else Hp
        w_ih = _pad2(pad_gate_cols(lw["w_ih"]), in_p, 4 * Hp)
        w_hh = _pad2(pad_gate_cols(lw["w_hh"]), Hp, 4 * Hp)
        b = pad_gate_cols(lw["b"]).astype(f32)
        if layer == 0:
            out["lstm"].append({"w_ih": w_ih.astype(bf16),
                                "w_hh": w_hh.astype(bf16), "b": b})
        else:
            out["lstm"].append({"w_cat": jnp.concatenate([w_ih, w_hh],
                                                         axis=0).astype(bf16),
                                "b": b})
    return out


def cnn_to_rnn_forward(images, captions, params):
    B, C, Hh, Ww = images.shape
    S = captions.shape[0]
    E = params["w_fc"].shape[1]
    Hd = params["w_out"].shape[0]
    V = params["w_out"].shape[1]
    K = params["w_stem"].shape[0]
    F = params["w_stem"].shape[1]
    T = S + 1

    # TPU-aligned padded sizes (zero padding, mathematically exact).
    Bp = _round_up(B, 8)                       # f32 sublane height
    Hp = Ep = _round_up(max(E, Hd), 128)       # lane width (shared seq buffer)
    Vp = _round_up(V, 128)
    Kp = _round_up(K, 8)
    Fp = _round_up(F, 128)                     # lane-dense conv/pool intermediates

    pp = pad_params(params, E=E, H=Hd, V=V, Ep=Ep, Hp=Hp, Vp=Vp, Kp=Kp, Fp=Fp)

    # Batch padding (extra rows produce finite garbage, sliced off below).
    images_p = jnp.pad(images.astype(jnp.float32),
                       ((0, Bp - B), (0, 0), (0, 0), (0, 0)))
    captions_p = jnp.pad(captions, ((0, 0), (0, Bp - B)))

    # Encoder inputs: im2col (flattened + K-padded, bf16) and GAP-as-matmul with
    # an exact 0/1 bf16 pooling matrix (1/P scale applied in-kernel in f32).
    P = (Hh - 2) * (Ww - 2)
    patches = jnp.pad(im2col_3x3(images_p),
                      ((0, 0), (0, Kp - K))).astype(jnp.bfloat16)   # (Bp*P, Kp)
    pool_ones = jnp.repeat(jnp.eye(Bp, dtype=jnp.bfloat16), P, axis=1)

    # Caption embeddings gathered in XLA (bf16); dropout = identity (eval mode).
    emb = jnp.take(pp["embed"], captions_p, axis=0)                 # (S, Bp, Ep)
    emb_flat = emb.reshape(S * Bp, Ep)

    lstm_flat = []
    for layer, lw in enumerate(pp["lstm"]):
        if layer == 0:
            lstm_flat += [lw["w_ih"], lw["w_hh"], lw["b"]]
        else:
            lstm_flat += [lw["w_cat"], lw["b"]]

    logits_p = run_fused(patches, pool_ones, pp["w_stem"], pp["b_stem"],
                         pp["w_fc"], pp["b_fc"], emb_flat, lstm_flat,
                         pp["w_out"], pp["b_out"],
                         T=T, Bp=Bp, Hp=Hp, num_layers=len(params["lstm"]),
                         inv_pool=1.0 / P)

    return logits_p.reshape(T, Bp, Vp)[:, :B, :V]                   # (S+1, B, V)


# ----------------------------------------------------------------------------
# Deterministic parameter construction (logical, unpadded sizes).
# ----------------------------------------------------------------------------
def make_params(embed_size, hidden_size, vocab_size, num_layers,
                in_channels=3, feat_channels=32, seed=42):
    keys = iter(jax.random.split(jax.random.PRNGKey(seed), 32))
    norm = lambda shape, s: (s * jax.random.normal(next(keys), shape)).astype(jnp.float32)

    K = in_channels * 9
    params = {
        "w_stem": norm((K, feat_channels), 0.1),
        "b_stem": norm((1, feat_channels), 0.01),
        "w_fc":   norm((feat_channels, embed_size), 0.1),   # replaced inception.fc
        "b_fc":   norm((1, embed_size), 0.01),
        "embed":  norm((vocab_size, embed_size), 0.1),
        "w_out":  norm((hidden_size, vocab_size), 0.1),
        "b_out":  norm((1, vocab_size), 0.01),
        "lstm": [],
    }
    for layer in range(num_layers):
        in_dim = embed_size if layer == 0 else hidden_size
        params["lstm"].append({
            # stored transposed vs PyTorch: (IN, 4H) / (H, 4H); gate order i,f,g,o
            "w_ih": norm((in_dim, 4 * hidden_size), 0.1),
            "w_hh": norm((hidden_size, 4 * hidden_size), 0.1),
            "b":    norm((1, 4 * hidden_size), 0.01),        # b_ih + b_hh combined
        })
    return params


if __name__ == "__main__":
    B, C, HW = 2, 3, 16
    embed_size, hidden_size, vocab_size, num_layers = 32, 32, 64, 2
    seq_len = 8

    params = make_params(embed_size, hidden_size, vocab_size, num_layers,
                         in_channels=C)

    k_img, k_cap = jax.random.split(jax.random.PRNGKey(0))
    images = jax.random.normal(k_img, (B, C, HW, HW), dtype=jnp.float32)
    captions = jax.random.randint(k_cap, (seq_len, B), 0, vocab_size,
                                  dtype=jnp.int32)

    fwd = jax.jit(lambda im, cap: cnn_to_rnn_forward(im, cap, params))
    out = fwd(images, captions)
    jax.block_until_ready(out)

    assert out.shape == (seq_len + 1, B, vocab_size), out.shape
    assert out.dtype == jnp.float32
    assert bool(jnp.all(jnp.isfinite(out)))
    print("KERNEL_OK")
</pallas_src>

<mosaic_0001>
module attributes {stable_mosaic.version = 11 : i64} {
  func.func @fused_cnn_to_rnn_kernel(%arg0: i32, %arg1: memref<1568x32xbf16, #tpu.memory_space<vmem>>, %arg2: memref<8x1568xbf16, #tpu.memory_space<vmem>>, %arg3: memref<32x128xbf16, #tpu.memory_space<vmem>>, %arg4: memref<1x128xf32, #tpu.memory_space<vmem>>, %arg5: memref<128x128xbf16, #tpu.memory_space<vmem>>, %arg6: memref<1x128xf32, #tpu.memory_space<vmem>>, %arg7: memref<64x128xbf16, #tpu.memory_space<vmem>>, %arg8: memref<128x512xbf16, #tpu.memory_space<vmem>>, %arg9: memref<128x512xbf16, #tpu.memory_space<vmem>>, %arg10: memref<1x512xf32, #tpu.memory_space<vmem>>, %arg11: memref<256x512xbf16, #tpu.memory_space<vmem>>, %arg12: memref<1x512xf32, #tpu.memory_space<vmem>>, %arg13: memref<128x128xbf16, #tpu.memory_space<vmem>>, %arg14: memref<1x128xf32, #tpu.memory_space<vmem>>, %arg15: memref<72x128xf32, #tpu.memory_space<vmem>>, %arg16: memref<72x512xf32, #tpu.memory_space<vmem>>, %arg17: memref<72x128xf32, #tpu.memory_space<vmem>>) attributes {dimension_semantics = [#tpu.dimension_semantics<arbitrary>], iteration_bounds = array<i64: 1>, scalar_prefetch = 0 : i64, scratch_operands = 2 : i64, tpu.core_type = #tpu.core_type<tc>, window_params = [{pipeline_mode = #tpu.pipeline_mode<synchronous>, transform_indices = @transform_0, window_bounds = array<i64: 1568, 32>}, {pipeline_mode = #tpu.pipeline_mode<synchronous>, transform_indices = @transform_1, window_bounds = array<i64: 8, 1568>}, {pipeline_mode = #tpu.pipeline_mode<synchronous>, transform_indices = @transform_2, window_bounds = array<i64: 32, 128>}, {pipeline_mode = #tpu.pipeline_mode<synchronous>, transform_indices = @transform_3, window_bounds = array<i64: 1, 128>}, {pipeline_mode = #tpu.pipeline_mode<synchronous>, transform_indices = @transform_4, window_bounds = array<i64: 128, 128>}, {pipeline_mode = #tpu.pipeline_mode<synchronous>, transform_indices = @transform_5, window_bounds = array<i64: 1, 128>}, {pipeline_mode = #tpu.pipeline_mode<synchronous>, transform_indices = @transform_6, window_bounds = array<i64: 64, 128>}, {pipeline_mode = #tpu.pipeline_mode<synchronous>, transform_indices = @transform_7, window_bounds = array<i64: 128, 512>}, {pipeline_mode = #tpu.pipeline_mode<synchronous>, transform_indices = @transform_8, window_bounds = array<i64: 128, 512>}, {pipeline_mode = #tpu.pipeline_mode<synchronous>, transform_indices = @transform_9, window_bounds = array<i64: 1, 512>}, {pipeline_mode = #tpu.pipeline_mode<synchronous>, transform_indices = @transform_10, window_bounds = array<i64: 256, 512>}, {pipeline_mode = #tpu.pipeline_mode<synchronous>, transform_indices = @transform_11, window_bounds = array<i64: 1, 512>}, {pipeline_mode = #tpu.pipeline_mode<synchronous>, transform_indices = @transform_12, window_bounds = array<i64: 128, 128>}, {pipeline_mode = #tpu.pipeline_mode<synchronous>, transform_indices = @transform_13, window_bounds = array<i64: 1, 128>}, {pipeline_mode = #tpu.pipeline_mode<synchronous>, transform_indices = @transform_14, window_bounds = array<i64: 72, 128>}]} {
    %c0 = arith.constant 0 : index
    %c0_0 = arith.constant 0 : index
    %0 = vector.load %arg1[%c0, %c0_0] : memref<1568x32xbf16, #tpu.memory_space<vmem>>, vector<1568x32xbf16>
    %c0_1 = arith.constant 0 : index
    %c0_2 = arith.constant 0 : index
    %1 = vector.load %arg3[%c0_1, %c0_2] : memref<32x128xbf16, #tpu.memory_space<vmem>>, vector<32x128xbf16>
    %cst = arith.constant dense<0.000000e+00> : vector<1568x128xf32>
    %2 = tpu.matmul %0, %1, %cst {dimension_numbers = #tpu.dot_dimension_numbers<[1], [0], [0], [1], [0, 0, 1, 1], [], []>} : vector<1568x32xbf16>, vector<32x128xbf16>, vector<1568x128xf32> -> vector<1568x128xf32>
    %c0_3 = arith.constant 0 : index
    %c0_4 = arith.constant 0 : index
    %3 = vector.load %arg4[%c0_3, %c0_4] : memref<1x128xf32, #tpu.memory_space<vmem>>, vector<1x128xf32>
    %4 = vector.broadcast %3 : vector<1x128xf32> to vector<1568x128xf32>
    %5 = arith.addf %2, %4 : vector<1568x128xf32>
    %cst_5 = arith.constant 0.000000e+00 : f32
    %6 = vector.broadcast %cst_5 : f32 to vector<1568x128xf32>
    %7 = arith.maximumf %5, %6 : vector<1568x128xf32>
    %c0_6 = arith.constant 0 : index
    %c0_7 = arith.constant 0 : index
    %8 = vector.load %arg2[%c0_6, %c0_7] : memref<8x1568xbf16, #tpu.memory_space<vmem>>, vector<8x1568xbf16>
    %9 = arith.truncf %7 : vector<1568x128xf32> to vector<1568x128xbf16>
    %cst_8 = arith.constant dense<0.000000e+00> : vector<8x128xf32>
    %10 = tpu.matmul %8, %9, %cst_8 {dimension_numbers = #tpu.dot_dimension_numbers<[1], [0], [0], [1], [0, 0, 1, 1], [], []>} : vector<8x1568xbf16>, vector<1568x128xbf16>, vector<8x128xf32> -> vector<8x128xf32>
    %cst_9 = arith.constant 0.00510204071 : f32
    %11 = vector.broadcast %cst_9 : f32 to vector<8x128xf32>
    %12 = arith.mulf %10, %11 : vector<8x128xf32>
    %13 = arith.truncf %12 : vector<8x128xf32> to vector<8x128xbf16>
    %c0_10 = arith.constant 0 : index
    %c0_11 = arith.constant 0 : index
    %14 = vector.load %arg5[%c0_10, %c0_11] : memref<128x128xbf16, #tpu.memory_space<vmem>>, vector<128x128xbf16>
    %cst_12 = arith.constant dense<0.000000e+00> : vector<8x128xf32>
    %15 = tpu.matmul %13, %14, %cst_12 {dimension_numbers = #tpu.dot_dimension_numbers<[1], [0], [0], [1], [0, 0, 1, 1], [], []>} : vector<8x128xbf16>, vector<128x128xbf16>, vector<8x128xf32> -> vector<8x128xf32>
    %c0_13 = arith.constant 0 : index
    %c0_14 = arith.constant 0 : index
    %16 = vector.load %arg6[%c0_13, %c0_14] : memref<1x128xf32, #tpu.memory_space<vmem>>, vector<1x128xf32>
    %17 = vector.broadcast %16 : vector<1x128xf32> to vector<8x128xf32>
    %18 = arith.addf %15, %17 : vector<8x128xf32>
    %cst_15 = arith.constant 0.000000e+00 : f32
    %19 = vector.broadcast %cst_15 : f32 to vector<8x128xf32>
    %20 = arith.maximumf %18, %19 : vector<8x128xf32>
    %c0_16 = arith.constant 0 : index
    %c0_17 = arith.constant 0 : index
    %21 = vector.load %arg17[%c0_16, %c0_17] : memref<72x128xf32, #tpu.memory_space<vmem>>, vector<8x128xf32>
    tpu.vector_store %arg17[%c0_16, %c0_17], %20 {strides = array<i32>} : memref<72x128xf32, #tpu.memory_space<vmem>>, vector<8x128xf32>,
    %c0_18 = arith.constant 0 : index
    %c0_19 = arith.constant 0 : index
    %22 = vector.load %arg7[%c0_18, %c0_19] : memref<64x128xbf16, #tpu.memory_space<vmem>>, vector<64x128xbf16>
    %23 = arith.extf %22 : vector<64x128xbf16> to vector<64x128xf32>
    %c8 = arith.constant 8 : index
    %c0_20 = arith.constant 0 : index
    %24 = vector.load %arg17[%c8, %c0_20] : memref<72x128xf32, #tpu.memory_space<vmem>>, vector<64x128xf32>
    tpu.vector_store %arg17[%c8, %c0_20], %23 {strides = array<i32>} : memref<72x128xf32, #tpu.memory_space<vmem>>, vector<64x128xf32>,
    %c0_21 = arith.constant 0 : index
    %c0_22 = arith.constant 0 : index
    %25 = vector.load %arg17[%c0_21, %c0_22] : memref<72x128xf32, #tpu.memory_space<vmem>>, vector<72x128xf32>
    %26 = arith.truncf %25 : vector<72x128xf32> to vector<72x128xbf16>
    %c0_23 = arith.constant 0 : index
    %c0_24 = arith.constant 0 : index
    %27 = vector.load %arg8[%c0_23, %c0_24] : memref<128x512xbf16, #tpu.memory_space<vmem>>, vector<128x512xbf16>
    %cst_25 = arith.constant dense<0.000000e+00> : vector<72x512xf32>
    %28 = tpu.matmul %26, %27, %cst_25 {dimension_numbers = #tpu.dot_dimension_numbers<[1], [0], [0], [1], [0, 0, 1, 1], [], []>} : vector<72x128xbf16>, vector<128x512xbf16>, vector<72x512xf32> -> vector<72x512xf32>
    %c0_26 = arith.constant 0 : index
    %c0_27 = arith.constant 0 : index
    %29 = vector.load %arg10[%c0_26, %c0_27] : memref<1x512xf32, #tpu.memory_space<vmem>>, vector<1x512xf32>
    %30 = vector.broadcast %29 : vector<1x512xf32> to vector<72x512xf32>
    %31 = arith.addf %28, %30 : vector<72x512xf32>
    %c0_28 = arith.constant 0 : index
    %c0_29 = arith.constant 0 : index
    %32 = vector.load %arg16[%c0_28, %c0_29] : memref<72x512xf32, #tpu.memory_space<vmem>>, vector<72x512xf32>
    tpu.vector_store %arg16[%c0_28, %c0_29], %31 {strides = array<i32>} : memref<72x512xf32, #tpu.memory_space<vmem>>, vector<72x512xf32>,
    %cst_30 = arith.constant 0.000000e+00 : f32
    %33 = vector.broadcast %cst_30 : f32 to vector<8x128xf32>
    %c0_31 = arith.constant 0 : index
    %c0_32 = arith.constant 0 : index
    %34 = vector.load %arg16[%c0_31, %c0_32] : memref<72x512xf32, #tpu.memory_space<vmem>>, vector<8x512xf32>
    %35 = arith.truncf %33 : vector<8x128xf32> to vector<8x128xbf16>
    %c0_33 = arith.constant 0 : index
    %c0_34 = arith.constant 0 : index
    %36 = vector.load %arg9[%c0_33, %c0_34] : memref<128x512xbf16, #tpu.memory_space<vmem>>, vector<128x512xbf16>
    %cst_35 = arith.constant dense<0.000000e+00> : vector<8x512xf32>
    %37 = tpu.matmul %35, %36, %cst_35 {dimension_numbers = #tpu.dot_dimension_numbers<[1], [0], [0], [1], [0, 0, 1, 1], [], []>} : vector<8x128xbf16>, vector<128x512xbf16>, vector<8x512xf32> -> vector<8x512xf32>
    %38 = arith.addf %34, %37 : vector<8x512xf32>
    %39 = vector.extract_strided_slice %38 {offsets = [0, 0], sizes = [8, 128], strides = [1, 1]} : vector<8x512xf32> to vector<8x128xf32>
    %40 = arith.negf %39 : vector<8x128xf32>
    %41 = math.exp %40 : vector<8x128xf32>
    %cst_36 = arith.constant 1.000000e+00 : f32
    %42 = vector.broadcast %cst_36 : f32 to vector<8x128xf32>
    %43 = arith.addf %42, %41 : vector<8x128xf32>
    %44 = arith.divf %42, %43 : vector<8x128xf32>
    %45 = vector.extract_strided_slice %38 {offsets = [0, 128], sizes = [8, 128], strides = [1, 1]} : vector<8x512xf32> to vector<8x128xf32>
    %46 = arith.negf %45 : vector<8x128xf32>
    %47 = math.exp %46 : vector<8x128xf32>
    %cst_37 = arith.constant 1.000000e+00 : f32
    %48 = vector.broadcast %cst_37 : f32 to vector<8x128xf32>
    %49 = arith.addf %48, %47 : vector<8x128xf32>
    %50 = arith.divf %48, %49 : vector<8x128xf32>
    %51 = vector.extract_strided_slice %38 {offsets = [0, 256], sizes = [8, 128], strides = [1, 1]} : vector<8x512xf32> to vector<8x128xf32>
    %52 = math.tanh %51 : vector<8x128xf32>
    %53 = vector.extract_strided_slice %38 {offsets = [0, 384], sizes = [8, 128], strides = [1, 1]} : vector<8x512xf32> to vector<8x128xf32>
    %54 = arith.negf %53 : vector<8x128xf32>
    %55 = math.exp %54 : vector<8x128xf32>
    %cst_38 = arith.constant 1.000000e+00 : f32
    %56 = vector.broadcast %cst_38 : f32 to vector<8x128xf32>
    %57 = arith.addf %56, %55 : vector<8x128xf32>
    %58 = arith.divf %56, %57 : vector<8x128xf32>
    %59 = arith.mulf %50, %33 : vector<8x128xf32>
    %60 = arith.mulf %44, %52 : vector<8x128xf32>
    %61 = arith.addf %59, %60 : vector<8x128xf32>
    %62 = math.tanh %61 : vector<8x128xf32>
    %63 = arith.mulf %58, %62 : vector<8x128xf32>
    %c8_39 = arith.constant 8 : index
    %c0_40 = arith.constant 0 : index
    %64 = vector.load %arg16[%c8_39, %c0_40] : memref<72x512xf32, #tpu.memory_space<vmem>>, vector<8x512xf32>
    %65 = arith.truncf %63 : vector<8x128xf32> to vector<8x128xbf16>
    %c0_41 = arith.constant 0 : index
    %c0_42 = arith.constant 0 : index
    %66 = vector.load %arg9[%c0_41, %c0_42] : memref<128x512xbf16, #tpu.memory_space<vmem>>, vector<128x512xbf16>
    %cst_43 = arith.constant dense<0.000000e+00> : vector<8x512xf32>
    %67 = tpu.matmul %65, %66, %cst_43 {dimension_numbers = #tpu.dot_dimension_numbers<[1], [0], [0], [1], [0, 0, 1, 1], [], []>} : vector<8x128xbf16>, vector<128x512xbf16>, vector<8x512xf32> -> vector<8x512xf32>
    %68 = arith.addf %64, %67 : vector<8x512xf32>
    %69 = vector.extract_strided_slice %68 {offsets = [0, 0], sizes = [8, 128], strides = [1, 1]} : vector<8x512xf32> to vector<8x128xf32>
    %70 = arith.negf %69 : vector<8x128xf32>
    %71 = math.exp %70 : vector<8x128xf32>
    %cst_44 = arith.constant 1.000000e+00 : f32
    %72 = vector.broadcast %cst_44 : f32 to vector<8x128xf32>
    %73 = arith.addf %72, %71 : vector<8x128xf32>
    %74 = arith.divf %72, %73 : vector<8x128xf32>
    %75 = vector.extract_strided_slice %68 {offsets = [0, 128], sizes = [8, 128], strides = [1, 1]} : vector<8x512xf32> to vector<8x128xf32>
    %76 = arith.negf %75 : vector<8x128xf32>
    %77 = math.exp %76 : vector<8x128xf32>
    %cst_45 = arith.constant 1.000000e+00 : f32
    %78 = vector.broadcast %cst_45 : f32 to vector<8x128xf32>
    %79 = arith.addf %78, %77 : vector<8x128xf32>
    %80 = arith.divf %78, %79 : vector<8x128xf32>
    %81 = vector.extract_strided_slice %68 {offsets = [0, 256], sizes = [8, 128], strides = [1, 1]} : vector<8x512xf32> to vector<8x128xf32>
    %82 = math.tanh %81 : vector<8x128xf32>
    %83 = vector.extract_strided_slice %68 {offsets = [0, 384], sizes = [8, 128], strides = [1, 1]} : vector<8x512xf32> to vector<8x128xf32>
    %84 = arith.negf %83 : vector<8x128xf32>
    %85 = math.exp %84 : vector<8x128xf32>
    %cst_46 = arith.constant 1.000000e+00 : f32
    %86 = vector.broadcast %cst_46 : f32 to vector<8x128xf32>
    %87 = arith.addf %86, %85 : vector<8x128xf32>
    %88 = arith.divf %86, %87 : vector<8x128xf32>
    %89 = arith.mulf %80, %61 : vector<8x128xf32>
    %90 = arith.mulf %74, %82 : vector<8x128xf32>
    %91 = arith.addf %89, %90 : vector<8x128xf32>
    %92 = math.tanh %91 : vector<8x128xf32>
    %93 = arith.mulf %88, %92 : vector<8x128xf32>
    %94 = arith.truncf %63 : vector<8x128xf32> to vector<8x128xbf16>
    %95 = arith.truncf %33 : vector<8x128xf32> to vector<8x128xbf16>
    %96 = tpu.concatenate %94, %95 in 1 : vector<8x128xbf16>, vector<8x128xbf16> -> vector<8x256xbf16>
    %c0_47 = arith.constant 0 : index
    %c0_48 = arith.constant 0 : index
    %97 = vector.load %arg11[%c0_47, %c0_48] : memref<256x512xbf16, #tpu.memory_space<vmem>>, vector<256x512xbf16>
    %cst_49 = arith.constant dense<0.000000e+00> : vector<8x512xf32>
    %98 = tpu.matmul %96, %97, %cst_49 {dimension_numbers = #tpu.dot_dimension_numbers<[1], [0], [0], [1], [0, 0, 1, 1], [], []>} : vector<8x256xbf16>, vector<256x512xbf16>, vector<8x512xf32> -> vector<8x512xf32>
    %c0_50 = arith.constant 0 : index
    %c0_51 = arith.constant 0 : index
    %99 = vector.load %arg12[%c0_50, %c0_51] : memref<1x512xf32, #tpu.memory_space<vmem>>, vector<1x512xf32>
    %100 = vector.broadcast %99 : vector<1x512xf32> to vector<8x512xf32>
    %101 = arith.addf %98, %100 : vector<8x512xf32>
    %102 = vector.extract_strided_slice %101 {offsets = [0, 0], sizes = [8, 128], strides = [1, 1]} : vector<8x512xf32> to vector<8x128xf32>
    %103 = arith.negf %102 : vector<8x128xf32>
    %104 = math.exp %103 : vector<8x128xf32>
    %cst_52 = arith.constant 1.000000e+00 : f32
    %105 = vector.broadcast %cst_52 : f32 to vector<8x128xf32>
    %106 = arith.addf %105, %104 : vector<8x128xf32>
    %107 = arith.divf %105, %106 : vector<8x128xf32>
    %108 = vector.extract_strided_slice %101 {offsets = [0, 128], sizes = [8, 128], strides = [1, 1]} : vector<8x512xf32> to vector<8x128xf32>
    %109 = arith.negf %108 : vector<8x128xf32>
    %110 = math.exp %109 : vector<8x128xf32>
    %cst_53 = arith.constant 1.000000e+00 : f32
    %111 = vector.broadcast %cst_53 : f32 to vector<8x128xf32>
    %112 = arith.addf %111, %110 : vector<8x128xf32>
    %113 = arith.divf %111, %112 : vector<8x128xf32>
    %114 = vector.extract_strided_slice %101 {offsets = [0, 256], sizes = [8, 128], strides = [1, 1]} : vector<8x512xf32> to vector<8x128xf32>
    %115 = math.tanh %114 : vector<8x128xf32>
    %116 = vector.extract_strided_slice %101 {offsets = [0, 384], sizes = [8, 128], strides = [1, 1]} : vector<8x512xf32> to vector<8x128xf32>
    %117 = arith.negf %116 : vector<8x128xf32>
    %118 = math.exp %117 : vector<8x128xf32>
    %cst_54 = arith.constant 1.000000e+00 : f32
    %119 = vector.broadcast %cst_54 : f32 to vector<8x128xf32>
    %120 = arith.addf %119, %118 : vector<8x128xf32>
    %121 = arith.divf %119, %120 : vector<8x128xf32>
    %122 = arith.mulf %113, %33 : vector<8x128xf32>
    %123 = arith.mulf %107, %115 : vector<8x128xf32>
    %124 = arith.addf %122, %123 : vector<8x128xf32>
    %125 = math.tanh %124 : vector<8x128xf32>
    %126 = arith.mulf %121, %125 : vector<8x128xf32>
    %c0_55 = arith.constant 0 : index
    %c0_56 = arith.constant 0 : index
    %127 = vector.load %arg17[%c0_55, %c0_56] : memref<72x128xf32, #tpu.memory_space<vmem>>, vector<8x128xf32>
    tpu.vector_store %arg17[%c0_55, %c0_56], %126 {strides = array<i32>} : memref<72x128xf32, #tpu.memory_space<vmem>>, vector<8x128xf32>,
    %c16 = arith.constant 16 : index
    %c0_57 = arith.constant 0 : index
    %128 = vector.load %arg16[%c16, %c0_57] : memref<72x512xf32, #tpu.memory_space<vmem>>, vector<8x512xf32>
    %129 = arith.truncf %93 : vector<8x128xf32> to vector<8x128xbf16>
    %c0_58 = arith.constant 0 : index
    %c0_59 = arith.constant 0 : index
    %130 = vector.load %arg9[%c0_58, %c0_59] : memref<128x512xbf16, #tpu.memory_space<vmem>>, vector<128x512xbf16>
    %cst_60 = arith.constant dense<0.000000e+00> : vector<8x512xf32>
    %131 = tpu.matmul %129, %130, %cst_60 {dimension_numbers = #tpu.dot_dimension_numbers<[1], [0], [0], [1], [0, 0, 1, 1], [], []>} : vector<8x128xbf16>, vector<128x512xbf16>, vector<8x512xf32> -> vector<8x512xf32>
    %132 = arith.addf %128, %131 : vector<8x512xf32>
    %133 = vector.extract_strided_slice %132 {offsets = [0, 0], sizes = [8, 128], strides = [1, 1]} : vector<8x512xf32> to vector<8x128xf32>
    %134 = arith.negf %133 : vector<8x128xf32>
    %135 = math.exp %134 : vector<8x128xf32>
    %cst_61 = arith.constant 1.000000e+00 : f32
    %136 = vector.broadcast %cst_61 : f32 to vector<8x128xf32>
    %137 = arith.addf %136, %135 : vector<8x128xf32>
    %138 = arith.divf %136, %137 : vector<8x128xf32>
    %139 = vector.extract_strided_slice %132 {offsets = [0, 128], sizes = [8, 128], strides = [1, 1]} : vector<8x512xf32> to vector<8x128xf32>
    %140 = arith.negf %139 : vector<8x128xf32>
    %141 = math.exp %140 : vector<8x128xf32>
    %cst_62 = arith.constant 1.000000e+00 : f32
    %142 = vector.broadcast %cst_62 : f32 to vector<8x128xf32>
    %143 = arith.addf %142, %141 : vector<8x128xf32>
    %144 = arith.divf %142, %143 : vector<8x128xf32>
    %145 = vector.extract_strided_slice %132 {offsets = [0, 256], sizes = [8, 128], strides = [1, 1]} : vector<8x512xf32> to vector<8x128xf32>
    %146 = math.tanh %145 : vector<8x128xf32>
    %147 = vector.extract_strided_slice %132 {offsets = [0, 384], sizes = [8, 128], strides = [1, 1]} : vector<8x512xf32> to vector<8x128xf32>
    %148 = arith.negf %147 : vector<8x128xf32>
    %149 = math.exp %148 : vector<8x128xf32>
    %cst_63 = arith.constant 1.000000e+00 : f32
    %150 = vector.broadcast %cst_63 : f32 to vector<8x128xf32>
    %151 = arith.addf %150, %149 : vector<8x128xf32>
    %152 = arith.divf %150, %151 : vector<8x128xf32>
    %153 = arith.mulf %144, %91 : vector<8x128xf32>
    %154 = arith.mulf %138, %146 : vector<8x128xf32>
    %155 = arith.addf %153, %154 : vector<8x128xf32>
    %156 = math.tanh %155 : vector<8x128xf32>
    %157 = arith.mulf %152, %156 : vector<8x128xf32>
    %158 = arith.truncf %93 : vector<8x128xf32> to vector<8x128xbf16>
    %159 = arith.truncf %126 : vector<8x128xf32> to vector<8x128xbf16>
    %160 = tpu.concatenate %158, %159 in 1 : vector<8x128xbf16>, vector<8x128xbf16> -> vector<8x256xbf16>
    %c0_64 = arith.constant 0 : index
    %c0_65 = arith.constant 0 : index
    %161 = vector.load %arg11[%c0_64, %c0_65] : memref<256x512xbf16, #tpu.memory_space<vmem>>, vector<256x512xbf16>
    %cst_66 = arith.constant dense<0.000000e+00> : vector<8x512xf32>
    %162 = tpu.matmul %160, %161, %cst_66 {dimension_numbers = #tpu.dot_dimension_numbers<[1], [0], [0], [1], [0, 0, 1, 1], [], []>} : vector<8x256xbf16>, vector<256x512xbf16>, vector<8x512xf32> -> vector<8x512xf32>
    %c0_67 = arith.constant 0 : index
    %c0_68 = arith.constant 0 : index
    %163 = vector.load %arg12[%c0_67, %c0_68] : memref<1x512xf32, #tpu.memory_space<vmem>>, vector<1x512xf32>
    %164 = vector.broadcast %163 : vector<1x512xf32> to vector<8x512xf32>
    %165 = arith.addf %162, %164 : vector<8x512xf32>
    %166 = vector.extract_strided_slice %165 {offsets = [0, 0], sizes = [8, 128], strides = [1, 1]} : vector<8x512xf32> to vector<8x128xf32>
    %167 = arith.negf %166 : vector<8x128xf32>
    %168 = math.exp %167 : vector<8x128xf32>
    %cst_69 = arith.constant 1.000000e+00 : f32
    %169 = vector.broadcast %cst_69 : f32 to vector<8x128xf32>
    %170 = arith.addf %169, %168 : vector<8x128xf32>
    %171 = arith.divf %169, %170 : vector<8x128xf32>
    %172 = vector.extract_strided_slice %165 {offsets = [0, 128], sizes = [8, 128], strides = [1, 1]} : vector<8x512xf32> to vector<8x128xf32>
    %173 = arith.negf %172 : vector<8x128xf32>
    %174 = math.exp %173 : vector<8x128xf32>
    %cst_70 = arith.constant 1.000000e+00 : f32
    %175 = vector.broadcast %cst_70 : f32 to vector<8x128xf32>
    %176 = arith.addf %175, %174 : vector<8x128xf32>
    %177 = arith.divf %175, %176 : vector<8x128xf32>
    %178 = vector.extract_strided_slice %165 {offsets = [0, 256], sizes = [8, 128], strides = [1, 1]} : vector<8x512xf32> to vector<8x128xf32>
    %179 = math.tanh %178 : vector<8x128xf32>
    %180 = vector.extract_strided_slice %165 {offsets = [0, 384], sizes = [8, 128], strides = [1, 1]} : vector<8x512xf32> to vector<8x128xf32>
    %181 = arith.negf %180 : vector<8x128xf32>
    %182 = math.exp %181 : vector<8x128xf32>
    %cst_71 = arith.constant 1.000000e+00 : f32
    %183 = vector.broadcast %cst_71 : f32 to vector<8x128xf32>
    %184 = arith.addf %183, %182 : vector<8x128xf32>
    %185 = arith.divf %183, %184 : vector<8x128xf32>
    %186 = arith.mulf %177, %124 : vector<8x128xf32>
    %187 = arith.mulf %171, %179 : vector<8x128xf32>
    %188 = arith.addf %186, %187 : vector<8x128xf32>
    %189 = math.tanh %188 : vector<8x128xf32>
    %190 = arith.mulf %185, %189 : vector<8x128xf32>
    %c8_72 = arith.constant 8 : index
    %c0_73 = arith.constant 0 : index
    %191 = vector.load %arg17[%c8_72, %c0_73] : memref<72x128xf32, #tpu.memory_space<vmem>>, vector<8x128xf32>
    tpu.vector_store %arg17[%c8_72, %c0_73], %190 {strides = array<i32>} : memref<72x128xf32, #tpu.memory_space<vmem>>, vector<8x128xf32>,
    %c24 = arith.constant 24 : index
    %c0_74 = arith.constant 0 : index
    %192 = vector.load %arg16[%c24, %c0_74] : memref<72x512xf32, #tpu.memory_space<vmem>>, vector<8x512xf32>
    %193 = arith.truncf %157 : vector<8x128xf32> to vector<8x128xbf16>
    %c0_75 = arith.constant 0 : index
    %c0_76 = arith.constant 0 : index
    %194 = vector.load %arg9[%c0_75, %c0_76] : memref<128x512xbf16, #tpu.memory_space<vmem>>, vector<128x512xbf16>
    %cst_77 = arith.constant dense<0.000000e+00> : vector<8x512xf32>
    %195 = tpu.matmul %193, %194, %cst_77 {dimension_numbers = #tpu.dot_dimension_numbers<[1], [0], [0], [1], [0, 0, 1, 1], [], []>} : vector<8x128xbf16>, vector<128x512xbf16>, vector<8x512xf32> -> vector<8x512xf32>
    %196 = arith.addf %192, %195 : vector<8x512xf32>
    %197 = vector.extract_strided_slice %196 {offsets = [0, 0], sizes = [8, 128], strides = [1, 1]} : vector<8x512xf32> to vector<8x128xf32>
    %198 = arith.negf %197 : vector<8x128xf32>
    %199 = math.exp %198 : vector<8x128xf32>
    %cst_78 = arith.constant 1.000000e+00 : f32
    %200 = vector.broadcast %cst_78 : f32 to vector<8x128xf32>
    %201 = arith.addf %200, %199 : vector<8x128xf32>
    %202 = arith.divf %200, %201 : vector<8x128xf32>
    %203 = vector.extract_strided_slice %196 {offsets = [0, 128], sizes = [8, 128], strides = [1, 1]} : vector<8x512xf32> to vector<8x128xf32>
    %204 = arith.negf %203 : vector<8x128xf32>
    %205 = math.exp %204 : vector<8x128xf32>
    %cst_79 = arith.constant 1.000000e+00 : f32
    %206 = vector.broadcast %cst_79 : f32 to vector<8x128xf32>
    %207 = arith.addf %206, %205 : vector<8x128xf32>
    %208 = arith.divf %206, %207 : vector<8x128xf32>
    %209 = vector.extract_strided_slice %196 {offsets = [0, 256], sizes = [8, 128], strides = [1, 1]} : vector<8x512xf32> to vector<8x128xf32>
    %210 = math.tanh %209 : vector<8x128xf32>
    %211 = vector.extract_strided_slice %196 {offsets = [0, 384], sizes = [8, 128], strides = [1, 1]} : vector<8x512xf32> to vector<8x128xf32>
    %212 = arith.negf %211 : vector<8x128xf32>
    %213 = math.exp %212 : vector<8x128xf32>
    %cst_80 = arith.constant 1.000000e+00 : f32
    %214 = vector.broadcast %cst_80 : f32 to vector<8x128xf32>
    %215 = arith.addf %214, %213 : vector<8x128xf32>
    %216 = arith.divf %214, %215 : vector<8x128xf32>
    %217 = arith.mulf %208, %155 : vector<8x128xf32>
    %218 = arith.mulf %202, %210 : vector<8x128xf32>
    %219 = arith.addf %217, %218 : vector<8x128xf32>
    %220 = math.tanh %219 : vector<8x128xf32>
    %221 = arith.mulf %216, %220 : vector<8x128xf32>
    %222 = arith.truncf %157 : vector<8x128xf32> to vector<8x128xbf16>
    %223 = arith.truncf %190 : vector<8x128xf32> to vector<8x128xbf16>
    %224 = tpu.concatenate %222, %223 in 1 : vector<8x128xbf16>, vector<8x128xbf16> -> vector<8x256xbf16>
    %c0_81 = arith.constant 0 : index
    %c0_82 = arith.constant 0 : index
    %225 = vector.load %arg11[%c0_81, %c0_82] : memref<256x512xbf16, #tpu.memory_space<vmem>>, vector<256x512xbf16>
    %cst_83 = arith.constant dense<0.000000e+00> : vector<8x512xf32>
    %226 = tpu.matmul %224, %225, %cst_83 {dimension_numbers = #tpu.dot_dimension_numbers<[1], [0], [0], [1], [0, 0, 1, 1], [], []>} : vector<8x256xbf16>, vector<256x512xbf16>, vector<8x512xf32> -> vector<8x512xf32>
    %c0_84 = arith.constant 0 : index
    %c0_85 = arith.constant 0 : index
    %227 = vector.load %arg12[%c0_84, %c0_85] : memref<1x512xf32, #tpu.memory_space<vmem>>, vector<1x512xf32>
    %228 = vector.broadcast %227 : vector<1x512xf32> to vector<8x512xf32>
    %229 = arith.addf %226, %228 : vector<8x512xf32>
    %230 = vector.extract_strided_slice %229 {offsets = [0, 0], sizes = [8, 128], strides = [1, 1]} : vector<8x512xf32> to vector<8x128xf32>
    %231 = arith.negf %230 : vector<8x128xf32>
    %232 = math.exp %231 : vector<8x128xf32>
    %cst_86 = arith.constant 1.000000e+00 : f32
    %233 = vector.broadcast %cst_86 : f32 to vector<8x128xf32>
    %234 = arith.addf %233, %232 : vector<8x128xf32>
    %235 = arith.divf %233, %234 : vector<8x128xf32>
    %236 = vector.extract_strided_slice %229 {offsets = [0, 128], sizes = [8, 128], strides = [1, 1]} : vector<8x512xf32> to vector<8x128xf32>
    %237 = arith.negf %236 : vector<8x128xf32>
    %238 = math.exp %237 : vector<8x128xf32>
    %cst_87 = arith.constant 1.000000e+00 : f32
    %239 = vector.broadcast %cst_87 : f32 to vector<8x128xf32>
    %240 = arith.addf %239, %238 : vector<8x128xf32>
    %241 = arith.divf %239, %240 : vector<8x128xf32>
    %242 = vector.extract_strided_slice %229 {offsets = [0, 256], sizes = [8, 128], strides = [1, 1]} : vector<8x512xf32> to vector<8x128xf32>
    %243 = math.tanh %242 : vector<8x128xf32>
    %244 = vector.extract_strided_slice %229 {offsets = [0, 384], sizes = [8, 128], strides = [1, 1]} : vector<8x512xf32> to vector<8x128xf32>
    %245 = arith.negf %244 : vector<8x128xf32>
    %246 = math.exp %245 : vector<8x128xf32>
    %cst_88 = arith.constant 1.000000e+00 : f32
    %247 = vector.broadcast %cst_88 : f32 to vector<8x128xf32>
    %248 = arith.addf %247, %246 : vector<8x128xf32>
    %249 = arith.divf %247, %248 : vector<8x128xf32>
    %250 = arith.mulf %241, %188 : vector<8x128xf32>
    %251 = arith.mulf %235, %243 : vector<8x128xf32>
    %252 = arith.addf %250, %251 : vector<8x128xf32>
    %253 = math.tanh %252 : vector<8x128xf32>
    %254 = arith.mulf %249, %253 : vector<8x128xf32>
    %c16_89 = arith.constant 16 : index
    %c0_90 = arith.constant 0 : index
    %255 = vector.load %arg17[%c16_89, %c0_90] : memref<72x128xf32, #tpu.memory_space<vmem>>, vector<8x128xf32>
    tpu.vector_store %arg17[%c16_89, %c0_90], %254 {strides = array<i32>} : memref<72x128xf32, #tpu.memory_space<vmem>>, vector<8x128xf32>,
    %c32 = arith.constant 32 : index
    %c0_91 = arith.constant 0 : index
    %256 = vector.load %arg16[%c32, %c0_91] : memref<72x512xf32, #tpu.memory_space<vmem>>, vector<8x512xf32>
    %257 = arith.truncf %221 : vector<8x128xf32> to vector<8x128xbf16>
    %c0_92 = arith.constant 0 : index
    %c0_93 = arith.constant 0 : index
    %258 = vector.load %arg9[%c0_92, %c0_93] : memref<128x512xbf16, #tpu.memory_space<vmem>>, vector<128x512xbf16>
    %cst_94 = arith.constant dense<0.000000e+00> : vector<8x512xf32>
    %259 = tpu.matmul %257, %258, %cst_94 {dimension_numbers = #tpu.dot_dimension_numbers<[1], [0], [0], [1], [0, 0, 1, 1], [], []>} : vector<8x128xbf16>, vector<128x512xbf16>, vector<8x512xf32> -> vector<8x512xf32>
    %260 = arith.addf %256, %259 : vector<8x512xf32>
    %261 = vector.extract_strided_slice %260 {offsets = [0, 0], sizes = [8, 128], strides = [1, 1]} : vector<8x512xf32> to vector<8x128xf32>
    %262 = arith.negf %261 : vector<8x128xf32>
    %263 = math.exp %262 : vector<8x128xf32>
    %cst_95 = arith.constant 1.000000e+00 : f32
    %264 = vector.broadcast %cst_95 : f32 to vector<8x128xf32>
    %265 = arith.addf %264, %263 : vector<8x128xf32>
    %266 = arith.divf %264, %265 : vector<8x128xf32>
    %267 = vector.extract_strided_slice %260 {offsets = [0, 128], sizes = [8, 128], strides = [1, 1]} : vector<8x512xf32> to vector<8x128xf32>
    %268 = arith.negf %267 : vector<8x128xf32>
    %269 = math.exp %268 : vector<8x128xf32>
    %cst_96 = arith.constant 1.000000e+00 : f32
    %270 = vector.broadcast %cst_96 : f32 to vector<8x128xf32>
    %271 = arith.addf %270, %269 : vector<8x128xf32>
    %272 = arith.divf %270, %271 : vector<8x128xf32>
    %273 = vector.extract_strided_slice %260 {offsets = [0, 256], sizes = [8, 128], strides = [1, 1]} : vector<8x512xf32> to vector<8x128xf32>
    %274 = math.tanh %273 : vector<8x128xf32>
    %275 = vector.extract_strided_slice %260 {offsets = [0, 384], sizes = [8, 128], strides = [1, 1]} : vector<8x512xf32> to vector<8x128xf32>
    %276 = arith.negf %275 : vector<8x128xf32>
    %277 = math.exp %276 : vector<8x128xf32>
    %cst_97 = arith.constant 1.000000e+00 : f32
    %278 = vector.broadcast %cst_97 : f32 to vector<8x128xf32>
    %279 = arith.addf %278, %277 : vector<8x128xf32>
    %280 = arith.divf %278, %279 : vector<8x128xf32>
    %281 = arith.mulf %272, %219 : vector<8x128xf32>
    %282 = arith.mulf %266, %274 : vector<8x128xf32>
    %283 = arith.addf %281, %282 : vector<8x128xf32>
    %284 = math.tanh %283 : vector<8x128xf32>
    %285 = arith.mulf %280, %284 : vector<8x128xf32>
    %286 = arith.truncf %221 : vector<8x128xf32> to vector<8x128xbf16>
    %287 = arith.truncf %254 : vector<8x128xf32> to vector<8x128xbf16>
    %288 = tpu.concatenate %286, %287 in 1 : vector<8x128xbf16>, vector<8x128xbf16> -> vector<8x256xbf16>
    %c0_98 = arith.constant 0 : index
    %c0_99 = arith.constant 0 : index
    %289 = vector.load %arg11[%c0_98, %c0_99] : memref<256x512xbf16, #tpu.memory_space<vmem>>, vector<256x512xbf16>
    %cst_100 = arith.constant dense<0.000000e+00> : vector<8x512xf32>
    %290 = tpu.matmul %288, %289, %cst_100 {dimension_numbers = #tpu.dot_dimension_numbers<[1], [0], [0], [1], [0, 0, 1, 1], [], []>} : vector<8x256xbf16>, vector<256x512xbf16>, vector<8x512xf32> -> vector<8x512xf32>
    %c0_101 = arith.constant 0 : index
    %c0_102 = arith.constant 0 : index
    %291 = vector.load %arg12[%c0_101, %c0_102] : memref<1x512xf32, #tpu.memory_space<vmem>>, vector<1x512xf32>
    %292 = vector.broadcast %291 : vector<1x512xf32> to vector<8x512xf32>
    %293 = arith.addf %290, %292 : vector<8x512xf32>
    %294 = vector.extract_strided_slice %293 {offsets = [0, 0], sizes = [8, 128], strides = [1, 1]} : vector<8x512xf32> to vector<8x128xf32>
    %295 = arith.negf %294 : vector<8x128xf32>
    %296 = math.exp %295 : vector<8x128xf32>
    %cst_103 = arith.constant 1.000000e+00 : f32
    %297 = vector.broadcast %cst_103 : f32 to vector<8x128xf32>
    %298 = arith.addf %297, %296 : vector<8x128xf32>
    %299 = arith.divf %297, %298 : vector<8x128xf32>
    %300 = vector.extract_strided_slice %293 {offsets = [0, 128], sizes = [8, 128], strides = [1, 1]} : vector<8x512xf32> to vector<8x128xf32>
    %301 = arith.negf %300 : vector<8x128xf32>
    %302 = math.exp %301 : vector<8x128xf32>
    %cst_104 = arith.constant 1.000000e+00 : f32
    %303 = vector.broadcast %cst_104 : f32 to vector<8x128xf32>
    %304 = arith.addf %303, %302 : vector<8x128xf32>
    %305 = arith.divf %303, %304 : vector<8x128xf32>
    %306 = vector.extract_strided_slice %293 {offsets = [0, 256], sizes = [8, 128], strides = [1, 1]} : vector<8x512xf32> to vector<8x128xf32>
    %307 = math.tanh %306 : vector<8x128xf32>
    %308 = vector.extract_strided_slice %293 {offsets = [0, 384], sizes = [8, 128], strides = [1, 1]} : vector<8x512xf32> to vector<8x128xf32>
    %309 = arith.negf %308 : vector<8x128xf32>
    %310 = math.exp %309 : vector<8x128xf32>
    %cst_105 = arith.constant 1.000000e+00 : f32
    %311 = vector.broadcast %cst_105 : f32 to vector<8x128xf32>
    %312 = arith.addf %311, %310 : vector<8x128xf32>
    %313 = arith.divf %311, %312 : vector<8x128xf32>
    %314 = arith.mulf %305, %252 : vector<8x128xf32>
    %315 = arith.mulf %299, %307 : vector<8x128xf32>
    %316 = arith.addf %314, %315 : vector<8x128xf32>
    %317 = math.tanh %316 : vector<8x128xf32>
    %318 = arith.mulf %313, %317 : vector<8x128xf32>
    %c24_106 = arith.constant 24 : index
    %c0_107 = arith.constant 0 : index
    %319 = vector.load %arg17[%c24_106, %c0_107] : memref<72x128xf32, #tpu.memory_space<vmem>>, vector<8x128xf32>
    tpu.vector_store %arg17[%c24_106, %c0_107], %318 {strides = array<i32>} : memref<72x128xf32, #tpu.memory_space<vmem>>, vector<8x128xf32>,
    %c40 = arith.constant 40 : index
    %c0_108 = arith.constant 0 : index
    %320 = vector.load %arg16[%c40, %c0_108] : memref<72x512xf32, #tpu.memory_space<vmem>>, vector<8x512xf32>
    %321 = arith.truncf %285 : vector<8x128xf32> to vector<8x128xbf16>
    %c0_109 = arith.constant 0 : index
    %c0_110 = arith.constant 0 : index
    %322 = vector.load %arg9[%c0_109, %c0_110] : memref<128x512xbf16, #tpu.memory_space<vmem>>, vector<128x512xbf16>
    %cst_111 = arith.constant dense<0.000000e+00> : vector<8x512xf32>
    %323 = tpu.matmul %321, %322, %cst_111 {dimension_numbers = #tpu.dot_dimension_numbers<[1], [0], [0], [1], [0, 0, 1, 1], [], []>} : vector<8x128xbf16>, vector<128x512xbf16>, vector<8x512xf32> -> vector<8x512xf32>
    %324 = arith.addf %320, %323 : vector<8x512xf32>
    %325 = vector.extract_strided_slice %324 {offsets = [0, 0], sizes = [8, 128], strides = [1, 1]} : vector<8x512xf32> to vector<8x128xf32>
    %326 = arith.negf %325 : vector<8x128xf32>
    %327 = math.exp %326 : vector<8x128xf32>
    %cst_112 = arith.constant 1.000000e+00 : f32
    %328 = vector.broadcast %cst_112 : f32 to vector<8x128xf32>
    %329 = arith.addf %328, %327 : vector<8x128xf32>
    %330 = arith.divf %328, %329 : vector<8x128xf32>
    %331 = vector.extract_strided_slice %324 {offsets = [0, 128], sizes = [8, 128], strides = [1, 1]} : vector<8x512xf32> to vector<8x128xf32>
    %332 = arith.negf %331 : vector<8x128xf32>
    %333 = math.exp %332 : vector<8x128xf32>
    %cst_113 = arith.constant 1.000000e+00 : f32
    %334 = vector.broadcast %cst_113 : f32 to vector<8x128xf32>
    %335 = arith.addf %334, %333 : vector<8x128xf32>
    %336 = arith.divf %334, %335 : vector<8x128xf32>
    %337 = vector.extract_strided_slice %324 {offsets = [0, 256], sizes = [8, 128], strides = [1, 1]} : vector<8x512xf32> to vector<8x128xf32>
    %338 = math.tanh %337 : vector<8x128xf32>
    %339 = vector.extract_strided_slice %324 {offsets = [0, 384], sizes = [8, 128], strides = [1, 1]} : vector<8x512xf32> to vector<8x128xf32>
    %340 = arith.negf %339 : vector<8x128xf32>
    %341 = math.exp %340 : vector<8x128xf32>
    %cst_114 = arith.constant 1.000000e+00 : f32
    %342 = vector.broadcast %cst_114 : f32 to vector<8x128xf32>
    %343 = arith.addf %342, %341 : vector<8x128xf32>
    %344 = arith.divf %342, %343 : vector<8x128xf32>
    %345 = arith.mulf %336, %283 : vector<8x128xf32>
    %346 = arith.mulf %330, %338 : vector<8x128xf32>
    %347 = arith.addf %345, %346 : vector<8x128xf32>
    %348 = math.tanh %347 : vector<8x128xf32>
    %349 = arith.mulf %344, %348 : vector<8x128xf32>
    %350 = arith.truncf %285 : vector<8x128xf32> to vector<8x128xbf16>
    %351 = arith.truncf %318 : vector<8x128xf32> to vector<8x128xbf16>
    %352 = tpu.concatenate %350, %351 in 1 : vector<8x128xbf16>, vector<8x128xbf16> -> vector<8x256xbf16>
    %c0_115 = arith.constant 0 : index
    %c0_116 = arith.constant 0 : index
    %353 = vector.load %arg11[%c0_115, %c0_116] : memref<256x512xbf16, #tpu.memory_space<vmem>>, vector<256x512xbf16>
    %cst_117 = arith.constant dense<0.000000e+00> : vector<8x512xf32>
    %354 = tpu.matmul %352, %353, %cst_117 {dimension_numbers = #tpu.dot_dimension_numbers<[1], [0], [0], [1], [0, 0, 1, 1], [], []>} : vector<8x256xbf16>, vector<256x512xbf16>, vector<8x512xf32> -> vector<8x512xf32>
    %c0_118 = arith.constant 0 : index
    %c0_119 = arith.constant 0 : index
    %355 = vector.load %arg12[%c0_118, %c0_119] : memref<1x512xf32, #tpu.memory_space<vmem>>, vector<1x512xf32>
    %356 = vector.broadcast %355 : vector<1x512xf32> to vector<8x512xf32>
    %357 = arith.addf %354, %356 : vector<8x512xf32>
    %358 = vector.extract_strided_slice %357 {offsets = [0, 0], sizes = [8, 128], strides = [1, 1]} : vector<8x512xf32> to vector<8x128xf32>
    %359 = arith.negf %358 : vector<8x128xf32>
    %360 = math.exp %359 : vector<8x128xf32>
    %cst_120 = arith.constant 1.000000e+00 : f32
    %361 = vector.broadcast %cst_120 : f32 to vector<8x128xf32>
    %362 = arith.addf %361, %360 : vector<8x128xf32>
    %363 = arith.divf %361, %362 : vector<8x128xf32>
    %364 = vector.extract_strided_slice %357 {offsets = [0, 128], sizes = [8, 128], strides = [1, 1]} : vector<8x512xf32> to vector<8x128xf32>
    %365 = arith.negf %364 : vector<8x128xf32>
    %366 = math.exp %365 : vector<8x128xf32>
    %cst_121 = arith.constant 1.000000e+00 : f32
    %367 = vector.broadcast %cst_121 : f32 to vector<8x128xf32>
    %368 = arith.addf %367, %366 : vector<8x128xf32>
    %369 = arith.divf %367, %368 : vector<8x128xf32>
    %370 = vector.extract_strided_slice %357 {offsets = [0, 256], sizes = [8, 128], strides = [1, 1]} : vector<8x512xf32> to vector<8x128xf32>
    %371 = math.tanh %370 : vector<8x128xf32>
    %372 = vector.extract_strided_slice %357 {offsets = [0, 384], sizes = [8, 128], strides = [1, 1]} : vector<8x512xf32> to vector<8x128xf32>
    %373 = arith.negf %372 : vector<8x128xf32>
    %374 = math.exp %373 : vector<8x128xf32>
    %cst_122 = arith.constant 1.000000e+00 : f32
    %375 = vector.broadcast %cst_122 : f32 to vector<8x128xf32>
    %376 = arith.addf %375, %374 : vector<8x128xf32>
    %377 = arith.divf %375, %376 : vector<8x128xf32>
    %378 = arith.mulf %369, %316 : vector<8x128xf32>
    %379 = arith.mulf %363, %371 : vector<8x128xf32>
    %380 = arith.addf %378, %379 : vector<8x128xf32>
    %381 = math.tanh %380 : vector<8x128xf32>
    %382 = arith.mulf %377, %381 : vector<8x128xf32>
    %c32_123 = arith.constant 32 : index
    %c0_124 = arith.constant 0 : index
    %383 = vector.load %arg17[%c32_123, %c0_124] : memref<72x128xf32, #tpu.memory_space<vmem>>, vector<8x128xf32>
    tpu.vector_store %arg17[%c32_123, %c0_124], %382 {strides = array<i32>} : memref<72x128xf32, #tpu.memory_space<vmem>>, vector<8x128xf32>,
    %c48 = arith.constant 48 : index
    %c0_125 = arith.constant 0 : index
    %384 = vector.load %arg16[%c48, %c0_125] : memref<72x512xf32, #tpu.memory_space<vmem>>, vector<8x512xf32>
    %385 = arith.truncf %349 : vector<8x128xf32> to vector<8x128xbf16>
    %c0_126 = arith.constant 0 : index
    %c0_127 = arith.constant 0 : index
    %386 = vector.load %arg9[%c0_126, %c0_127] : memref<128x512xbf16, #tpu.memory_space<vmem>>, vector<128x512xbf16>
    %cst_128 = arith.constant dense<0.000000e+00> : vector<8x512xf32>
    %387 = tpu.matmul %385, %386, %cst_128 {dimension_numbers = #tpu.dot_dimension_numbers<[1], [0], [0], [1], [0, 0, 1, 1], [], []>} : vector<8x128xbf16>, vector<128x512xbf16>, vector<8x512xf32> -> vector<8x512xf32>
    %388 = arith.addf %384, %387 : vector<8x512xf32>
    %389 = vector.extract_strided_slice %388 {offsets = [0, 0], sizes = [8, 128], strides = [1, 1]} : vector<8x512xf32> to vector<8x128xf32>
    %390 = arith.negf %389 : vector<8x128xf32>
    %391 = math.exp %390 : vector<8x128xf32>
    %cst_129 = arith.constant 1.000000e+00 : f32
    %392 = vector.broadcast %cst_129 : f32 to vector<8x128xf32>
    %393 = arith.addf %392, %391 : vector<8x128xf32>
    %394 = arith.divf %392, %393 : vector<8x128xf32>
    %395 = vector.extract_strided_slice %388 {offsets = [0, 128], sizes = [8, 128], strides = [1, 1]} : vector<8x512xf32> to vector<8x128xf32>
    %396 = arith.negf %395 : vector<8x128xf32>
    %397 = math.exp %396 : vector<8x128xf32>
    %cst_130 = arith.constant 1.000000e+00 : f32
    %398 = vector.broadcast %cst_130 : f32 to vector<8x128xf32>
    %399 = arith.addf %398, %397 : vector<8x128xf32>
    %400 = arith.divf %398, %399 : vector<8x128xf32>
    %401 = vector.extract_strided_slice %388 {offsets = [0, 256], sizes = [8, 128], strides = [1, 1]} : vector<8x512xf32> to vector<8x128xf32>
    %402 = math.tanh %401 : vector<8x128xf32>
    %403 = vector.extract_strided_slice %388 {offsets = [0, 384], sizes = [8, 128], strides = [1, 1]} : vector<8x512xf32> to vector<8x128xf32>
    %404 = arith.negf %403 : vector<8x128xf32>
    %405 = math.exp %404 : vector<8x128xf32>
    %cst_131 = arith.constant 1.000000e+00 : f32
    %406 = vector.broadcast %cst_131 : f32 to vector<8x128xf32>
    %407 = arith.addf %406, %405 : vector<8x128xf32>
    %408 = arith.divf %406, %407 : vector<8x128xf32>
    %409 = arith.mulf %400, %347 : vector<8x128xf32>
    %410 = arith.mulf %394, %402 : vector<8x128xf32>
    %411 = arith.addf %409, %410 : vector<8x128xf32>
    %412 = math.tanh %411 : vector<8x128xf32>
    %413 = arith.mulf %408, %412 : vector<8x128xf32>
    %414 = arith.truncf %349 : vector<8x128xf32> to vector<8x128xbf16>
    %415 = arith.truncf %382 : vector<8x128xf32> to vector<8x128xbf16>
    %416 = tpu.concatenate %414, %415 in 1 : vector<8x128xbf16>, vector<8x128xbf16> -> vector<8x256xbf16>
    %c0_132 = arith.constant 0 : index
    %c0_133 = arith.constant 0 : index
    %417 = vector.load %arg11[%c0_132, %c0_133] : memref<256x512xbf16, #tpu.memory_space<vmem>>, vector<256x512xbf16>
    %cst_134 = arith.constant dense<0.000000e+00> : vector<8x512xf32>
    %418 = tpu.matmul %416, %417, %cst_134 {dimension_numbers = #tpu.dot_dimension_numbers<[1], [0], [0], [1], [0, 0, 1, 1], [], []>} : vector<8x256xbf16>, vector<256x512xbf16>, vector<8x512xf32> -> vector<8x512xf32>
    %c0_135 = arith.constant 0 : index
    %c0_136 = arith.constant 0 : index
    %419 = vector.load %arg12[%c0_135, %c0_136] : memref<1x512xf32, #tpu.memory_space<vmem>>, vector<1x512xf32>
    %420 = vector.broadcast %419 : vector<1x512xf32> to vector<8x512xf32>
    %421 = arith.addf %418, %420 : vector<8x512xf32>
    %422 = vector.extract_strided_slice %421 {offsets = [0, 0], sizes = [8, 128], strides = [1, 1]} : vector<8x512xf32> to vector<8x128xf32>
    %423 = arith.negf %422 : vector<8x128xf32>
    %424 = math.exp %423 : vector<8x128xf32>
    %cst_137 = arith.constant 1.000000e+00 : f32
    %425 = vector.broadcast %cst_137 : f32 to vector<8x128xf32>
    %426 = arith.addf %425, %424 : vector<8x128xf32>
    %427 = arith.divf %425, %426 : vector<8x128xf32>
    %428 = vector.extract_strided_slice %421 {offsets = [0, 128], sizes = [8, 128], strides = [1, 1]} : vector<8x512xf32> to vector<8x128xf32>
    %429 = arith.negf %428 : vector<8x128xf32>
    %430 = math.exp %429 : vector<8x128xf32>
    %cst_138 = arith.constant 1.000000e+00 : f32
    %431 = vector.broadcast %cst_138 : f32 to vector<8x128xf32>
    %432 = arith.addf %431, %430 : vector<8x128xf32>
    %433 = arith.divf %431, %432 : vector<8x128xf32>
    %434 = vector.extract_strided_slice %421 {offsets = [0, 256], sizes = [8, 128], strides = [1, 1]} : vector<8x512xf32> to vector<8x128xf32>
    %435 = math.tanh %434 : vector<8x128xf32>
    %436 = vector.extract_strided_slice %421 {offsets = [0, 384], sizes = [8, 128], strides = [1, 1]} : vector<8x512xf32> to vector<8x128xf32>
    %437 = arith.negf %436 : vector<8x128xf32>
    %438 = math.exp %437 : vector<8x128xf32>
    %cst_139 = arith.constant 1.000000e+00 : f32
    %439 = vector.broadcast %cst_139 : f32 to vector<8x128xf32>
    %440 = arith.addf %439, %438 : vector<8x128xf32>
    %441 = arith.divf %439, %440 : vector<8x128xf32>
    %442 = arith.mulf %433, %380 : vector<8x128xf32>
    %443 = arith.mulf %427, %435 : vector<8x128xf32>
    %444 = arith.addf %442, %443 : vector<8x128xf32>
    %445 = math.tanh %444 : vector<8x128xf32>
    %446 = arith.mulf %441, %445 : vector<8x128xf32>
    %c40_140 = arith.constant 40 : index
    %c0_141 = arith.constant 0 : index
    %447 = vector.load %arg17[%c40_140, %c0_141] : memref<72x128xf32, #tpu.memory_space<vmem>>, vector<8x128xf32>
    tpu.vector_store %arg17[%c40_140, %c0_141], %446 {strides = array<i32>} : memref<72x128xf32, #tpu.memory_space<vmem>>, vector<8x128xf32>,
    %c56 = arith.constant 56 : index
    %c0_142 = arith.constant 0 : index
    %448 = vector.load %arg16[%c56, %c0_142] : memref<72x512xf32, #tpu.memory_space<vmem>>, vector<8x512xf32>
    %449 = arith.truncf %413 : vector<8x128xf32> to vector<8x128xbf16>
    %c0_143 = arith.constant 0 : index
    %c0_144 = arith.constant 0 : index
    %450 = vector.load %arg9[%c0_143, %c0_144] : memref<128x512xbf16, #tpu.memory_space<vmem>>, vector<128x512xbf16>
    %cst_145 = arith.constant dense<0.000000e+00> : vector<8x512xf32>
    %451 = tpu.matmul %449, %450, %cst_145 {dimension_numbers = #tpu.dot_dimension_numbers<[1], [0], [0], [1], [0, 0, 1, 1], [], []>} : vector<8x128xbf16>, vector<128x512xbf16>, vector<8x512xf32> -> vector<8x512xf32>
    %452 = arith.addf %448, %451 : vector<8x512xf32>
    %453 = vector.extract_strided_slice %452 {offsets = [0, 0], sizes = [8, 128], strides = [1, 1]} : vector<8x512xf32> to vector<8x128xf32>
    %454 = arith.negf %453 : vector<8x128xf32>
    %455 = math.exp %454 : vector<8x128xf32>
    %cst_146 = arith.constant 1.000000e+00 : f32
    %456 = vector.broadcast %cst_146 : f32 to vector<8x128xf32>
    %457 = arith.addf %456, %455 : vector<8x128xf32>
    %458 = arith.divf %456, %457 : vector<8x128xf32>
    %459 = vector.extract_strided_slice %452 {offsets = [0, 128], sizes = [8, 128], strides = [1, 1]} : vector<8x512xf32> to vector<8x128xf32>
    %460 = arith.negf %459 : vector<8x128xf32>
    %461 = math.exp %460 : vector<8x128xf32>
    %cst_147 = arith.constant 1.000000e+00 : f32
    %462 = vector.broadcast %cst_147 : f32 to vector<8x128xf32>
    %463 = arith.addf %462, %461 : vector<8x128xf32>
    %464 = arith.divf %462, %463 : vector<8x128xf32>
    %465 = vector.extract_strided_slice %452 {offsets = [0, 256], sizes = [8, 128], strides = [1, 1]} : vector<8x512xf32> to vector<8x128xf32>
    %466 = math.tanh %465 : vector<8x128xf32>
    %467 = vector.extract_strided_slice %452 {offsets = [0, 384], sizes = [8, 128], strides = [1, 1]} : vector<8x512xf32> to vector<8x128xf32>
    %468 = arith.negf %467 : vector<8x128xf32>
    %469 = math.exp %468 : vector<8x128xf32>
    %cst_148 = arith.constant 1.000000e+00 : f32
    %470 = vector.broadcast %cst_148 : f32 to vector<8x128xf32>
    %471 = arith.addf %470, %469 : vector<8x128xf32>
    %472 = arith.divf %470, %471 : vector<8x128xf32>
    %473 = arith.mulf %464, %411 : vector<8x128xf32>
    %474 = arith.mulf %458, %466 : vector<8x128xf32>
    %475 = arith.addf %473, %474 : vector<8x128xf32>
    %476 = math.tanh %475 : vector<8x128xf32>
    %477 = arith.mulf %472, %476 : vector<8x128xf32>
    %478 = arith.truncf %413 : vector<8x128xf32> to vector<8x128xbf16>
    %479 = arith.truncf %446 : vector<8x128xf32> to vector<8x128xbf16>
    %480 = tpu.concatenate %478, %479 in 1 : vector<8x128xbf16>, vector<8x128xbf16> -> vector<8x256xbf16>
    %c0_149 = arith.constant 0 : index
    %c0_150 = arith.constant 0 : index
    %481 = vector.load %arg11[%c0_149, %c0_150] : memref<256x512xbf16, #tpu.memory_space<vmem>>, vector<256x512xbf16>
    %cst_151 = arith.constant dense<0.000000e+00> : vector<8x512xf32>
    %482 = tpu.matmul %480, %481, %cst_151 {dimension_numbers = #tpu.dot_dimension_numbers<[1], [0], [0], [1], [0, 0, 1, 1], [], []>} : vector<8x256xbf16>, vector<256x512xbf16>, vector<8x512xf32> -> vector<8x512xf32>
    %c0_152 = arith.constant 0 : index
    %c0_153 = arith.constant 0 : index
    %483 = vector.load %arg12[%c0_152, %c0_153] : memref<1x512xf32, #tpu.memory_space<vmem>>, vector<1x512xf32>
    %484 = vector.broadcast %483 : vector<1x512xf32> to vector<8x512xf32>
    %485 = arith.addf %482, %484 : vector<8x512xf32>
    %486 = vector.extract_strided_slice %485 {offsets = [0, 0], sizes = [8, 128], strides = [1, 1]} : vector<8x512xf32> to vector<8x128xf32>
    %487 = arith.negf %486 : vector<8x128xf32>
    %488 = math.exp %487 : vector<8x128xf32>
    %cst_154 = arith.constant 1.000000e+00 : f32
    %489 = vector.broadcast %cst_154 : f32 to vector<8x128xf32>
    %490 = arith.addf %489, %488 : vector<8x128xf32>
    %491 = arith.divf %489, %490 : vector<8x128xf32>
    %492 = vector.extract_strided_slice %485 {offsets = [0, 128], sizes = [8, 128], strides = [1, 1]} : vector<8x512xf32> to vector<8x128xf32>
    %493 = arith.negf %492 : vector<8x128xf32>
    %494 = math.exp %493 : vector<8x128xf32>
    %cst_155 = arith.constant 1.000000e+00 : f32
    %495 = vector.broadcast %cst_155 : f32 to vector<8x128xf32>
    %496 = arith.addf %495, %494 : vector<8x128xf32>
    %497 = arith.divf %495, %496 : vector<8x128xf32>
    %498 = vector.extract_strided_slice %485 {offsets = [0, 256], sizes = [8, 128], strides = [1, 1]} : vector<8x512xf32> to vector<8x128xf32>
    %499 = math.tanh %498 : vector<8x128xf32>
    %500 = vector.extract_strided_slice %485 {offsets = [0, 384], sizes = [8, 128], strides = [1, 1]} : vector<8x512xf32> to vector<8x128xf32>
    %501 = arith.negf %500 : vector<8x128xf32>
    %502 = math.exp %501 : vector<8x128xf32>
    %cst_156 = arith.constant 1.000000e+00 : f32
    %503 = vector.broadcast %cst_156 : f32 to vector<8x128xf32>
    %504 = arith.addf %503, %502 : vector<8x128xf32>
    %505 = arith.divf %503, %504 : vector<8x128xf32>
    %506 = arith.mulf %497, %444 : vector<8x128xf32>
    %507 = arith.mulf %491, %499 : vector<8x128xf32>
    %508 = arith.addf %506, %507 : vector<8x128xf32>
    %509 = math.tanh %508 : vector<8x128xf32>
    %510 = arith.mulf %505, %509 : vector<8x128xf32>
    %c48_157 = arith.constant 48 : index
    %c0_158 = arith.constant 0 : index
    %511 = vector.load %arg17[%c48_157, %c0_158] : memref<72x128xf32, #tpu.memory_space<vmem>>, vector<8x128xf32>
    tpu.vector_store %arg17[%c48_157, %c0_158], %510 {strides = array<i32>} : memref<72x128xf32, #tpu.memory_space<vmem>>, vector<8x128xf32>,
    %c64 = arith.constant 64 : index
    %c0_159 = arith.constant 0 : index
    %512 = vector.load %arg16[%c64, %c0_159] : memref<72x512xf32, #tpu.memory_space<vmem>>, vector<8x512xf32>
    %513 = arith.truncf %477 : vector<8x128xf32> to vector<8x128xbf16>
    %c0_160 = arith.constant 0 : index
    %c0_161 = arith.constant 0 : index
    %514 = vector.load %arg9[%c0_160, %c0_161] : memref<128x512xbf16, #tpu.memory_space<vmem>>, vector<128x512xbf16>
    %cst_162 = arith.constant dense<0.000000e+00> : vector<8x512xf32>
    %515 = tpu.matmul %513, %514, %cst_162 {dimension_numbers = #tpu.dot_dimension_numbers<[1], [0], [0], [1], [0, 0, 1, 1], [], []>} : vector<8x128xbf16>, vector<128x512xbf16>, vector<8x512xf32> -> vector<8x512xf32>
    %516 = arith.addf %512, %515 : vector<8x512xf32>
    %517 = vector.extract_strided_slice %516 {offsets = [0, 0], sizes = [8, 128], strides = [1, 1]} : vector<8x512xf32> to vector<8x128xf32>
    %518 = arith.negf %517 : vector<8x128xf32>
    %519 = math.exp %518 : vector<8x128xf32>
    %cst_163 = arith.constant 1.000000e+00 : f32
    %520 = vector.broadcast %cst_163 : f32 to vector<8x128xf32>
    %521 = arith.addf %520, %519 : vector<8x128xf32>
    %522 = arith.divf %520, %521 : vector<8x128xf32>
    %523 = vector.extract_strided_slice %516 {offsets = [0, 128], sizes = [8, 128], strides = [1, 1]} : vector<8x512xf32> to vector<8x128xf32>
    %524 = arith.negf %523 : vector<8x128xf32>
    %525 = math.exp %524 : vector<8x128xf32>
    %cst_164 = arith.constant 1.000000e+00 : f32
    %526 = vector.broadcast %cst_164 : f32 to vector<8x128xf32>
    %527 = arith.addf %526, %525 : vector<8x128xf32>
    %528 = arith.divf %526, %527 : vector<8x128xf32>
    %529 = vector.extract_strided_slice %516 {offsets = [0, 256], sizes = [8, 128], strides = [1, 1]} : vector<8x512xf32> to vector<8x128xf32>
    %530 = math.tanh %529 : vector<8x128xf32>
    %531 = vector.extract_strided_slice %516 {offsets = [0, 384], sizes = [8, 128], strides = [1, 1]} : vector<8x512xf32> to vector<8x128xf32>
    %532 = arith.negf %531 : vector<8x128xf32>
    %533 = math.exp %532 : vector<8x128xf32>
    %cst_165 = arith.constant 1.000000e+00 : f32
    %534 = vector.broadcast %cst_165 : f32 to vector<8x128xf32>
    %535 = arith.addf %534, %533 : vector<8x128xf32>
    %536 = arith.divf %534, %535 : vector<8x128xf32>
    %537 = arith.mulf %528, %475 : vector<8x128xf32>
    %538 = arith.mulf %522, %530 : vector<8x128xf32>
    %539 = arith.addf %537, %538 : vector<8x128xf32>
    %540 = math.tanh %539 : vector<8x128xf32>
    %541 = arith.mulf %536, %540 : vector<8x128xf32>
    %542 = arith.truncf %477 : vector<8x128xf32> to vector<8x128xbf16>
    %543 = arith.truncf %510 : vector<8x128xf32> to vector<8x128xbf16>
    %544 = tpu.concatenate %542, %543 in 1 : vector<8x128xbf16>, vector<8x128xbf16> -> vector<8x256xbf16>
    %c0_166 = arith.constant 0 : index
    %c0_167 = arith.constant 0 : index
    %545 = vector.load %arg11[%c0_166, %c0_167] : memref<256x512xbf16, #tpu.memory_space<vmem>>, vector<256x512xbf16>
    %cst_168 = arith.constant dense<0.000000e+00> : vector<8x512xf32>
    %546 = tpu.matmul %544, %545, %cst_168 {dimension_numbers = #tpu.dot_dimension_numbers<[1], [0], [0], [1], [0, 0, 1, 1], [], []>} : vector<8x256xbf16>, vector<256x512xbf16>, vector<8x512xf32> -> vector<8x512xf32>
    %c0_169 = arith.constant 0 : index
    %c0_170 = arith.constant 0 : index
    %547 = vector.load %arg12[%c0_169, %c0_170] : memref<1x512xf32, #tpu.memory_space<vmem>>, vector<1x512xf32>
    %548 = vector.broadcast %547 : vector<1x512xf32> to vector<8x512xf32>
    %549 = arith.addf %546, %548 : vector<8x512xf32>
    %550 = vector.extract_strided_slice %549 {offsets = [0, 0], sizes = [8, 128], strides = [1, 1]} : vector<8x512xf32> to vector<8x128xf32>
    %551 = arith.negf %550 : vector<8x128xf32>
    %552 = math.exp %551 : vector<8x128xf32>
    %cst_171 = arith.constant 1.000000e+00 : f32
    %553 = vector.broadcast %cst_171 : f32 to vector<8x128xf32>
    %554 = arith.addf %553, %552 : vector<8x128xf32>
    %555 = arith.divf %553, %554 : vector<8x128xf32>
    %556 = vector.extract_strided_slice %549 {offsets = [0, 128], sizes = [8, 128], strides = [1, 1]} : vector<8x512xf32> to vector<8x128xf32>
    %557 = arith.negf %556 : vector<8x128xf32>
    %558 = math.exp %557 : vector<8x128xf32>
    %cst_172 = arith.constant 1.000000e+00 : f32
    %559 = vector.broadcast %cst_172 : f32 to vector<8x128xf32>
    %560 = arith.addf %559, %558 : vector<8x128xf32>
    %561 = arith.divf %559, %560 : vector<8x128xf32>
    %562 = vector.extract_strided_slice %549 {offsets = [0, 256], sizes = [8, 128], strides = [1, 1]} : vector<8x512xf32> to vector<8x128xf32>
    %563 = math.tanh %562 : vector<8x128xf32>
    %564 = vector.extract_strided_slice %549 {offsets = [0, 384], sizes = [8, 128], strides = [1, 1]} : vector<8x512xf32> to vector<8x128xf32>
    %565 = arith.negf %564 : vector<8x128xf32>
    %566 = math.exp %565 : vector<8x128xf32>
    %cst_173 = arith.constant 1.000000e+00 : f32
    %567 = vector.broadcast %cst_173 : f32 to vector<8x128xf32>
    %568 = arith.addf %567, %566 : vector<8x128xf32>
    %569 = arith.divf %567, %568 : vector<8x128xf32>
    %570 = arith.mulf %561, %508 : vector<8x128xf32>
    %571 = arith.mulf %555, %563 : vector<8x128xf32>
    %572 = arith.addf %570, %571 : vector<8x128xf32>
    %573 = math.tanh %572 : vector<8x128xf32>
    %574 = arith.mulf %569, %573 : vector<8x128xf32>
    %c56_174 = arith.constant 56 : index
    %c0_175 = arith.constant 0 : index
    %575 = vector.load %arg17[%c56_174, %c0_175] : memref<72x128xf32, #tpu.memory_space<vmem>>, vector<8x128xf32>
    tpu.vector_store %arg17[%c56_174, %c0_175], %574 {strides = array<i32>} : memref<72x128xf32, #tpu.memory_space<vmem>>, vector<8x128xf32>,
    %576 = arith.truncf %541 : vector<8x128xf32> to vector<8x128xbf16>
    %577 = arith.truncf %574 : vector<8x128xf32> to vector<8x128xbf16>
    %578 = tpu.concatenate %576, %577 in 1 : vector<8x128xbf16>, vector<8x128xbf16> -> vector<8x256xbf16>
    %c0_176 = arith.constant 0 : index
    %c0_177 = arith.constant 0 : index
    %579 = vector.load %arg11[%c0_176, %c0_177] : memref<256x512xbf16, #tpu.memory_space<vmem>>, vector<256x512xbf16>
    %cst_178 = arith.constant dense<0.000000e+00> : vector<8x512xf32>
    %580 = tpu.matmul %578, %579, %cst_178 {dimension_numbers = #tpu.dot_dimension_numbers<[1], [0], [0], [1], [0, 0, 1, 1], [], []>} : vector<8x256xbf16>, vector<256x512xbf16>, vector<8x512xf32> -> vector<8x512xf32>
    %c0_179 = arith.constant 0 : index
    %c0_180 = arith.constant 0 : index
    %581 = vector.load %arg12[%c0_179, %c0_180] : memref<1x512xf32, #tpu.memory_space<vmem>>, vector<1x512xf32>
    %582 = vector.broadcast %581 : vector<1x512xf32> to vector<8x512xf32>
    %583 = arith.addf %580, %582 : vector<8x512xf32>
    %584 = vector.extract_strided_slice %583 {offsets = [0, 0], sizes = [8, 128], strides = [1, 1]} : vector<8x512xf32> to vector<8x128xf32>
    %585 = arith.negf %584 : vector<8x128xf32>
    %586 = math.exp %585 : vector<8x128xf32>
    %cst_181 = arith.constant 1.000000e+00 : f32
    %587 = vector.broadcast %cst_181 : f32 to vector<8x128xf32>
    %588 = arith.addf %587, %586 : vector<8x128xf32>
    %589 = arith.divf %587, %588 : vector<8x128xf32>
    %590 = vector.extract_strided_slice %583 {offsets = [0, 128], sizes = [8, 128], strides = [1, 1]} : vector<8x512xf32> to vector<8x128xf32>
    %591 = arith.negf %590 : vector<8x128xf32>
    %592 = math.exp %591 : vector<8x128xf32>
    %cst_182 = arith.constant 1.000000e+00 : f32
    %593 = vector.broadcast %cst_182 : f32 to vector<8x128xf32>
    %594 = arith.addf %593, %592 : vector<8x128xf32>
    %595 = arith.divf %593, %594 : vector<8x128xf32>
    %596 = vector.extract_strided_slice %583 {offsets = [0, 256], sizes = [8, 128], strides = [1, 1]} : vector<8x512xf32> to vector<8x128xf32>
    %597 = math.tanh %596 : vector<8x128xf32>
    %598 = vector.extract_strided_slice %583 {offsets = [0, 384], sizes = [8, 128], strides = [1, 1]} : vector<8x512xf32> to vector<8x128xf32>
    %599 = arith.negf %598 : vector<8x128xf32>
    %600 = math.exp %599 : vector<8x128xf32>
    %cst_183 = arith.constant 1.000000e+00 : f32
    %601 = vector.broadcast %cst_183 : f32 to vector<8x128xf32>
    %602 = arith.addf %601, %600 : vector<8x128xf32>
    %603 = arith.divf %601, %602 : vector<8x128xf32>
    %604 = arith.mulf %595, %572 : vector<8x128xf32>
    %605 = arith.mulf %589, %597 : vector<8x128xf32>
    %606 = arith.addf %604, %605 : vector<8x128xf32>
    %607 = math.tanh %606 : vector<8x128xf32>
    %608 = arith.mulf %603, %607 : vector<8x128xf32>
    %c64_184 = arith.constant 64 : index
    %c0_185 = arith.constant 0 : index
    %609 = vector.load %arg17[%c64_184, %c0_185] : memref<72x128xf32, #tpu.memory_space<vmem>>, vector<8x128xf32>
    tpu.vector_store %arg17[%c64_184, %c0_185], %608 {strides = array<i32>} : memref<72x128xf32, #tpu.memory_space<vmem>>, vector<8x128xf32>,
    %c0_186 = arith.constant 0 : index
    %c0_187 = arith.constant 0 : index
    %610 = vector.load %arg17[%c0_186, %c0_187] : memref<72x128xf32, #tpu.memory_space<vmem>>, vector<72x128xf32>
    %611 = arith.truncf %610 : vector<72x128xf32> to vector<72x128xbf16>
    %c0_188 = arith.constant 0 : index
    %c0_189 = arith.constant 0 : index
    %612 = vector.load %arg13[%c0_188, %c0_189] : memref<128x128xbf16, #tpu.memory_space<vmem>>, vector<128x128xbf16>
    %cst_190 = arith.constant dense<0.000000e+00> : vector<72x128xf32>
    %613 = tpu.matmul %611, %612, %cst_190 {dimension_numbers = #tpu.dot_dimension_numbers<[1], [0], [0], [1], [0, 0, 1, 1], [], []>} : vector<72x128xbf16>, vector<128x128xbf16>, vector<72x128xf32> -> vector<72x128xf32>
    %c0_191 = arith.constant 0 : index
    %c0_192 = arith.constant 0 : index
    %614 = vector.load %arg14[%c0_191, %c0_192] : memref<1x128xf32, #tpu.memory_space<vmem>>, vector<1x128xf32>
    %615 = vector.broadcast %614 : vector<1x128xf32> to vector<72x128xf32>
    %616 = arith.addf %613, %615 : vector<72x128xf32>
    %c0_193 = arith.constant 0 : index
    %c0_194 = arith.constant 0 : index
    %617 = vector.load %arg15[%c0_193, %c0_194] : memref<72x128xf32, #tpu.memory_space<vmem>>, vector<72x128xf32>
    tpu.vector_store %arg15[%c0_193, %c0_194], %616 {strides = array<i32>} : memref<72x128xf32, #tpu.memory_space<vmem>>, vector<72x128xf32>,
    return
  }
  func.func @transform_0(%arg0: i32) -> (i32, i32) {
    %c0_i32 = arith.constant 0 : i32
    %c0_i32_0 = arith.constant 0 : i32
    %c0_i32_1 = arith.constant 0 : i32
    return %c0_i32, %c0_i32_0 : i32, i32
  }
  func.func @transform_1(%arg0: i32) -> (i32, i32) {
    %c0_i32 = arith.constant 0 : i32
    %c0_i32_0 = arith.constant 0 : i32
    %c0_i32_1 = arith.constant 0 : i32
    return %c0_i32, %c0_i32_0 : i32, i32
  }
  func.func @transform_2(%arg0: i32) -> (i32, i32) {
    %c0_i32 = arith.constant 0 : i32
    %c0_i32_0 = arith.constant 0 : i32
    %c0_i32_1 = arith.constant 0 : i32
    return %c0_i32, %c0_i32_0 : i32, i32
  }
  func.func @transform_3(%arg0: i32) -> (i32, i32) {
    %c0_i32 = arith.constant 0 : i32
    %c0_i32_0 = arith.constant 0 : i32
    %c0_i32_1 = arith.constant 0 : i32
    return %c0_i32, %c0_i32_0 : i32, i32
  }
  func.func @transform_4(%arg0: i32) -> (i32, i32) {
    %c0_i32 = arith.constant 0 : i32
    %c0_i32_0 = arith.constant 0 : i32
    %c0_i32_1 = arith.constant 0 : i32
    return %c0_i32, %c0_i32_0 : i32, i32
  }
  func.func @transform_5(%arg0: i32) -> (i32, i32) {
    %c0_i32 = arith.constant 0 : i32
    %c0_i32_0 = arith.constant 0 : i32
    %c0_i32_1 = arith.constant 0 : i32
    return %c0_i32, %c0_i32_0 : i32, i32
  }
  func.func @transform_6(%arg0: i32) -> (i32, i32) {
    %c0_i32 = arith.constant 0 : i32
    %c0_i32_0 = arith.constant 0 : i32
    %c0_i32_1 = arith.constant 0 : i32
    return %c0_i32, %c0_i32_0 : i32, i32
  }
  func.func @transform_7(%arg0: i32) -> (i32, i32) {
    %c0_i32 = arith.constant 0 : i32
    %c0_i32_0 = arith.constant 0 : i32
    %c0_i32_1 = arith.constant 0 : i32
    return %c0_i32, %c0_i32_0 : i32, i32
  }
  func.func @transform_8(%arg0: i32) -> (i32, i32) {
    %c0_i32 = arith.constant 0 : i32
    %c0_i32_0 = arith.constant 0 : i32
    %c0_i32_1 = arith.constant 0 : i32
    return %c0_i32, %c0_i32_0 : i32, i32
  }
  func.func @transform_9(%arg0: i32) -> (i32, i32) {
    %c0_i32 = arith.constant 0 : i32
    %c0_i32_0 = arith.constant 0 : i32
    %c0_i32_1 = arith.constant 0 : i32
    return %c0_i32, %c0_i32_0 : i32, i32
  }
  func.func @transform_10(%arg0: i32) -> (i32, i32) {
    %c0_i32 = arith.constant 0 : i32
    %c0_i32_0 = arith.constant 0 : i32
    %c0_i32_1 = arith.constant 0 : i32
    return %c0_i32, %c0_i32_0 : i32, i32
  }
  func.func @transform_11(%arg0: i32) -> (i32, i32) {
    %c0_i32 = arith.constant 0 : i32
    %c0_i32_0 = arith.constant 0 : i32
    %c0_i32_1 = arith.constant 0 : i32
    return %c0_i32, %c0_i32_0 : i32, i32
  }
  func.func @transform_12(%arg0: i32) -> (i32, i32) {
    %c0_i32 = arith.constant 0 : i32
    %c0_i32_0 = arith.constant 0 : i32
    %c0_i32_1 = arith.constant 0 : i32
    return %c0_i32, %c0_i32_0 : i32, i32
  }
  func.func @transform_13(%arg0: i32) -> (i32, i32) {
    %c0_i32 = arith.constant 0 : i32
    %c0_i32_0 = arith.constant 0 : i32
    %c0_i32_1 = arith.constant 0 : i32
    return %c0_i32, %c0_i32_0 : i32, i32
  }
  func.func @transform_14(%arg0: i32) -> (i32, i32) {
    %c0_i32 = arith.constant 0 : i32
    %c0_i32_0 = arith.constant 0 : i32
    %c0_i32_1 = arith.constant 0 : i32
    return %c0_i32, %c0_i32_0 : i32, i32
  }
}

</mosaic_0001>

<bundles_post_ra>
// kernel: _lambda_.1
= control target key start
LH: loop header
LB: loop body
LE: loop exit
PB: predicated region body
PF: predicated region fallthrough
CT: control target
= control target key end

     0   :  { %vm757_vm0 = vcmask 261120   ;;  %vm13324_vm1 = vmmov 0   ;;  %s17908_s2 = inlined_call_operand.vmem [shape: bf16[32,128], index: 2, kind: input, shape index: {}]   ;;  %s17909_s0 = inlined_call_operand.vmem [shape: bf16[1568,32], index: 0, kind: input, shape index: {}]   ;;  %s17910_s3 = inlined_call_operand.vmem [shape: f32[1,128], index: 3, kind: input, shape index: {}]   ;;  %s17911_s1 = inlined_call_operand.vmem [shape: bf16[8,1568], index: 1, kind: input, shape index: {}]   ;;  %s17912_s4 = inlined_call_operand.vmem [shape: bf16[128,128], index: 4, kind: input, shape index: {}]   ;;  %s17913_s7 = inlined_call_operand.vmem [shape: bf16[128,512], index: 7, kind: input, shape index: {}]   ;;  %s17914_s8 = inlined_call_operand.vmem [shape: bf16[128,512], index: 8, kind: input, shape index: {}]   ;;  %s17915_s6 = inlined_call_operand.vmem [shape: bf16[64,128], index: 6, kind: input, shape index: {}]   ;;  %s17916_s5 = inlined_call_operand.vmem [shape: f32[1,128], index: 5, kind: input, shape index: {}]   ;;  %s17917_s9 = inlined_call_operand.vmem [shape: f32[1,512], index: 9, kind: input, shape index: {}]   ;;  %s17918_s10 = inlined_call_operand.vmem [shape: bf16[256,512], index: 10, kind: input, shape index: {}]   ;;  %s17919_s11 = inlined_call_operand.vmem [shape: f32[1,512], index: 11, kind: input, shape index: {}]   ;;  %s17920_s12 = inlined_call_operand.vmem [shape: bf16[128,128], index: 12, kind: input, shape index: {}]   ;;  %s17921_s13 = inlined_call_operand.vmem [shape: f32[1,128], index: 13, kind: input, shape index: {}]   ;;  %s17922_s14 = inlined_call_operand.vmem [shape: f32[72,128], index: 14, kind: output, shape index: {}]  }
   0x1   :  { %v12147_v0 = vld [vmem:[%s17908_s2 + $0x8] sm:$0xff]   ;;  %v12148_v1 = vld [vmem:[%s17908_s2] sm:$0xff]   ;;  %v12151_v4 = vld [vmem:[%s17909_s0 + $0x10] sm:$0xff]  }
   0x2   :  { %11870 = vmatprep.subr.bf16.mxu0 %v12147_v0  ;;  %v12149_v2 = vld [vmem:[%s17909_s0] sm:$0xff]   ;;  %12134 = vmatprep.subr.bf16.mxu1 %v12147_v0  ;;  %v12150_v3 = vld [vmem:[%s17909_s0 + $0x8] sm:$0xff]   ;;  %v12152_v5 = vld [vmem:[%s17909_s0 + $0x18] sm:$0xff]  }
   0x3   :  { %11871 = vmatpush3.bf16.msra.mxu0 %v12147_v0  ;;  %12136 = vmatpush3.bf16.msra.mxu1 %v12147_v0  ;;  %v12153_v6 = vld [vmem:[%s17909_s0 + $0x20] sm:$0xff]   ;;  %v12154_v7 = vld [vmem:[%s17909_s0 + $0x28] sm:$0xff]   ;;  %v12155_v8 = vld [vmem:[%s17909_s0 + $0x30] sm:$0xff]  }
   0x4   :  { %11872 = vmatprep.subr.bf16.mxu0 %v12148_v1  ;;  %11874 = vmatprep.mubr.msk.bf16.mxu0 %vm757_vm0, %v12149_v2  ;;  %v12156_v9 = vld [vmem:[%s17909_s0 + $0x38] sm:$0xff]   ;;  %v12157_v10 = vld [vmem:[%s17909_s0 + $0x40] sm:$0xff]   ;;  %v12158_v11 = vld [vmem:[%s17909_s0 + $0x48] sm:$0xff]  }
   0x5   :  { %12135 = vmatprep.subr.bf16.mxu1 %v12148_v1  ;;  %v12159_v12 = vld [vmem:[%s17909_s0 + $0x50] sm:$0xff]   ;;  %v12160_v13 = vld [vmem:[%s17909_s0 + $0x58] sm:$0xff]   ;;  %v12161_v14 = vld [vmem:[%s17909_s0 + $0x60] sm:$0xff]  }
   0x6   :  { %v12162_v15 = vld [vmem:[%s17909_s0 + $0x68] sm:$0xff]   ;;  %v12163_v16 = vld [vmem:[%s17909_s0 + $0x70] sm:$0xff]   ;;  %v12164_v17 = vld [vmem:[%s17909_s0 + $0x78] sm:$0xff]  }
   0x7   :  { %11873 = vmatpush3.bf16.msra.mxu0 %v12148_v1  ;;  %12137 = vmatpush3.bf16.msra.mxu1 %v12148_v1  ;;  %v12165_v18 = vld [vmem:[%s17909_s0 + $0x80] sm:$0xff]   ;;  %v12166_v19 = vld [vmem:[%s17909_s0 + $0x88] sm:$0xff]   ;;  %v12167_v20 = vld [vmem:[%s17909_s0 + $0x90] sm:$0xff]  }
   0x8   :  { %v12168_v21 = vld [vmem:[%s17909_s0 + $0x98] sm:$0xff]   ;;  %v12169_v22 = vld [vmem:[%s17909_s0 + $0xa0] sm:$0xff]   ;;  %v12170_v23 = vld [vmem:[%s17909_s0 + $0xa8] sm:$0xff]  }
   0x9   :  { %v12171_v24 = vld [vmem:[%s17909_s0 + $0xb0] sm:$0xff]   ;;  %v12172_v25 = vld [vmem:[%s17909_s0 + $0xb8] sm:$0xff]   ;;  %v12173_v26 = vld [vmem:[%s17909_s0 + $0xc0] sm:$0xff]  }
   0xa   :  { %11875 = vmatmul.mubr.msk.bf16.vlgmr.msra.gmra.mxu0 %vm757_vm0, %v12150_v3  ;;  %v12174_v27 = vld [vmem:[%s17909_s0 + $0xc8] sm:$0xff]   ;;  %v12175_v28 = vld [vmem:[%s17909_s0 + $0xd0] sm:$0xff]   ;;  %v12176_v29 = vld [vmem:[%s17909_s0 + $0xd8] sm:$0xff]  }
   0xb   :  { %11878 = vmatprep.mubr.msk.bf16.mxu0 %vm757_vm0, %v12151_v4  ;;  %v12177_v30 = vld [vmem:[%s17909_s0 + $0xe0] sm:$0xff]   ;;  %v12178_v31 = vld [vmem:[%s17909_s0 + $0xe8] sm:$0xff]   ;;  %v12179_v32 = vld [vmem:[%s17909_s0 + $0xf0] sm:$0xff]  }
   0xc   :  { %v12180_v33 = vld [vmem:[%s17909_s0 + $0xf8] sm:$0xff]   ;;  %v12181_v34 = vld [vmem:[%s17909_s0 + $0x100] sm:$0xff]   ;;  %v12182_v35 = vld [vmem:[%s17909_s0 + $0x108] sm:$0xff]  }
   0xd   :  { %v12183_v36 = vld [vmem:[%s17909_s0 + $0x110] sm:$0xff]   ;;  %v12215_v37 = vld [vmem:[%s17909_s0 + $0x2c0] sm:$0xff]   ;;  %v12216_v38 = vld [vmem:[%s17909_s0 + $0x2c8] sm:$0xff]  }
   0xe   :  { %12050 = vmatprep.mubr.msk.bf16.mxu1 %vm757_vm0, %v12215_v37  ;;  %v12184_v39 = vld [vmem:[%s17909_s0 + $0x118] sm:$0xff]   ;;  %v12185_v40 = vld [vmem:[%s17909_s0 + $0x120] sm:$0xff]   ;;  %v12186_v41 = vld [vmem:[%s17909_s0 + $0x128] sm:$0xff]  }
   0xf   :  { %12051 = vmatmul.mubr.msk.bf16.vlgmr.msra.gmra.mxu1 %vm757_vm0, %v12216_v38  ;;  %v12187_v42 = vld [vmem:[%s17909_s0 + $0x130] sm:$0xff]   ;;  %v12188_v43 = vld [vmem:[%s17909_s0 + $0x138] sm:$0xff]   ;;  %v12189_v44 = vld [vmem:[%s17909_s0 + $0x140] sm:$0xff]  }
  0x10   :  { %v12190_v45 = vld [vmem:[%s17909_s0 + $0x148] sm:$0xff]   ;;  %v12191_v46 = vld [vmem:[%s17909_s0 + $0x150] sm:$0xff]   ;;  %v12226_v48 = vld [vmem:[%s17909_s0 + $0x2d8] sm:$0xff]  }
  0x11   :  { %v12225_v47 = vld [vmem:[%s17909_s0 + $0x2d0] sm:$0xff]   ;;  %v12192_v49 = vld [vmem:[%s17909_s0 + $0x158] sm:$0xff]   ;;  %v12193_v50 = vld [vmem:[%s17909_s0 + $0x160] sm:$0xff]  }
  0x12   :  { %11879 = vmatmul.mubr.msk.bf16.gmra.mxu0 %vm757_vm0, %v12152_v5  ;;  %12054 = vmatprep.mubr.msk.bf16.mxu1 %vm757_vm0, %v12225_v47  ;;  %v12229_v51 = vld [vmem:[%s17909_s0 + $0x2e0] sm:$0xff]   ;;  %v12230_v52 = vld [vmem:[%s17909_s0 + $0x2e8] sm:$0xff]   ;;  %v12195_v54 = vld [vmem:[%s17909_s0 + $0x170] sm:$0xff]  }
  0x13   :  { %11882 = vmatprep.mubr.msk.bf16.mxu0 %vm757_vm0, %v12153_v6  ;;  %v12194_v53 = vld [vmem:[%s17909_s0 + $0x168] sm:$0xff]   ;;  %v12233_v55 = vld [vmem:[%s17909_s0 + $0x2f0] sm:$0xff]   ;;  %v12234_v56 = vld [vmem:[%s17909_s0 + $0x2f8] sm:$0xff]  }
  0x14   :  { %v12196_v57 = vld [vmem:[%s17909_s0 + $0x178] sm:$0xff]   ;;  %v12197_v58 = vld [vmem:[%s17909_s0 + $0x180] sm:$0xff]   ;;  %v12238_v60 = vld [vmem:[%s17909_s0 + $0x308] sm:$0xff]  }
  0x15   :  { %v12237_v59 = vld [vmem:[%s17909_s0 + $0x300] sm:$0xff]   ;;  %v12198_v61 = vld [vmem:[%s17909_s0 + $0x188] sm:$0xff]   ;;  %v12199_v62 = vld [vmem:[%s17909_s0 + $0x190] sm:$0xff]  }
  0x16   :  { %v13652_v0 = vld [vmem:[%s17910_s3] ss:$0 sm:$0xff]  ;;  %v12200_v6 = vld [vmem:[%s17909_s0 + $0x198] sm:$0xff]  }
  0x17   :  { %12055 = vmatmul.mubr.msk.bf16.gmra.mxu1 %vm757_vm0, %v12226_v48  ;;  %v13658_v1 = vld [vmem:[%s17911_s1] sm:$0xff]  ;;  %v12204_v37 = vld [vmem:[%s17909_s0 + $0x1b8] sm:$0xff]  }
  0x18   :  { %12058 = vmatprep.mubr.msk.bf16.mxu1 %vm757_vm0, %v12229_v51  ;;  %v10629_v2 = vcombine.high %v13658_v1, %v13658_v1  ;;  %v12205_v38 = vld [vmem:[%s17909_s0 + $0x1c0] sm:$0xff]  }
  0x1a   :  { %11883 = vmatmul.mubr.msk.bf16.gmra.mxu0 %vm757_vm0, %v12154_v7 }
  0x1b   :  { %11886 = vmatprep.mubr.msk.bf16.mxu0 %vm757_vm0, %v12155_v8 }
  0x1f   :  { %12059 = vmatmul.mubr.msk.bf16.gmra.mxu1 %vm757_vm0, %v12230_v52 }
  0x20   :  { %12062 = vmatprep.mubr.msk.bf16.mxu1 %vm757_vm0, %v12233_v55  ;;  %v12210_v55 = vld [vmem:[%s17909_s0 + $0x1e8] sm:$0xff]  }
  0x22   :  { %11887 = vmatmul.mubr.msk.bf16.gmra.mxu0 %vm757_vm0, %v12156_v9  ;;  %v12201_v9 = vld [vmem:[%s17909_s0 + $0x1a0] sm:$0xff]  }
  0x23   :  { %11890 = vmatprep.mubr.msk.bf16.mxu0 %vm757_vm0, %v12157_v10 }
  0x27   :  { %12063 = vmatmul.mubr.msk.bf16.gmra.mxu1 %vm757_vm0, %v12234_v56  ;;  %v12211_v56 = vld [vmem:[%s17909_s0 + $0x1f0] sm:$0xff]  }
  0x28   :  { %12066 = vmatprep.mubr.msk.bf16.mxu1 %vm757_vm0, %v12237_v59 }
  0x2a   :  { %11891 = vmatmul.mubr.msk.bf16.gmra.mxu0 %vm757_vm0, %v12158_v11 }
  0x2b   :  { %11894 = vmatprep.mubr.msk.bf16.mxu0 %vm757_vm0, %v12159_v12 }
  0x2f   :  { %12067 = vmatmul.mubr.msk.bf16.gmra.mxu1 %vm757_vm0, %v12238_v60 }
  0x30   :  { %2250 = vmatprep.mubr.bf16.mxu1 %v10629_v2 }
  0x32   :  { %11895 = vmatmul.mubr.msk.bf16.gmra.mxu0 %vm757_vm0, %v12160_v13 }
  0x33   :  { %11898 = vmatprep.mubr.msk.bf16.mxu0 %vm757_vm0, %v12161_v14 }
  0x3a   :  { %11899 = vmatmul.mubr.msk.bf16.gmra.mxu0 %vm757_vm0, %v12162_v15 }
  0x3b   :  { %11902 = vmatprep.mubr.msk.bf16.mxu0 %vm757_vm0, %v12163_v16 }
  0x42   :  { %11903 = vmatmul.mubr.msk.bf16.gmra.mxu0 %vm757_vm0, %v12164_v17 }
  0x43   :  { %11906 = vmatprep.mubr.msk.bf16.mxu0 %vm757_vm0, %v12165_v18 }
  0x4a   :  { %11907 = vmatmul.mubr.msk.bf16.gmra.mxu0 %vm757_vm0, %v12166_v19 }
  0x4b   :  { %11910 = vmatprep.mubr.msk.bf16.mxu0 %vm757_vm0, %v12167_v20 }
  0x52   :  { %11911 = vmatmul.mubr.msk.bf16.gmra.mxu0 %vm757_vm0, %v12168_v21 }
  0x53   :  { %11914 = vmatprep.mubr.msk.bf16.mxu0 %vm757_vm0, %v12169_v22  ;;  %v12202_v22 = vld [vmem:[%s17909_s0 + $0x1a8] sm:$0xff]  }
  0x5a   :  { %11915 = vmatmul.mubr.msk.bf16.gmra.mxu0 %vm757_vm0, %v12170_v23 }
  0x5b   :  { %11918 = vmatprep.mubr.msk.bf16.mxu0 %vm757_vm0, %v12171_v24 }
  0x62   :  { %11919 = vmatmul.mubr.msk.bf16.gmra.mxu0 %vm757_vm0, %v12172_v25  ;;  %v12203_v25 = vld [vmem:[%s17909_s0 + $0x1b0] sm:$0xff]  }
  0x63   :  { %11922 = vmatprep.mubr.msk.bf16.mxu0 %vm757_vm0, %v12173_v26 }
  0x6a   :  { %11923 = vmatmul.mubr.msk.bf16.gmra.mxu0 %vm757_vm0, %v12174_v27 }
  0x6b   :  { %11926 = vmatprep.mubr.msk.bf16.mxu0 %vm757_vm0, %v12175_v28 }
  0x72   :  { %11927 = vmatmul.mubr.msk.bf16.gmra.mxu0 %vm757_vm0, %v12176_v29 }
  0x73   :  { %11930 = vmatprep.mubr.msk.bf16.mxu0 %vm757_vm0, %v12177_v30 }
  0x7a   :  { %11931 = vmatmul.mubr.msk.bf16.gmra.mxu0 %vm757_vm0, %v12178_v31 }
  0x7b   :  { %11934 = vmatprep.mubr.msk.bf16.mxu0 %vm757_vm0, %v12179_v32 }
  0x82   :  { %11935 = vmatmul.mubr.msk.bf16.gmra.mxu0 %vm757_vm0, %v12180_v33 }
  0x83   :  { %11938 = vmatprep.mubr.msk.bf16.mxu0 %vm757_vm0, %v12181_v34 }
  0x8a   :  { %11939 = vmatmul.mubr.msk.bf16.gmra.mxu0 %vm757_vm0, %v12182_v35 }
  0x8b   :  { %11942 = vmatprep.mubr.msk.bf16.mxu0 %vm757_vm0, %v12183_v36 }
  0x92   :  { %11943 = vmatmul.mubr.msk.bf16.gmra.mxu0 %vm757_vm0, %v12184_v39 }
  0x93   :  { %11946 = vmatprep.mubr.msk.bf16.mxu0 %vm757_vm0, %v12185_v40 }
  0x9a   :  { %11947 = vmatmul.mubr.msk.bf16.gmra.mxu0 %vm757_vm0, %v12186_v41 }
  0x9b   :  { %11950 = vmatprep.mubr.msk.bf16.mxu0 %vm757_vm0, %v12187_v42 }
  0xa2   :  { %11951 = vmatmul.mubr.msk.bf16.gmra.mxu0 %vm757_vm0, %v12188_v43  ;;  %v12206_v43 = vld [vmem:[%s17909_s0 + $0x1c8] sm:$0xff]  }
  0xa3   :  { %11954 = vmatprep.mubr.msk.bf16.mxu0 %vm757_vm0, %v12189_v44  ;;  %v12207_v44 = vld [vmem:[%s17909_s0 + $0x1d0] sm:$0xff]  }
  0xaa   :  { %11955 = vmatmul.mubr.msk.bf16.gmra.mxu0 %vm757_vm0, %v12190_v45 }
  0xab   :  { %11958 = vmatprep.mubr.msk.bf16.mxu0 %vm757_vm0, %v12191_v46 }
  0xb2   :  { %11959 = vmatmul.mubr.msk.bf16.gmra.mxu0 %vm757_vm0, %v12192_v49  ;;  %v12208_v49 = vld [vmem:[%s17909_s0 + $0x1d8] sm:$0xff]  }
  0xb3   :  { %11962 = vmatprep.mubr.msk.bf16.mxu0 %vm757_vm0, %v12193_v50  ;;  %v12209_v50 = vld [vmem:[%s17909_s0 + $0x1e0] sm:$0xff]  }
  0xba   :  { %11963 = vmatmul.mubr.msk.bf16.gmra.mxu0 %vm757_vm0, %v12194_v53 }
  0xbb   :  { %11966 = vmatprep.mubr.msk.bf16.mxu0 %vm757_vm0, %v12195_v54 }
  0xc2   :  { %11967 = vmatmul.mubr.msk.bf16.gmra.mxu0 %vm757_vm0, %v12196_v57 }
  0xc3   :  { %11970 = vmatprep.mubr.msk.bf16.mxu0 %vm757_vm0, %v12197_v58 }
  0xca   :  { %v11876_v63 = vpop.f32.mrf.mxu0  ;;  %11971 = vmatmul.mubr.msk.bf16.gmra.mxu0 %vm757_vm0, %v12198_v61  ;;  %v12212_v61 = vld [vmem:[%s17909_s0 + $0x1f8] sm:$0xff]  }
  0xcb   :  { %11974 = vmatprep.mubr.msk.bf16.mxu0 %vm757_vm0, %v12199_v62  ;;  %v1095_v4 = vadd.f32 %v11876_v63, %v13652_v0  ;;  %v12213_v62 = vld [vmem:[%s17909_s0 + $0x200] sm:$0xff]  }
  0xcc   :  { %v1086_v3 = vpop.f32.mrf.mxu0 }
  0xcd   :  { %v1087_v7 = vadd.f32 %v13652_v0, %v1086_v3  ;;  %v1871_v11 = vmax.f32 %v1095_v4, 0.0 }
  0xce   :  { %v11877_v5 = vpop.f32.mrf.mxu0 }
  0xcf   :  { %v1098_v8 = vadd.f32 %v11877_v5, %v13652_v0  ;;  %v1869_v15 = vmax.f32 %v1087_v7, 0.0 }
  0xd0   :  { %v1089_v10 = vpop.f32.mrf.mxu0 }
  0xd1   :  { %v1872_v12 = vmax.f32 %v1098_v8, 0.0  ;;  %v1090_v13 = vadd.f32 %v13652_v0, %v1089_v10  ;;  %v12214_v8 = vld [vmem:[%s17909_s0 + $0x208] sm:$0xff]  }
  0xd2   :  { %v11880_v14 = vpop.f32.mrf.mxu0  ;;  %11975 = vmatmul.mubr.msk.bf16.gmra.mxu0 %vm757_vm0, %v12200_v6 }
  0xd3   :  { %v13674_v16 = vpack.c.bf16 %v1872_v12, %v1871_v11  ;;  %v1870_v17 = vmax.f32 %v1090_v13, 0.0  ;;  %11978 = vmatprep.mubr.msk.bf16.mxu0 %vm757_vm0, %v12201_v9  ;;  %v1111_v20 = vadd.f32 %v11880_v14, %v13652_v0  ;;  %v12217_v11 = vld [vmem:[%s17909_s0 + $0x210] sm:$0xff]  }
  0xd4   :  { %v1102_v18 = vpop.f32.mrf.mxu0 }
  0xd5   :  { %v13677_v19 = vpack.c.bf16 %v1870_v17, %v1869_v15  ;;  %v1103_v23 = vadd.f32 %v13652_v0, %v1102_v18  ;;  %v1875_v27 = vmax.f32 %v1111_v20, 0.0 }
  0xd6   :  { %v11881_v21 = vpop.f32.mrf.mxu0 }
  0xd7   :  { %v1114_v24 = vadd.f32 %v11881_v21, %v13652_v0  ;;  %v1873_v31 = vmax.f32 %v1103_v23, 0.0 }
  0xd8   :  { %v1105_v26 = vpop.f32.mrf.mxu0 }
  0xd9   :  { %v1876_v28 = vmax.f32 %v1114_v24, 0.0  ;;  %v1106_v29 = vadd.f32 %v13652_v0, %v1105_v26 }
  0xda   :  { %v13689_v30 = vpop.f32.mrf.mxu0  ;;  %11979 = vmatmul.mubr.msk.bf16.gmra.mxu0 %vm757_vm0, %v12202_v22 }
  0xdb   :  { %v13692_v32 = vpack.c.bf16 %v1876_v28, %v1875_v27  ;;  %v1874_v33 = vmax.f32 %v1106_v29, 0.0  ;;  %11982 = vmatprep.mubr.msk.bf16.mxu0 %vm757_vm0, %v12203_v25 }
  0xdc   :  { %v13695_v34 = vpop.f32.mrf.mxu0 }
  0xdd   :  { %v13697_v35 = vpack.c.bf16 %v1874_v33, %v1873_v31 }
  0xde   :  { %v11885_v36 = vpop.f32.mrf.mxu0 }
  0xdf   :  { %v1130_v25 = vadd.f32 %v11885_v36, %v13652_v0 }
  0xe0   :  { %v13705_v39 = vpop.f32.mrf.mxu0 }
  0xe2   :  { %v11888_v40 = vpop.f32.mrf.mxu0  ;;  %11983 = vmatmul.mubr.msk.bf16.gmra.mxu0 %vm757_vm0, %v12204_v37 }
  0xe3   :  { %11986 = vmatprep.mubr.msk.bf16.mxu0 %vm757_vm0, %v12205_v38  ;;  %v1143_v6 = vadd.f32 %v11888_v40, %v13652_v0 }
  0xe4   :  { %v1134_v41 = vpop.f32.mrf.mxu0 }
  0xe5   :  { %v1883_v21 = vmax.f32 %v1143_v6, 0.0  ;;  %v1135_v22 = vadd.f32 %v13652_v0, %v1134_v41  ;;  %v1119_v6 = vadd.f32 %v13652_v0, %v13695_v34 }
  0xe6   :  { %v11889_v42 = vpop.f32.mrf.mxu0 }
  0xe7   :  { %v1146_v3 = vadd.f32 %v11889_v42, %v13652_v0  ;;  %v1127_v42 = vadd.f32 %v13689_v30, %v13652_v0  ;;  %v12219_v30 = vld [vmem:[%s17909_s0 + $0x220] sm:$0xff]  }
  0xe8   :  { %v1137_v45 = vpop.f32.mrf.mxu0 }
  0xe9   :  { %v1884_v12 = vmax.f32 %v1146_v3, 0.0  ;;  %v1138_v13 = vadd.f32 %v13652_v0, %v1137_v45  ;;  %v12218_v45 = vld [vmem:[%s17909_s0 + $0x218] sm:$0xff]  }
  0xea   :  { %v13715_v46 = vpop.f32.mrf.mxu0  ;;  %11987 = vmatmul.mubr.msk.bf16.gmra.mxu0 %vm757_vm0, %v12206_v43  ;;  %v1881_v43 = vmax.f32 %v1135_v22, 0.0  ;;  %v12220_v22 = vld [vmem:[%s17909_s0 + $0x228] sm:$0xff]  }
  0xeb   :  { %11990 = vmatprep.mubr.msk.bf16.mxu0 %vm757_vm0, %v12207_v44  ;;  %v2079_v29 = vpack.c.bf16 %v1884_v12, %v1883_v21  ;;  %v1882_v31 = vmax.f32 %v1138_v13, 0.0 }
  0xec   :  { %v13719_v47 = vpop.f32.mrf.mxu0 }
  0xee   :  { %v13721_v48 = vpop.f32.mrf.mxu0 }
  0xf0   :  { %v13729_v51 = vpop.f32.mrf.mxu0 }
  0xf2   :  { %v13731_v52 = vpop.f32.mrf.mxu0  ;;  %11991 = vmatmul.mubr.msk.bf16.gmra.mxu0 %vm757_vm0, %v12208_v49  ;;  %v1880_v49 = vmax.f32 %v1130_v25, 0.0  ;;  %v12221_v25 = vld [vmem:[%s17909_s0 + $0x230] sm:$0xff]  }
  0xf3   :  { %11994 = vmatprep.mubr.msk.bf16.mxu0 %vm757_vm0, %v12209_v50 }
  0xf4   :  { %v13735_v53 = vpop.f32.mrf.mxu0 }
  0xf6   :  { %v13737_v54 = vpop.f32.mrf.mxu0 }
  0xf8   :  { %v13745_v57 = vpop.f32.mrf.mxu0 }
  0xf9   :  { %v1170_v34 = vadd.f32 %v13652_v0, %v13745_v57 }
  0xfa   :  { %v11900_v58 = vpop.f32.mrf.mxu0  ;;  %11995 = vmatmul.mubr.msk.bf16.gmra.mxu0 %vm757_vm0, %v12210_v55 }
  0xfb   :  { %11998 = vmatprep.mubr.msk.bf16.mxu0 %vm757_vm0, %v12211_v56  ;;  %v1191_v23 = vadd.f32 %v11900_v58, %v13652_v0  ;;  %v1122_v58 = vadd.f32 %v13652_v0, %v13705_v39 }
  0xfc   :  { %v1182_v59 = vpop.f32.mrf.mxu0 }
  0xfd   :  { %v1895_v36 = vmax.f32 %v1191_v23, 0.0  ;;  %v1183_v50 = vadd.f32 %v13652_v0, %v1182_v59  ;;  %v1878_v12 = vmax.f32 %v1122_v58, 0.0  ;;  %v1167_v23 = vadd.f32 %v13652_v0, %v13735_v53 }
  0xfe   :  { %v11901_v60 = vpop.f32.mrf.mxu0 }
  0xff   :  { %v1194_v14 = vadd.f32 %v11901_v60, %v13652_v0  ;;  %v2078_v60 = vpack.c.bf16 %v1882_v31, %v1881_v43  ;;  %v1893_v39 = vmax.f32 %v1183_v50, 0.0  ;;  %v1890_v31 = vmax.f32 %v1170_v34, 0.0 }
 0x100   :  { %v1185_v63 = vpop.f32.mrf.mxu0 }
 0x101   :  { %v1896_v33 = vmax.f32 %v1194_v14, 0.0  ;;  %v1186_v38 = vadd.f32 %v13652_v0, %v1185_v63 }
 0x102   :  { %v11904_v2 = vpop.f32.mrf.mxu0  ;;  %11999 = vmatmul.mubr.msk.bf16.gmra.mxu0 %vm757_vm0, %v12212_v61  ;;  %v1178_v61 = vadd.f32 %v13737_v54, %v13652_v0 }
 0x103   :  { %12002 = vmatprep.mubr.msk.bf16.mxu0 %vm757_vm0, %v12213_v62  ;;  %v1207_v5 = vadd.f32 %v11904_v2, %v13652_v0  ;;  %v2085_v62 = vpack.c.bf16 %v1896_v33, %v1895_v36  ;;  %v1894_v2 = vmax.f32 %v1186_v38, 0.0  ;;  %v1159_v38 = vadd.f32 %v13715_v46, %v13652_v0 }
 0x104   :  { %v1198_v4 = vpop.f32.mrf.mxu0  ;;  %v1892_v13 = vmax.f32 %v1178_v61, 0.0 }
 0x105   :  { %v1199_v9 = vadd.f32 %v13652_v0, %v1198_v4  ;;  %v1899_v17 = vmax.f32 %v1207_v5, 0.0  ;;  %v1879_v5 = vmax.f32 %v1127_v42, 0.0 }
 0x106   :  { %v11905_v7 = vpop.f32.mrf.mxu0 }
 0x107   :  { %v1210_v10 = vadd.f32 %v11905_v7, %v13652_v0  ;;  %v1897_v26 = vmax.f32 %v1199_v9, 0.0  ;;  %v1175_v7 = vadd.f32 %v13731_v52, %v13652_v0 }
 0x108   :  { %v1201_v15 = vpop.f32.mrf.mxu0 }
 0x109   :  { %v1900_v18 = vmax.f32 %v1210_v10, 0.0  ;;  %v1202_v20 = vadd.f32 %v13652_v0, %v1201_v15 }
 0x10a   :  { %v11908_v24 = vpop.f32.mrf.mxu0  ;;  %12003 = vmatmul.mubr.msk.bf16.gmra.mxu0 %vm757_vm0, %v12214_v8 }
 0x10b   :  { %v2087_v27 = vpack.c.bf16 %v1900_v18, %v1899_v17  ;;  %v1898_v28 = vmax.f32 %v1202_v20, 0.0  ;;  %12006 = vmatprep.mubr.msk.bf16.mxu0 %vm757_vm0, %v12217_v11  ;;  %v1223_v40 = vadd.f32 %v11908_v24, %v13652_v0  ;;  %v2077_v11 = vpack.c.bf16 %v1880_v49, %v1879_v5 }
 0x10c   :  { %v1214_v37 = vpop.f32.mrf.mxu0  ;;  %v2084_v17 = vpack.c.bf16 %v1894_v2, %v1893_v39  ;;  %v1877_v18 = vmax.f32 %v1119_v6, 0.0  ;;  %v1891_v20 = vmax.f32 %v1175_v7, 0.0  ;;  %v10628_v5 = vcombine.low %v13658_v1, %v13658_v1  ;;  %v12228_v1 = vld [vmem:[%s17909_s0 + $0x258] sm:$0xff]   ;;  %v12231_v39 = vld [vmem:[%s17909_s0 + $0x260] sm:$0xff]  }
 0x10d   :  { %11713 = vmatprep.subr.bf16.mxu1 %v2087_v27  ;;  %v2086_v41 = vpack.c.bf16 %v1898_v28, %v1897_v26  ;;  %v1215_v55 = vadd.f32 %v13652_v0, %v1214_v37  ;;  %v1903_v59 = vmax.f32 %v1223_v40, 0.0  ;;  %v1162_v27 = vadd.f32 %v13721_v48, %v13652_v0 }
 0x10e   :  { %v11909_v44 = vpop.f32.mrf.mxu0  ;;  %11714 = vmatpush3.bf16.msra.mxu1 %v2079_v29  ;;  %v2076_v26 = vpack.c.bf16 %v1878_v12, %v1877_v18  ;;  %v2083_v28 = vpack.c.bf16 %v1892_v13, %v1891_v20  ;;  %v12232_v12 = vld [vmem:[%s17909_s0 + $0x268] sm:$0xff]   ;;  %v12235_v13 = vld [vmem:[%s17909_s0 + $0x270] sm:$0xff]   ;;  %v12236_v18 = vld [vmem:[%s17909_s0 + $0x278] sm:$0xff]  }
 0x10f   :  { %v1226_v56 = vadd.f32 %v11909_v44, %v13652_v0  ;;  %11715 = vmatprep.subr.bf16.mxu1 %v2086_v41  ;;  %v1901_v54 = vmax.f32 %v1215_v55, 0.0  ;;  %v1889_v41 = vmax.f32 %v1167_v23, 0.0  ;;  %v1888_v44 = vmax.f32 %v1162_v27, 0.0  ;;  %v12222_v55 = vld [vmem:[%s17909_s0 + $0x238] sm:$0xff]   ;;  %v12239_v20 = vld [vmem:[%s17909_s0 + $0x280] sm:$0xff]   ;;  %v12240_v27 = vld [vmem:[%s17909_s0 + $0x288] sm:$0xff]  }
 0x110   :  { %v1217_v63 = vpop.f32.mrf.mxu0 }
 0x111   :  { %v1904_v3 = vmax.f32 %v1226_v56, 0.0  ;;  %v1218_v4 = vadd.f32 %v13652_v0, %v1217_v63  ;;  %v2082_v49 = vpack.c.bf16 %v1890_v31, %v1889_v41  ;;  %v1887_v56 = vmax.f32 %v1159_v38, 0.0  ;;  %v12243_v31 = vld [vmem:[%s17909_s0 + $0x290] sm:$0xff]  }
 0x112   :  { %v11912_v8 = vpop.f32.mrf.mxu0  ;;  %12007 = vmatmul.mubr.msk.bf16.gmra.mxu0 %vm757_vm0, %v12218_v45  ;;  %11716 = vmatpush3.bf16.msra.mxu1 %v2078_v60  ;;  %v1154_v45 = vadd.f32 %v13652_v0, %v13729_v51  ;;  %v12223_v51 = vld [vmem:[%s17909_s0 + $0x240] sm:$0xff]  }
 0x113   :  { %v13799_v9 = vpack.c.bf16 %v1904_v3, %v1903_v59  ;;  %v1902_v10 = vmax.f32 %v1218_v4, 0.0  ;;  %11717 = vmatprep.subr.bf16.mxu1 %v2085_v62  ;;  %12010 = vmatprep.mubr.msk.bf16.mxu0 %vm757_vm0, %v12219_v30  ;;  %v1239_v15 = vadd.f32 %v11912_v8, %v13652_v0  ;;  %v1151_v30 = vadd.f32 %v13652_v0, %v13719_v47  ;;  %v12224_v59 = vld [vmem:[%s17909_s0 + $0x248] sm:$0xff]   ;;  %v12227_v3 = vld [vmem:[%s17909_s0 + $0x250] sm:$0xff]  }
 0x114   :  { %v1230_v14 = vpop.f32.mrf.mxu0  ;;  %v2081_v60 = vpack.c.bf16 %v1888_v44, %v1887_v56  ;;  %v1886_v61 = vmax.f32 %v1154_v45, 0.0 }
 0x115   :  { %v13804_v52 = vpack.c.bf16 %v1902_v10, %v1901_v54  ;;  %v1231_v24 = vadd.f32 %v13652_v0, %v1230_v14  ;;  %v1907_v33 = vmax.f32 %v1239_v15, 0.0 }
 0x116   :  { %v11913_v21 = vpop.f32.mrf.mxu0  ;;  %11718 = vmatpush3.bf16.msra.mxu1 %v2077_v11 }
 0x117   :  { %v1242_v57 = vadd.f32 %v11913_v21, %v13652_v0  ;;  %11719 = vmatprep.subr.bf16.mxu1 %v2084_v17  ;;  %v1905_v42 = vmax.f32 %v1231_v24, 0.0 }
 0x118   :  { %v1233_v29 = vpop.f32.mrf.mxu0 }
 0x119   :  { %v1908_v37 = vmax.f32 %v1242_v57, 0.0  ;;  %v1234_v53 = vadd.f32 %v13652_v0, %v1233_v29 }
 0x11a   :  { %v13822_v40 = vpop.f32.mrf.mxu0  ;;  %12011 = vmatmul.mubr.msk.bf16.gmra.mxu0 %vm757_vm0, %v12220_v22  ;;  %11720 = vmatpush3.bf16.msra.mxu1 %v2076_v26 }
 0x11b   :  { %v13825_v43 = vpack.c.bf16 %v1908_v37, %v1907_v33  ;;  %v1906_v48 = vmax.f32 %v1234_v53, 0.0  ;;  %11721 = vmatprep.subr.bf16.mxu1 %v2083_v28  ;;  %12014 = vmatprep.mubr.msk.bf16.mxu0 %vm757_vm0, %v12221_v25 }
 0x11c   :  { %v13828_v36 = vpop.f32.mrf.mxu0 }
 0x11d   :  { %v13832_v46 = vpack.c.bf16 %v1906_v48, %v1905_v42 }
 0x11e   :  { %v13834_v50 = vpop.f32.mrf.mxu0  ;;  %11722 = vmatpush3.bf16.msra.mxu1 %v13692_v32  ;;  %v1885_v32 = vmax.f32 %v1151_v30, 0.0 }
 0x11f   :  { %11723 = vmatprep.subr.bf16.mxu1 %v2082_v49 }
 0x120   :  { %v13845_v58 = vpop.f32.mrf.mxu0  ;;  %v2080_v47 = vpack.c.bf16 %v1886_v61, %v1885_v32 }
 0x122   :  { %v11920_v62 = vpop.f32.mrf.mxu0  ;;  %12015 = vmatmul.mubr.msk.bf16.gmra.mxu0 %vm757_vm0, %v12222_v55  ;;  %11724 = vmatpush3.bf16.msra.mxu1 %v13697_v35  ;;  %v13860_v35 = vld [vmem:[%s17911_s1 + $0x8] sm:$0xff] }
 0x123   :  { %11725 = vmatprep.subr.bf16.mxu1 %v2081_v60  ;;  %12018 = vmatprep.mubr.msk.bf16.mxu0 %vm757_vm0, %v12223_v51  ;;  %v1271_v25 = vadd.f32 %v11920_v62, %v13652_v0  ;;  %v1258_v60 = vadd.f32 %v13834_v50, %v13652_v0  ;;  %v12244_v50 = vld [vmem:[%s17909_s0 + $0x298] sm:$0xff]  }
 0x124   :  { %v1262_v63 = vpop.f32.mrf.mxu0 }
 0x125   :  { %v1915_v44 = vmax.f32 %v1271_v25, 0.0  ;;  %v1263_v45 = vadd.f32 %v13652_v0, %v1262_v63 }
 0x126   :  { %v11921_v2 = vpop.f32.mrf.mxu0  ;;  %11726 = vmatpush3.bf16.msra.mxu1 %v13674_v16  ;;  %v10631_v16 = vcombine.high %v13860_v35, %v13860_v35 }
 0x127   :  { %11727 = vmatprep.subr.bf16.mxu1 %v2080_v47  ;;  %v1274_v23 = vadd.f32 %v11921_v2, %v13652_v0 }
 0x128   :  { %v1265_v4 = vpop.f32.mrf.mxu0 }
 0x129   :  { %v1916_v33 = vmax.f32 %v1274_v23, 0.0  ;;  %v1266_v37 = vadd.f32 %v13652_v0, %v1265_v4  ;;  %v1913_v4 = vmax.f32 %v1263_v45, 0.0 }
 0x12a   :  { %v13864_v6 = vpop.f32.mrf.mxu0  ;;  %12019 = vmatmul.mubr.msk.bf16.gmra.mxu0 %vm757_vm0, %v12224_v59  ;;  %11728 = vmatpush3.bf16.msra.mxu1 %v13677_v19 }
 0x12b   :  { %12022 = vmatprep.mubr.msk.bf16.mxu0 %vm757_vm0, %v12227_v3  ;;  %v2095_v61 = vpack.c.bf16 %v1916_v33, %v1915_v44  ;;  %v1914_v62 = vmax.f32 %v1266_v37, 0.0  ;;  %v1255_v3 = vadd.f32 %v13822_v40, %v13652_v0  ;;  %v1250_v40 = vadd.f32 %v13652_v0, %v13845_v58 }
 0x12c   :  { %v13871_v7 = vpop.f32.mrf.mxu0 }
 0x12d   :  { %2251 = vmatmul.mubr.bf16.vlgmr.msra.gmra.mxu1 %v10628_v5  ;;  %v1911_v23 = vmax.f32 %v1255_v3, 0.0  ;;  %v1279_v3 = vadd.f32 %v13652_v0, %v13871_v7  ;;  %v13998_v7 = vld [vmem:[%s17911_s1 + $0x10] sm:$0xff] }
 0x12e   :  { %v13873_v8 = vpop.f32.mrf.mxu0  ;;  %2290 = vmatprep.mubr.bf16.mxu1 %v10631_v16 }
 0x12f   :  { %v1290_v44 = vadd.f32 %v13873_v8, %v13652_v0 }
 0x130   :  { %v13881_v19 = vpop.f32.mrf.mxu0 }
 0x132   :  { %v13883_v54 = vpop.f32.mrf.mxu0  ;;  %12023 = vmatmul.mubr.msk.bf16.gmra.mxu0 %vm757_vm0, %v12228_v1 }
 0x133   :  { %12026 = vmatprep.mubr.msk.bf16.mxu0 %vm757_vm0, %v12231_v39  ;;  %v1303_v58 = vadd.f32 %v13883_v54, %v13652_v0  ;;  %v12246_v54 = vld [vmem:[%s17909_s0 + $0x2a8] sm:$0xff]  }
 0x134   :  { %v13887_v10 = vpop.f32.mrf.mxu0 }
 0x136   :  { %v11929_v11 = vpop.f32.mrf.mxu0 }
 0x138   :  { %v13895_v14 = vpop.f32.mrf.mxu0 }
 0x13a   :  { %v11932_v34 = vpop.f32.mrf.mxu0  ;;  %12027 = vmatmul.mubr.msk.bf16.gmra.mxu0 %vm757_vm0, %v12232_v12  ;;  %v12245_v12 = vld [vmem:[%s17909_s0 + $0x2a0] sm:$0xff]  }
 0x13b   :  { %12030 = vmatprep.mubr.msk.bf16.mxu0 %vm757_vm0, %v12235_v13  ;;  %v1319_v55 = vadd.f32 %v11932_v34, %v13652_v0  ;;  %v1912_v13 = vmax.f32 %v1258_v60, 0.0  ;;  %v2094_v34 = vpack.c.bf16 %v1914_v62, %v1913_v4  ;;  %v1920_v62 = vmax.f32 %v1290_v44, 0.0 }
 0x13c   :  { %v1310_v15 = vpop.f32.mrf.mxu0 }
 0x13d   :  { %v1927_v16 = vmax.f32 %v1319_v55, 0.0  ;;  %v1311_v1 = vadd.f32 %v13652_v0, %v1310_v15 }
 0x13e   :  { %v11933_v17 = vpop.f32.mrf.mxu0 }
 0x13f   :  { %v1322_v38 = vadd.f32 %v11933_v17, %v13652_v0  ;;  %v1306_v17 = vadd.f32 %v11929_v11, %v13652_v0  ;;  %v1925_v25 = vmax.f32 %v1311_v1, 0.0  ;;  %v2093_v11 = vpack.c.bf16 %v1912_v13, %v1911_v23 }
 0x140   :  { %v1313_v21 = vpop.f32.mrf.mxu0  ;;  %v10630_v13 = vcombine.low %v13860_v35, %v13860_v35 }
 0x141   :  { %v1928_v47 = vmax.f32 %v1322_v38, 0.0  ;;  %v1314_v63 = vadd.f32 %v13652_v0, %v1313_v21  ;;  %v1923_v38 = vmax.f32 %v1303_v58, 0.0 }
 0x142   :  { %v11936_v22 = vpop.f32.mrf.mxu0  ;;  %12031 = vmatmul.mubr.msk.bf16.gmra.mxu0 %vm757_vm0, %v12236_v18 }
 0x143   :  { %12034 = vmatprep.mubr.msk.bf16.mxu0 %vm757_vm0, %v12239_v20  ;;  %v1335_v57 = vadd.f32 %v11936_v22, %v13652_v0  ;;  %v2101_v20 = vpack.c.bf16 %v1928_v47, %v1927_v16  ;;  %v1926_v21 = vmax.f32 %v1314_v63, 0.0  ;;  %v1282_v47 = vadd.f32 %v13652_v0, %v13881_v19 }
 0x144   :  { %v1326_v24 = vpop.f32.mrf.mxu0  ;;  %v1917_v19 = vmax.f32 %v1279_v3, 0.0 }
 0x145   :  { %v1327_v28 = vadd.f32 %v13652_v0, %v1326_v24  ;;  %v1931_v41 = vmax.f32 %v1335_v57, 0.0  ;;  %v1247_v24 = vadd.f32 %v13652_v0, %v13828_v36  ;;  %v1298_v36 = vadd.f32 %v13652_v0, %v13895_v14  ;;  %v12247_v14 = vld [vmem:[%s17909_s0 + $0x2b0] sm:$0xff]  }
 0x146   :  { %v11937_v26 = vpop.f32.mrf.mxu0  ;;  %v2100_v33 = vpack.c.bf16 %v1926_v21, %v1925_v25 }
 0x147   :  { %v1338_v29 = vadd.f32 %v11937_v26, %v13652_v0  ;;  %v1929_v56 = vmax.f32 %v1327_v28, 0.0  ;;  %v1909_v37 = vmax.f32 %v1247_v24, 0.0  ;;  %v1922_v55 = vmax.f32 %v1298_v36, 0.0 }
 0x148   :  { %v1329_v53 = vpop.f32.mrf.mxu0 }
 0x149   :  { %v1932_v42 = vmax.f32 %v1338_v29, 0.0  ;;  %v1330_v48 = vadd.f32 %v13652_v0, %v1329_v53  ;;  %v1924_v29 = vmax.f32 %v1306_v17, 0.0 }
 0x14a   :  { %v11940_v49 = vpop.f32.mrf.mxu0  ;;  %12035 = vmatmul.mubr.msk.bf16.gmra.mxu0 %vm757_vm0, %v12240_v27  ;;  %v1910_v27 = vmax.f32 %v1250_v40, 0.0 }
 0x14b   :  { %v2103_v30 = vpack.c.bf16 %v1932_v42, %v1931_v41  ;;  %v1930_v51 = vmax.f32 %v1330_v48, 0.0  ;;  %12038 = vmatprep.mubr.msk.bf16.mxu0 %vm757_vm0, %v12243_v31  ;;  %v1351_v2 = vadd.f32 %v11940_v49, %v13652_v0  ;;  %v1295_v41 = vadd.f32 %v13652_v0, %v13887_v10 }
 0x14c   :  { %v13927_v32 = vpop.f32.mrf.mxu0  ;;  %v2092_v48 = vpack.c.bf16 %v1910_v27, %v1909_v37  ;;  %v2099_v49 = vpack.c.bf16 %v1924_v29, %v1923_v38  ;;  %v1287_v10 = vadd.f32 %v13864_v6, %v13652_v0  ;;  %v12248_v6 = vld [vmem:[%s17909_s0 + $0x2b8] sm:$0xff]  }
 0x14d   :  { %11735 = vmatprep.subr.bf16.mxu1 %v2103_v30  ;;  %v2102_v59 = vpack.c.bf16 %v1930_v51, %v1929_v56  ;;  %v1935_v22 = vmax.f32 %v1351_v2, 0.0  ;;  %v1921_v60 = vmax.f32 %v1295_v41, 0.0 }
 0x14e   :  { %v11941_v5 = vpop.f32.mrf.mxu0  ;;  %11736 = vmatpush3.bf16.msra.mxu1 %v2095_v61 }
 0x14f   :  { %v1354_v39 = vadd.f32 %v11941_v5, %v13652_v0  ;;  %11737 = vmatprep.subr.bf16.mxu1 %v2102_v59  ;;  %v2098_v63 = vpack.c.bf16 %v1922_v55, %v1921_v60  ;;  %v1919_v59 = vmax.f32 %v1287_v10, 0.0 }
 0x150   :  { %v13944_v18 = vpop.f32.mrf.mxu0 }
 0x151   :  { %v1936_v15 = vmax.f32 %v1354_v39, 0.0  ;;  %v2097_v5 = vpack.c.bf16 %v1920_v62, %v1919_v59 }
 0x152   :  { %v11944_v57 = vpop.f32.mrf.mxu0  ;;  %12039 = vmatmul.mubr.msk.bf16.gmra.mxu0 %vm757_vm0, %v12244_v50  ;;  %11738 = vmatpush3.bf16.msra.mxu1 %v2094_v34  ;;  %v1918_v50 = vmax.f32 %v1282_v47, 0.0 }
 0x153   :  { %v13951_v26 = vpack.c.bf16 %v1936_v15, %v1935_v22  ;;  %11739 = vmatprep.subr.bf16.mxu1 %v2101_v20  ;;  %12042 = vmatprep.mubr.msk.bf16.mxu0 %vm757_vm0, %v12245_v12  ;;  %v1367_v31 = vadd.f32 %v11944_v57, %v13652_v0 }
 0x154   :  { %v13954_v28 = vpop.f32.mrf.mxu0  ;;  %v2096_v1 = vpack.c.bf16 %v1918_v50, %v1917_v19 }
 0x155   :  { %v1939_v56 = vmax.f32 %v1367_v31, 0.0 }
 0x156   :  { %v11945_v53 = vpop.f32.mrf.mxu0  ;;  %11740 = vmatpush3.bf16.msra.mxu1 %v2093_v11  ;;  %v12052_v11 = vpop.f32.mrf.mxu1 }
 0x157   :  { %v1370_v42 = vadd.f32 %v11945_v53, %v13652_v0  ;;  %11741 = vmatprep.subr.bf16.mxu1 %v2100_v33  ;;  %v1799_v41 = vadd.f32 %v12052_v11, %v13652_v0 }
 0x158   :  { %v13970_v45 = vpop.f32.mrf.mxu0  ;;  %v14022_v31 = vpop.f32.mrf.mxu1 }
 0x159   :  { %v1940_v30 = vmax.f32 %v1370_v42, 0.0  ;;  %v2047_v50 = vmax.f32 %v1799_v41, 0.0 }
 0x15a   :  { %v13972_v51 = vpop.f32.mrf.mxu0  ;;  %12043 = vmatmul.mubr.msk.bf16.gmra.mxu0 %vm757_vm0, %v12246_v54  ;;  %11742 = vmatpush3.bf16.msra.mxu1 %v2092_v48  ;;  %v12053_v42 = vpop.f32.mrf.mxu1 }
 0x15b   :  { %v13977_v61 = vpack.c.bf16 %v1940_v30, %v1939_v56  ;;  %11743 = vmatprep.subr.bf16.mxu1 %v2099_v49  ;;  %12046 = vmatprep.mubr.msk.bf16.mxu0 %vm757_vm0, %v12247_v14 }
 0x15c   :  { %v13980_v8 = vpop.f32.mrf.mxu0  ;;  %v14032_v60 = vpop.f32.mrf.mxu1 }
 0x15e   :  { %v11949_v2 = vpop.f32.mrf.mxu0  ;;  %11744 = vmatpush3.bf16.msra.mxu1 %v13825_v43  ;;  %v12056_v19 = vpop.f32.mrf.mxu1 }
 0x15f   :  { %11745 = vmatprep.subr.bf16.mxu1 %v2098_v63  ;;  %v1386_v55 = vadd.f32 %v11949_v2, %v13652_v0 }
 0x160   :  { %v13990_v4 = vpop.f32.mrf.mxu0 }
 0x162   :  { %v11952_v16 = vpop.f32.mrf.mxu0  ;;  %12047 = vmatmul.mubr.msk.bf16.gmra.mxu0 %vm757_vm0, %v12248_v6  ;;  %11746 = vmatpush3.bf16.msra.mxu1 %v13832_v46  ;;  %v10633_v46 = vcombine.high %v13998_v7, %v13998_v7 }
 0x163   :  { %11747 = vmatprep.subr.bf16.mxu1 %v2097_v5  ;;  %v1399_v29 = vadd.f32 %v11952_v16, %v13652_v0  ;;  %v1802_v16 = vadd.f32 %v12053_v42, %v13652_v0 }
 0x164   :  { %v1390_v43 = vpop.f32.mrf.mxu0 }
 0x165   :  { %v1947_v56 = vmax.f32 %v1399_v29, 0.0  ;;  %v1391_v30 = vadd.f32 %v13652_v0, %v1390_v43 }
 0x166   :  { %v11953_v39 = vpop.f32.mrf.mxu0  ;;  %11748 = vmatpush3.bf16.msra.mxu1 %v13799_v9 }
 0x167   :  { %11749 = vmatprep.subr.bf16.mxu1 %v2096_v1  ;;  %v1402_v58 = vadd.f32 %v11953_v39, %v13652_v0 }
 0x168   :  { %v1393_v12 = vpop.f32.mrf.mxu0 }
 0x169   :  { %v1948_v53 = vmax.f32 %v1402_v58, 0.0  ;;  %v1394_v54 = vadd.f32 %v13652_v0, %v1393_v12  ;;  %v1383_v12 = vadd.f32 %v13972_v51, %v13652_v0  ;;  %v1378_v58 = vadd.f32 %v13652_v0, %v13990_v4 }
 0x16a   :  { %v14002_v40 = vpop.f32.mrf.mxu0  ;;  %11750 = vmatpush3.bf16.msra.mxu1 %v13804_v52 }
 0x16b   :  { %v2111_v59 = vpack.c.bf16 %v1948_v53, %v1947_v56  ;;  %v1946_v3 = vmax.f32 %v1394_v54, 0.0  ;;  %v1943_v41 = vmax.f32 %v1383_v12, 0.0 }
 0x16c   :  { %v14007_v34 = vpop.f32.mrf.mxu0 }
 0x16d   :  { %2291 = vmatmul.mubr.bf16.vlgmr.msra.gmra.mxu1 %v10630_v13  ;;  %v1944_v13 = vmax.f32 %v1386_v55, 0.0  ;;  %v1942_v55 = vmax.f32 %v1378_v58, 0.0 }
 0x16e   :  { %v14009_v9 = vpop.f32.mrf.mxu0  ;;  %2330 = vmatprep.mubr.bf16.mxu1 %v10633_v46  ;;  %v1945_v46 = vmax.f32 %v1391_v30, 0.0 }
 0x170   :  { %v14011_v17 = vpop.f32.mrf.mxu0 }
 0x172   :  { %v14013_v20 = vpop.f32.mrf.mxu0 }
 0x174   :  { %v14015_v21 = vpop.f32.mrf.mxu0 }
 0x176   :  { %v11961_v35 = vpop.f32.mrf.mxu0 }
 0x177   :  { %v1434_v29 = vadd.f32 %v11961_v35, %v13652_v0  ;;  %v1431_v35 = vadd.f32 %v14013_v20, %v13652_v0 }
 0x178   :  { %v14017_v22 = vpop.f32.mrf.mxu0 }
 0x17a   :  { %v11964_v15 = vpop.f32.mrf.mxu0 }
 0x17b   :  { %v1447_v62 = vadd.f32 %v11964_v15, %v13652_v0 }
 0x17c   :  { %v1438_v52 = vpop.f32.mrf.mxu0 }
 0x17e   :  { %v11965_v23 = vpop.f32.mrf.mxu0 }
 0x17f   :  { %v1450_v14 = vadd.f32 %v11965_v23, %v13652_v0  ;;  %v2048_v23 = vmax.f32 %v1802_v16, 0.0  ;;  %v1362_v16 = vadd.f32 %v13652_v0, %v13970_v45 }
 0x180   :  { %v1441_v24 = vpop.f32.mrf.mxu0 }
 0x181   :  { %v1960_v2 = vmax.f32 %v1450_v14, 0.0  ;;  %v1442_v1 = vadd.f32 %v13652_v0, %v1441_v24  ;;  %v1439_v24 = vadd.f32 %v13652_v0, %v1438_v52  ;;  %v1375_v52 = vadd.f32 %v13652_v0, %v13980_v8 }
 0x182   :  { %v11968_v57 = vpop.f32.mrf.mxu0  ;;  %v1956_v8 = vmax.f32 %v1434_v29, 0.0  ;;  %v1938_v29 = vmax.f32 %v1362_v16, 0.0 }
 0x183   :  { %v1463_v27 = vadd.f32 %v11968_v57, %v13652_v0  ;;  %v14042_v57 = vpop.f32.mrf.mxu1  ;;  %v1958_v54 = vmax.f32 %v1442_v1, 0.0  ;;  %v1941_v20 = vmax.f32 %v1375_v52, 0.0 }
 0x184   :  { %v1454_v25 = vpop.f32.mrf.mxu0 }
 0x185   :  { %v1455_v33 = vadd.f32 %v13652_v0, %v1454_v25  ;;  %v1963_v48 = vmax.f32 %v1463_v27, 0.0  ;;  %v1959_v25 = vmax.f32 %v1447_v62, 0.0  ;;  %v2110_v27 = vpack.c.bf16 %v1946_v3, %v1945_v46 }
 0x186   :  { %v11969_v36 = vpop.f32.mrf.mxu0 }
 0x187   :  { %v1466_v37 = vadd.f32 %v11969_v36, %v13652_v0  ;;  %v1961_v47 = vmax.f32 %v1455_v33, 0.0  ;;  %v14051_v36 = vpack.c.bf16 %v2048_v23, %v2047_v50  ;;  %v1815_v33 = vadd.f32 %v12056_v19, %v13652_v0 }
 0x188   :  { %v1457_v38 = vpop.f32.mrf.mxu0  ;;  %v2117_v53 = vpack.c.bf16 %v1960_v2, %v1959_v25  ;;  %v1955_v19 = vmax.f32 %v1431_v35, 0.0  ;;  %v1423_v2 = vadd.f32 %v13652_v0, %v14015_v21  ;;  %v1359_v21 = vadd.f32 %v13652_v0, %v13954_v28 }
 0x189   :  { %v1964_v44 = vmax.f32 %v1466_v37, 0.0  ;;  %v1458_v49 = vadd.f32 %v13652_v0, %v1457_v38  ;;  %v12057_v37 = vpop.f32.mrf.mxu1  ;;  %v2051_v30 = vmax.f32 %v1815_v33, 0.0  ;;  %v1407_v35 = vadd.f32 %v13652_v0, %v14007_v34 }
 0x18a   :  { %v11972_v10 = vpop.f32.mrf.mxu0 }
 0x18b   :  { %v2119_v63 = vpack.c.bf16 %v1964_v44, %v1963_v48  ;;  %v1962_v6 = vmax.f32 %v1458_v49, 0.0  ;;  %v1479_v43 = vadd.f32 %v11972_v10, %v13652_v0  ;;  %v14056_v14 = vpop.f32.mrf.mxu1  ;;  %v1957_v48 = vmax.f32 %v1439_v24, 0.0 }
 0x18c   :  { %v14035_v5 = vpop.f32.mrf.mxu0  ;;  %v2109_v49 = vpack.c.bf16 %v1944_v13, %v1943_v41  ;;  %v1818_v10 = vadd.f32 %v12057_v37, %v13652_v0  ;;  %v1937_v41 = vmax.f32 %v1359_v21, 0.0 }
 0x18d   :  { %11757 = vmatprep.subr.bf16.mxu1 %v2119_v63  ;;  %v2118_v39 = vpack.c.bf16 %v1962_v6, %v1961_v47  ;;  %v1967_v38 = vmax.f32 %v1479_v43, 0.0  ;;  %v12060_v62 = vpop.f32.mrf.mxu1  ;;  %v1426_v47 = vadd.f32 %v13652_v0, %v14017_v22  ;;  %v2116_v6 = vpack.c.bf16 %v1958_v54, %v1957_v48 }
 0x18e   :  { %v11973_v15 = vpop.f32.mrf.mxu0  ;;  %11758 = vmatpush3.bf16.msra.mxu1 %v2111_v59  ;;  %v2052_v3 = vmax.f32 %v1818_v10, 0.0  ;;  %v2108_v22 = vpack.c.bf16 %v1942_v55, %v1941_v20  ;;  %v1418_v43 = vadd.f32 %v14009_v9, %v13652_v0  ;;  %v1831_v13 = vadd.f32 %v12060_v62, %v13652_v0 }
 0x18f   :  { %v1482_v11 = vadd.f32 %v11973_v15, %v13652_v0  ;;  %11759 = vmatprep.subr.bf16.mxu1 %v2118_v39  ;;  %v14068_v50 = vpop.f32.mrf.mxu1  ;;  %v2115_v15 = vpack.c.bf16 %v1956_v8, %v1955_v19  ;;  %v1954_v45 = vmax.f32 %v1426_v47, 0.0  ;;  %v1415_v9 = vadd.f32 %v14002_v40, %v13652_v0 }
 0x190   :  { %v14049_v51 = vpop.f32.mrf.mxu0  ;;  %v14079_v12 = vpack.c.bf16 %v2052_v3, %v2051_v30  ;;  %v2055_v37 = vmax.f32 %v1831_v13, 0.0  ;;  %v1952_v28 = vmax.f32 %v1418_v43, 0.0  ;;  %v2106_v55 = vpack.c.bf16 %v1938_v29, %v1937_v41 }
 0x191   :  { %v1968_v4 = vmax.f32 %v1482_v11, 0.0  ;;  %v12061_v46 = vpop.f32.mrf.mxu1  ;;  %v1953_v11 = vmax.f32 %v1423_v2, 0.0  ;;  %v10632_v13 = vcombine.low %v13998_v7, %v13998_v7 }
 0x192   :  { %v11976_v42 = vpop.f32.mrf.mxu0  ;;  %11760 = vmatpush3.bf16.msra.mxu1 %v2110_v27 }
 0x193   :  { %v14060_v44 = vpack.c.bf16 %v1968_v4, %v1967_v38  ;;  %11761 = vmatprep.subr.bf16.mxu1 %v2117_v53  ;;  %v1495_v63 = vadd.f32 %v11976_v42, %v13652_v0  ;;  %v14086_v24 = vpop.f32.mrf.mxu1  ;;  %v1834_v53 = vadd.f32 %v12061_v46, %v13652_v0  ;;  %v1410_v38 = vadd.f32 %v13652_v0, %v14011_v17 }
 0x194   :  { %v14062_v56 = vpop.f32.mrf.mxu0  ;;  %v2114_v4 = vpack.c.bf16 %v1954_v45, %v1953_v11  ;;  %v1951_v42 = vmax.f32 %v1415_v9, 0.0 }
 0x195   :  { %v1971_v23 = vmax.f32 %v1495_v63, 0.0  ;;  %v12064_v54 = vpop.f32.mrf.mxu1  ;;  %v2056_v40 = vmax.f32 %v1834_v53, 0.0  ;;  %v1950_v34 = vmax.f32 %v1410_v38, 0.0 }
 0x196   :  { %v11977_v59 = vpop.f32.mrf.mxu0  ;;  %11762 = vmatpush3.bf16.msra.mxu1 %v2109_v49  ;;  %v1346_v49 = vadd.f32 %v13652_v0, %v13944_v18  ;;  %v2113_v62 = vpack.c.bf16 %v1952_v28, %v1951_v42 }
 0x197   :  { %v1498_v1 = vadd.f32 %v11977_v59, %v13652_v0  ;;  %11763 = vmatprep.subr.bf16.mxu1 %v2116_v6  ;;  %v14102_v48 = vpop.f32.mrf.mxu1  ;;  %v14108_v17 = vpack.c.bf16 %v2056_v40, %v2055_v37  ;;  %v1949_v0 = vmax.f32 %v1407_v35, 0.0 }
 0x198   :  { %v14077_v39 = vpop.f32.mrf.mxu0  ;;  %v1934_v63 = vmax.f32 %v1346_v49, 0.0 }
 0x199   :  { %v1972_v58 = vmax.f32 %v1498_v1, 0.0  ;;  %v12065_v18 = vpop.f32.mrf.mxu1  ;;  %v2112_v3 = vpack.c.bf16 %v1950_v34, %v1949_v0 }
 0x19a   :  { %v14084_v25 = vpop.f32.mrf.mxu0  ;;  %11764 = vmatpush3.bf16.msra.mxu1 %v2108_v22 }
 0x19b   :  { %v14090_v27 = vpack.c.bf16 %v1972_v58, %v1971_v23  ;;  %11765 = vmatprep.subr.bf16.mxu1 %v2115_v15  ;;  %v14145_v11 = vpop.f32.mrf.mxu1 }
 0x19c   :  { %v14092_v33 = vpop.f32.mrf.mxu0 }
 0x19d   :  { %v12068_v37 = vpop.f32.mrf.mxu1 }
 0x19e   :  { %v14097_v52 = vpop.f32.mrf.mxu0  ;;  %11766 = vmatpush3.bf16.msra.mxu1 %v13977_v61  ;;  %v14113_v61 = vld [vmem:[%s17910_s3] ss:$0 sm:$0xff] }
 0x19f   :  { %11767 = vmatprep.subr.bf16.mxu1 %v2114_v4  ;;  %v1847_v10 = vadd.f32 %v14113_v61, %v12064_v54  ;;  %v1343_v8 = vadd.f32 %v14113_v61, %v13927_v32  ;;  %v1850_v59 = vadd.f32 %v14113_v61, %v12065_v18  ;;  %v14123_v32 = vld [vmem:[%s17911_s1 + $0x18] sm:$0xff]  ;;  %v1863_v54 = vadd.f32 %v14113_v61, %v12068_v37  ;;  %v14148_v38 = vpop.f32.mrf.mxu1 }
 0x1a0   :  { %v14106_v30 = vpop.f32.mrf.mxu0 }
 0x1a1   :  { %v2059_v20 = vmax.f32 %v1847_v10, 0.0  ;;  %v1933_v16 = vmax.f32 %v1343_v8, 0.0  ;;  %v2060_v2 = vmax.f32 %v1850_v59, 0.0  ;;  %v12069_v41 = vpop.f32.mrf.mxu1  ;;  %v2063_v40 = vmax.f32 %v1863_v54, 0.0 }
 0x1a2   :  { %v11984_v47 = vpop.f32.mrf.mxu0  ;;  %11768 = vmatpush3.bf16.msra.mxu1 %v2106_v55  ;;  %v1866_v42 = vadd.f32 %v14113_v61, %v12069_v41 }
 0x1a3   :  { %11769 = vmatprep.subr.bf16.mxu1 %v2113_v62  ;;  %v2104_v1 = vpack.c.bf16 %v1934_v63, %v1933_v16  ;;  %v14125_v43 = vpack.c.bf16 %v2060_v2, %v2059_v20  ;;  %v1527_v8 = vadd.f32 %v14113_v61, %v11984_v47 }
 0x1a4   :  { %v1518_v6 = vpop.f32.mrf.mxu0  ;;  %v2064_v49 = vmax.f32 %v1866_v42, 0.0  ;;  %v1514_v42 = vadd.f32 %v14113_v61, %v14097_v52 }
 0x1a6   :  { %v11985_v19 = vpop.f32.mrf.mxu0  ;;  %11770 = vmatpush3.bf16.msra.mxu1 %v13951_v26  ;;  %v10635_v26 = vcombine.high %v14123_v32, %v14123_v32  ;;  %v14153_v34 = vpack.c.bf16 %v2064_v49, %v2063_v40 }
 0x1a7   :  { %11771 = vmatprep.subr.bf16.mxu1 %v2112_v3  ;;  %v1530_v55 = vadd.f32 %v14113_v61, %v11985_v19 }
 0x1a8   :  { %v1521_v22 = vpop.f32.mrf.mxu0 }
 0x1a9   :  { %v1980_v20 = vmax.f32 %v1530_v55, 0.0  ;;  %v1522_v59 = vadd.f32 %v14113_v61, %v1521_v22 }
 0x1aa   :  { %v14129_v46 = vpop.f32.mrf.mxu0  ;;  %11772 = vmatpush3.bf16.msra.mxu1 %v2104_v1 }
 0x1ac   :  { %v14133_v15 = vpop.f32.mrf.mxu0 }
 0x1ad   :  { %2331 = vmatmul.mubr.bf16.vlgmr.msra.gmra.mxu1 %v10632_v13  ;;  %v1979_v13 = vmax.f32 %v1527_v8, 0.0 }
 0x1ae   :  { %v14135_v45 = vpop.f32.mrf.mxu0  ;;  %2370 = vmatprep.mubr.bf16.mxu1 %v10635_v26  ;;  %v1519_v26 = vadd.f32 %v14113_v61, %v1518_v6 }
 0x1af   :  { %v2127_v22 = vpack.c.bf16 %v1980_v20, %v1979_v13 }
 0x1b0   :  { %v14137_v23 = vpop.f32.mrf.mxu0 }
 0x1b2   :  { %v14139_v58 = vpop.f32.mrf.mxu0 }
 0x1b4   :  { %v14141_v21 = vpop.f32.mrf.mxu0 }
 0x1b6   :  { %v11993_v9 = vpop.f32.mrf.mxu0 }
 0x1b8   :  { %v14143_v7 = vpop.f32.mrf.mxu0 }
 0x1ba   :  { %v11996_v29 = vpop.f32.mrf.mxu0 }
 0x1bb   :  { %v1575_v47 = vadd.f32 %v14113_v61, %v11996_v29  ;;  %v1511_v29 = vadd.f32 %v14113_v61, %v14084_v25 }
 0x1bc   :  { %v1566_v53 = vpop.f32.mrf.mxu0 }
 0x1bd   :  { %v1567_v52 = vadd.f32 %v14113_v61, %v1566_v53  ;;  %v1503_v53 = vadd.f32 %v14113_v61, %v14092_v33 }
 0x1be   :  { %v11997_v28 = vpop.f32.mrf.mxu0 }
 0x1bf   :  { %v1578_v16 = vadd.f32 %v14113_v61, %v11997_v28 }
 0x1c0   :  { %v1569_v4 = vpop.f32.mrf.mxu0 }
 0x1c1   :  { %v1992_v28 = vmax.f32 %v1578_v16, 0.0  ;;  %v1570_v55 = vadd.f32 %v14113_v61, %v1569_v4  ;;  %v1506_v4 = vadd.f32 %v14113_v61, %v14106_v30 }
 0x1c2   :  { %v12000_v35 = vpop.f32.mrf.mxu0 }
 0x1c3   :  { %v1591_v62 = vadd.f32 %v14113_v61, %v12000_v35  ;;  %v1978_v35 = vmax.f32 %v1522_v59, 0.0  ;;  %v1562_v59 = vadd.f32 %v14113_v61, %v11993_v9  ;;  %v1990_v25 = vmax.f32 %v1570_v55, 0.0 }
 0x1c4   :  { %v1582_v10 = vpop.f32.mrf.mxu0 }
 0x1c5   :  { %v1583_v18 = vadd.f32 %v14113_v61, %v1582_v10  ;;  %v1995_v2 = vmax.f32 %v1591_v62, 0.0  ;;  %v1977_v62 = vmax.f32 %v1519_v26, 0.0  ;;  %v1559_v26 = vadd.f32 %v14113_v61, %v14139_v58 }
 0x1c6   :  { %v12001_v0 = vpop.f32.mrf.mxu0  ;;  %v1551_v58 = vadd.f32 %v14113_v61, %v14141_v21 }
 0x1c7   :  { %v1594_v63 = vadd.f32 %v14113_v61, %v12001_v0  ;;  %v1993_v54 = vmax.f32 %v1583_v18, 0.0  ;;  %v1991_v0 = vmax.f32 %v1575_v47, 0.0  ;;  %v2126_v20 = vpack.c.bf16 %v1978_v35, %v1977_v62 }
 0x1c8   :  { %v1585_v3 = vpop.f32.mrf.mxu0  ;;  %v1974_v47 = vmax.f32 %v1506_v4, 0.0 }
 0x1c9   :  { %v1996_v19 = vmax.f32 %v1594_v63, 0.0  ;;  %v1586_v1 = vadd.f32 %v14113_v61, %v1585_v3  ;;  %v1976_v63 = vmax.f32 %v1514_v42, 0.0  ;;  %v2133_v16 = vpack.c.bf16 %v1992_v28, %v1991_v0 }
 0x1ca   :  { %v12004_v37 = vpop.f32.mrf.mxu0  ;;  %v1987_v28 = vmax.f32 %v1559_v26, 0.0 }
 0x1cb   :  { %v2135_v41 = vpack.c.bf16 %v1996_v19, %v1995_v2  ;;  %v1994_v40 = vmax.f32 %v1586_v1, 0.0  ;;  %v1607_v10 = vadd.f32 %v14113_v61, %v12004_v37  ;;  %v1975_v1 = vmax.f32 %v1511_v29, 0.0 }
 0x1cc   :  { %v14165_v49 = vpop.f32.mrf.mxu0  ;;  %v1989_v37 = vmax.f32 %v1567_v52, 0.0 }
 0x1cd   :  { %11779 = vmatprep.subr.bf16.mxu1 %v2135_v41  ;;  %v2134_v6 = vpack.c.bf16 %v1994_v40, %v1993_v54  ;;  %v1999_v2 = vmax.f32 %v1607_v10, 0.0  ;;  %v2125_v9 = vpack.c.bf16 %v1976_v63, %v1975_v1  ;;  %v1988_v41 = vmax.f32 %v1562_v59, 0.0 }
 0x1ce   :  { %v12005_v8 = vpop.f32.mrf.mxu0  ;;  %11780 = vmatpush3.bf16.msra.mxu1 %v2127_v22  ;;  %v1554_v40 = vadd.f32 %v14113_v61, %v14143_v7  ;;  %v2132_v33 = vpack.c.bf16 %v1990_v25, %v1989_v37  ;;  %v1973_v22 = vmax.f32 %v1503_v53, 0.0  ;;  %v1490_v10 = vadd.f32 %v14113_v61, %v14077_v39 }
 0x1cf   :  { %v1610_v18 = vadd.f32 %v14113_v61, %v12005_v8  ;;  %11781 = vmatprep.subr.bf16.mxu1 %v2134_v6  ;;  %v1546_v7 = vadd.f32 %v14113_v61, %v14135_v45  ;;  %v2131_v62 = vpack.c.bf16 %v1988_v41, %v1987_v28  ;;  %v1543_v63 = vadd.f32 %v14113_v61, %v14129_v46 }
 0x1d0   :  { %v14176_v3 = vpop.f32.mrf.mxu0  ;;  %v2124_v6 = vpack.c.bf16 %v1974_v47, %v1973_v22  ;;  %v1986_v8 = vmax.f32 %v1554_v40, 0.0  ;;  %v1985_v39 = vmax.f32 %v1551_v58, 0.0  ;;  %v1970_v45 = vmax.f32 %v1490_v10, 0.0  ;;  %v14233_v58 = vpop.f32.mrf.mxu1 }
 0x1d1   :  { %v2000_v19 = vmax.f32 %v1610_v18, 0.0  ;;  %v1487_v18 = vadd.f32 %v14113_v61, %v14062_v56  ;;  %v1984_v59 = vmax.f32 %v1546_v7, 0.0  ;;  %v1535_v46 = vadd.f32 %v14113_v61, %v14133_v15 }
 0x1d2   :  { %v12008_v13 = vpop.f32.mrf.mxu0  ;;  %11782 = vmatpush3.bf16.msra.mxu1 %v2126_v20  ;;  %v2130_v25 = vpack.c.bf16 %v1986_v8, %v1985_v39  ;;  %v1474_v1 = vadd.f32 %v14113_v61, %v14049_v51  ;;  %v14225_v51 = vld [vmem:[%s17911_s1 + $0x20] sm:$0xff] }
 0x1d3   :  { %v14182_v30 = vpack.c.bf16 %v2000_v19, %v1999_v2  ;;  %11783 = vmatprep.subr.bf16.mxu1 %v2133_v16  ;;  %v1623_v42 = vadd.f32 %v14113_v61, %v12008_v13  ;;  %v1538_v16 = vadd.f32 %v14113_v61, %v14137_v23  ;;  %v1969_v2 = vmax.f32 %v1487_v18, 0.0 }
 0x1d4   :  { %v14184_v54 = vpop.f32.mrf.mxu0  ;;  %v1983_v19 = vmax.f32 %v1543_v63, 0.0  ;;  %v1471_v23 = vadd.f32 %v14113_v61, %v14035_v5  ;;  %v1981_v47 = vmax.f32 %v1535_v46, 0.0  ;;  %v10634_v5 = vcombine.low %v14123_v32, %v14123_v32 }
 0x1d5   :  { %v2003_v0 = vmax.f32 %v1623_v42, 0.0  ;;  %v2122_v53 = vpack.c.bf16 %v1970_v45, %v1969_v2  ;;  %v1982_v37 = vmax.f32 %v1538_v16, 0.0  ;;  %v10637_v28 = vcombine.high %v14225_v51, %v14225_v51 }
 0x1d6   :  { %v12009_v35 = vpop.f32.mrf.mxu0  ;;  %11784 = vmatpush3.bf16.msra.mxu1 %v2125_v9  ;;  %v2129_v26 = vpack.c.bf16 %v1984_v59, %v1983_v19  ;;  %v1965_v15 = vmax.f32 %v1471_v23, 0.0 }
 0x1d7   :  { %v1626_v55 = vadd.f32 %v14113_v61, %v12009_v35  ;;  %11785 = vmatprep.subr.bf16.mxu1 %v2132_v33  ;;  %v2128_v40 = vpack.c.bf16 %v1982_v37, %v1981_v47 }
 0x1d8   :  { %v14196_v29 = vpop.f32.mrf.mxu0 }
 0x1d9   :  { %v2004_v52 = vmax.f32 %v1626_v55, 0.0 }
 0x1da   :  { %v14200_v21 = vpop.f32.mrf.mxu0  ;;  %11786 = vmatpush3.bf16.msra.mxu1 %v2124_v6 }
 0x1db   :  { %v14204_v4 = vpack.c.bf16 %v2004_v52, %v2003_v0  ;;  %11787 = vmatprep.subr.bf16.mxu1 %v2131_v62 }
 0x1dc   :  { %v14206_v20 = vpop.f32.mrf.mxu0 }
 0x1de   :  { %v14210_v56 = vpop.f32.mrf.mxu0  ;;  %11788 = vmatpush3.bf16.msra.mxu1 %v14090_v27  ;;  %v1966_v27 = vmax.f32 %v1474_v1, 0.0 }
 0x1df   :  { %11789 = vmatprep.subr.bf16.mxu1 %v2130_v25 }
 0x1e0   :  { %v14217_v13 = vpop.f32.mrf.mxu0  ;;  %v2120_v33 = vpack.c.bf16 %v1966_v27, %v1965_v15 }
 0x1e2   :  { %v12016_v9 = vpop.f32.mrf.mxu0  ;;  %11790 = vmatpush3.bf16.msra.mxu1 %v2122_v53 }
 0x1e3   :  { %11791 = vmatprep.subr.bf16.mxu1 %v2129_v26  ;;  %v1655_v1 = vadd.f32 %v14113_v61, %v12016_v9 }
 0x1e4   :  { %v1646_v41 = vpop.f32.mrf.mxu0 }
 0x1e6   :  { %v12017_v42 = vpop.f32.mrf.mxu0  ;;  %11792 = vmatpush3.bf16.msra.mxu1 %v14060_v44 }
 0x1e7   :  { %11793 = vmatprep.subr.bf16.mxu1 %v2128_v40  ;;  %v1658_v2 = vadd.f32 %v14113_v61, %v12017_v42 }
 0x1e8   :  { %v1649_v22 = vpop.f32.mrf.mxu0 }
 0x1e9   :  { %v2012_v23 = vmax.f32 %v1658_v2, 0.0  ;;  %v1650_v47 = vadd.f32 %v14113_v61, %v1649_v22  ;;  %v1642_v22 = vadd.f32 %v14113_v61, %v14210_v56 }
 0x1ea   :  { %v14229_v35 = vpop.f32.mrf.mxu0  ;;  %11794 = vmatpush3.bf16.msra.mxu1 %v2120_v33 }
 0x1eb   :  { %v2010_v2 = vmax.f32 %v1650_v47, 0.0  ;;  %v2008_v56 = vmax.f32 %v1642_v22, 0.0 }
 0x1ec   :  { %v14235_v44 = vpop.f32.mrf.mxu0 }
 0x1ed   :  { %2371 = vmatmul.mubr.bf16.vlgmr.msra.gmra.mxu1 %v10634_v5  ;;  %v11729_v55 = vpop.f32.mrf.mxu1  ;;  %v2011_v5 = vmax.f32 %v1655_v1, 0.0 }
 0x1ee   :  { %v14237_v10 = vpop.f32.mrf.mxu0  ;;  %2410 = vmatprep.mubr.bf16.mxu1 %v10637_v28  ;;  %v1647_v28 = vadd.f32 %v14113_v61, %v1646_v41  ;;  %v1639_v41 = vadd.f32 %v14113_v61, %v14200_v21 }
 0x1ef   :  { %v11730_v6 = vpop.f32.mrf.mxu1 }
 0x1f0   :  { %v14239_v7 = vpop.f32.mrf.mxu0  ;;  %v14241_v62 = vadd.f32 %v11730_v6, %v11729_v55  ;;  %v2007_v21 = vmax.f32 %v1639_v41, 0.0  ;;  %v1615_v41 = vadd.f32 %v14113_v61, %v14184_v54 }
 0x1f1   :  { %v11732_v32 = vpop.f32.mrf.mxu1 }
 0x1f2   :  { %v12024_v8 = vpop.f32.mrf.mxu0 }
 0x1f3   :  { %v11733_v0 = vpop.f32.mrf.mxu1 }
 0x1f4   :  { %v14243_v52 = vpop.f32.mrf.mxu0 }
 0x1f6   :  { %v12025_v18 = vpop.f32.mrf.mxu0 }
 0x1f8   :  { %v1681_v63 = vpop.f32.mrf.mxu0 }
 0x1fa   :  { %v12028_v39 = vpop.f32.mrf.mxu0 }
 0x1fb   :  { %v1703_v9 = vadd.f32 %v14113_v61, %v12028_v39 }
 0x1fc   :  { %v1694_v45 = vpop.f32.mrf.mxu0 }
 0x1fe   :  { %v12029_v59 = vpop.f32.mrf.mxu0 }
 0x1ff   :  { %v1706_v40 = vadd.f32 %v14113_v61, %v12029_v59 }
 0x200   :  { %v1697_v16 = vpop.f32.mrf.mxu0 }
 0x202   :  { %v12032_v25 = vpop.f32.mrf.mxu0 }
 0x203   :  { %v1719_v46 = vadd.f32 %v14113_v61, %v12032_v25  ;;  %v2143_v25 = vpack.c.bf16 %v2012_v23, %v2011_v5  ;;  %v1634_v23 = vadd.f32 %v14113_v61, %v14217_v13 }
 0x204   :  { %v1710_v19 = vpop.f32.mrf.mxu0 }
 0x205   :  { %v1711_v26 = vadd.f32 %v14113_v61, %v1710_v19  ;;  %v2027_v15 = vmax.f32 %v1719_v46, 0.0  ;;  %v2024_v19 = vmax.f32 %v1706_v40, 0.0  ;;  %v1698_v46 = vadd.f32 %v14113_v61, %v1697_v16 }
 0x206   :  { %v12033_v53 = vpop.f32.mrf.mxu0  ;;  %v1690_v16 = vadd.f32 %v14113_v61, %v12025_v18  ;;  %v2006_v13 = vmax.f32 %v1634_v23, 0.0  ;;  %v1682_v18 = vadd.f32 %v14113_v61, %v1681_v63  ;;  %v1666_v23 = vadd.f32 %v14113_v61, %v14239_v7 }
 0x207   :  { %v1722_v37 = vadd.f32 %v14113_v61, %v12033_v53  ;;  %v2025_v6 = vmax.f32 %v1711_v26, 0.0  ;;  %v2009_v53 = vmax.f32 %v1647_v28, 0.0  ;;  %v2023_v26 = vmax.f32 %v1703_v9, 0.0 }
 0x208   :  { %v1713_v27 = vpop.f32.mrf.mxu0  ;;  %v2141_v28 = vpack.c.bf16 %v2008_v56, %v2007_v21  ;;  %v1599_v7 = vadd.f32 %v14113_v61, %v14165_v49 }
 0x209   :  { %v2028_v33 = vmax.f32 %v1722_v37, 0.0  ;;  %v1714_v42 = vadd.f32 %v14113_v61, %v1713_v27  ;;  %v1695_v37 = vadd.f32 %v14113_v61, %v1694_v45  ;;  %v2142_v47 = vpack.c.bf16 %v2010_v2, %v2009_v53 }
 0x20a   :  { %v14254_v55 = vpop.f32.mrf.mxu0  ;;  %v2149_v40 = vpack.c.bf16 %v2024_v19, %v2023_v26  ;;  %v1687_v45 = vadd.f32 %v14113_v61, %v12024_v8  ;;  %v1618_v8 = vadd.f32 %v14113_v61, %v14196_v29 }
 0x20b   :  { %v2151_v32 = vpack.c.bf16 %v2028_v33, %v2027_v15  ;;  %v2026_v0 = vmax.f32 %v1714_v42, 0.0  ;;  %v2022_v15 = vmax.f32 %v1698_v46, 0.0  ;;  %v1631_v33 = vadd.f32 %v14113_v61, %v14206_v20 }
 0x20c   :  { %v14259_v59 = vpop.f32.mrf.mxu0  ;;  %v2021_v5 = vmax.f32 %v1695_v37, 0.0  ;;  %v2019_v20 = vmax.f32 %v1687_v45, 0.0  ;;  %v1674_v46 = vadd.f32 %v14113_v61, %v14237_v10  ;;  %v2002_v37 = vmax.f32 %v1618_v8, 0.0 }
 0x20d   :  { %v2150_v1 = vpack.c.bf16 %v2026_v0, %v2025_v6  ;;  %11801 = vmatprep.subr.bf16.mxu1 %v2151_v32  ;;  %v2020_v6 = vmax.f32 %v1690_v16, 0.0  ;;  %v2005_v0 = vmax.f32 %v1631_v33, 0.0  ;;  %v2014_v45 = vmax.f32 %v1666_v23, 0.0 }
 0x20e   :  { %v14264_v39 = vpop.f32.mrf.mxu0  ;;  %11802 = vmatpush3.bf16.msra.mxu1 %v2143_v25  ;;  %v2148_v32 = vpack.c.bf16 %v2022_v15, %v2021_v5  ;;  %v1679_v25 = vadd.f32 %v14113_v61, %v14243_v52  ;;  %v1671_v52 = vadd.f32 %v14113_v61, %v14229_v35  ;;  %v2016_v56 = vmax.f32 %v1674_v46, 0.0 }
 0x20f   :  { %11803 = vmatprep.subr.bf16.mxu1 %v2150_v1  ;;  %v2140_v2 = vpack.c.bf16 %v2006_v13, %v2005_v0  ;;  %v2147_v63 = vpack.c.bf16 %v2020_v6, %v2019_v20  ;;  %v2018_v1 = vmax.f32 %v1682_v18, 0.0  ;;  %v1602_v35 = vadd.f32 %v14113_v61, %v14176_v3  ;;  %v14315_v20 = vld [vmem:[%s17911_s1 + $0x28] sm:$0xff] }
 0x210   :  { %v14269_v27 = vpop.f32.mrf.mxu0  ;;  %v2017_v26 = vmax.f32 %v1679_v25, 0.0  ;;  %v2015_v54 = vmax.f32 %v1671_v52, 0.0  ;;  %v1839_v13 = vadd.f32 %v14113_v61, %v14102_v48  ;;  %v1826_v23 = vadd.f32 %v14113_v61, %v14086_v24 }
 0x212   :  { %v14274_v42 = vpop.f32.mrf.mxu0  ;;  %11804 = vmatpush3.bf16.msra.mxu1 %v2142_v47  ;;  %v2146_v10 = vpack.c.bf16 %v2018_v1, %v2017_v26  ;;  %v2001_v47 = vmax.f32 %v1615_v41, 0.0  ;;  %v2145_v33 = vpack.c.bf16 %v2016_v56, %v2015_v54  ;;  %v2057_v25 = vmax.f32 %v1839_v13, 0.0 }
 0x213   :  { %11805 = vmatprep.subr.bf16.mxu1 %v2149_v40  ;;  %v1663_v40 = vadd.f32 %v14113_v61, %v14235_v44  ;;  %v1842_v44 = vadd.f32 %v14113_v61, %v14145_v11  ;;  %v10636_v1 = vcombine.low %v14225_v51, %v14225_v51  ;;  %v10639_v41 = vcombine.high %v14315_v20, %v14315_v20 }
 0x214   :  { %v14277_v9 = vpop.f32.mrf.mxu0  ;;  %v2138_v15 = vpack.c.bf16 %v2002_v37, %v2001_v47  ;;  %v1823_v56 = vadd.f32 %v14113_v61, %v14068_v50  ;;  %v2054_v50 = vmax.f32 %v1826_v23, 0.0  ;;  %v1807_v13 = vadd.f32 %v14113_v61, %v14042_v57 }
 0x215   :  { %v2058_v8 = vmax.f32 %v1842_v44, 0.0  ;;  %v1810_v44 = vadd.f32 %v14113_v61, %v14056_v14  ;;  %v1743_v57 = vadd.f32 %v14113_v61, %v14277_v9  ;;  %v1738_v14 = vadd.f32 %v14113_v61, %v14264_v39 }
 0x216   :  { %v14280_v22 = vpop.f32.mrf.mxu0  ;;  %11806 = vmatpush3.bf16.msra.mxu1 %v2141_v28  ;;  %v2013_v28 = vmax.f32 %v1663_v40, 0.0 }
 0x217   :  { %11807 = vmatprep.subr.bf16.mxu1 %v2148_v32  ;;  %v1997_v32 = vmax.f32 %v1599_v7, 0.0  ;;  %v2166_v51 = vpack.c.bf16 %v2058_v8, %v2057_v25  ;;  %v1735_v8 = vadd.f32 %v14113_v61, %v14254_v55  ;;  %v2032_v9 = vmax.f32 %v1738_v14, 0.0 }
 0x218   :  { %v14286_v19 = vpop.f32.mrf.mxu0  ;;  %v2144_v18 = vpack.c.bf16 %v2014_v45, %v2013_v28  ;;  %v1754_v28 = vadd.f32 %v14113_v61, %v14280_v22 }
 0x21a   :  { %v12044_v53 = vpop.f32.mrf.mxu0  ;;  %11808 = vmatpush3.bf16.msra.mxu1 %v2140_v2 }
 0x21b   :  { %11809 = vmatprep.subr.bf16.mxu1 %v2147_v63  ;;  %v1767_v47 = vadd.f32 %v14113_v61, %v12044_v53 }
 0x21c   :  { %v14294_v29 = vpop.f32.mrf.mxu0 }
 0x21d   :  { %v2039_v7 = vmax.f32 %v1767_v47, 0.0  ;;  %v1759_v24 = vadd.f32 %v14113_v61, %v14294_v29  ;;  %v1751_v29 = vadd.f32 %v14113_v61, %v14274_v42  ;;  %v12261_v47 = vld [vmem:[%s17912_s4 + $0x30] sm:$0xff]  }
 0x21e   :  { %v12045_v16 = vpop.f32.mrf.mxu0  ;;  %11810 = vmatpush3.bf16.msra.mxu1 %v14204_v4  ;;  %v1998_v4 = vmax.f32 %v1602_v35, 0.0 }
 0x21f   :  { %11811 = vmatprep.subr.bf16.mxu1 %v2146_v10  ;;  %v1770_v26 = vadd.f32 %v14113_v61, %v12045_v16 }
 0x220   :  { %v1761_v21 = vpop.f32.mrf.mxu0  ;;  %v2136_v48 = vpack.c.bf16 %v1998_v4, %v1997_v32  ;;  %v2050_v32 = vmax.f32 %v1810_v44, 0.0 }
 0x221   :  { %v1762_v16 = vadd.f32 %v14113_v61, %v1761_v21 }
 0x222   :  { %v12048_v5 = vpop.f32.mrf.mxu0  ;;  %11812 = vmatpush3.bf16.msra.mxu1 %v2138_v15 }
 0x223   :  { %11813 = vmatprep.subr.bf16.mxu1 %v2145_v33  ;;  %v1783_v3 = vadd.f32 %v14113_v61, %v12048_v5  ;;  %v2053_v33 = vmax.f32 %v1823_v56, 0.0  ;;  %v2038_v4 = vmax.f32 %v1762_v16, 0.0  ;;  %v12265_v16 = vld [vmem:[%s17912_s4 + $0x10] sm:$0xff]  }
 0x224   :  { %v1774_v6 = vpop.f32.mrf.mxu0 }
 0x225   :  { %v2043_v2 = vmax.f32 %v1783_v3, 0.0  ;;  %v1746_v3 = vadd.f32 %v14113_v61, %v14286_v19  ;;  %v1794_v19 = vadd.f32 %v14113_v61, %v14032_v60 }
 0x226   :  { %v12049_v0 = vpop.f32.mrf.mxu0  ;;  %11814 = vmatpush3.bf16.msra.mxu1 %v14182_v30  ;;  %v1775_v30 = vadd.f32 %v14113_v61, %v1774_v6  ;;  %v2164_v6 = vpack.c.bf16 %v2054_v50, %v2053_v33  ;;  %v12270_v33 = vld [vmem:[%s17913_s7 + $0xe4] ss:$16 sps:$4 sm:$0xff]  }
 0x227   :  { %v1786_v49 = vadd.f32 %v14113_v61, %v12049_v0  ;;  %11815 = vmatprep.subr.bf16.mxu1 %v2144_v18  ;;  %v2049_v18 = vmax.f32 %v1807_v13, 0.0  ;;  %v2035_v0 = vmax.f32 %v1751_v29, 0.0 }
 0x228   :  { %v1777_v11 = vpop.f32.mrf.mxu0  ;;  %v2041_v54 = vmax.f32 %v1775_v30, 0.0 }
 0x229   :  { %v2044_v46 = vmax.f32 %v1786_v49, 0.0  ;;  %v1778_v63 = vadd.f32 %v14113_v61, %v1777_v11  ;;  %v2034_v49 = vmax.f32 %v1746_v3, 0.0  ;;  %v2162_v25 = vpack.c.bf16 %v2050_v32, %v2049_v18 }
 0x22a   :  { %11816 = vmatpush3.bf16.msra.mxu1 %v2136_v48  ;;  %v1791_v48 = vadd.f32 %v14113_v61, %v14022_v31  ;;  %v2033_v11 = vmax.f32 %v1743_v57, 0.0  ;;  %v1727_v31 = vadd.f32 %v14113_v61, %v14259_v59  ;;  %v17923_v59 = vmov 0.0  }
 0x22b   :  { %v2159_v52 = vpack.c.bf16 %v2044_v46, %v2043_v2  ;;  %11823 = vmatprep.subr.bf16.mxu1 %v14125_v43  ;;  %v2042_v37 = vmax.f32 %v1778_v63, 0.0  ;;  %v2040_v43 = vmax.f32 %v1770_v26, 0.0  ;;  %v2046_v46 = vmax.f32 %v1794_v19, 0.0  ;;  %v12268_v19 = vld [vmem:[%s17913_s7 + $0xe0] ss:$16 sps:$4 sm:$0xff]  }
 0x22c   :  { %v2154_v39 = vpack.c.bf16 %v2034_v49, %v2033_v11  ;;  %v2045_v2 = vmax.f32 %v1791_v48, 0.0  ;;  %v2031_v63 = vmax.f32 %v1735_v8, 0.0  ;;  %v2029_v30 = vmax.f32 %v1727_v31, 0.0  ;;  %v12273_v8 = vld [vmem:[%s17913_s7 + $0xc4] ss:$16 sps:$4 sm:$0xff]  }
 0x22d   :  { %2411 = vmatmul.mubr.bf16.vlgmr.msra.gmra.mxu1 %v10636_v1  ;;  %v11751_v10 = vpop.f32.mrf.mxu1  ;;  %v2158_v35 = vpack.c.bf16 %v2042_v37, %v2041_v54  ;;  %v2157_v21 = vpack.c.bf16 %v2040_v43, %v2039_v7  ;;  %v10638_v26 = vcombine.low %v14315_v20, %v14315_v20  ;;  %v12262_v54 = vld [vmem:[%s17912_s4 + $0x28] sm:$0xff]   ;;  %v12264_v43 = vld [vmem:[%s17912_s4 + $0x18] sm:$0xff]   ;;  %v12280_v31 = vld [vmem:[%s17913_s7 + $0x60] ss:$16 sps:$4 sm:$0xff]  }
 0x22e   :  { %11824 = vmatpush3.bf16.msra.mxu1 %v2159_v52  ;;  %2450 = vmatprep.mubr.bf16.mxu1 %v10639_v41  ;;  %v2153_v60 = vpack.c.bf16 %v2032_v9, %v2031_v63  ;;  %v2160_v55 = vpack.c.bf16 %v2046_v46, %v2045_v2  ;;  %v1858_v52 = vadd.f32 %v14113_v61, %v14233_v58  ;;  %v12271_v9 = vld [vmem:[%s17913_s7 + $0xc0] ss:$16 sps:$4 sm:$0xff]   ;;  %v12279_v2 = vld [vmem:[%s17913_s7 + $0x84] ss:$16 sps:$4 sm:$0xff]  }
 0x22f   :  { %11825 = vmatprep.subr.bf16.mxu1 %v2166_v51  ;;  %v11752_v40 = vpop.f32.mrf.mxu1  ;;  %v12277_v46 = vld [vmem:[%s17913_s7 + $0x80] ss:$16 sps:$4 sm:$0xff]   ;;  %v12282_v63 = vld [vmem:[%s17913_s7 + $0x64] ss:$16 sps:$4 sm:$0xff]  }
 0x230   :  { %v11753_v15 = vadd.f32 %v11752_v40, %v11751_v10  ;;  %v2062_v37 = vmax.f32 %v1858_v52, 0.0  ;;  %v12260_v10 = vld [vmem:[%s17912_s4 + $0x38] sm:$0xff]   ;;  %v12263_v40 = vld [vmem:[%s17912_s4 + $0x20] sm:$0xff]   ;;  %v17925_v52 = vmov 0  }
 0x231   :  { %v11754_v45 = vpop.f32.mrf.mxu1  ;;  %3406 = vmatprep.mubr.bf16.mxu0 %v17925_v52 }
 0x232   :  { %11826 = vmatpush3.bf16.msra.mxu1 %v2158_v35  ;;  %v14334_v53 = vadd.f32 %v11753_v15, %v14241_v62  ;;  %v2037_v62 = vmax.f32 %v1759_v24, 0.0  ;;  %v12266_v35 = vld [vmem:[%s17912_s4 + $0x8] sm:$0xff]   ;;  %v12267_v15 = vld [vmem:[%s17912_s4] sm:$0xff]  }
 0x233   :  { %11827 = vmatprep.subr.bf16.mxu1 %v14108_v17  ;;  %v11755_v5 = vpop.f32.mrf.mxu1  ;;  %v2036_v17 = vmax.f32 %v1754_v28, 0.0  ;;  %v14419_v28 = vld [vmem:[%s17914_s8 + $0xe0] ss:$16 sps:$4 sm:$0xff]  }
 0x234   :  { %v2156_v22 = vpack.c.bf16 %v2038_v4, %v2037_v62 }
 0x235   :  { %v2155_v42 = vpack.c.bf16 %v2036_v17, %v2035_v0 }
 0x236   :  { %11828 = vmatpush3.bf16.msra.mxu1 %v2157_v21  ;;  %v14424_v21 = vld [vmem:[%s17914_s8 + $0xe4] ss:$16 sps:$4 sm:$0xff]  }
 0x237   :  { %11829 = vmatprep.subr.bf16.mxu1 %v2164_v6  ;;  %3374 = vmatprep.subr.bf16.mxu0 %v14424_v21 }
 0x238   :  { %3375 = vmatpush1.bf16.msra.mxu0 %v14419_v28 }
 0x23a   :  { %11830 = vmatpush3.bf16.msra.mxu1 %v2156_v22 }
 0x23b   :  { %11831 = vmatprep.subr.bf16.mxu1 %v14079_v12  ;;  %v1730_v12 = vadd.f32 %v14113_v61, %v14269_v27  ;;  %v1855_v27 = vadd.f32 %v14113_v61, %v14148_v38  ;;  %v12259_v61 = vld [vmem:[%s17911_s1 + $0x30] ss:$0 sps:$4 sm:$0xff]  }
 0x23d   :  { %v2030_v1 = vmax.f32 %v1730_v12, 0.0  ;;  %v12276_v12 = vld [vmem:[%s17913_s7 + $0xa4] ss:$16 sps:$4 sm:$0xff]  }
 0x23e   :  { %11832 = vmatpush3.bf16.msra.mxu1 %v2155_v42 }
 0x23f   :  { %11833 = vmatprep.subr.bf16.mxu1 %v2162_v25  ;;  %v2152_v41 = vpack.c.bf16 %v2030_v1, %v2029_v30  ;;  %v12283_v1 = vld [vmem:[%s17913_s7 + $0x40] ss:$16 sps:$4 sm:$0xff]  }
 0x240   :  { %v12286_v30 = vld [vmem:[%s17913_s7 + $0x20] ss:$16 sps:$4 sm:$0xff]  }
 0x242   :  { %11834 = vmatpush3.bf16.msra.mxu1 %v2154_v39  ;;  %v12274_v39 = vld [vmem:[%s17913_s7 + $0xa0] ss:$16 sps:$4 sm:$0xff]  }
 0x243   :  { %11835 = vmatprep.subr.bf16.mxu1 %v14051_v36  ;;  %v2061_v36 = vmax.f32 %v1855_v27, 0.0  ;;  %v12292_v27 = vld [vmem:[%s17913_s7] ss:$16 sps:$4 sm:$0xff]  }
 0x245   :  { %v2168_v38 = vpack.c.bf16 %v2062_v37, %v2061_v36  ;;  %v14481_v36 = vld [vmem:[%s17914_s8 + $0xc4] ss:$16 sps:$4 sm:$0xff]   ;;  %v14486_v37 = vld [vmem:[%s17914_s8 + $0xc0] ss:$16 sps:$4 sm:$0xff]  }
 0x246   :  { %11836 = vmatpush3.bf16.msra.mxu1 %v2153_v60  ;;  %v12285_v60 = vld [vmem:[%s17913_s7 + $0x44] ss:$16 sps:$4 sm:$0xff]   ;;  %3376 = vmatprep.subr.bf16.mxu0 %v14481_v36 }
 0x247   :  { %11837 = vmatprep.subr.bf16.mxu1 %v2160_v55  ;;  %v12288_v55 = vld [vmem:[%s17913_s7 + $0x24] ss:$16 sps:$4 sm:$0xff]   ;;  %3377 = vmatpush1.bf16.msra.mxu0 %v14486_v37 }
 0x24a   :  { %11838 = vmatpush3.bf16.msra.mxu1 %v2152_v41  ;;  %v12294_v41 = vld [vmem:[%s17913_s7 + $0x4] ss:$16 sps:$4 sm:$0xff]  }
 0x24b   :  { %12070 = vmatprep.subr.bf16.mxu1 %v17923_v59 }
 0x24d   :  { %2451 = vmatmul.mubr.bf16.vlgmr.msra.gmra.mxu1 %v10638_v26  ;;  %v12297_v26 = vld [vmem:[%s17913_s7 + $0xec] ss:$16 sps:$4 sm:$0xff]  }
 0x24e   :  { %12071 = vmatpush3.bf16.msra.mxu1 %v14153_v34  ;;  %12074 = vmatprep.mubr.msk.bf16.mxu1 %vm13324_vm1, %v17923_v59 }
 0x24f   :  { %12072 = vmatprep.subr.bf16.mxu1 %v17923_v59 }
 0x252   :  { %12073 = vmatpush3.bf16.msra.mxu1 %v2168_v38  ;;  %v14493_v38 = vld [vmem:[%s17914_s8 + $0xa4] ss:$16 sps:$4 sm:$0xff]  }
 0x253   :  { %12078 = vmatprep.subr.bf16.mxu1 %v17923_v59  ;;  %3378 = vmatprep.subr.bf16.mxu0 %v14493_v38 }
 0x255   :  { %12075 = vmatmul.mubr.msk.bf16.vlgmr.msra.gmra.mxu1 %vm757_vm0, %v12259_v61  ;;  %v14498_v61 = vld [vmem:[%s17914_s8 + $0xa0] ss:$16 sps:$4 sm:$0xff]  }
 0x256   :  { %12094 = vmatprep.mubr.msk.bf16.mxu1 %vm13324_vm1, %v17923_v59  ;;  %12079 = vmatpush3.bf16.msra.mxu1 %v12260_v10  ;;  %v14539_v10 = vld [vmem:[%s17914_s8 + $0x24] ss:$16 sps:$4 sm:$0xff]  }
 0x257   :  { %12080 = vmatprep.subr.bf16.mxu1 %v17923_v59  ;;  %3379 = vmatpush1.bf16.msra.mxu0 %v14498_v61 }
 0x25a   :  { %12081 = vmatpush3.bf16.msra.mxu1 %v12261_v47  ;;  %v14547_v47 = vld [vmem:[%s17914_s8 + $0x20] ss:$16 sps:$4 sm:$0xff]  }
 0x25b   :  { %12082 = vmatprep.subr.bf16.mxu1 %v17923_v59 }
 0x25e   :  { %12083 = vmatpush3.bf16.msra.mxu1 %v12262_v54  ;;  %v14553_v54 = vld [vmem:[%s17914_s8 + $0x4] ss:$16 sps:$4 sm:$0xff]  }
 0x25f   :  { %12084 = vmatprep.subr.bf16.mxu1 %v17923_v59 }
 0x262   :  { %12085 = vmatpush3.bf16.msra.mxu1 %v12263_v40  ;;  %v14558_v40 = vld [vmem:[%s17914_s8] ss:$16 sps:$4 sm:$0xff]  }
 0x263   :  { %12086 = vmatprep.subr.bf16.mxu1 %v17923_v59 }
 0x266   :  { %12087 = vmatpush3.bf16.msra.mxu1 %v12264_v43  ;;  %v10642_v43 = vld [vmem:[%s17916_s5] ss:$0 sm:$0xff] }
 0x267   :  { %12088 = vmatprep.subr.bf16.mxu1 %v17923_v59 }
 0x26a   :  { %12089 = vmatpush3.bf16.msra.mxu1 %v12265_v16  ;;  %v11579_v16 = vld [vmem:[%s17915_s6] sm:$0xf]  }
 0x26b   :  { %12090 = vmatprep.subr.bf16.mxu1 %v17923_v59 }
 0x26d   :  { %v11773_v34 = vpop.f32.mrf.mxu1 }
 0x26e   :  { %12091 = vmatpush3.bf16.msra.mxu1 %v12266_v35 }
 0x26f   :  { %v11774_v58 = vpop.f32.mrf.mxu1  ;;  %12092 = vmatprep.subr.bf16.mxu1 %v17923_v59  ;;  %v14962_v59 = vld [vmem:[%s17918_s10 + $0x2c] ss:$16 sps:$4 sm:$0xff]  }
 0x270   :  { %v11775_v20 = vadd.f32 %v11774_v58, %v11773_v34  ;;  %v14503_v34 = vld [vmem:[%s17914_s8 + $0x84] ss:$16 sps:$4 sm:$0xff]   ;;  %v14511_v58 = vld [vmem:[%s17914_s8 + $0x80] ss:$16 sps:$4 sm:$0xff]  }
 0x271   :  { %v11776_v56 = vpop.f32.mrf.mxu1  ;;  %3380 = vmatprep.subr.bf16.mxu0 %v14503_v34 }
 0x272   :  { %v2333_v23 = vadd.f32 %v11775_v20, %v14334_v53  ;;  %12093 = vmatpush3.bf16.msra.mxu1 %v12267_v15  ;;  %3381 = vmatpush1.bf16.msra.mxu0 %v14511_v58  ;;  %v14517_v20 = vld [vmem:[%s17914_s8 + $0x64] ss:$16 sps:$4 sm:$0xff]   ;;  %v14522_v56 = vld [vmem:[%s17914_s8 + $0x60] ss:$16 sps:$4 sm:$0xff]  }
 0x273   :  { %v11777_v51 = vpop.f32.mrf.mxu1  ;;  %2865 = vmatprep.subr.bf16.mxu1 %v12270_v33  ;;  %3382 = vmatprep.subr.bf16.mxu0 %v14517_v20  ;;  %v11580_v33 = vunpack.c.l.bf16 %v11579_v16 }
 0x274   :  { %v14534_v51 = vld [vmem:[%s17914_s8 + $0x40] ss:$16 sps:$4 sm:$0xff]  }
 0x276   :  { %3383 = vmatpush1.bf16.msra.mxu0 %v14522_v56 }
 0x2ad   :  { %v11795_v50 = vpop.f32.mrf.mxu1 }
 0x2af   :  { %v11796_v45 = vpop.f32.mrf.mxu1 }
 0x2b0   :  { %v11797_v7 = vadd.f32 %v11796_v45, %v11795_v50 }
 0x2b1   :  { %v11798_v24 = vpop.f32.mrf.mxu1 }
 0x2b2   :  { %v2373_v53 = vadd.f32 %v11797_v7, %v2333_v23  ;;  %v14529_v23 = vld [vmem:[%s17914_s8 + $0x44] ss:$16 sps:$4 sm:$0xff]   ;;  %v12295_v24 = vld [vmem:[%s17913_s7 + $0xe8] ss:$16 sps:$4 sm:$0xff]  }
 0x2b3   :  { %v11799_v5 = vpop.f32.mrf.mxu1  ;;  %3384 = vmatprep.subr.bf16.mxu0 %v14529_v23 }
 0x2b4   :  { %3385 = vmatpush1.bf16.msra.mxu0 %v14534_v51  ;;  %v12300_v5 = vld [vmem:[%s17913_s7 + $0xcc] ss:$16 sps:$4 sm:$0xff]  }
 0x2b5   :  { %3386 = vmatprep.subr.bf16.mxu0 %v14539_v10 }
 0x2b8   :  { %3387 = vmatpush1.bf16.msra.mxu0 %v14547_v47 }
 0x2b9   :  { %3388 = vmatprep.subr.bf16.mxu0 %v14553_v54 }
 0x2bc   :  { %3389 = vmatpush1.bf16.msra.mxu0 %v14558_v40 }
 0x2ed   :  { %v11817_v4 = vpop.f32.mrf.mxu1 }
 0x2ef   :  { %v11818_v13 = vpop.f32.mrf.mxu1 }
 0x2f0   :  { %v11819_v62 = vadd.f32 %v11818_v13, %v11817_v4  ;;  %v12298_v13 = vld [vmem:[%s17913_s7 + $0xc8] ss:$16 sps:$4 sm:$0xff]  }
 0x2f1   :  { %v11820_v44 = vpop.f32.mrf.mxu1 }
 0x2f2   :  { %v2413_v18 = vadd.f32 %v11819_v62, %v2373_v53  ;;  %v12303_v44 = vld [vmem:[%s17913_s7 + $0xac] ss:$16 sps:$4 sm:$0xff]  }
 0x2f3   :  { %v11821_v6 = vpop.f32.mrf.mxu1  ;;  %v12306_v62 = vld [vmem:[%s17913_s7 + $0x8c] ss:$16 sps:$4 sm:$0xff]  }
 0x2f4   :  { %v12140_v6 = vld [vmem:[%s17915_s6 + $0x4] sm:$0xff]  }
 0x30d   :  { %v11839_v29 = vpop.f32.mrf.mxu1 }
 0x30f   :  { %v11840_v17 = vpop.f32.mrf.mxu1 }
 0x310   :  { %v11841_v3 = vadd.f32 %v11840_v17, %v11839_v29  ;;  %v12301_v29 = vld [vmem:[%s17913_s7 + $0xa8] ss:$16 sps:$4 sm:$0xff]  }
 0x311   :  { %v11842_v22 = vpop.f32.mrf.mxu1  ;;  %v12304_v17 = vld [vmem:[%s17913_s7 + $0x88] ss:$16 sps:$4 sm:$0xff]  }
 0x312   :  { %v2453_v0 = vadd.f32 %v11841_v3, %v2413_v18  ;;  %v12309_v3 = vld [vmem:[%s17913_s7 + $0x6c] ss:$16 sps:$4 sm:$0xff]   ;;  %v12307_v18 = vld [vmem:[%s17913_s7 + $0x68] ss:$16 sps:$4 sm:$0xff]  }
 0x313   :  { %v11843_v32 = vpop.f32.mrf.mxu1  ;;  %v12142_v22 = vld [vmem:[%s17915_s6 + $0xc] sm:$0xff]  }
 0x314   :  { %v12312_v32 = vld [vmem:[%s17913_s7 + $0x4c] ss:$16 sps:$4 sm:$0xff]  }
 0x315   :  { %v2492_v57 = vpop.f32.mrf.mxu1 }
 0x316   :  { %v2493_v14 = vadd.f32 %v2492_v57, %v2453_v0  ;;  %v12310_v0 = vld [vmem:[%s17913_s7 + $0x48] ss:$16 sps:$4 sm:$0xff]   ;;  %v12315_v57 = vld [vmem:[%s17913_s7 + $0x2c] ss:$16 sps:$4 sm:$0xff]  }
 0x317   :  { %v12076_v42 = vpop.f32.mrf.mxu1 }
 0x318   :  { %v2498_v49 = vmul.f32 0.0051020407, %v2493_v14  ;;  %v12143_v14 = vld [vmem:[%s17915_s6 + $0x14] sm:$0xff]  }
 0x319   :  { %v2495_v48 = vpop.f32.mrf.mxu1  ;;  %v12313_v42 = vld [vmem:[%s17913_s7 + $0x28] ss:$16 sps:$4 sm:$0xff]  }
 0x31a   :  { %v2499_v25 = vpack.c.bf16 %v2498_v49, %v2498_v49  ;;  %v12319_v49 = vld [vmem:[%s17913_s7 + $0xc] ss:$16 sps:$4 sm:$0xff]   ;;  %v12317_v48 = vld [vmem:[%s17913_s7 + $0x8] ss:$16 sps:$4 sm:$0xff]  }
 0x31b   :  { %v12077_v11 = vpop.f32.mrf.mxu1 }
 0x31c   :  { %12095 = vmatmul.mubr.bf16.vlgmr.msra.gmra.mxu1 %v2499_v25  ;;  %v12346_v25 = vld [vmem:[%s17914_s8 + $0xcc] ss:$16 sps:$4 sm:$0xff]  }
 0x31d   :  { %2866 = vmatpush1.bf16.msra.mxu1 %v12268_v19  ;;  %2897 = vmatprep.mubr.bf16.mxu1 %v17925_v52  ;;  %v12316_v19 = vld [vmem:[%s17915_s6 + $0x1c] ss:$0 sps:$4 sm:$0xff]  }
 0x31e   :  { %2867 = vmatprep.subr.bf16.mxu1 %v12273_v8  ;;  %v12344_v8 = vld [vmem:[%s17914_s8 + $0xc8] ss:$16 sps:$4 sm:$0xff]   ;;  %v12349_v11 = vld [vmem:[%s17914_s8 + $0xac] ss:$16 sps:$4 sm:$0xff]  }
 0x321   :  { %2868 = vmatpush1.bf16.msra.mxu1 %v12271_v9  ;;  %v12347_v9 = vld [vmem:[%s17914_s8 + $0xa8] ss:$16 sps:$4 sm:$0xff]  }
 0x322   :  { %2869 = vmatprep.subr.bf16.mxu1 %v12276_v12  ;;  %v12352_v12 = vld [vmem:[%s17914_s8 + $0x8c] ss:$16 sps:$4 sm:$0xff]  }
 0x325   :  { %2870 = vmatpush1.bf16.msra.mxu1 %v12274_v39  ;;  %v12350_v39 = vld [vmem:[%s17914_s8 + $0x88] ss:$16 sps:$4 sm:$0xff]  }
 0x326   :  { %2871 = vmatprep.subr.bf16.mxu1 %v12279_v2  ;;  %v12355_v2 = vld [vmem:[%s17914_s8 + $0x6c] ss:$16 sps:$4 sm:$0xff]  }
 0x329   :  { %2872 = vmatpush1.bf16.msra.mxu1 %v12277_v46  ;;  %v12353_v46 = vld [vmem:[%s17914_s8 + $0x68] ss:$16 sps:$4 sm:$0xff]  }
 0x32a   :  { %2873 = vmatprep.subr.bf16.mxu1 %v12282_v63  ;;  %v12358_v63 = vld [vmem:[%s17914_s8 + $0x4c] ss:$16 sps:$4 sm:$0xff]  }
 0x32d   :  { %2874 = vmatpush1.bf16.msra.mxu1 %v12280_v31  ;;  %v12356_v31 = vld [vmem:[%s17914_s8 + $0x48] ss:$16 sps:$4 sm:$0xff]  }
 0x32e   :  { %2875 = vmatprep.subr.bf16.mxu1 %v12285_v60  ;;  %v12361_v60 = vld [vmem:[%s17914_s8 + $0x2c] ss:$16 sps:$4 sm:$0xff]  }
 0x331   :  { %2876 = vmatpush1.bf16.msra.mxu1 %v12283_v1  ;;  %v12359_v1 = vld [vmem:[%s17914_s8 + $0x28] ss:$16 sps:$4 sm:$0xff]  }
 0x332   :  { %2877 = vmatprep.subr.bf16.mxu1 %v12288_v55  ;;  %v12364_v55 = vld [vmem:[%s17914_s8 + $0xc] ss:$16 sps:$4 sm:$0xff]  }
 0x335   :  { %2878 = vmatpush1.bf16.msra.mxu1 %v12286_v30  ;;  %v12362_v30 = vld [vmem:[%s17914_s8 + $0x8] ss:$16 sps:$4 sm:$0xff]  }
 0x336   :  { %2879 = vmatprep.subr.bf16.mxu1 %v12294_v41  ;;  %v2685_v41 = vlaneseq }
 0x339   :  { %2880 = vmatpush1.bf16.msra.mxu1 %v12292_v27  ;;  %v2686_v27 = vshrl.u32 %v2685_v41, 7 }
 0x33a   :  { %2946 = vmatprep.subr.bf16.mxu1 %v12297_v26 }
 0x33b   :  { %v14703_v26 = vsub.s32 0, %v2686_v27 }
 0x3dc   :  { %v2605_v35 = vpop.f32.mrf.mxu1 }
 0x3dd   :  { %v2606_v15 = vadd.f32 %v10642_v43, %v2605_v35 }
 0x3de   :  { %v12096_v50 = vpop.f32.mrf.mxu1 }
 0x3df   :  { %v2611_v45 = vmax.f32 %v2606_v15, 0.0 }
 0x3e0   :  { %v2608_v7 = vpop.f32.mrf.mxu1 }
 0x3e1   :  { %v2646_v53 = vpack.c.bf16 %v11580_v33, %v2611_v45 }
 0x3e2   :  { %v12097_v4 = vpop.f32.mrf.mxu1 }
 0x3e3   :  { %2898 = vmatmul.mubr.bf16.vlgmr.msra.gmra.mxu1 %v2646_v53 }
 0x3e4   :  { %2947 = vmatpush1.bf16.msra.mxu1 %v12295_v24  ;;  %2907 = vmatprep.mubr.bf16.mxu1 %v17925_v52 }
 0x3e5   :  { %2948 = vmatprep.subr.bf16.mxu1 %v12300_v5 }
 0x3e8   :  { %2949 = vmatpush1.bf16.msra.mxu1 %v12298_v13 }
 0x3e9   :  { %2950 = vmatprep.subr.bf16.mxu1 %v12303_v44 }
 0x3eb   :  { %2908 = vmatmul.mubr.bf16.gmra.mxu1 %v12140_v6 }
 0x3ec   :  { %2951 = vmatpush1.bf16.msra.mxu1 %v12301_v29  ;;  %2917 = vmatprep.mubr.bf16.mxu1 %v17925_v52 }
 0x3ed   :  { %2952 = vmatprep.subr.bf16.mxu1 %v12306_v62 }
 0x3f0   :  { %2953 = vmatpush1.bf16.msra.mxu1 %v12304_v17 }
 0x3f1   :  { %2954 = vmatprep.subr.bf16.mxu1 %v12309_v3 }
 0x3f3   :  { %2918 = vmatmul.mubr.bf16.gmra.mxu1 %v12142_v22 }
 0x3f4   :  { %2955 = vmatpush1.bf16.msra.mxu1 %v12307_v18  ;;  %2927 = vmatprep.mubr.bf16.mxu1 %v17925_v52 }
 0x3f5   :  { %2956 = vmatprep.subr.bf16.mxu1 %v12312_v32 }
 0x3f8   :  { %2957 = vmatpush1.bf16.msra.mxu1 %v12310_v0 }
 0x3f9   :  { %2958 = vmatprep.subr.bf16.mxu1 %v12315_v57 }
 0x3fb   :  { %2928 = vmatmul.mubr.bf16.gmra.mxu1 %v12143_v14 }
 0x3fc   :  { %2937 = vmatprep.mubr.bf16.mxu1 %v17925_v52  ;;  %2959 = vmatpush1.bf16.msra.mxu1 %v12313_v42 }
 0x3fd   :  { %2960 = vmatprep.subr.bf16.mxu1 %v12319_v49 }
 0x400   :  { %2961 = vmatpush1.bf16.msra.mxu1 %v12317_v48  ;;  %v14773_v48 = vsub.s32 2, %v2686_v27 }
 0x401   :  { %3259 = vmatprep.subr.bf16.mxu1 %v14424_v21  ;;  %v12341_v21 = vld [vmem:[%s17914_s8 + $0xe8] ss:$16 sps:$4 sm:$0xff]  }
 0x402   :  { %18094 = vst [vmem:[#allocation18_spill] sm:$0xff] %v14773_v48 }
 0x403   :  { %2938 = vmatmul.mubr.bf16.gmra.mxu1 %v12316_v19 }
 0x404   :  { %2978 = vmatprep.mubr.bf16.mxu1 %v17925_v52 }
 0x40b   :  { %2979 = vmatmul.mubr.bf16.vlgmr.msra.gmra.mxu1 %v2646_v53 }
 0x40c   :  { %3260 = vmatpush1.bf16.msra.mxu1 %v14419_v28  ;;  %2988 = vmatprep.mubr.bf16.mxu1 %v17925_v52  ;;  %v12343_v28 = vld [vmem:[%s17914_s8 + $0xec] ss:$16 sps:$4 sm:$0xff]  }
 0x40d   :  { %3261 = vmatprep.subr.bf16.mxu1 %v14481_v36  ;;  %v2683_v36 = vld [vmem:[%s17917_s9] sm:$0xf] }
 0x410   :  { %3262 = vmatpush1.bf16.msra.mxu1 %v14486_v37 }
 0x411   :  { %3263 = vmatprep.subr.bf16.mxu1 %v14493_v38 }
 0x413   :  { %2989 = vmatmul.mubr.bf16.gmra.mxu1 %v12140_v6 }
 0x414   :  { %3264 = vmatpush1.bf16.msra.mxu1 %v14498_v61  ;;  %2998 = vmatprep.mubr.bf16.mxu1 %v17925_v52  ;;  %v14713_v61 = vrot.slane %v2683_v36, %v14703_v26 }
 0x415   :  { %3265 = vmatprep.subr.bf16.mxu1 %v14503_v34 }
 0x418   :  { %3266 = vmatpush1.bf16.msra.mxu1 %v14511_v58  ;;  %v14715_v58 = vsub.s32 1, %v2686_v27 }
 0x419   :  { %3267 = vmatprep.subr.bf16.mxu1 %v14517_v20 }
 0x41b   :  { %2999 = vmatmul.mubr.bf16.gmra.mxu1 %v12142_v22 }
 0x41c   :  { %3268 = vmatpush1.bf16.msra.mxu1 %v14522_v56  ;;  %3008 = vmatprep.mubr.bf16.mxu1 %v17925_v52 }
 0x41d   :  { %3269 = vmatprep.subr.bf16.mxu1 %v14529_v23 }
 0x420   :  { %3270 = vmatpush1.bf16.msra.mxu1 %v14534_v51  ;;  %v14723_v51 = vrot.slane %v2683_v36, %v14715_v58 }
 0x421   :  { %3271 = vmatprep.subr.bf16.mxu1 %v14539_v10 }
 0x423   :  { %3009 = vmatmul.mubr.bf16.gmra.mxu1 %v12143_v14 }
 0x424   :  { %3018 = vmatprep.mubr.bf16.mxu1 %v17925_v52  ;;  %3272 = vmatpush1.bf16.msra.mxu1 %v14547_v47  ;;  %v12367_v47 = vld [vmem:[%s17918_s10 + $0xe4] ss:$16 sps:$4 sm:$0xff]  }
 0x425   :  { %3273 = vmatprep.subr.bf16.mxu1 %v14553_v54  ;;  %3890 = vmatprep.subr.bf16.mxu0 %v12367_v47 }
 0x428   :  { %3274 = vmatpush1.bf16.msra.mxu1 %v14558_v40  ;;  %v12370_v40 = vld [vmem:[%s17918_s10 + $0xec] ss:$16 sps:$4 sm:$0xff]  }
 0x429   :  { %3300 = vmatprep.subr.bf16.mxu1 %v12343_v28 }
 0x42b   :  { %3019 = vmatmul.mubr.bf16.gmra.mxu1 %v12316_v19 }
 0x42c   :  { %3291 = vmatprep.mubr.bf16.mxu1 %v17925_v52 }
 0x433   :  { %3292 = vmatmul.mubr.bf16.vlgmr.msra.gmra.mxu1 %v17925_v52 }
 0x434   :  { %3301 = vmatpush1.bf16.msra.mxu1 %v12341_v21  ;;  %3332 = vmatprep.mubr.bf16.mxu1 %v17925_v52 }
 0x435   :  { %3302 = vmatprep.subr.bf16.mxu1 %v12346_v25 }
 0x438   :  { %3303 = vmatpush1.bf16.msra.mxu1 %v12344_v8 }
 0x439   :  { %3304 = vmatprep.subr.bf16.mxu1 %v12349_v11 }
 0x43c   :  { %3305 = vmatpush1.bf16.msra.mxu1 %v12347_v9 }
 0x43d   :  { %3306 = vmatprep.subr.bf16.mxu1 %v12352_v12 }
 0x440   :  { %3307 = vmatpush1.bf16.msra.mxu1 %v12350_v39 }
 0x441   :  { %3308 = vmatprep.subr.bf16.mxu1 %v12355_v2 }
 0x444   :  { %3309 = vmatpush1.bf16.msra.mxu1 %v12353_v46 }
 0x445   :  { %3310 = vmatprep.subr.bf16.mxu1 %v12358_v63 }
 0x448   :  { %3311 = vmatpush1.bf16.msra.mxu1 %v12356_v31 }
 0x449   :  { %3312 = vmatprep.subr.bf16.mxu1 %v12361_v60 }
 0x44c   :  { %3313 = vmatpush1.bf16.msra.mxu1 %v12359_v1 }
 0x44d   :  { %3314 = vmatprep.subr.bf16.mxu1 %v12364_v55 }
 0x450   :  { %3315 = vmatpush1.bf16.msra.mxu1 %v12362_v30 }
 0x451   :  { %3415 = vmatprep.subr.bf16.mxu1 %v12343_v28  ;;  %v14775_v28 = vsub.s32 3, %v2686_v27 }
 0x453   :  { %3333 = vmatmul.mubr.bf16.vlgmr.msra.gmra.mxu1 %v17925_v52  ;;  %18095 = vst [vmem:[#allocation19_spill] sm:$0xff] %v14775_v28 }
 0x454   :  { %3416 = vmatpush1.bf16.msra.mxu1 %v12341_v21  ;;  %3447 = vmatprep.mubr.bf16.mxu1 %v17925_v52 }
 0x455   :  { %3417 = vmatprep.subr.bf16.mxu1 %v12346_v25  ;;  %v2696_v25 = vrot.slane %v2683_v36, %v14773_v48 }
 0x458   :  { %3418 = vmatpush1.bf16.msra.mxu1 %v12344_v8 }
 0x459   :  { %3419 = vmatprep.subr.bf16.mxu1 %v12349_v11  ;;  %v2700_v11 = vrot.slane %v2683_v36, %v14775_v28 }
 0x45c   :  { %3420 = vmatpush1.bf16.msra.mxu1 %v12347_v9 }
 0x45d   :  { %3421 = vmatprep.subr.bf16.mxu1 %v12352_v12 }
 0x460   :  { %3422 = vmatpush1.bf16.msra.mxu1 %v12350_v39 }
 0x461   :  { %3423 = vmatprep.subr.bf16.mxu1 %v12355_v2 }
 0x464   :  { %3424 = vmatpush1.bf16.msra.mxu1 %v12353_v46 }
 0x465   :  { %3425 = vmatprep.subr.bf16.mxu1 %v12358_v63 }
 0x468   :  { %3426 = vmatpush1.bf16.msra.mxu1 %v12356_v31 }
 0x469   :  { %3427 = vmatprep.subr.bf16.mxu1 %v12361_v60 }
 0x46c   :  { %3428 = vmatpush1.bf16.msra.mxu1 %v12359_v1 }
 0x46d   :  { %3429 = vmatprep.subr.bf16.mxu1 %v12364_v55 }
 0x470   :  { %3430 = vmatpush1.bf16.msra.mxu1 %v12362_v30 }
 0x471   :  { %3931 = vmatprep.subr.bf16.mxu1 %v12370_v40 }
 0x4a3   :  { %v14708_v37 = vpop.f32.mrf.mxu1 }
 0x4a5   :  { %v14710_v38 = vpop.f32.mrf.mxu1 }
 0x4a7   :  { %v2903_v34 = vpop.f32.mrf.mxu1 }
 0x4a8   :  { %v14718_v20 = vadd.f32 %v2903_v34, %v14713_v61 }
 0x4a9   :  { %v14720_v56 = vpop.f32.mrf.mxu1 }
 0x4ab   :  { %v2909_v23 = vpop.f32.mrf.mxu1 }
 0x4ac   :  { %v14726_v10 = vadd.f32 %v2909_v23, %v14713_v61 }
 0x4ad   :  { %v2911_v54 = vpop.f32.mrf.mxu1 }
 0x4ae   :  { %18080 = vst [vmem:[#allocation4_spill] sm:$0xff] %v14726_v10  ;;  %v14735_v43 = vadd.f32 %v2911_v54, %v14723_v51  ;;  %v15137_v10 = vld [vmem:[%s17918_s10 + $0x140] ss:$16 sps:$4 sm:$0xff]  }
 0x4af   :  { %v2913_v16 = vpop.f32.mrf.mxu1  ;;  %18125 = vst [vmem:[#allocation49_spill] sm:$0xff] %v15137_v10 }
 0x4b0   :  { %18081 = vst [vmem:[#allocation5_spill] sm:$0xff] %v14735_v43  ;;  %v14738_v35 = vadd.f32 %v2913_v16, %v14713_v61  ;;  %v15130_v43 = vld [vmem:[%s17918_s10 + $0x14c] ss:$16 sps:$4 sm:$0xff]  }
 0x4b1   :  { %v2915_v15 = vpop.f32.mrf.mxu1  ;;  %18124 = vst [vmem:[#allocation48_spill] sm:$0xff] %v15130_v43 }
 0x4b2   :  { %18082 = vst [vmem:[#allocation6_spill] sm:$0xff] %v14738_v35  ;;  %v14741_v33 = vadd.f32 %v2915_v15, %v14723_v51  ;;  %v15113_v35 = vld [vmem:[%s17918_s10 + $0x160] ss:$16 sps:$4 sm:$0xff]  }
 0x4b3   :  { %v2919_v50 = vpop.f32.mrf.mxu1  ;;  %18121 = vst [vmem:[#allocation45_spill] sm:$0xff] %v15113_v35 }
 0x4b4   :  { %18083 = vst [vmem:[#allocation7_spill] sm:$0xff] %v14741_v33  ;;  %v14744_v45 = vadd.f32 %v2919_v50, %v14713_v61  ;;  %v15106_v33 = vld [vmem:[%s17918_s10 + $0x16c] ss:$16 sps:$4 sm:$0xff]  }
 0x4b5   :  { %v2921_v7 = vpop.f32.mrf.mxu1  ;;  %18120 = vst [vmem:[#allocation44_spill] sm:$0xff] %v15106_v33 }
 0x4b6   :  { %18084 = vst [vmem:[#allocation8_spill] sm:$0xff] %v14744_v45  ;;  %v14747_v24 = vadd.f32 %v2921_v7, %v14723_v51  ;;  %v15089_v45 = vld [vmem:[%s17918_s10 + $0x180] ss:$16 sps:$4 sm:$0xff]  }
 0x4b7   :  { %v2923_v53 = vpop.f32.mrf.mxu1  ;;  %18117 = vst [vmem:[#allocation41_spill] sm:$0xff] %v15089_v45 }
 0x4b8   :  { %18085 = vst [vmem:[#allocation9_spill] sm:$0xff] %v14747_v24  ;;  %v14750_v5 = vadd.f32 %v2923_v53, %v14713_v61  ;;  %v15082_v24 = vld [vmem:[%s17918_s10 + $0x18c] ss:$16 sps:$4 sm:$0xff]  }
 0x4b9   :  { %v2925_v4 = vpop.f32.mrf.mxu1  ;;  %18116 = vst [vmem:[#allocation40_spill] sm:$0xff] %v15082_v24 }
 0x4ba   :  { %18086 = vst [vmem:[#allocation10_spill] sm:$0xff] %v14750_v5  ;;  %v14753_v13 = vadd.f32 %v2925_v4, %v14723_v51  ;;  %v15065_v5 = vld [vmem:[%s17918_s10 + $0x1a0] ss:$16 sps:$4 sm:$0xff]  }
 0x4bb   :  { %v2929_v44 = vpop.f32.mrf.mxu1  ;;  %18113 = vst [vmem:[#allocation37_spill] sm:$0xff] %v15065_v5 }
 0x4bc   :  { %18087 = vst [vmem:[#allocation11_spill] sm:$0xff] %v14753_v13  ;;  %v14756_v6 = vadd.f32 %v2929_v44, %v14713_v61  ;;  %v15058_v13 = vld [vmem:[%s17918_s10 + $0x1ac] ss:$16 sps:$4 sm:$0xff]  }
 0x4bd   :  { %v2931_v29 = vpop.f32.mrf.mxu1  ;;  %18112 = vst [vmem:[#allocation36_spill] sm:$0xff] %v15058_v13 }
 0x4be   :  { %18088 = vst [vmem:[#allocation12_spill] sm:$0xff] %v14756_v6  ;;  %v14759_v62 = vadd.f32 %v2931_v29, %v14723_v51  ;;  %v15041_v6 = vld [vmem:[%s17918_s10 + $0x1c0] ss:$16 sps:$4 sm:$0xff]  }
 0x4bf   :  { %v2933_v17 = vpop.f32.mrf.mxu1 }
 0x4c0   :  { %18089 = vst [vmem:[#allocation13_spill] sm:$0xff] %v14759_v62  ;;  %v14762_v3 = vadd.f32 %v2933_v17, %v14713_v61  ;;  %v15034_v62 = vld [vmem:[%s17918_s10 + $0x1cc] ss:$16 sps:$4 sm:$0xff]  }
 0x4c1   :  { %v2935_v22 = vpop.f32.mrf.mxu1 }
 0x4c2   :  { %18090 = vst [vmem:[#allocation14_spill] sm:$0xff] %v14762_v3  ;;  %v14765_v18 = vadd.f32 %v2935_v22, %v14723_v51  ;;  %v15017_v3 = vld [vmem:[%s17918_s10 + $0x1e0] ss:$16 sps:$4 sm:$0xff]  }
 0x4c3   :  { %v2939_v32 = vpop.f32.mrf.mxu1 }
 0x4c4   :  { %18091 = vst [vmem:[#allocation15_spill] sm:$0xff] %v14765_v18  ;;  %v14768_v0 = vadd.f32 %v2939_v32, %v14713_v61  ;;  %v15010_v18 = vld [vmem:[%s17918_s10 + $0x1ec] ss:$16 sps:$4 sm:$0xff]  }
 0x4c5   :  { %v2941_v57 = vpop.f32.mrf.mxu1 }
 0x4c6   :  { %18092 = vst [vmem:[#allocation16_spill] sm:$0xff] %v14768_v0  ;;  %v14771_v14 = vadd.f32 %v2941_v57, %v14723_v51  ;;  %v14993_v0 = vld [vmem:[%s17918_s10] ss:$16 sps:$4 sm:$0xff]  }
 0x4c7   :  { %v2943_v42 = vpop.f32.mrf.mxu1 }
 0x4c8   :  { %18093 = vst [vmem:[#allocation17_spill] sm:$0xff] %v14771_v14  ;;  %v14981_v14 = vld [vmem:[%s17918_s10 + $0x4] ss:$16 sps:$4 sm:$0xff]  }
 0x4c9   :  { %v2944_v49 = vpop.f32.mrf.mxu1 }
 0x4cb   :  { %v2980_v19 = vpop.f32.mrf.mxu1 }
 0x4cd   :  { %v2982_v21 = vpop.f32.mrf.mxu1 }
 0x4cf   :  { %v2984_v8 = vpop.f32.mrf.mxu1 }
 0x4d0   :  { %v14779_v9 = vadd.f32 %v2984_v8, %v2696_v25 }
 0x4d1   :  { %v2986_v12 = vpop.f32.mrf.mxu1 }
 0x4d2   :  { %v14781_v39 = vadd.f32 %v2986_v12, %v2700_v11 }
 0x4d3   :  { %v2990_v2 = vpop.f32.mrf.mxu1 }
 0x4d4   :  { %v14783_v46 = vadd.f32 %v2990_v2, %v2696_v25  ;;  %v2902_v2 = vadd.f32 %v14710_v38, %v14723_v51 }
 0x4d5   :  { %v2992_v63 = vpop.f32.mrf.mxu1 }
 0x4d6   :  { %18096 = vst [vmem:[#allocation20_spill] sm:$0xff] %v14783_v46  ;;  %v14785_v31 = vadd.f32 %v2992_v63, %v2700_v11  ;;  %v2900_v63 = vadd.f32 %v14708_v37, %v14713_v61  ;;  %v15118_v46 = vld [vmem:[%s17918_s10 + $0x168] ss:$16 sps:$4 sm:$0xff]  }
 0x4d7   :  { %v2994_v60 = vpop.f32.mrf.mxu1  ;;  %18122 = vst [vmem:[#allocation46_spill] sm:$0xff] %v15118_v46 }
 0x4d8   :  { %18097 = vst [vmem:[#allocation21_spill] sm:$0xff] %v14785_v31  ;;  %v14787_v1 = vadd.f32 %v2994_v60, %v2696_v25  ;;  %v15125_v31 = vld [vmem:[%s17918_s10 + $0x144] ss:$16 sps:$4 sm:$0xff]  }
 0x4d9   :  { %v2996_v55 = vpop.f32.mrf.mxu1  ;;  %18123 = vst [vmem:[#allocation47_spill] sm:$0xff] %v15125_v31 }
 0x4da   :  { %18098 = vst [vmem:[#allocation22_spill] sm:$0xff] %v14787_v1  ;;  %v14789_v30 = vadd.f32 %v2996_v55, %v2700_v11  ;;  %v15094_v1 = vld [vmem:[%s17918_s10 + $0x188] ss:$16 sps:$4 sm:$0xff]  }
 0x4db   :  { %v3000_v41 = vpop.f32.mrf.mxu1  ;;  %18118 = vst [vmem:[#allocation42_spill] sm:$0xff] %v15094_v1 }
 0x4dc   :  { %18099 = vst [vmem:[#allocation23_spill] sm:$0xff] %v14789_v30  ;;  %v14791_v27 = vadd.f32 %v3000_v41, %v2696_v25  ;;  %v15101_v30 = vld [vmem:[%s17918_s10 + $0x164] ss:$16 sps:$4 sm:$0xff]  }
 0x4dd   :  { %v3002_v36 = vpop.f32.mrf.mxu1  ;;  %18119 = vst [vmem:[#allocation43_spill] sm:$0xff] %v15101_v30 }
 0x4de   :  { %18100 = vst [vmem:[#allocation24_spill] sm:$0xff] %v14791_v27  ;;  %v14793_v34 = vadd.f32 %v3002_v36, %v2700_v11  ;;  %v15070_v27 = vld [vmem:[%s17918_s10 + $0x1a8] ss:$16 sps:$4 sm:$0xff]  }
 0x4df   :  { %v3004_v23 = vpop.f32.mrf.mxu1  ;;  %18114 = vst [vmem:[#allocation38_spill] sm:$0xff] %v15070_v27 }
 0x4e0   :  { %18101 = vst [vmem:[#allocation25_spill] sm:$0xff] %v14793_v34  ;;  %v14795_v47 = vadd.f32 %v3004_v23, %v2696_v25  ;;  %v15077_v34 = vld [vmem:[%s17918_s10 + $0x184] ss:$16 sps:$4 sm:$0xff]  }
 0x4e1   :  { %v3006_v54 = vpop.f32.mrf.mxu1  ;;  %18115 = vst [vmem:[#allocation39_spill] sm:$0xff] %v15077_v34 }
 0x4e2   :  { %18102 = vst [vmem:[#allocation26_spill] sm:$0xff] %v14795_v47  ;;  %v14797_v40 = vadd.f32 %v3006_v54, %v2700_v11  ;;  %v15046_v47 = vld [vmem:[%s17918_s10 + $0x1c8] ss:$16 sps:$4 sm:$0xff]  }
 0x4e3   :  { %v3010_v16 = vpop.f32.mrf.mxu1  ;;  %18110 = vst [vmem:[#allocation34_spill] sm:$0xff] %v15046_v47 }
 0x4e4   :  { %18103 = vst [vmem:[#allocation27_spill] sm:$0xff] %v14797_v40  ;;  %v14799_v15 = vadd.f32 %v3010_v16, %v2696_v25  ;;  %v15053_v40 = vld [vmem:[%s17918_s10 + $0x1a4] ss:$16 sps:$4 sm:$0xff]  }
 0x4e5   :  { %v3012_v50 = vpop.f32.mrf.mxu1  ;;  %18111 = vst [vmem:[#allocation35_spill] sm:$0xff] %v15053_v40 }
 0x4e6   :  { %18104 = vst [vmem:[#allocation28_spill] sm:$0xff] %v14799_v15  ;;  %v14801_v7 = vadd.f32 %v3012_v50, %v2700_v11  ;;  %v15022_v15 = vld [vmem:[%s17918_s10 + $0x1e8] ss:$16 sps:$4 sm:$0xff]  }
 0x4e7   :  { %v3014_v53 = vpop.f32.mrf.mxu1 }
 0x4e8   :  { %18105 = vst [vmem:[#allocation29_spill] sm:$0xff] %v14801_v7  ;;  %v14803_v4 = vadd.f32 %v3014_v53, %v2696_v25  ;;  %v15029_v7 = vld [vmem:[%s17918_s10 + $0x1c4] ss:$16 sps:$4 sm:$0xff]  }
 0x4e9   :  { %v3016_v44 = vpop.f32.mrf.mxu1 }
 0x4ea   :  { %18106 = vst [vmem:[#allocation30_spill] sm:$0xff] %v14803_v4  ;;  %v14805_v29 = vadd.f32 %v3016_v44, %v2700_v11  ;;  %v14998_v4 = vld [vmem:[%s17918_s10 + $0x8] ss:$16 sps:$4 sm:$0xff]  }
 0x4eb   :  { %v3020_v17 = vpop.f32.mrf.mxu1 }
 0x4ec   :  { %18107 = vst [vmem:[#allocation31_spill] sm:$0xff] %v14805_v29  ;;  %v14807_v22 = vadd.f32 %v3020_v17, %v2696_v25  ;;  %v2981_v17 = vadd.f32 %v2980_v19, %v2696_v25  ;;  %v15005_v29 = vld [vmem:[%s17918_s10 + $0x1e4] ss:$16 sps:$4 sm:$0xff]  }
 0x4ed   :  { %v3022_v32 = vpop.f32.mrf.mxu1 }
 0x4ee   :  { %18108 = vst [vmem:[#allocation32_spill] sm:$0xff] %v14807_v22  ;;  %v14809_v57 = vadd.f32 %v3022_v32, %v2700_v11  ;;  %v14986_v22 = vld [vmem:[%s17918_s10 + $0xc] ss:$16 sps:$4 sm:$0xff]  }
 0x4ef   :  { %v3024_v42 = vpop.f32.mrf.mxu1 }
 0x4f0   :  { %18109 = vst [vmem:[#allocation33_spill] sm:$0xff] %v14809_v57  ;;  %v2983_v42 = vadd.f32 %v2982_v21, %v2700_v11  ;;  %v14974_v57 = vld [vmem:[%s17918_s10 + $0x28] ss:$16 sps:$4 sm:$0xff]  }
 0x4f1   :  { %v3025_v49 = vpop.f32.mrf.mxu1 }
 0x4f3   :  { %v3293_v8 = vpop.f32.mrf.mxu1 }
 0x4f4   :  { %v3341_v41 = vadd.f32 %v3293_v8, %v2900_v63 }
 0x4f5   :  { %v3295_v12 = vpop.f32.mrf.mxu1 }
 0x4f6   :  { %v3342_v55 = vadd.f32 %v3295_v12, %v2902_v2  ;;  %v10715_v54 = vmul.f32 -1.442695, %v3341_v41 }
 0x4f7   :  { %v3297_v60 = vpop.f32.mrf.mxu1 }
 0x4f8   :  { %v10716_v23 = vmul.f32 -1.442695, %v3342_v55 }
 0x4f9   :  { %v3298_v36 = vpop.f32.mrf.mxu1 }
 0x4fa   :  { %13006 = vpow2.f32 %v10716_v23 }
 0x4fb   :  { %13008 = vpow2.f32 %v10715_v54  ;;  %v14821_v54 = vld [vmem:[%s17918_s10 + $0xe0] ss:$16 sps:$4 sm:$0xff]  }
 0x507   :  { %v13007_v16 = vpop.eup %13006 }
 0x508   :  { %v13009_v50 = vpop.eup %13008  ;;  %v3354_v53 = vadd.f32 1.0, %v13007_v16  ;;  %v14826_v16 = vld [vmem:[%s17918_s10 + $0xe8] ss:$16 sps:$4 sm:$0xff]  }
 0x509   :  { %v3348_v44 = vadd.f32 1.0, %v13009_v50 }
 0x50a   :  { %13010 = vrcp.f32 %v3354_v53  ;;  %v14833_v53 = vld [vmem:[%s17918_s10 + $0xc4] ss:$16 sps:$4 sm:$0xff]  }
 0x50b   :  { %13012 = vrcp.f32 %v3348_v44  ;;  %v14838_v44 = vld [vmem:[%s17918_s10 + $0xcc] ss:$16 sps:$4 sm:$0xff]  }
 0x513   :  { %v3334_v32 = vpop.f32.mrf.mxu1 }
 0x514   :  { %v3343_v38 = vadd.f32 %v3334_v32, %v2981_v17  ;;  %v14847_v17 = vld [vmem:[%s17918_s10 + $0xc0] ss:$16 sps:$4 sm:$0xff]   ;;  %v14852_v32 = vld [vmem:[%s17918_s10 + $0xc8] ss:$16 sps:$4 sm:$0xff]  }
 0x515   :  { %v3336_v49 = vpop.f32.mrf.mxu1 }
 0x516   :  { %13014 = vtanh.f32 %v3343_v38  ;;  %v3344_v37 = vadd.f32 %v3336_v49, %v2983_v42  ;;  %v14859_v42 = vld [vmem:[%s17918_s10 + $0xa4] ss:$16 sps:$4 sm:$0xff]   ;;  %v14864_v38 = vld [vmem:[%s17918_s10 + $0xac] ss:$16 sps:$4 sm:$0xff]   ;;  %v14873_v49 = vld [vmem:[%s17918_s10 + $0xa0] ss:$16 sps:$4 sm:$0xff]  }
 0x517   :  { %v3338_v61 = vpop.f32.mrf.mxu1  ;;  %v13011_v2 = vpop.eup %13010 }
 0x518   :  { %v10717_v8 = vmul.f32 -1.442695, %v3344_v37  ;;  %v13013_v63 = vpop.eup %13012  ;;  %v3364_v55 = vmul.f32 0.0, %v13011_v2  ;;  %v14878_v37 = vld [vmem:[%s17918_s10 + $0xa8] ss:$16 sps:$4 sm:$0xff]  }
 0x519   :  { %v3339_v12 = vpop.f32.mrf.mxu1  ;;  %v14885_v61 = vld [vmem:[%s17918_s10 + $0x84] ss:$16 sps:$4 sm:$0xff]   ;;  %v14902_v2 = vld [vmem:[%s17918_s10 + $0x88] ss:$16 sps:$4 sm:$0xff]  }
 0x51a   :  { %13016 = vpow2.f32 %v10717_v8  ;;  %v14890_v8 = vld [vmem:[%s17918_s10 + $0x8c] ss:$16 sps:$4 sm:$0xff]   ;;  %v14897_v12 = vld [vmem:[%s17918_s10 + $0x80] ss:$16 sps:$4 sm:$0xff]  }
 0x523   :  { %v13015_v60 = vpop.eup %13014 }
 0x524   :  { %v3365_v41 = vmul.f32 %v13015_v60, %v13013_v63  ;;  %v14909_v63 = vld [vmem:[%s17918_s10 + $0x64] ss:$16 sps:$4 sm:$0xff]   ;;  %v14914_v60 = vld [vmem:[%s17918_s10 + $0x6c] ss:$16 sps:$4 sm:$0xff]  }
 0x526   :  { %v14815_v36 = vadd.f32 %v3365_v41, %v3364_v55  ;;  %v14921_v55 = vld [vmem:[%s17918_s10 + $0x60] ss:$16 sps:$4 sm:$0xff]   ;;  %v14926_v41 = vld [vmem:[%s17918_s10 + $0x68] ss:$16 sps:$4 sm:$0xff]  }
 0x527   :  { %v13017_v19 = vpop.eup %13016 }
 0x528   :  { %v3361_v25 = vadd.f32 1.0, %v13017_v19  ;;  %13018 = vtanh.f32 %v14815_v36  ;;  %v14933_v19 = vld [vmem:[%s17918_s10 + $0x44] ss:$16 sps:$4 sm:$0xff]  }
 0x52a   :  { %13020 = vrcp.f32 %v3361_v25  ;;  %v14938_v25 = vld [vmem:[%s17918_s10 + $0x4c] ss:$16 sps:$4 sm:$0xff]  }
 0x535   :  { %v13019_v21 = vpop.eup %13018 }
 0x537   :  { %v13021_v11 = vpop.eup %13020 }
 0x538   :  { %v3368_v23 = vmul.f32 %v13021_v11, %v13019_v21  ;;  %v14945_v21 = vld [vmem:[%s17918_s10 + $0x40] ss:$16 sps:$4 sm:$0xff]   ;;  %v14950_v11 = vld [vmem:[%s17918_s10 + $0x48] ss:$16 sps:$4 sm:$0xff]  }
 0x53a   :  { %v14828_v50 = vpack.c.bf16 %v3368_v23, %v3368_v23  ;;  %v14957_v23 = vld [vmem:[%s17918_s10 + $0x24] ss:$16 sps:$4 sm:$0xff]  }
 0x53c   :  { %3407 = vmatmul.mubr.bf16.vlgmr.msra.gmra.mxu0 %v14828_v50  ;;  %3448 = vmatmul.mubr.bf16.vlgmr.msra.gmra.mxu1 %v14828_v50 }
 0x53d   :  { %3891 = vmatpush1.bf16.msra.mxu0 %v14821_v54  ;;  %3932 = vmatpush1.bf16.msra.mxu1 %v14826_v16 }
 0x53e   :  { %3892 = vmatprep.subr.bf16.mxu0 %v14833_v53  ;;  %3933 = vmatprep.subr.bf16.mxu1 %v14838_v44 }
 0x53f   :  { %3922 = vmatprep.mubr.bf16.mxu0 %v17925_v52  ;;  %3963 = vmatprep.mubr.bf16.mxu1 %v17925_v52  ;;  %v14969_v52 = vld [vmem:[%s17918_s10 + $0x20] ss:$16 sps:$4 sm:$0xff]  }
 0x541   :  { %3893 = vmatpush1.bf16.msra.mxu0 %v14847_v17  ;;  %3934 = vmatpush1.bf16.msra.mxu1 %v14852_v32 }
 0x542   :  { %3894 = vmatprep.subr.bf16.mxu0 %v14859_v42  ;;  %3935 = vmatprep.subr.bf16.mxu1 %v14864_v38 }
 0x545   :  { %3895 = vmatpush1.bf16.msra.mxu0 %v14873_v49  ;;  %3936 = vmatpush1.bf16.msra.mxu1 %v14878_v37 }
 0x546   :  { %3896 = vmatprep.subr.bf16.mxu0 %v14885_v61  ;;  %3937 = vmatprep.subr.bf16.mxu1 %v14890_v8 }
 0x549   :  { %3897 = vmatpush1.bf16.msra.mxu0 %v14897_v12  ;;  %3938 = vmatpush1.bf16.msra.mxu1 %v14902_v2 }
 0x54a   :  { %3898 = vmatprep.subr.bf16.mxu0 %v14909_v63  ;;  %3939 = vmatprep.subr.bf16.mxu1 %v14914_v60 }
 0x54d   :  { %3899 = vmatpush1.bf16.msra.mxu0 %v14921_v55  ;;  %3940 = vmatpush1.bf16.msra.mxu1 %v14926_v41 }
 0x54e   :  { %3900 = vmatprep.subr.bf16.mxu0 %v14933_v19  ;;  %3941 = vmatprep.subr.bf16.mxu1 %v14938_v25 }
 0x551   :  { %3901 = vmatpush1.bf16.msra.mxu0 %v14945_v21  ;;  %3942 = vmatpush1.bf16.msra.mxu1 %v14950_v11 }
 0x552   :  { %3902 = vmatprep.subr.bf16.mxu0 %v14957_v23  ;;  %3943 = vmatprep.subr.bf16.mxu1 %v14962_v59 }
 0x555   :  { %3903 = vmatpush1.bf16.msra.mxu0 %v14969_v52  ;;  %3944 = vmatpush1.bf16.msra.mxu1 %v14974_v57 }
 0x556   :  { %3904 = vmatprep.subr.bf16.mxu0 %v14981_v14  ;;  %3945 = vmatprep.subr.bf16.mxu1 %v14986_v22 }
 0x559   :  { %3905 = vmatpush1.bf16.msra.mxu0 %v14993_v0  ;;  %3946 = vmatpush1.bf16.msra.mxu1 %v14998_v4 }
 0x55a   :  { %3906 = vmatprep.subr.bf16.mxu0 %v15005_v29  ;;  %3947 = vmatprep.subr.bf16.mxu1 %v15010_v18 }
 0x55d   :  { %3907 = vmatpush2.bf16.msra.mxu0 %v15017_v3  ;;  %3948 = vmatpush2.bf16.msra.mxu1 %v15022_v15 }
 0x55e   :  { %3908 = vmatprep.subr.bf16.mxu0 %v15029_v7  ;;  %3949 = vmatprep.subr.bf16.mxu1 %v15034_v62 }
 0x561   :  { %3909 = vmatpush2.bf16.msra.mxu0 %v15041_v6  ;;  %3950 = vmatpush2.bf16.msra.mxu1 %v15046_v47 }
 0x562   :  { %3910 = vmatprep.subr.bf16.mxu0 %v15053_v40  ;;  %3951 = vmatprep.subr.bf16.mxu1 %v15058_v13 }
 0x565   :  { %3911 = vmatpush2.bf16.msra.mxu0 %v15065_v5  ;;  %3952 = vmatpush2.bf16.msra.mxu1 %v15070_v27 }
 0x566   :  { %3912 = vmatprep.subr.bf16.mxu0 %v15077_v34  ;;  %3953 = vmatprep.subr.bf16.mxu1 %v15082_v24 }
 0x569   :  { %3913 = vmatpush2.bf16.msra.mxu0 %v15089_v45  ;;  %3954 = vmatpush2.bf16.msra.mxu1 %v15094_v1 }
 0x56a   :  { %3914 = vmatprep.subr.bf16.mxu0 %v15101_v30  ;;  %3955 = vmatprep.subr.bf16.mxu1 %v15106_v33  ;;  %v15142_v33 = vld [vmem:[%s17918_s10 + $0x148] ss:$16 sps:$4 sm:$0xff]  }
 0x56b   :  { %18126 = vst [vmem:[#allocation50_spill] sm:$0xff] %v15142_v33 }
 0x56d   :  { %3915 = vmatpush2.bf16.msra.mxu0 %v15113_v35  ;;  %3956 = vmatpush2.bf16.msra.mxu1 %v15118_v46  ;;  %v15149_v35 = vld [vmem:[%s17918_s10 + $0x124] ss:$16 sps:$4 sm:$0xff]   ;;  %v15154_v46 = vld [vmem:[%s17918_s10 + $0x12c] ss:$16 sps:$4 sm:$0xff]  }
 0x56e   :  { %3916 = vmatprep.subr.bf16.mxu0 %v15125_v31  ;;  %3957 = vmatprep.subr.bf16.mxu1 %v15130_v43  ;;  %18127 = vst [vmem:[#allocation51_spill] sm:$0xff] %v15149_v35  ;;  %18128 = vst [vmem:[#allocation52_spill] sm:$0xff] %v15154_v46  ;;  %v15161_v31 = vld [vmem:[%s17918_s10 + $0x120] ss:$16 sps:$4 sm:$0xff]   ;;  %v15166_v43 = vld [vmem:[%s17918_s10 + $0x128] ss:$16 sps:$4 sm:$0xff]  }
 0x56f   :  { %18129 = vst [vmem:[#allocation53_spill] sm:$0xff] %v15161_v31  ;;  %18130 = vst [vmem:[#allocation54_spill] sm:$0xff] %v15166_v43 }
 0x571   :  { %3917 = vmatpush2.bf16.msra.mxu0 %v15137_v10  ;;  %3958 = vmatpush2.bf16.msra.mxu1 %v15142_v33  ;;  %v15173_v10 = vld [vmem:[%s17918_s10 + $0x104] ss:$16 sps:$4 sm:$0xff]   ;;  %v15178_v33 = vld [vmem:[%s17918_s10 + $0x10c] ss:$16 sps:$4 sm:$0xff]  }
 0x572   :  { %3918 = vmatprep.subr.bf16.mxu0 %v15149_v35  ;;  %3959 = vmatprep.subr.bf16.mxu1 %v15154_v46  ;;  %18131 = vst [vmem:[#allocation55_spill] sm:$0xff] %v15173_v10  ;;  %18132 = vst [vmem:[#allocation56_spill] sm:$0xff] %v15178_v33  ;;  %v15185_v35 = vld [vmem:[%s17918_s10 + $0x100] ss:$16 sps:$4 sm:$0xff]   ;;  %v15190_v46 = vld [vmem:[%s17918_s10 + $0x108] ss:$16 sps:$4 sm:$0xff]  }
 0x573   :  { %18133 = vst [vmem:[#allocation57_spill] sm:$0xff] %v15185_v35  ;;  %18134 = vst [vmem:[#allocation58_spill] sm:$0xff] %v15190_v46 }
 0x575   :  { %3919 = vmatpush2.bf16.msra.mxu0 %v15161_v31  ;;  %3960 = vmatpush2.bf16.msra.mxu1 %v15166_v43  ;;  %v13295_v43 = vld [vmem:[%s17914_s8 + $0xec] ss:$16 sps:$4 sm:$0xff]   ;;  %v13296_v31 = vld [vmem:[%s17914_s8 + $0xe8] ss:$16 sps:$4 sm:$0xff]  }
 0x576   :  { %3920 = vmatprep.subr.bf16.mxu0 %v15173_v10  ;;  %3961 = vmatprep.subr.bf16.mxu1 %v15178_v33  ;;  %v18135_v10 = vmov 0   ;;  %v2906_v33 = vadd.f32 %v14720_v56, %v14723_v51 }
 0x579   :  { %3921 = vmatpush2.bf16.msra.mxu0 %v15185_v35  ;;  %3962 = vmatpush2.bf16.msra.mxu1 %v15190_v46  ;;  %v13297_v46 = vld [vmem:[%s17914_s8 + $0xcc] ss:$16 sps:$4 sm:$0xff]  }
 0x57a   :  { %4235 = vmatprep.subr.bf16.mxu1 %v13295_v43  ;;  %v13298_v43 = vld [vmem:[%s17914_s8 + $0xc8] ss:$16 sps:$4 sm:$0xff]  }
 0x57c   :  { %3923 = vmatmul.mubr.bf16.vlgmr.msra.gmra.mxu0 %v14828_v50  ;;  %3964 = vmatmul.mubr.bf16.vlgmr.msra.gmra.mxu1 %v14828_v50  ;;  %v13299_v50 = vld [vmem:[%s17914_s8 + $0xac] ss:$16 sps:$4 sm:$0xff]  }
 0x57d   :  { %4236 = vmatpush1.bf16.msra.mxu1 %v13296_v31  ;;  %4226 = vmatprep.mubr.bf16.mxu0 %v18135_v10  ;;  %v13300_v31 = vld [vmem:[%s17914_s8 + $0xa8] ss:$16 sps:$4 sm:$0xff]  }
 0x57e   :  { %4237 = vmatprep.subr.bf16.mxu1 %v13297_v46  ;;  %4267 = vmatprep.mubr.bf16.mxu1 %v18135_v10  ;;  %v13301_v46 = vld [vmem:[%s17914_s8 + $0x8c] ss:$16 sps:$4 sm:$0xff]   ;;  %v13302_v10 = vld [vmem:[%s17914_s8 + $0x88] ss:$16 sps:$4 sm:$0xff]  }
 0x581   :  { %4238 = vmatpush1.bf16.msra.mxu1 %v13298_v43  ;;  %v13303_v43 = vld [vmem:[%s17914_s8 + $0x6c] ss:$16 sps:$4 sm:$0xff]  }
 0x582   :  { %4239 = vmatprep.subr.bf16.mxu1 %v13299_v50  ;;  %v13304_v50 = vld [vmem:[%s17914_s8 + $0x68] ss:$16 sps:$4 sm:$0xff]  }
 0x585   :  { %4240 = vmatpush1.bf16.msra.mxu1 %v13300_v31  ;;  %v13305_v31 = vld [vmem:[%s17914_s8 + $0x4c] ss:$16 sps:$4 sm:$0xff]  }
 0x586   :  { %4241 = vmatprep.subr.bf16.mxu1 %v13301_v46  ;;  %v13306_v46 = vld [vmem:[%s17914_s8 + $0x48] ss:$16 sps:$4 sm:$0xff]  }
 0x589   :  { %4242 = vmatpush1.bf16.msra.mxu1 %v13302_v10  ;;  %v13307_v10 = vld [vmem:[%s17914_s8 + $0x2c] ss:$16 sps:$4 sm:$0xff]  }
 0x58a   :  { %4243 = vmatprep.subr.bf16.mxu1 %v13303_v43  ;;  %v13308_v43 = vld [vmem:[%s17914_s8 + $0x28] ss:$16 sps:$4 sm:$0xff]  }
 0x58d   :  { %4244 = vmatpush1.bf16.msra.mxu1 %v13304_v50  ;;  %v15245_v50 = vld [vmem:[%s17914_s8 + $0xe4] ss:$16 sps:$4 sm:$0xff]  }
 0x58e   :  { %4245 = vmatprep.subr.bf16.mxu1 %v13305_v31  ;;  %18136 = vst [vmem:[#allocation59_spill] sm:$0xff] %v15245_v50  ;;  %v13309_v31 = vld [vmem:[%s17914_s8 + $0xc] ss:$16 sps:$4 sm:$0xff]   ;;  %4194 = vmatprep.subr.bf16.mxu0 %v15245_v50  ;;  %v13313_v50 = vld [vmem:[%s17914_s8 + $0xc0] ss:$16 sps:$4 sm:$0xff]  }
 0x591   :  { %4246 = vmatpush1.bf16.msra.mxu1 %v13306_v46  ;;  %v15253_v46 = vld [vmem:[%s17914_s8 + $0xe0] ss:$16 sps:$4 sm:$0xff]  }
 0x592   :  { %4247 = vmatprep.subr.bf16.mxu1 %v13307_v10  ;;  %18137 = vst [vmem:[#allocation60_spill] sm:$0xff] %v15253_v46  ;;  %4195 = vmatpush1.bf16.msra.mxu0 %v15253_v46  ;;  %v13310_v10 = vld [vmem:[%s17914_s8 + $0x8] ss:$16 sps:$4 sm:$0xff]   ;;  %v13314_v46 = vld [vmem:[%s17914_s8 + $0xa4] ss:$16 sps:$4 sm:$0xff]  }
 0x595   :  { %4248 = vmatpush1.bf16.msra.mxu1 %v13308_v43  ;;  %v13311_v43 = vld [vmem:[%s17914_s8 + $0xc4] ss:$16 sps:$4 sm:$0xff]  }
 0x596   :  { %4249 = vmatprep.subr.bf16.mxu1 %v13309_v31  ;;  %4196 = vmatprep.subr.bf16.mxu0 %v13311_v43  ;;  %v13312_v31 = vld [vmem:[%s17918_s10 + $0xec] ss:$16 sps:$4 sm:$0xff]   ;;  %v13316_v43 = vld [vmem:[%s17914_s8 + $0x84] ss:$16 sps:$4 sm:$0xff]  }
 0x597   :  { %4197 = vmatpush1.bf16.msra.mxu0 %v13313_v50  ;;  %v13318_v50 = vld [vmem:[%s17914_s8 + $0x64] ss:$16 sps:$4 sm:$0xff]  }
 0x598   :  { %4198 = vmatprep.subr.bf16.mxu0 %v13314_v46  ;;  %v13319_v46 = vld [vmem:[%s17914_s8 + $0x60] ss:$16 sps:$4 sm:$0xff]  }
 0x599   :  { %4250 = vmatpush1.bf16.msra.mxu1 %v13310_v10  ;;  %v13315_v10 = vld [vmem:[%s17914_s8 + $0xa0] ss:$16 sps:$4 sm:$0xff]  }
 0x59a   :  { %4752 = vmatprep.subr.bf16.mxu1 %v13312_v31  ;;  %v13317_v31 = vld [vmem:[%s17914_s8 + $0x80] ss:$16 sps:$4 sm:$0xff]  }
 0x59b   :  { %4199 = vmatpush1.bf16.msra.mxu0 %v13315_v10  ;;  %v13320_v10 = vld [vmem:[%s17914_s8 + $0x44] ss:$16 sps:$4 sm:$0xff]  }
 0x59c   :  { %4200 = vmatprep.subr.bf16.mxu0 %v13316_v43  ;;  %v15293_v43 = vld [vmem:[%s17914_s8 + $0x24] ss:$16 sps:$4 sm:$0xff]  }
 0x59d   :  { %18138 = vst [vmem:[#allocation61_spill] sm:$0xff] %v15293_v43 }
 0x59f   :  { %4201 = vmatpush1.bf16.msra.mxu0 %v13317_v31  ;;  %v13321_v31 = vld [vmem:[%s17914_s8 + $0x40] ss:$16 sps:$4 sm:$0xff]  }
 0x5a0   :  { %4202 = vmatprep.subr.bf16.mxu0 %v13318_v50  ;;  %v15301_v50 = vld [vmem:[%s17914_s8 + $0x20] ss:$16 sps:$4 sm:$0xff]  }
 0x5a1   :  { %18139 = vst [vmem:[#allocation62_spill] sm:$0xff] %v15301_v50 }
 0x5a3   :  { %4203 = vmatpush1.bf16.msra.mxu0 %v13319_v46  ;;  %v15307_v46 = vld [vmem:[%s17914_s8 + $0x4] ss:$16 sps:$4 sm:$0xff]  }
 0x5a4   :  { %4204 = vmatprep.subr.bf16.mxu0 %v13320_v10  ;;  %18140 = vst [vmem:[#allocation63_spill] sm:$0xff] %v15307_v46  ;;  %v15313_v10 = vld [vmem:[%s17914_s8] ss:$16 sps:$4 sm:$0xff]  }
 0x5a5   :  { %18141 = vst [vmem:[#allocation64_spill] sm:$0xff] %v15313_v10 }
 0x5a7   :  { %4205 = vmatpush1.bf16.msra.mxu0 %v13321_v31  ;;  %v13322_v31 = vld [vmem:[%s17918_s10 + $0xe4] ss:$16 sps:$4 sm:$0xff]  }
 0x5a8   :  { %4206 = vmatprep.subr.bf16.mxu0 %v15293_v43 }
 0x5ab   :  { %4207 = vmatpush1.bf16.msra.mxu0 %v15301_v50 }
 0x5ac   :  { %4208 = vmatprep.subr.bf16.mxu0 %v15307_v46 }
 0x5af   :  { %4209 = vmatpush1.bf16.msra.mxu0 %v15313_v10 }
 0x5b0   :  { %4711 = vmatprep.subr.bf16.mxu0 %v13322_v31 }
 0x5fc   :  { %v3408_v43 = vpop.f32.mrf.mxu0  ;;  %v3449_v35 = vpop.f32.mrf.mxu1 }
 0x5fd   :  { %v3456_v50 = vadd.f32 %v3408_v43, %v14718_v20  ;;  %v3458_v13 = vadd.f32 %v3449_v35, %v14779_v9 }
 0x5fe   :  { %v3410_v30 = vpop.f32.mrf.mxu0  ;;  %v3451_v1 = vpop.f32.mrf.mxu1 }
 0x5ff   :  { %v10718_v45 = vmul.f32 -1.442695, %v3456_v50  ;;  %v3457_v24 = vadd.f32 %v3410_v30, %v2906_v33  ;;  %v3459_v31 = vadd.f32 %v3451_v1, %v14781_v39 }
 0x600   :  { %v3412_v34 = vpop.f32.mrf.mxu0  ;;  %v3453_v46 = vpop.f32.mrf.mxu1 }
 0x601   :  { %13022 = vpow2.f32 %v10718_v45  ;;  %v10719_v10 = vmul.f32 -1.442695, %v3457_v24  ;;  %v10720_v40 = vmul.f32 -1.442695, %v3459_v31 }
 0x602   :  { %v3413_v27 = vpop.f32.mrf.mxu0  ;;  %v3454_v5 = vpop.f32.mrf.mxu1 }
 0x603   :  { %13024 = vpow2.f32 %v10719_v10 }
 0x604   :  { %13026 = vtanh.f32 %v3458_v13 }
 0x605   :  { %13028 = vpow2.f32 %v10720_v40 }
 0x60e   :  { %v13023_v47 = vpop.eup %13022 }
 0x60f   :  { %v3463_v56 = vadd.f32 1.0, %v13023_v47  ;;  %v3548_v47 = vld [vmem:[%s17919_s11] sm:$0xf] }
 0x610   :  { %v13025_v20 = vpop.eup %13024  ;;  %v3553_v40 = vrot.slane %v3548_v47, %v14703_v26 }
 0x611   :  { %13030 = vrcp.f32 %v3463_v56  ;;  %v3469_v51 = vadd.f32 1.0, %v13025_v20  ;;  %v13027_v33 = vpop.eup %13026  ;;  %v18156_v20 = vld [vmem:[#allocation48_spill] sm:$0xff] }
 0x612   :  { %v13029_v30 = vpop.eup %13028 }
 0x613   :  { %13032 = vrcp.f32 %v3469_v51  ;;  %v3476_v5 = vadd.f32 1.0, %v13029_v30  ;;  %v18157_v51 = vld [vmem:[#allocation49_spill] sm:$0xff]  ;;  %v18159_v30 = vld [vmem:[#allocation51_spill] sm:$0xff] }
 0x615   :  { %13034 = vrcp.f32 %v3476_v5 }
 0x61e   :  { %v13031_v45 = vpop.eup %13030 }
 0x61f   :  { %v3480_v24 = vmul.f32 %v13031_v45, %v13027_v33  ;;  %v18158_v33 = vld [vmem:[#allocation50_spill] sm:$0xff]  ;;  %v18160_v45 = vld [vmem:[#allocation52_spill] sm:$0xff] }
 0x620   :  { %v13033_v27 = vpop.eup %13032 }
 0x621   :  { %v3479_v34 = vmul.f32 %v13033_v27, %v14815_v36  ;;  %v3557_v36 = vrot.slane %v3548_v47, %v14715_v58  ;;  %v18162_v27 = vld [vmem:[#allocation54_spill] sm:$0xff] }
 0x622   :  { %v13035_v35 = vpop.eup %13034 }
 0x623   :  { %v15326_v39 = vadd.f32 %v3480_v24, %v3479_v34  ;;  %v18161_v24 = vld [vmem:[#allocation53_spill] sm:$0xff]  ;;  %v18163_v34 = vld [vmem:[#allocation55_spill] sm:$0xff] }
 0x625   :  { %13036 = vtanh.f32 %v15326_v39 }
 0x632   :  { %v13037_v13 = vpop.eup %13036 }
 0x633   :  { %v3483_v9 = vmul.f32 %v13037_v13, %v13035_v35  ;;  %v18164_v35 = vld [vmem:[#allocation56_spill] sm:$0xff] }
 0x635   :  { %v15329_v1 = vpack.c.bf16 %v3483_v9, %v3483_v9 }
 0x637   :  { %4227 = vmatmul.mubr.bf16.vlgmr.msra.gmra.mxu0 %v15329_v1  ;;  %4268 = vmatmul.mubr.bf16.vlgmr.msra.gmra.mxu1 %v15329_v1 }
 0x638   :  { %4712 = vmatpush1.bf16.msra.mxu0 %v14821_v54  ;;  %4753 = vmatpush1.bf16.msra.mxu1 %v14826_v16 }
 0x639   :  { %4713 = vmatprep.subr.bf16.mxu0 %v14833_v53  ;;  %4754 = vmatprep.subr.bf16.mxu1 %v14838_v44 }
 0x63c   :  { %v3924_v43 = vpop.f32.mrf.mxu0  ;;  %v3965_v50 = vpop.f32.mrf.mxu1  ;;  %4714 = vmatpush1.bf16.msra.mxu0 %v14847_v17  ;;  %4755 = vmatpush1.bf16.msra.mxu1 %v14852_v32 }
 0x63d   :  { %v3925_v46 = vadd.f32 %v3924_v43, %v3553_v40  ;;  %4715 = vmatprep.subr.bf16.mxu0 %v14859_v42  ;;  %4756 = vmatprep.subr.bf16.mxu1 %v14864_v38  ;;  %v3565_v42 = vrot.slane %v3548_v47, %v14775_v28  ;;  %v18167_v40 = vld [vmem:[#allocation58_spill] sm:$0xff]  ;;  %v18168_v43 = vld [vmem:[#allocation59_spill] sm:$0xff] }
 0x63e   :  { %v3926_v54 = vpop.f32.mrf.mxu0  ;;  %v3967_v16 = vpop.f32.mrf.mxu1 }
 0x63f   :  { %v10785_v10 = vmul.f32 -1.442695, %v3925_v46  ;;  %v3927_v31 = vadd.f32 %v3926_v54, %v3557_v36  ;;  %v3968_v38 = vadd.f32 %v3967_v16, %v3565_v42  ;;  %v18170_v46 = vmov 0   ;;  %v15418_v54 = vld [vmem:[%s17914_s8 + $0xec] ss:$16 sps:$4 sm:$0xff]  }
 0x640   :  { %v3928_v53 = vpop.f32.mrf.mxu0  ;;  %v3969_v56 = vpop.f32.mrf.mxu1  ;;  %4716 = vmatpush1.bf16.msra.mxu0 %v14873_v49  ;;  %4757 = vmatpush1.bf16.msra.mxu1 %v14878_v37  ;;  %v3561_v49 = vrot.slane %v3548_v47, %v14773_v48  ;;  %v18166_v47 = vld [vmem:[#allocation57_spill] sm:$0xff]  ;;  %v15478_v42 = vld [vmem:[%s17914_s8 + $0x84] ss:$16 sps:$4 sm:$0xff]  }
 0x641   :  { %13038 = vpow2.f32 %v10785_v10  ;;  %v10786_v44 = vmul.f32 -1.442695, %v3927_v31  ;;  %4717 = vmatprep.subr.bf16.mxu0 %v14885_v61  ;;  %4758 = vmatprep.subr.bf16.mxu1 %v14890_v8  ;;  %v10787_v37 = vmul.f32 -1.442695, %v3968_v38  ;;  %v15423_v16 = vld [vmem:[%s17914_s8 + $0xe8] ss:$16 sps:$4 sm:$0xff]  }
 0x642   :  { %v3929_v17 = vpop.f32.mrf.mxu0  ;;  %v3970_v32 = vpop.f32.mrf.mxu1  ;;  %v3966_v8 = vadd.f32 %v3965_v50, %v3561_v49  ;;  %v18169_v50 = vld [vmem:[#allocation60_spill] sm:$0xff]  ;;  %v15435_v10 = vld [vmem:[%s17914_s8 + $0xcc] ss:$16 sps:$4 sm:$0xff]   ;;  %v15445_v53 = vld [vmem:[%s17914_s8 + $0xc8] ss:$16 sps:$4 sm:$0xff]  }
 0x643   :  { %13040 = vpow2.f32 %v10786_v44  ;;  %v15440_v31 = vld [vmem:[%s17914_s8 + $0xc0] ss:$16 sps:$4 sm:$0xff]   ;;  %v15454_v56 = vld [vmem:[%s17914_s8 + $0xa4] ss:$16 sps:$4 sm:$0xff]   ;;  %v15459_v44 = vld [vmem:[%s17914_s8 + $0xac] ss:$16 sps:$4 sm:$0xff]  }
 0x644   :  { %4718 = vmatpush1.bf16.msra.mxu0 %v14897_v12  ;;  %4759 = vmatpush1.bf16.msra.mxu1 %v14902_v2  ;;  %13042 = vpow2.f32 %v10787_v37  ;;  %v15464_v17 = vld [vmem:[%s17914_s8 + $0xa0] ss:$16 sps:$4 sm:$0xff]   ;;  %v15469_v32 = vld [vmem:[%s17914_s8 + $0xa8] ss:$16 sps:$4 sm:$0xff]   ;;  %v15483_v38 = vld [vmem:[%s17914_s8 + $0x8c] ss:$16 sps:$4 sm:$0xff]  }
 0x645   :  { %4719 = vmatprep.subr.bf16.mxu0 %v14909_v63  ;;  %4760 = vmatprep.subr.bf16.mxu1 %v14914_v60  ;;  %v15488_v49 = vld [vmem:[%s17914_s8 + $0x80] ss:$16 sps:$4 sm:$0xff]   ;;  %v15493_v37 = vld [vmem:[%s17914_s8 + $0x88] ss:$16 sps:$4 sm:$0xff]  }
 0x648   :  { %4720 = vmatpush1.bf16.msra.mxu0 %v14921_v55  ;;  %4761 = vmatpush1.bf16.msra.mxu1 %v14926_v41  ;;  %v18149_v55 = vld [vmem:[#allocation41_spill] sm:$0xff]  ;;  %v18150_v41 = vld [vmem:[#allocation42_spill] sm:$0xff] }
 0x649   :  { %4721 = vmatprep.subr.bf16.mxu0 %v14933_v19  ;;  %4762 = vmatprep.subr.bf16.mxu1 %v14938_v25  ;;  %v18151_v19 = vld [vmem:[#allocation43_spill] sm:$0xff]  ;;  %v18152_v25 = vld [vmem:[#allocation44_spill] sm:$0xff] }
 0x64c   :  { %4722 = vmatpush1.bf16.msra.mxu0 %v14945_v21  ;;  %4763 = vmatpush1.bf16.msra.mxu1 %v14950_v11  ;;  %v18153_v21 = vld [vmem:[#allocation45_spill] sm:$0xff]  ;;  %v18154_v11 = vld [vmem:[#allocation46_spill] sm:$0xff] }
 0x64d   :  { %4723 = vmatprep.subr.bf16.mxu0 %v14957_v23  ;;  %4764 = vmatprep.subr.bf16.mxu1 %v14962_v59  ;;  %v18142_v59 = vld [vmem:[#allocation34_spill] sm:$0xff]  ;;  %v18155_v23 = vld [vmem:[#allocation47_spill] sm:$0xff] }
 0x64e   :  { %v13039_v61 = vpop.eup %13038 }
 0x64f   :  { %v3975_v12 = vadd.f32 1.0, %v13039_v61  ;;  %v15500_v61 = vld [vmem:[%s17914_s8 + $0x64] ss:$16 sps:$4 sm:$0xff]  }
 0x650   :  { %v13041_v2 = vpop.eup %13040  ;;  %4724 = vmatpush1.bf16.msra.mxu0 %v14969_v52  ;;  %4765 = vmatpush1.bf16.msra.mxu1 %v14974_v57 }
 0x651   :  { %13044 = vrcp.f32 %v3975_v12  ;;  %v3981_v63 = vadd.f32 1.0, %v13041_v2  ;;  %4725 = vmatprep.subr.bf16.mxu0 %v14981_v14  ;;  %4766 = vmatprep.subr.bf16.mxu1 %v14986_v22  ;;  %v13043_v52 = vpop.eup %13042  ;;  %v18144_v14 = vld [vmem:[#allocation36_spill] sm:$0xff]  ;;  %v15512_v12 = vld [vmem:[%s17914_s8 + $0x68] ss:$16 sps:$4 sm:$0xff]   ;;  %v15517_v2 = vld [vmem:[%s17914_s8 + $0x6c] ss:$16 sps:$4 sm:$0xff]  }
 0x652   :  { %13046 = vtanh.f32 %v3966_v8  ;;  %v3988_v22 = vadd.f32 1.0, %v13043_v52  ;;  %v15507_v8 = vld [vmem:[%s17914_s8 + $0x60] ss:$16 sps:$4 sm:$0xff]  }
 0x653   :  { %13048 = vrcp.f32 %v3981_v63  ;;  %v15523_v63 = vld [vmem:[%s17914_s8 + $0x44] ss:$16 sps:$4 sm:$0xff]   ;;  %v15536_v52 = vld [vmem:[%s17914_s8 + $0x40] ss:$16 sps:$4 sm:$0xff]  }
 0x654   :  { %4726 = vmatpush1.bf16.msra.mxu0 %v14993_v0  ;;  %4767 = vmatpush1.bf16.msra.mxu1 %v14998_v4  ;;  %v18143_v0 = vld [vmem:[#allocation35_spill] sm:$0xff]  ;;  %13050 = vrcp.f32 %v3988_v22  ;;  %v18172_v22 = vld [vmem:[#allocation62_spill] sm:$0xff] }
 0x655   :  { %4727 = vmatprep.subr.bf16.mxu0 %v15005_v29  ;;  %4768 = vmatprep.subr.bf16.mxu1 %v15010_v18 }
 0x658   :  { %4728 = vmatpush2.bf16.msra.mxu0 %v15017_v3  ;;  %4769 = vmatpush2.bf16.msra.mxu1 %v15022_v15  ;;  %v18145_v3 = vld [vmem:[#allocation37_spill] sm:$0xff]  ;;  %v18146_v15 = vld [vmem:[#allocation38_spill] sm:$0xff] }
 0x659   :  { %4729 = vmatprep.subr.bf16.mxu0 %v15029_v7  ;;  %4770 = vmatprep.subr.bf16.mxu1 %v15034_v62  ;;  %v18147_v62 = vld [vmem:[#allocation39_spill] sm:$0xff] }
 0x65c   :  { %4730 = vmatpush2.bf16.msra.mxu0 %v15041_v6  ;;  %4771 = vmatpush2.bf16.msra.mxu1 %v18142_v59  ;;  %v18148_v6 = vld [vmem:[#allocation40_spill] sm:$0xff]  ;;  %v15528_v59 = vld [vmem:[%s17914_s8 + $0x4c] ss:$16 sps:$4 sm:$0xff]  }
 0x65d   :  { %4731 = vmatprep.subr.bf16.mxu0 %v18143_v0  ;;  %4772 = vmatprep.subr.bf16.mxu1 %v18144_v14  ;;  %v15541_v0 = vld [vmem:[%s17914_s8 + $0x48] ss:$16 sps:$4 sm:$0xff]   ;;  %v15548_v14 = vld [vmem:[%s17914_s8 + $0x2c] ss:$16 sps:$4 sm:$0xff]  }
 0x65e   :  { %v13045_v4 = vpop.eup %13044 }
 0x65f   :  { %v13047_v29 = vpop.eup %13046 }
 0x660   :  { %v13049_v18 = vpop.eup %13048  ;;  %4732 = vmatpush2.bf16.msra.mxu0 %v18145_v3  ;;  %4773 = vmatpush2.bf16.msra.mxu1 %v18146_v15  ;;  %v3992_v57 = vmul.f32 %v13047_v29, %v13045_v4  ;;  %v15555_v4 = vld [vmem:[%s17914_s8 + $0x28] ss:$16 sps:$4 sm:$0xff]  }
 0x661   :  { %v3991_v7 = vmul.f32 0.0, %v13049_v18  ;;  %4733 = vmatprep.subr.bf16.mxu0 %v18147_v62  ;;  %4774 = vmatprep.subr.bf16.mxu1 %v18148_v6  ;;  %v13051_v5 = vpop.eup %13050  ;;  %v18171_v29 = vld [vmem:[#allocation61_spill] sm:$0xff]  ;;  %v18173_v15 = vld [vmem:[#allocation63_spill] sm:$0xff] }
 0x662   :  { %v15562_v18 = vld [vmem:[%s17914_s8 + $0xc] ss:$16 sps:$4 sm:$0xff]   ;;  %v15569_v3 = vld [vmem:[%s17914_s8 + $0x8] ss:$16 sps:$4 sm:$0xff]  }
 0x663   :  { %v15384_v60 = vadd.f32 %v3992_v57, %v3991_v7  ;;  %v18174_v7 = vld [vmem:[#allocation64_spill] sm:$0xff]  ;;  %v15583_v62 = vld [vmem:[%s17918_s10 + $0xec] ss:$16 sps:$4 sm:$0xff]  }
 0x664   :  { %4734 = vmatpush2.bf16.msra.mxu0 %v18149_v55  ;;  %4775 = vmatpush2.bf16.msra.mxu1 %v18150_v41  ;;  %v15578_v57 = vld [vmem:[%s17918_s10 + $0xe4] ss:$16 sps:$4 sm:$0xff]  }
 0x665   :  { %13052 = vtanh.f32 %v15384_v60  ;;  %4735 = vmatprep.subr.bf16.mxu0 %v18151_v19  ;;  %4776 = vmatprep.subr.bf16.mxu1 %v18152_v25  ;;  %v18175_v41 = vld [vmem:[#allocation4_spill] sm:$0xff] }
 0x668   :  { %4736 = vmatpush2.bf16.msra.mxu0 %v18153_v21  ;;  %4777 = vmatpush2.bf16.msra.mxu1 %v18154_v11 }
 0x669   :  { %4737 = vmatprep.subr.bf16.mxu0 %v18155_v23  ;;  %4778 = vmatprep.subr.bf16.mxu1 %v18156_v20  ;;  %v18176_v23 = vld [vmem:[#allocation5_spill] sm:$0xff] }
 0x66c   :  { %4738 = vmatpush2.bf16.msra.mxu0 %v18157_v51  ;;  %4779 = vmatpush2.bf16.msra.mxu1 %v18158_v33 }
 0x66d   :  { %4739 = vmatprep.subr.bf16.mxu0 %v18159_v30  ;;  %4780 = vmatprep.subr.bf16.mxu1 %v18160_v45 }
 0x670   :  { %4740 = vmatpush2.bf16.msra.mxu0 %v18161_v24  ;;  %4781 = vmatpush2.bf16.msra.mxu1 %v18162_v27  ;;  %v18177_v27 = vld [vmem:[#allocation21_spill] sm:$0xff] }
 0x671   :  { %4741 = vmatprep.subr.bf16.mxu0 %v18163_v34  ;;  %4782 = vmatprep.subr.bf16.mxu1 %v18164_v35  ;;  %v18178_v34 = vld [vmem:[#allocation20_spill] sm:$0xff] }
 0x672   :  { %v13053_v13 = vpop.eup %13052 }
 0x673   :  { %v15403_v9 = vmul.f32 %v13053_v13, %v13051_v5 }
 0x674   :  { %4742 = vmatpush2.bf16.msra.mxu0 %v18166_v47  ;;  %4783 = vmatpush2.bf16.msra.mxu1 %v18167_v40 }
 0x675   :  { %18165 = vst [vmem:[#allocation34_spill] sm:$0xff] %v15403_v9  ;;  %v4304_v36 = vpack.c.bf16 %v15403_v9, %v15403_v9  ;;  %5015 = vmatprep.subr.bf16.mxu0 %v18168_v43  ;;  %5056 = vmatprep.subr.bf16.mxu1 %v15418_v54  ;;  %v15743_v9 = vld [vmem:[%s17918_s10 + $0x24] ss:$16 sps:$4 sm:$0xff]  }
 0x676   :  { %18185 = vst [vmem:[#allocation41_spill] sm:$0xff] %v15743_v9 }
 0x677   :  { %4743 = vmatprep.mubr.bf16.mxu0 %v4304_v36  ;;  %4784 = vmatprep.mubr.bf16.mxu1 %v4304_v36 }
 0x678   :  { %4744 = vmatmul.mubr.bf16.vlgmr.msra.gmra.mxu0 %v15329_v1  ;;  %4785 = vmatmul.mubr.bf16.vlgmr.msra.gmra.mxu1 %v15329_v1  ;;  %v15430_v1 = vld [vmem:[%s17914_s8 + $0xc4] ss:$16 sps:$4 sm:$0xff]  }
 0x679   :  { %5016 = vmatpush1.bf16.msra.mxu0 %v18169_v50  ;;  %5047 = vmatprep.mubr.bf16.mxu0 %v18170_v46 }
 0x67a   :  { %5088 = vmatprep.mubr.bf16.mxu1 %v18170_v46  ;;  %5057 = vmatpush1.bf16.msra.mxu1 %v15423_v16 }
 0x67b   :  { %5017 = vmatprep.subr.bf16.mxu0 %v15430_v1  ;;  %5058 = vmatprep.subr.bf16.mxu1 %v15435_v10 }
 0x67d   :  { %5018 = vmatpush1.bf16.msra.mxu0 %v15440_v31 }
 0x67e   :  { %5059 = vmatpush1.bf16.msra.mxu1 %v15445_v53  ;;  %5019 = vmatprep.subr.bf16.mxu0 %v15454_v56 }
 0x67f   :  { %5060 = vmatprep.subr.bf16.mxu1 %v15459_v44 }
 0x681   :  { %5020 = vmatpush1.bf16.msra.mxu0 %v15464_v17 }
 0x682   :  { %5061 = vmatpush1.bf16.msra.mxu1 %v15469_v32  ;;  %5021 = vmatprep.subr.bf16.mxu0 %v15478_v42 }
 0x683   :  { %5062 = vmatprep.subr.bf16.mxu1 %v15483_v38 }
 0x685   :  { %5022 = vmatpush1.bf16.msra.mxu0 %v15488_v49 }
 0x686   :  { %5063 = vmatpush1.bf16.msra.mxu1 %v15493_v37  ;;  %5023 = vmatprep.subr.bf16.mxu0 %v15500_v61 }
 0x687   :  { %5064 = vmatprep.subr.bf16.mxu1 %v15517_v2 }
 0x689   :  { %5024 = vmatpush1.bf16.msra.mxu0 %v15507_v8 }
 0x68a   :  { %5065 = vmatpush1.bf16.msra.mxu1 %v15512_v12  ;;  %5025 = vmatprep.subr.bf16.mxu0 %v15523_v63 }
 0x68b   :  { %5066 = vmatprep.subr.bf16.mxu1 %v15528_v59 }
 0x68d   :  { %5026 = vmatpush1.bf16.msra.mxu0 %v15536_v52 }
 0x68e   :  { %5067 = vmatpush1.bf16.msra.mxu1 %v15541_v0  ;;  %5027 = vmatprep.subr.bf16.mxu0 %v18171_v29 }
 0x68f   :  { %5068 = vmatprep.subr.bf16.mxu1 %v15548_v14 }
 0x691   :  { %5028 = vmatpush1.bf16.msra.mxu0 %v18172_v22 }
 0x692   :  { %5069 = vmatpush1.bf16.msra.mxu1 %v15555_v4  ;;  %5029 = vmatprep.subr.bf16.mxu0 %v18173_v15 }
 0x693   :  { %5070 = vmatprep.subr.bf16.mxu1 %v15562_v18 }
 0x695   :  { %5030 = vmatpush1.bf16.msra.mxu0 %v18174_v7 }
 0x696   :  { %5071 = vmatpush1.bf16.msra.mxu1 %v15569_v3  ;;  %5532 = vmatprep.subr.bf16.mxu0 %v15578_v57 }
 0x697   :  { %5573 = vmatprep.subr.bf16.mxu1 %v15583_v62 }
 0x6f7   :  { %v4228_v6 = vpop.f32.mrf.mxu0  ;;  %v4269_v55 = vpop.f32.mrf.mxu1 }
 0x6f8   :  { %v4276_v19 = vadd.f32 %v4228_v6, %v18175_v41  ;;  %v4278_v35 = vadd.f32 %v4269_v55, %v18178_v34 }
 0x6f9   :  { %v4230_v25 = vpop.f32.mrf.mxu0  ;;  %v4271_v21 = vpop.f32.mrf.mxu1 }
 0x6fa   :  { %v10820_v11 = vmul.f32 -1.442695, %v4276_v19  ;;  %v4277_v20 = vadd.f32 %v4230_v25, %v18176_v23  ;;  %v4279_v5 = vadd.f32 %v4271_v21, %v18177_v27  ;;  %v15603_v23 = vld [vmem:[%s17918_s10 + $0xe8] ss:$16 sps:$4 sm:$0xff]   ;;  %v15646_v27 = vld [vmem:[%s17918_s10 + $0xac] ss:$16 sps:$4 sm:$0xff]  }
 0x6fb   :  { %v4232_v51 = vpop.f32.mrf.mxu0  ;;  %v4273_v33 = vpop.f32.mrf.mxu1 }
 0x6fc   :  { %13054 = vpow2.f32 %v10820_v11  ;;  %v10821_v30 = vmul.f32 -1.442695, %v4277_v20  ;;  %v10822_v13 = vmul.f32 -1.442695, %v4279_v5  ;;  %v15598_v11 = vld [vmem:[%s17918_s10 + $0xe0] ss:$16 sps:$4 sm:$0xff]  }
 0x6fd   :  { %v4233_v45 = vpop.f32.mrf.mxu0  ;;  %v4274_v24 = vpop.f32.mrf.mxu1  ;;  %v15615_v51 = vld [vmem:[%s17918_s10 + $0xcc] ss:$16 sps:$4 sm:$0xff]   ;;  %v15622_v33 = vld [vmem:[%s17919_s11] sm:$0xf] }
 0x6fe   :  { %13056 = vpow2.f32 %v10821_v30  ;;  %v15629_v30 = vld [vmem:[%s17918_s10 + $0xc0] ss:$16 sps:$4 sm:$0xff]   ;;  %v15634_v45 = vld [vmem:[%s17918_s10 + $0xc8] ss:$16 sps:$4 sm:$0xff]   ;;  %v15641_v24 = vld [vmem:[%s17918_s10 + $0xa4] ss:$16 sps:$4 sm:$0xff]   ;;  %v4374_v5 = vrot.slane %v15622_v33, %v14703_v26  ;;  %v4378_v34 = vrot.slane %v15622_v33, %v14715_v58 }
 0x6ff   :  { %13058 = vtanh.f32 %v4278_v35  ;;  %v15657_v35 = vld [vmem:[%s17918_s10 + $0xa0] ss:$16 sps:$4 sm:$0xff]  }
 0x700   :  { %13060 = vpow2.f32 %v10822_v13  ;;  %v15662_v13 = vld [vmem:[%s17918_s10 + $0xa8] ss:$16 sps:$4 sm:$0xff]  }
 0x709   :  { %v13055_v47 = vpop.eup %13054 }
 0x70a   :  { %v4283_v40 = vadd.f32 1.0, %v13055_v47 }
 0x70b   :  { %v13057_v36 = vpop.eup %13056 }
 0x70c   :  { %13062 = vrcp.f32 %v4283_v40  ;;  %v4289_v43 = vadd.f32 1.0, %v13057_v36  ;;  %v13059_v50 = vpop.eup %13058  ;;  %v15669_v36 = vld [vmem:[%s17918_s10 + $0x84] ss:$16 sps:$4 sm:$0xff]  }
 0x70d   :  { %v13061_v29 = vpop.eup %13060 }
 0x70e   :  { %13064 = vrcp.f32 %v4289_v43  ;;  %v4296_v6 = vadd.f32 1.0, %v13061_v29  ;;  %v15674_v43 = vld [vmem:[%s17918_s10 + $0x8c] ss:$16 sps:$4 sm:$0xff]  }
 0x710   :  { %13066 = vrcp.f32 %v4296_v6  ;;  %v15681_v6 = vld [vmem:[%s17918_s10 + $0x80] ss:$16 sps:$4 sm:$0xff]  }
 0x719   :  { %v13063_v22 = vpop.eup %13062 }
 0x71a   :  { %v4300_v15 = vmul.f32 %v13063_v22, %v13059_v50 }
 0x71b   :  { %v13065_v7 = vpop.eup %13064 }
 0x71c   :  { %v4299_v41 = vmul.f32 %v13065_v7, %v15326_v39  ;;  %v15610_v39 = vld [vmem:[%s17918_s10 + $0xc4] ss:$16 sps:$4 sm:$0xff]  }
 0x71d   :  { %v13067_v55 = vpop.eup %13066 }
 0x71e   :  { %v15592_v19 = vadd.f32 %v4300_v15, %v4299_v41  ;;  %v15686_v41 = vld [vmem:[%s17918_s10 + $0x88] ss:$16 sps:$4 sm:$0xff]  }
 0x720   :  { %13068 = vtanh.f32 %v15592_v19 }
 0x72d   :  { %v13069_v25 = vpop.eup %13068 }
 0x72e   :  { %v4303_v21 = vmul.f32 %v13069_v25, %v13067_v55 }
 0x730   :  { %v15605_v20 = vpack.c.bf16 %v4303_v21, %v4303_v21  ;;  %v15693_v21 = vld [vmem:[%s17918_s10 + $0x64] ss:$16 sps:$4 sm:$0xff]  }
 0x732   :  { %5048 = vmatmul.mubr.bf16.vlgmr.msra.gmra.mxu0 %v15605_v20  ;;  %5089 = vmatmul.mubr.bf16.vlgmr.msra.gmra.mxu1 %v15605_v20 }
 0x733   :  { %5533 = vmatpush1.bf16.msra.mxu0 %v15598_v11  ;;  %5574 = vmatpush1.bf16.msra.mxu1 %v15603_v23 }
 0x734   :  { %5534 = vmatprep.subr.bf16.mxu0 %v15610_v39  ;;  %5575 = vmatprep.subr.bf16.mxu1 %v15615_v51 }
 0x737   :  { %5535 = vmatpush1.bf16.msra.mxu0 %v15629_v30  ;;  %5576 = vmatpush1.bf16.msra.mxu1 %v15634_v45 }
 0x738   :  { %v4745_v47 = vpop.f32.mrf.mxu0  ;;  %v4786_v40 = vpop.f32.mrf.mxu1  ;;  %5536 = vmatprep.subr.bf16.mxu0 %v15641_v24  ;;  %5577 = vmatprep.subr.bf16.mxu1 %v15646_v27 }
 0x739   :  { %v4746_v50 = vadd.f32 %v4745_v47, %v4374_v5  ;;  %v15698_v5 = vld [vmem:[%s17918_s10 + $0x6c] ss:$16 sps:$4 sm:$0xff]  }
 0x73a   :  { %v4747_v29 = vpop.f32.mrf.mxu0  ;;  %v4788_v22 = vpop.f32.mrf.mxu1 }
 0x73b   :  { %v10887_v15 = vmul.f32 -1.442695, %v4746_v50  ;;  %v4748_v7 = vadd.f32 %v4747_v29, %v4378_v34  ;;  %5537 = vmatpush1.bf16.msra.mxu0 %v15657_v35  ;;  %5578 = vmatpush1.bf16.msra.mxu1 %v15662_v13  ;;  %v15705_v29 = vld [vmem:[%s17918_s10 + $0x60] ss:$16 sps:$4 sm:$0xff]  }
 0x73c   :  { %v4749_v55 = vpop.f32.mrf.mxu0  ;;  %v4790_v25 = vpop.f32.mrf.mxu1  ;;  %5538 = vmatprep.subr.bf16.mxu0 %v15669_v36  ;;  %5579 = vmatprep.subr.bf16.mxu1 %v15674_v43  ;;  %18179 = vst [vmem:[#allocation35_spill] sm:$0xff] %v15705_v29 }
 0x73d   :  { %13070 = vpow2.f32 %v10887_v15  ;;  %v10888_v34 = vmul.f32 -1.442695, %v4748_v7  ;;  %v15710_v55 = vld [vmem:[%s17918_s10 + $0x68] ss:$16 sps:$4 sm:$0xff]   ;;  %v4386_v15 = vrot.slane %v15622_v33, %v14775_v28  ;;  %v15719_v7 = vld [vmem:[%s17918_s10 + $0x44] ss:$16 sps:$4 sm:$0xff]  }
 0x73e   :  { %v4750_v47 = vpop.f32.mrf.mxu0  ;;  %v4791_v50 = vpop.f32.mrf.mxu1  ;;  %18180 = vst [vmem:[#allocation36_spill] sm:$0xff] %v15710_v55  ;;  %18181 = vst [vmem:[#allocation37_spill] sm:$0xff] %v15719_v7  ;;  %v15724_v25 = vld [vmem:[%s17918_s10 + $0x4c] ss:$16 sps:$4 sm:$0xff]  }
 0x73f   :  { %13072 = vpow2.f32 %v10888_v34  ;;  %5539 = vmatpush1.bf16.msra.mxu0 %v15681_v6  ;;  %5580 = vmatpush1.bf16.msra.mxu1 %v15686_v41  ;;  %18182 = vst [vmem:[#allocation38_spill] sm:$0xff] %v15724_v25  ;;  %v15731_v34 = vld [vmem:[%s17918_s10 + $0x40] ss:$16 sps:$4 sm:$0xff]   ;;  %v15736_v47 = vld [vmem:[%s17918_s10 + $0x48] ss:$16 sps:$4 sm:$0xff]   ;;  %v4789_v50 = vadd.f32 %v4788_v22, %v4386_v15 }
 0x740   :  { %5540 = vmatprep.subr.bf16.mxu0 %v15693_v21  ;;  %5581 = vmatprep.subr.bf16.mxu1 %v15698_v5  ;;  %18183 = vst [vmem:[#allocation39_spill] sm:$0xff] %v15731_v34  ;;  %18184 = vst [vmem:[#allocation40_spill] sm:$0xff] %v15736_v47  ;;  %v15757_v22 = vld [vmem:[%s17918_s10 + $0x20] ss:$16 sps:$4 sm:$0xff]   ;;  %v15762_v15 = vld [vmem:[%s17918_s10 + $0x28] ss:$16 sps:$4 sm:$0xff]  }
 0x741   :  { %18187 = vst [vmem:[#allocation43_spill] sm:$0xff] %v15757_v22  ;;  %18188 = vst [vmem:[#allocation44_spill] sm:$0xff] %v15762_v15 }
 0x743   :  { %5541 = vmatpush1.bf16.msra.mxu0 %v15705_v29  ;;  %5582 = vmatpush1.bf16.msra.mxu1 %v15710_v55  ;;  %v15748_v55 = vld [vmem:[%s17918_s10 + $0x2c] ss:$16 sps:$4 sm:$0xff]   ;;  %v4382_v29 = vrot.slane %v15622_v33, %v14773_v48  ;;  %v15769_v33 = vld [vmem:[%s17918_s10 + $0x4] ss:$16 sps:$4 sm:$0xff]  }
 0x744   :  { %5542 = vmatprep.subr.bf16.mxu0 %v15719_v7  ;;  %5583 = vmatprep.subr.bf16.mxu1 %v15724_v25  ;;  %18186 = vst [vmem:[#allocation42_spill] sm:$0xff] %v15748_v55  ;;  %v10889_v25 = vmul.f32 -1.442695, %v4789_v50  ;;  %18189 = vst [vmem:[#allocation45_spill] sm:$0xff] %v15769_v33  ;;  %v15781_v50 = vld [vmem:[%s17918_s10] ss:$16 sps:$4 sm:$0xff]  }
 0x745   :  { %v4787_v48 = vadd.f32 %v4786_v40, %v4382_v29  ;;  %18191 = vst [vmem:[#allocation47_spill] sm:$0xff] %v15781_v50  ;;  %v15793_v40 = vld [vmem:[%s17918_s10 + $0x1e4] ss:$16 sps:$4 sm:$0xff]   ;;  %v15798_v29 = vld [vmem:[%s17918_s10 + $0x1ec] ss:$16 sps:$4 sm:$0xff]  }
 0x746   :  { %13074 = vpow2.f32 %v10889_v25  ;;  %18193 = vst [vmem:[#allocation49_spill] sm:$0xff] %v15793_v40  ;;  %18194 = vst [vmem:[#allocation50_spill] sm:$0xff] %v15798_v29  ;;  %v15805_v25 = vld [vmem:[%s17918_s10 + $0x1e0] ss:$16 sps:$4 sm:$0xff]  }
 0x747   :  { %5543 = vmatpush1.bf16.msra.mxu0 %v15731_v34  ;;  %5584 = vmatpush1.bf16.msra.mxu1 %v15736_v47  ;;  %v15774_v47 = vld [vmem:[%s17918_s10 + $0xc] ss:$16 sps:$4 sm:$0xff]   ;;  %18195 = vst [vmem:[#allocation51_spill] sm:$0xff] %v15805_v25 }
 0x748   :  { %5544 = vmatprep.subr.bf16.mxu0 %v15743_v9  ;;  %5585 = vmatprep.subr.bf16.mxu1 %v15748_v55  ;;  %18190 = vst [vmem:[#allocation46_spill] sm:$0xff] %v15774_v47  ;;  %v15786_v55 = vld [vmem:[%s17918_s10 + $0x8] ss:$16 sps:$4 sm:$0xff]  }
 0x749   :  { %18192 = vst [vmem:[#allocation48_spill] sm:$0xff] %v15786_v55 }
 0x74a   :  { %v13071_v34 = vpop.eup %13070 }
 0x74b   :  { %v4796_v7 = vadd.f32 1.0, %v13071_v34  ;;  %5545 = vmatpush1.bf16.msra.mxu0 %v15757_v22  ;;  %5586 = vmatpush1.bf16.msra.mxu1 %v15762_v15 }
 0x74c   :  { %v13073_v9 = vpop.eup %13072  ;;  %5546 = vmatprep.subr.bf16.mxu0 %v15769_v33  ;;  %5587 = vmatprep.subr.bf16.mxu1 %v15774_v47  ;;  %v15810_v47 = vld [vmem:[%s17918_s10 + $0x1e8] ss:$16 sps:$4 sm:$0xff]  }
 0x74d   :  { %13076 = vrcp.f32 %v4796_v7  ;;  %v4802_v34 = vadd.f32 1.0, %v13073_v9  ;;  %18196 = vst [vmem:[#allocation52_spill] sm:$0xff] %v15810_v47  ;;  %v15822_v9 = vld [vmem:[%s17918_s10 + $0x1cc] ss:$16 sps:$4 sm:$0xff]   ;;  %v15829_v7 = vld [vmem:[%s17918_s10 + $0x1c0] ss:$16 sps:$4 sm:$0xff]  }
 0x74e   :  { %13078 = vtanh.f32 %v4787_v48  ;;  %v15817_v48 = vld [vmem:[%s17918_s10 + $0x1c4] ss:$16 sps:$4 sm:$0xff]   ;;  %18198 = vst [vmem:[#allocation54_spill] sm:$0xff] %v15822_v9  ;;  %18199 = vst [vmem:[#allocation55_spill] sm:$0xff] %v15829_v7 }
 0x74f   :  { %13080 = vrcp.f32 %v4802_v34  ;;  %5547 = vmatpush1.bf16.msra.mxu0 %v15781_v50  ;;  %5588 = vmatpush1.bf16.msra.mxu1 %v15786_v55  ;;  %18197 = vst [vmem:[#allocation53_spill] sm:$0xff] %v15817_v48  ;;  %v15834_v34 = vld [vmem:[%s17918_s10 + $0x1c8] ss:$16 sps:$4 sm:$0xff]  }
 0x750   :  { %5548 = vmatprep.subr.bf16.mxu0 %v15793_v40  ;;  %5589 = vmatprep.subr.bf16.mxu1 %v15798_v29  ;;  %18200 = vst [vmem:[#allocation56_spill] sm:$0xff] %v15834_v34 }
 0x753   :  { %5549 = vmatpush2.bf16.msra.mxu0 %v15805_v25  ;;  %5590 = vmatpush2.bf16.msra.mxu1 %v15810_v47  ;;  %v15841_v25 = vld [vmem:[%s17918_s10 + $0x1a4] ss:$16 sps:$4 sm:$0xff]   ;;  %v15846_v47 = vld [vmem:[%s17918_s10 + $0x1ac] ss:$16 sps:$4 sm:$0xff]   ;;  %v13075_v29 = vpop.eup %13074 }
 0x754   :  { %5550 = vmatprep.subr.bf16.mxu0 %v15817_v48  ;;  %5591 = vmatprep.subr.bf16.mxu1 %v15822_v9  ;;  %18201 = vst [vmem:[#allocation57_spill] sm:$0xff] %v15841_v25  ;;  %18202 = vst [vmem:[#allocation58_spill] sm:$0xff] %v15846_v47  ;;  %v15853_v48 = vld [vmem:[%s17918_s10 + $0x1a0] ss:$16 sps:$4 sm:$0xff]   ;;  %v15858_v9 = vld [vmem:[%s17918_s10 + $0x1a8] ss:$16 sps:$4 sm:$0xff]  }
 0x755   :  { %18203 = vst [vmem:[#allocation59_spill] sm:$0xff] %v15853_v48  ;;  %18204 = vst [vmem:[#allocation60_spill] sm:$0xff] %v15858_v9  ;;  %v4809_v33 = vadd.f32 1.0, %v13075_v29  ;;  %v15904_v29 = vld [vmem:[%s17918_s10 + $0x160] ss:$16 sps:$4 sm:$0xff]  }
 0x757   :  { %5551 = vmatpush2.bf16.msra.mxu0 %v15829_v7  ;;  %5592 = vmatpush2.bf16.msra.mxu1 %v15834_v34  ;;  %v15865_v7 = vld [vmem:[%s17918_s10 + $0x184] ss:$16 sps:$4 sm:$0xff]   ;;  %v15870_v34 = vld [vmem:[%s17918_s10 + $0x18c] ss:$16 sps:$4 sm:$0xff]   ;;  %13082 = vrcp.f32 %v4809_v33 }
 0x758   :  { %5552 = vmatprep.subr.bf16.mxu0 %v15841_v25  ;;  %5593 = vmatprep.subr.bf16.mxu1 %v15846_v47  ;;  %18205 = vst [vmem:[#allocation61_spill] sm:$0xff] %v15870_v34  ;;  %v15877_v47 = vld [vmem:[%s17918_s10 + $0x180] ss:$16 sps:$4 sm:$0xff]   ;;  %v15882_v25 = vld [vmem:[%s17918_s10 + $0x188] ss:$16 sps:$4 sm:$0xff]  }
 0x759   :  { %v15941_v33 = vld [vmem:[%s17918_s10 + $0x124] ss:$16 sps:$4 sm:$0xff]  }
 0x75a   :  { %v13077_v40 = vpop.eup %13076  ;;  %18211 = vst [vmem:[#allocation21_spill] sm:$0xff] %v15941_v33 }
 0x75b   :  { %v13079_v55 = vpop.eup %13078  ;;  %5553 = vmatpush2.bf16.msra.mxu0 %v15853_v48  ;;  %5594 = vmatpush2.bf16.msra.mxu1 %v15858_v9  ;;  %v15889_v9 = vld [vmem:[%s17918_s10 + $0x164] ss:$16 sps:$4 sm:$0xff]   ;;  %v15894_v48 = vld [vmem:[%s17918_s10 + $0x16c] ss:$16 sps:$4 sm:$0xff]  }
 0x75c   :  { %v13081_v50 = vpop.eup %13080  ;;  %5554 = vmatprep.subr.bf16.mxu0 %v15865_v7  ;;  %5595 = vmatprep.subr.bf16.mxu1 %v15870_v34  ;;  %v4813_v15 = vmul.f32 %v13079_v55, %v13077_v40  ;;  %v15909_v34 = vld [vmem:[%s17918_s10 + $0x168] ss:$16 sps:$4 sm:$0xff]   ;;  %v15921_v55 = vld [vmem:[%s17918_s10 + $0x14c] ss:$16 sps:$4 sm:$0xff]   ;;  %v15953_v40 = vld [vmem:[%s17918_s10 + $0x120] ss:$16 sps:$4 sm:$0xff]  }
 0x75d   :  { %v4812_v22 = vmul.f32 %v13081_v50, %v15384_v60  ;;  %18206 = vst [vmem:[#allocation62_spill] sm:$0xff] %v15909_v34  ;;  %v15916_v60 = vld [vmem:[%s17918_s10 + $0x144] ss:$16 sps:$4 sm:$0xff]   ;;  %18208 = vst [vmem:[#allocation64_spill] sm:$0xff] %v15921_v55  ;;  %v15946_v50 = vld [vmem:[%s17918_s10 + $0x12c] ss:$16 sps:$4 sm:$0xff]  }
 0x75e   :  { %18207 = vst [vmem:[#allocation63_spill] sm:$0xff] %v15916_v60  ;;  %18212 = vst [vmem:[#allocation20_spill] sm:$0xff] %v15946_v50 }
 0x75f   :  { %v15897_v28 = vadd.f32 %v4813_v15, %v4812_v22  ;;  %5555 = vmatpush2.bf16.msra.mxu0 %v15877_v47  ;;  %5596 = vmatpush2.bf16.msra.mxu1 %v15882_v25  ;;  %v15929_v22 = vld [vmem:[%s17918_s10 + $0x140] ss:$16 sps:$4 sm:$0xff]   ;;  %v15934_v15 = vld [vmem:[%s17918_s10 + $0x148] ss:$16 sps:$4 sm:$0xff]   ;;  %18213 = vst [vmem:[#allocation65_spill] sm:$0xff] %v15953_v40 }
 0x760   :  { %5556 = vmatprep.subr.bf16.mxu0 %v15889_v9  ;;  %5597 = vmatprep.subr.bf16.mxu1 %v15894_v48  ;;  %18209 = vst [vmem:[#allocation4_spill] sm:$0xff] %v15929_v22  ;;  %18210 = vst [vmem:[#allocation5_spill] sm:$0xff] %v15934_v15 }
 0x761   :  { %13084 = vtanh.f32 %v15897_v28 }
 0x763   :  { %5557 = vmatpush2.bf16.msra.mxu0 %v15904_v29  ;;  %5598 = vmatpush2.bf16.msra.mxu1 %v15909_v34 }
 0x764   :  { %5558 = vmatprep.subr.bf16.mxu0 %v15916_v60  ;;  %5599 = vmatprep.subr.bf16.mxu1 %v15921_v55  ;;  %v15958_v55 = vld [vmem:[%s17918_s10 + $0x128] ss:$16 sps:$4 sm:$0xff]   ;;  %v13083_v60 = vpop.eup %13082 }
 0x765   :  { %18214 = vst [vmem:[#allocation66_spill] sm:$0xff] %v15958_v55 }
 0x767   :  { %5559 = vmatpush2.bf16.msra.mxu0 %v15929_v22  ;;  %5600 = vmatpush2.bf16.msra.mxu1 %v15934_v15  ;;  %v15965_v22 = vld [vmem:[%s17918_s10 + $0x104] ss:$16 sps:$4 sm:$0xff]   ;;  %v15970_v15 = vld [vmem:[%s17918_s10 + $0x10c] ss:$16 sps:$4 sm:$0xff]  }
 0x768   :  { %5560 = vmatprep.subr.bf16.mxu0 %v15941_v33  ;;  %5601 = vmatprep.subr.bf16.mxu1 %v15946_v50  ;;  %v15977_v33 = vld [vmem:[%s17918_s10 + $0x100] ss:$16 sps:$4 sm:$0xff]   ;;  %v15982_v50 = vld [vmem:[%s17918_s10 + $0x108] ss:$16 sps:$4 sm:$0xff]  }
 0x76b   :  { %5561 = vmatpush2.bf16.msra.mxu0 %v15953_v40  ;;  %5602 = vmatpush2.bf16.msra.mxu1 %v15958_v55 }
 0x76c   :  { %5562 = vmatprep.subr.bf16.mxu0 %v15965_v22  ;;  %5603 = vmatprep.subr.bf16.mxu1 %v15970_v15 }
 0x76e   :  { %v13085_v34 = vpop.eup %13084 }
 0x76f   :  { %5563 = vmatpush2.bf16.msra.mxu0 %v15977_v33  ;;  %5604 = vmatpush2.bf16.msra.mxu1 %v15982_v50  ;;  %v15988_v55 = vmul.f32 %v13085_v34, %v13083_v60 }
 0x770   :  { %5877 = vmatprep.subr.bf16.mxu1 %v15418_v54  ;;  %v16012_v54 = vld [vmem:[%s17914_s8 + $0xe4] ss:$16 sps:$4 sm:$0xff]  }
 0x771   :  { %18215 = vst [vmem:[#allocation67_spill] sm:$0xff] %v15988_v55  ;;  %v5125_v40 = vpack.c.bf16 %v15988_v55, %v15988_v55  ;;  %5836 = vmatprep.subr.bf16.mxu0 %v16012_v54  ;;  %v16445_v55 = vld [vmem:[%s17918_s10 + $0x60] ss:$16 sps:$4 sm:$0xff]  }
 0x773   :  { %5564 = vmatprep.mubr.bf16.mxu0 %v5125_v40  ;;  %5605 = vmatprep.mubr.bf16.mxu1 %v5125_v40 }
 0x774   :  { %5565 = vmatmul.mubr.bf16.vlgmr.msra.gmra.mxu0 %v15605_v20  ;;  %5606 = vmatmul.mubr.bf16.vlgmr.msra.gmra.mxu1 %v15605_v20 }
 0x775   :  { %5878 = vmatpush1.bf16.msra.mxu1 %v15423_v16  ;;  %5868 = vmatprep.mubr.bf16.mxu0 %v18170_v46  ;;  %v16018_v16 = vld [vmem:[%s17914_s8 + $0xe0] ss:$16 sps:$4 sm:$0xff]  }
 0x776   :  { %5879 = vmatprep.subr.bf16.mxu1 %v15435_v10  ;;  %5909 = vmatprep.mubr.bf16.mxu1 %v18170_v46  ;;  %v16043_v10 = vld [vmem:[%s17914_s8 + $0x20] ss:$16 sps:$4 sm:$0xff]  }
 0x777   :  { %5837 = vmatpush1.bf16.msra.mxu0 %v16018_v16 }
 0x778   :  { %5838 = vmatprep.subr.bf16.mxu0 %v15430_v1  ;;  %v16037_v1 = vld [vmem:[%s17914_s8 + $0x24] ss:$16 sps:$4 sm:$0xff]  }
 0x779   :  { %5880 = vmatpush1.bf16.msra.mxu1 %v15445_v53  ;;  %v16055_v53 = vld [vmem:[%s17914_s8] ss:$16 sps:$4 sm:$0xff]  }
 0x77a   :  { %5881 = vmatprep.subr.bf16.mxu1 %v15459_v44 }
 0x77b   :  { %5839 = vmatpush1.bf16.msra.mxu0 %v15440_v31  ;;  %v16049_v31 = vld [vmem:[%s17914_s8 + $0x4] ss:$16 sps:$4 sm:$0xff]  }
 0x77c   :  { %5840 = vmatprep.subr.bf16.mxu0 %v15454_v56 }
 0x77d   :  { %5882 = vmatpush1.bf16.msra.mxu1 %v15469_v32 }
 0x77e   :  { %5883 = vmatprep.subr.bf16.mxu1 %v15483_v38 }
 0x77f   :  { %5841 = vmatpush1.bf16.msra.mxu0 %v15464_v17  ;;  %v18216_v17 = vld [vmem:[#allocation6_spill] sm:$0xff] }
 0x780   :  { %5842 = vmatprep.subr.bf16.mxu0 %v15478_v42 }
 0x781   :  { %5884 = vmatpush1.bf16.msra.mxu1 %v15493_v37  ;;  %v18217_v37 = vld [vmem:[#allocation7_spill] sm:$0xff] }
 0x782   :  { %5885 = vmatprep.subr.bf16.mxu1 %v15517_v2 }
 0x783   :  { %5843 = vmatpush1.bf16.msra.mxu0 %v15488_v49 }
 0x784   :  { %5844 = vmatprep.subr.bf16.mxu0 %v15500_v61 }
 0x785   :  { %5886 = vmatpush1.bf16.msra.mxu1 %v15512_v12 }
 0x786   :  { %5887 = vmatprep.subr.bf16.mxu1 %v15528_v59 }
 0x787   :  { %5845 = vmatpush1.bf16.msra.mxu0 %v15507_v8 }
 0x788   :  { %5846 = vmatprep.subr.bf16.mxu0 %v15523_v63 }
 0x789   :  { %5888 = vmatpush1.bf16.msra.mxu1 %v15541_v0 }
 0x78a   :  { %5889 = vmatprep.subr.bf16.mxu1 %v15548_v14  ;;  %v18219_v14 = vld [vmem:[#allocation22_spill] sm:$0xff] }
 0x78b   :  { %5847 = vmatpush1.bf16.msra.mxu0 %v15536_v52  ;;  %v18218_v52 = vld [vmem:[#allocation23_spill] sm:$0xff] }
 0x78c   :  { %5848 = vmatprep.subr.bf16.mxu0 %v16037_v1  ;;  %18264 = vst [vmem:[#allocation23_spill] sm:$0xff] %v16445_v55 }
 0x78d   :  { %5890 = vmatpush1.bf16.msra.mxu1 %v15555_v4 }
 0x78e   :  { %5891 = vmatprep.subr.bf16.mxu1 %v15562_v18 }
 0x78f   :  { %5849 = vmatpush1.bf16.msra.mxu0 %v16043_v10 }
 0x790   :  { %5850 = vmatprep.subr.bf16.mxu0 %v16049_v31 }
 0x791   :  { %5892 = vmatpush1.bf16.msra.mxu1 %v15569_v3 }
 0x792   :  { %6394 = vmatprep.subr.bf16.mxu1 %v15583_v62 }
 0x793   :  { %5851 = vmatpush1.bf16.msra.mxu0 %v16055_v53 }
 0x794   :  { %6353 = vmatprep.subr.bf16.mxu0 %v15578_v57 }
 0x7f2   :  { %v5049_v56 = vpop.f32.mrf.mxu0  ;;  %v5090_v44 = vpop.f32.mrf.mxu1 }
 0x7f3   :  { %v5097_v32 = vadd.f32 %v5049_v56, %v18216_v17  ;;  %v5099_v4 = vadd.f32 %v5090_v44, %v18219_v14  ;;  %v18224_v14 = vld [vmem:[#allocation38_spill] sm:$0xff] }
 0x7f4   :  { %v5051_v42 = vpop.f32.mrf.mxu0  ;;  %v5092_v38 = vpop.f32.mrf.mxu1 }
 0x7f5   :  { %v10922_v49 = vmul.f32 -1.442695, %v5097_v32  ;;  %v5098_v61 = vadd.f32 %v5051_v42, %v18217_v37  ;;  %v5100_v0 = vadd.f32 %v5092_v38, %v18218_v52 }
 0x7f6   :  { %v5053_v8 = vpop.f32.mrf.mxu0  ;;  %v5094_v12 = vpop.f32.mrf.mxu1 }
 0x7f7   :  { %13086 = vpow2.f32 %v10922_v49  ;;  %v10923_v2 = vmul.f32 -1.442695, %v5098_v61  ;;  %v10924_v18 = vmul.f32 -1.442695, %v5100_v0  ;;  %v18223_v0 = vld [vmem:[#allocation37_spill] sm:$0xff] }
 0x7f8   :  { %v5054_v63 = vpop.f32.mrf.mxu0  ;;  %v5095_v59 = vpop.f32.mrf.mxu1 }
 0x7f9   :  { %13088 = vpow2.f32 %v10923_v2 }
 0x7fa   :  { %13090 = vtanh.f32 %v5099_v4 }
 0x7fb   :  { %13092 = vpow2.f32 %v10924_v18  ;;  %v18225_v18 = vld [vmem:[#allocation18_spill] sm:$0xff] }
 0x804   :  { %v13087_v3 = vpop.eup %13086 }
 0x805   :  { %v5104_v57 = vadd.f32 1.0, %v13087_v3  ;;  %v18226_v3 = vld [vmem:[#allocation39_spill] sm:$0xff] }
 0x806   :  { %v13089_v62 = vpop.eup %13088 }
 0x807   :  { %13094 = vrcp.f32 %v5104_v57  ;;  %v5110_v20 = vadd.f32 1.0, %v13089_v62  ;;  %v13091_v34 = vpop.eup %13090 }
 0x808   :  { %v13093_v60 = vpop.eup %13092 }
 0x809   :  { %13096 = vrcp.f32 %v5110_v20  ;;  %v5117_v32 = vadd.f32 1.0, %v13093_v60  ;;  %v18231_v60 = vld [vmem:[#allocation44_spill] sm:$0xff] }
 0x80b   :  { %13098 = vrcp.f32 %v5117_v32 }
 0x814   :  { %v13095_v40 = vpop.eup %13094 }
 0x815   :  { %v5121_v56 = vmul.f32 %v13095_v40, %v13091_v34  ;;  %v18230_v34 = vld [vmem:[#allocation43_spill] sm:$0xff] }
 0x816   :  { %v13097_v17 = vpop.eup %13096 }
 0x817   :  { %v5120_v42 = vmul.f32 %v13097_v17, %v15592_v19  ;;  %v5190_v19 = vld [vmem:[%s17919_s11] sm:$0xf]  ;;  %v18233_v17 = vld [vmem:[#allocation46_spill] sm:$0xff] }
 0x818   :  { %v13099_v44 = vpop.eup %13098  ;;  %v5195_v8 = vrot.slane %v5190_v19, %v14703_v26  ;;  %v5199_v12 = vrot.slane %v5190_v19, %v14715_v58 }
 0x819   :  { %v16065_v38 = vadd.f32 %v5121_v56, %v5120_v42  ;;  %v18232_v56 = vld [vmem:[#allocation45_spill] sm:$0xff] }
 0x81b   :  { %13100 = vtanh.f32 %v16065_v38 }
 0x828   :  { %v13101_v49 = vpop.eup %13100 }
 0x829   :  { %v5124_v37 = vmul.f32 %v13101_v49, %v13099_v44  ;;  %v18234_v44 = vld [vmem:[#allocation47_spill] sm:$0xff]  ;;  %v18235_v49 = vld [vmem:[#allocation48_spill] sm:$0xff] }
 0x82b   :  { %v16068_v61 = vpack.c.bf16 %v5124_v37, %v5124_v37  ;;  %v18236_v37 = vld [vmem:[#allocation49_spill] sm:$0xff] }
 0x82d   :  { %5869 = vmatmul.mubr.bf16.vlgmr.msra.gmra.mxu0 %v16068_v61  ;;  %5910 = vmatmul.mubr.bf16.vlgmr.msra.gmra.mxu1 %v16068_v61 }
 0x82e   :  { %6354 = vmatpush1.bf16.msra.mxu0 %v15598_v11  ;;  %6395 = vmatpush1.bf16.msra.mxu1 %v15603_v23 }
 0x82f   :  { %6355 = vmatprep.subr.bf16.mxu0 %v15610_v39  ;;  %6396 = vmatprep.subr.bf16.mxu1 %v15615_v51 }
 0x832   :  { %6356 = vmatpush1.bf16.msra.mxu0 %v15629_v30  ;;  %6397 = vmatpush1.bf16.msra.mxu1 %v15634_v45 }
 0x833   :  { %6357 = vmatprep.subr.bf16.mxu0 %v15641_v24  ;;  %6398 = vmatprep.subr.bf16.mxu1 %v15646_v27 }
 0x834   :  { %v5566_v11 = vpop.f32.mrf.mxu0  ;;  %v5607_v23 = vpop.f32.mrf.mxu1 }
 0x835   :  { %v5567_v2 = vadd.f32 %v5566_v11, %v5195_v8  ;;  %v18238_v8 = vld [vmem:[#allocation51_spill] sm:$0xff]  ;;  %v18240_v11 = vld [vmem:[#allocation53_spill] sm:$0xff] }
 0x836   :  { %v5568_v63 = vpop.f32.mrf.mxu0  ;;  %v5609_v59 = vpop.f32.mrf.mxu1  ;;  %6358 = vmatpush1.bf16.msra.mxu0 %v15657_v35  ;;  %6399 = vmatpush1.bf16.msra.mxu1 %v15662_v13  ;;  %v18220_v35 = vld [vmem:[#allocation19_spill] sm:$0xff] }
 0x837   :  { %v10989_v39 = vmul.f32 -1.442695, %v5567_v2  ;;  %v5569_v51 = vadd.f32 %v5568_v63, %v5199_v12  ;;  %6359 = vmatprep.subr.bf16.mxu0 %v15669_v36  ;;  %6400 = vmatprep.subr.bf16.mxu1 %v15674_v43  ;;  %v5207_v13 = vrot.slane %v5190_v19, %v18220_v35  ;;  %v18221_v36 = vld [vmem:[#allocation35_spill] sm:$0xff]  ;;  %v18222_v43 = vld [vmem:[#allocation36_spill] sm:$0xff] }
 0x838   :  { %v5570_v30 = vpop.f32.mrf.mxu0  ;;  %v5611_v45 = vpop.f32.mrf.mxu1  ;;  %v18239_v12 = vld [vmem:[#allocation52_spill] sm:$0xff]  ;;  %v18242_v2 = vld [vmem:[#allocation55_spill] sm:$0xff] }
 0x839   :  { %13102 = vpow2.f32 %v10989_v39  ;;  %v10990_v24 = vmul.f32 -1.442695, %v5569_v51  ;;  %v5610_v4 = vadd.f32 %v5609_v59, %v5207_v13  ;;  %v18243_v63 = vld [vmem:[#allocation56_spill] sm:$0xff]  ;;  %v18244_v59 = vld [vmem:[#allocation57_spill] sm:$0xff]  ;;  %v18245_v39 = vld [vmem:[#allocation58_spill] sm:$0xff] }
 0x83a   :  { %v5571_v27 = vpop.f32.mrf.mxu0  ;;  %v5612_v52 = vpop.f32.mrf.mxu1  ;;  %6360 = vmatpush1.bf16.msra.mxu0 %v15681_v6  ;;  %6401 = vmatpush1.bf16.msra.mxu1 %v15686_v41  ;;  %v5203_v6 = vrot.slane %v5190_v19, %v18225_v18  ;;  %v18227_v41 = vld [vmem:[#allocation40_spill] sm:$0xff]  ;;  %v18237_v19 = vld [vmem:[#allocation50_spill] sm:$0xff]  ;;  %v18246_v45 = vld [vmem:[#allocation59_spill] sm:$0xff] }
 0x83b   :  { %13104 = vpow2.f32 %v10990_v24  ;;  %6361 = vmatprep.subr.bf16.mxu0 %v15693_v21  ;;  %6402 = vmatprep.subr.bf16.mxu1 %v15698_v5  ;;  %v18228_v21 = vld [vmem:[#allocation41_spill] sm:$0xff]  ;;  %v18229_v5 = vld [vmem:[#allocation42_spill] sm:$0xff]  ;;  %v10991_v57 = vmul.f32 -1.442695, %v5610_v4  ;;  %v18247_v24 = vld [vmem:[#allocation60_spill] sm:$0xff] }
 0x83c   :  { %v5608_v20 = vadd.f32 %v5607_v23, %v5203_v6  ;;  %v18241_v23 = vld [vmem:[#allocation54_spill] sm:$0xff]  ;;  %v18248_v52 = vld [vmem:[#allocation61_spill] sm:$0xff]  ;;  %v18250_v4 = vld [vmem:[#allocation63_spill] sm:$0xff] }
 0x83d   :  { %13106 = vpow2.f32 %v10991_v57  ;;  %v18254_v6 = vld [vmem:[#allocation21_spill] sm:$0xff] }
 0x83e   :  { %6362 = vmatpush1.bf16.msra.mxu0 %v18221_v36  ;;  %6403 = vmatpush1.bf16.msra.mxu1 %v18222_v43  ;;  %v16199_v57 = vld [vmem:[%s17914_s8 + $0xac] ss:$16 sps:$4 sm:$0xff]  }
 0x83f   :  { %6363 = vmatprep.subr.bf16.mxu0 %v18223_v0  ;;  %6404 = vmatprep.subr.bf16.mxu1 %v18224_v14 }
 0x842   :  { %6364 = vmatpush1.bf16.msra.mxu0 %v18226_v3  ;;  %6405 = vmatpush1.bf16.msra.mxu1 %v18227_v41  ;;  %v18257_v3 = vld [vmem:[#allocation66_spill] sm:$0xff] }
 0x843   :  { %6365 = vmatprep.subr.bf16.mxu0 %v18228_v21  ;;  %6406 = vmatprep.subr.bf16.mxu1 %v18229_v5 }
 0x846   :  { %v13103_v62 = vpop.eup %13102  ;;  %6366 = vmatpush1.bf16.msra.mxu0 %v18230_v34  ;;  %6407 = vmatpush1.bf16.msra.mxu1 %v18231_v60  ;;  %v16218_v34 = vld [vmem:[%s17914_s8 + $0x84] ss:$16 sps:$4 sm:$0xff]   ;;  %v16223_v60 = vld [vmem:[%s17914_s8 + $0x8c] ss:$16 sps:$4 sm:$0xff]  }
 0x847   :  { %v5617_v40 = vadd.f32 1.0, %v13103_v62  ;;  %6367 = vmatprep.subr.bf16.mxu0 %v18232_v56  ;;  %6408 = vmatprep.subr.bf16.mxu1 %v18233_v17  ;;  %v16204_v62 = vld [vmem:[%s17914_s8 + $0xa0] ss:$16 sps:$4 sm:$0xff]   ;;  %v16233_v56 = vld [vmem:[%s17914_s8 + $0x88] ss:$16 sps:$4 sm:$0xff]  }
 0x848   :  { %v13105_v32 = vpop.eup %13104  ;;  %v16240_v17 = vld [vmem:[%s17914_s8 + $0x64] ss:$16 sps:$4 sm:$0xff]  }
 0x849   :  { %13108 = vrcp.f32 %v5617_v40  ;;  %v5623_v42 = vadd.f32 1.0, %v13105_v32  ;;  %v16228_v40 = vld [vmem:[%s17914_s8 + $0x80] ss:$16 sps:$4 sm:$0xff]  }
 0x84a   :  { %13110 = vtanh.f32 %v5608_v20  ;;  %6368 = vmatpush1.bf16.msra.mxu0 %v18234_v44  ;;  %6409 = vmatpush1.bf16.msra.mxu1 %v18235_v49  ;;  %v13107_v51 = vpop.eup %13106  ;;  %v16209_v20 = vld [vmem:[%s17914_s8 + $0xa8] ss:$16 sps:$4 sm:$0xff]   ;;  %v16247_v32 = vld [vmem:[%s17914_s8 + $0x60] ss:$16 sps:$4 sm:$0xff]   ;;  %v16257_v44 = vld [vmem:[%s17914_s8 + $0x6c] ss:$16 sps:$4 sm:$0xff]  }
 0x84b   :  { %13112 = vrcp.f32 %v5623_v42  ;;  %6369 = vmatprep.subr.bf16.mxu0 %v18236_v37  ;;  %6410 = vmatprep.subr.bf16.mxu1 %v18237_v19  ;;  %v5630_v36 = vadd.f32 1.0, %v13107_v51  ;;  %v16252_v42 = vld [vmem:[%s17914_s8 + $0x68] ss:$16 sps:$4 sm:$0xff]   ;;  %v16263_v49 = vld [vmem:[%s17914_s8 + $0x44] ss:$16 sps:$4 sm:$0xff]  }
 0x84c   :  { %v16268_v37 = vld [vmem:[%s17914_s8 + $0x4c] ss:$16 sps:$4 sm:$0xff]   ;;  %v16276_v19 = vld [vmem:[%s17914_s8 + $0x40] ss:$16 sps:$4 sm:$0xff]  }
 0x84d   :  { %13114 = vrcp.f32 %v5630_v36 }
 0x84e   :  { %6370 = vmatpush2.bf16.msra.mxu0 %v18238_v8  ;;  %6411 = vmatpush2.bf16.msra.mxu1 %v18239_v12  ;;  %v16281_v8 = vld [vmem:[%s17914_s8 + $0x48] ss:$16 sps:$4 sm:$0xff]   ;;  %v16288_v12 = vld [vmem:[%s17914_s8 + $0x2c] ss:$16 sps:$4 sm:$0xff]  }
 0x84f   :  { %6371 = vmatprep.subr.bf16.mxu0 %v18240_v11  ;;  %6412 = vmatprep.subr.bf16.mxu1 %v18241_v23  ;;  %v16295_v11 = vld [vmem:[%s17914_s8 + $0x28] ss:$16 sps:$4 sm:$0xff]   ;;  %v16302_v23 = vld [vmem:[%s17914_s8 + $0xc] ss:$16 sps:$4 sm:$0xff]  }
 0x852   :  { %6372 = vmatpush2.bf16.msra.mxu0 %v18242_v2  ;;  %6413 = vmatpush2.bf16.msra.mxu1 %v18243_v63  ;;  %v16309_v2 = vld [vmem:[%s17914_s8 + $0x8] ss:$16 sps:$4 sm:$0xff]  }
 0x853   :  { %6373 = vmatprep.subr.bf16.mxu0 %v18244_v59  ;;  %6414 = vmatprep.subr.bf16.mxu1 %v18245_v39  ;;  %v18259_v59 = vld [vmem:[#allocation8_spill] sm:$0xff] }
 0x856   :  { %v13109_v30 = vpop.eup %13108  ;;  %6374 = vmatpush2.bf16.msra.mxu0 %v18246_v45  ;;  %6415 = vmatpush2.bf16.msra.mxu1 %v18247_v24  ;;  %v18260_v45 = vld [vmem:[#allocation9_spill] sm:$0xff] }
 0x857   :  { %v13111_v27 = vpop.eup %13110  ;;  %6375 = vmatprep.subr.bf16.mxu0 %v15865_v7  ;;  %6416 = vmatprep.subr.bf16.mxu1 %v18248_v52  ;;  %v18249_v7 = vld [vmem:[#allocation62_spill] sm:$0xff] }
 0x858   :  { %v13113_v13 = vpop.eup %13112  ;;  %v5634_v43 = vmul.f32 %v13111_v27, %v13109_v30 }
 0x859   :  { %v5633_v0 = vmul.f32 %v13113_v13, %v15897_v28  ;;  %v18251_v28 = vld [vmem:[#allocation64_spill] sm:$0xff] }
 0x85a   :  { %6376 = vmatpush2.bf16.msra.mxu0 %v15877_v47  ;;  %6417 = vmatpush2.bf16.msra.mxu1 %v15882_v25  ;;  %v18252_v47 = vld [vmem:[#allocation4_spill] sm:$0xff]  ;;  %v18253_v25 = vld [vmem:[#allocation5_spill] sm:$0xff] }
 0x85b   :  { %v16126_v14 = vadd.f32 %v5634_v43, %v5633_v0  ;;  %6377 = vmatprep.subr.bf16.mxu0 %v15889_v9  ;;  %6418 = vmatprep.subr.bf16.mxu1 %v15894_v48  ;;  %v18255_v9 = vld [vmem:[#allocation20_spill] sm:$0xff]  ;;  %v18256_v48 = vld [vmem:[#allocation65_spill] sm:$0xff] }
 0x85c   :  { %v18261_v0 = vld [vmem:[#allocation25_spill] sm:$0xff] }
 0x85d   :  { %13116 = vtanh.f32 %v16126_v14 }
 0x85e   :  { %6378 = vmatpush2.bf16.msra.mxu0 %v15904_v29  ;;  %6419 = vmatpush2.bf16.msra.mxu1 %v18249_v7  ;;  %v13115_v29 = vpop.eup %13114 }
 0x85f   :  { %6379 = vmatprep.subr.bf16.mxu0 %v18250_v4  ;;  %6420 = vmatprep.subr.bf16.mxu1 %v18251_v28  ;;  %v18262_v4 = vld [vmem:[#allocation24_spill] sm:$0xff] }
 0x862   :  { %6380 = vmatpush2.bf16.msra.mxu0 %v18252_v47  ;;  %6421 = vmatpush2.bf16.msra.mxu1 %v18253_v25 }
 0x863   :  { %6381 = vmatprep.subr.bf16.mxu0 %v18254_v6  ;;  %6422 = vmatprep.subr.bf16.mxu1 %v18255_v9 }
 0x866   :  { %6382 = vmatpush2.bf16.msra.mxu0 %v18256_v48  ;;  %6423 = vmatpush2.bf16.msra.mxu1 %v18257_v3 }
 0x867   :  { %6383 = vmatprep.subr.bf16.mxu0 %v15965_v22  ;;  %6424 = vmatprep.subr.bf16.mxu1 %v15970_v15  ;;  %v16158_v22 = vld [vmem:[%s17914_s8 + $0xec] ss:$16 sps:$4 sm:$0xff]   ;;  %v16163_v15 = vld [vmem:[%s17914_s8 + $0xe8] ss:$16 sps:$4 sm:$0xff]  }
 0x86a   :  { %v13117_v41 = vpop.eup %13116  ;;  %6384 = vmatpush2.bf16.msra.mxu0 %v15977_v33  ;;  %6425 = vmatpush2.bf16.msra.mxu1 %v15982_v50  ;;  %v16170_v33 = vld [vmem:[%s17914_s8 + $0xc4] ss:$16 sps:$4 sm:$0xff]   ;;  %v16175_v50 = vld [vmem:[%s17914_s8 + $0xcc] ss:$16 sps:$4 sm:$0xff]  }
 0x86b   :  { %v16145_v21 = vmul.f32 %v13117_v41, %v13115_v29  ;;  %6657 = vmatprep.subr.bf16.mxu0 %v16012_v54  ;;  %6698 = vmatprep.subr.bf16.mxu1 %v16158_v22  ;;  %v16180_v54 = vld [vmem:[%s17914_s8 + $0xc0] ss:$16 sps:$4 sm:$0xff]  }
 0x86d   :  { %18258 = vst [vmem:[#allocation6_spill] sm:$0xff] %v16145_v21  ;;  %v5946_v5 = vpack.c.bf16 %v16145_v21, %v16145_v21 }
 0x86f   :  { %6385 = vmatprep.mubr.bf16.mxu0 %v5946_v5  ;;  %6426 = vmatprep.mubr.bf16.mxu1 %v5946_v5 }
 0x870   :  { %6386 = vmatmul.mubr.bf16.vlgmr.msra.gmra.mxu0 %v16068_v61  ;;  %6427 = vmatmul.mubr.bf16.vlgmr.msra.gmra.mxu1 %v16068_v61  ;;  %v16194_v61 = vld [vmem:[%s17914_s8 + $0xa4] ss:$16 sps:$4 sm:$0xff]  }
 0x871   :  { %6658 = vmatpush1.bf16.msra.mxu0 %v16018_v16  ;;  %6689 = vmatprep.mubr.bf16.mxu0 %v18170_v46  ;;  %v16185_v16 = vld [vmem:[%s17914_s8 + $0xc8] ss:$16 sps:$4 sm:$0xff]  }
 0x872   :  { %6730 = vmatprep.mubr.bf16.mxu1 %v18170_v46  ;;  %6699 = vmatpush1.bf16.msra.mxu1 %v16163_v15 }
 0x873   :  { %6659 = vmatprep.subr.bf16.mxu0 %v16170_v33  ;;  %6700 = vmatprep.subr.bf16.mxu1 %v16175_v50 }
 0x875   :  { %6660 = vmatpush1.bf16.msra.mxu0 %v16180_v54 }
 0x876   :  { %6701 = vmatpush1.bf16.msra.mxu1 %v16185_v16  ;;  %6661 = vmatprep.subr.bf16.mxu0 %v16194_v61 }
 0x877   :  { %6702 = vmatprep.subr.bf16.mxu1 %v16199_v57 }
 0x879   :  { %6662 = vmatpush1.bf16.msra.mxu0 %v16204_v62 }
 0x87a   :  { %6703 = vmatpush1.bf16.msra.mxu1 %v16209_v20  ;;  %6663 = vmatprep.subr.bf16.mxu0 %v16218_v34 }
 0x87b   :  { %6704 = vmatprep.subr.bf16.mxu1 %v16223_v60 }
 0x87d   :  { %6664 = vmatpush1.bf16.msra.mxu0 %v16228_v40 }
 0x87e   :  { %6705 = vmatpush1.bf16.msra.mxu1 %v16233_v56  ;;  %6665 = vmatprep.subr.bf16.mxu0 %v16240_v17 }
 0x87f   :  { %6706 = vmatprep.subr.bf16.mxu1 %v16257_v44 }
 0x881   :  { %6666 = vmatpush1.bf16.msra.mxu0 %v16247_v32 }
 0x882   :  { %6707 = vmatpush1.bf16.msra.mxu1 %v16252_v42  ;;  %6667 = vmatprep.subr.bf16.mxu0 %v16263_v49 }
 0x883   :  { %6708 = vmatprep.subr.bf16.mxu1 %v16268_v37 }
 0x885   :  { %6668 = vmatpush1.bf16.msra.mxu0 %v16276_v19 }
 0x886   :  { %6709 = vmatpush1.bf16.msra.mxu1 %v16281_v8  ;;  %6669 = vmatprep.subr.bf16.mxu0 %v16037_v1  ;;  %v16318_v1 = vld [vmem:[%s17918_s10 + $0xe4] ss:$16 sps:$4 sm:$0xff]  }
 0x887   :  { %6710 = vmatprep.subr.bf16.mxu1 %v16288_v12 }
 0x889   :  { %6670 = vmatpush1.bf16.msra.mxu0 %v16043_v10  ;;  %v16323_v10 = vld [vmem:[%s17918_s10 + $0xec] ss:$16 sps:$4 sm:$0xff]  }
 0x88a   :  { %6711 = vmatpush1.bf16.msra.mxu1 %v16295_v11  ;;  %6671 = vmatprep.subr.bf16.mxu0 %v16049_v31 }
 0x88b   :  { %6712 = vmatprep.subr.bf16.mxu1 %v16302_v23 }
 0x88d   :  { %6672 = vmatpush1.bf16.msra.mxu0 %v16055_v53 }
 0x88e   :  { %6713 = vmatpush1.bf16.msra.mxu1 %v16309_v2  ;;  %7174 = vmatprep.subr.bf16.mxu0 %v16318_v1 }
 0x88f   :  { %7215 = vmatprep.subr.bf16.mxu1 %v16323_v10 }
 0x8ed   :  { %v5870_v31 = vpop.f32.mrf.mxu0  ;;  %v5911_v63 = vpop.f32.mrf.mxu1 }
 0x8ee   :  { %v5918_v53 = vadd.f32 %v5870_v31, %v18259_v59  ;;  %v5920_v28 = vadd.f32 %v5911_v63, %v18262_v4 }
 0x8ef   :  { %v5872_v39 = vpop.f32.mrf.mxu0  ;;  %v5913_v51 = vpop.f32.mrf.mxu1 }
 0x8f0   :  { %v11024_v30 = vmul.f32 -1.442695, %v5918_v53  ;;  %v5919_v24 = vadd.f32 %v5872_v39, %v18260_v45  ;;  %v5921_v7 = vadd.f32 %v5913_v51, %v18261_v0  ;;  %v16338_v45 = vld [vmem:[%s17918_s10 + $0xe0] ss:$16 sps:$4 sm:$0xff]   ;;  %v16381_v0 = vld [vmem:[%s17918_s10 + $0xa4] ss:$16 sps:$4 sm:$0xff]  }
 0x8f1   :  { %v5874_v27 = vpop.f32.mrf.mxu0  ;;  %v5915_v52 = vpop.f32.mrf.mxu1 }
 0x8f2   :  { %13118 = vpow2.f32 %v11024_v30  ;;  %v11025_v13 = vmul.f32 -1.442695, %v5919_v24  ;;  %v11026_v47 = vmul.f32 -1.442695, %v5921_v7  ;;  %v16343_v24 = vld [vmem:[%s17918_s10 + $0xe8] ss:$16 sps:$4 sm:$0xff]  }
 0x8f3   :  { %v5875_v36 = vpop.f32.mrf.mxu0  ;;  %v5916_v43 = vpop.f32.mrf.mxu1  ;;  %v16355_v52 = vld [vmem:[%s17918_s10 + $0xcc] ss:$16 sps:$4 sm:$0xff]  }
 0x8f4   :  { %13120 = vpow2.f32 %v11025_v13  ;;  %v16364_v13 = vld [vmem:[%s17918_s10 + $0xc0] ss:$16 sps:$4 sm:$0xff]   ;;  %v16369_v36 = vld [vmem:[%s17918_s10 + $0xc8] ss:$16 sps:$4 sm:$0xff]   ;;  %v16386_v7 = vld [vmem:[%s17918_s10 + $0xac] ss:$16 sps:$4 sm:$0xff]  }
 0x8f5   :  { %13122 = vtanh.f32 %v5920_v28  ;;  %v16374_v43 = vld [vmem:[%s17919_s11] sm:$0xf] }
 0x8f6   :  { %13124 = vpow2.f32 %v11026_v47  ;;  %v6016_v4 = vrot.slane %v16374_v43, %v14703_v26  ;;  %v16395_v28 = vld [vmem:[%s17918_s10 + $0xa0] ss:$16 sps:$4 sm:$0xff]   ;;  %v16400_v47 = vld [vmem:[%s17918_s10 + $0xa8] ss:$16 sps:$4 sm:$0xff]  }
 0x8ff   :  { %v13119_v25 = vpop.eup %13118 }
 0x900   :  { %v5925_v6 = vadd.f32 1.0, %v13119_v25  ;;  %v16407_v25 = vld [vmem:[%s17918_s10 + $0x84] ss:$16 sps:$4 sm:$0xff]  }
 0x901   :  { %v13121_v9 = vpop.eup %13120 }
 0x902   :  { %13126 = vrcp.f32 %v5925_v6  ;;  %v5931_v48 = vadd.f32 1.0, %v13121_v9  ;;  %v13123_v3 = vpop.eup %13122  ;;  %v16412_v6 = vld [vmem:[%s17918_s10 + $0x8c] ss:$16 sps:$4 sm:$0xff]   ;;  %v6020_v9 = vrot.slane %v16374_v43, %v14715_v58 }
 0x903   :  { %v13125_v29 = vpop.eup %13124  ;;  %18263 = vst [vmem:[#allocation7_spill] sm:$0xff] %v16412_v6 }
 0x904   :  { %13128 = vrcp.f32 %v5931_v48  ;;  %v5938_v59 = vadd.f32 1.0, %v13125_v29 }
 0x906   :  { %13130 = vrcp.f32 %v5938_v59 }
 0x90f   :  { %v13127_v41 = vpop.eup %13126 }
 0x910   :  { %v5942_v5 = vmul.f32 %v13127_v41, %v13123_v3  ;;  %v16421_v41 = vld [vmem:[%s17918_s10 + $0x80] ss:$16 sps:$4 sm:$0xff]  }
 0x911   :  { %v13129_v31 = vpop.eup %13128 }
 0x912   :  { %v5941_v53 = vmul.f32 %v13129_v31, %v16065_v38  ;;  %v16350_v38 = vld [vmem:[%s17918_s10 + $0xc4] ss:$16 sps:$4 sm:$0xff]  }
 0x913   :  { %v13131_v63 = vpop.eup %13130 }
 0x914   :  { %v16332_v39 = vadd.f32 %v5942_v5, %v5941_v53  ;;  %v16426_v5 = vld [vmem:[%s17918_s10 + $0x88] ss:$16 sps:$4 sm:$0xff]   ;;  %v16433_v53 = vld [vmem:[%s17918_s10 + $0x64] ss:$16 sps:$4 sm:$0xff]  }
 0x916   :  { %13132 = vtanh.f32 %v16332_v39 }
 0x923   :  { %v13133_v51 = vpop.eup %13132 }
 0x924   :  { %v5945_v30 = vmul.f32 %v13133_v51, %v13131_v63  ;;  %v16438_v63 = vld [vmem:[%s17918_s10 + $0x6c] ss:$16 sps:$4 sm:$0xff]  }
 0x926   :  { %v16345_v27 = vpack.c.bf16 %v5945_v30, %v5945_v30 }
 0x928   :  { %6690 = vmatmul.mubr.bf16.vlgmr.msra.gmra.mxu0 %v16345_v27  ;;  %6731 = vmatmul.mubr.bf16.vlgmr.msra.gmra.mxu1 %v16345_v27 }
 0x929   :  { %7175 = vmatpush1.bf16.msra.mxu0 %v16338_v45  ;;  %7216 = vmatpush1.bf16.msra.mxu1 %v16343_v24 }
 0x92a   :  { %7176 = vmatprep.subr.bf16.mxu0 %v16350_v38  ;;  %7217 = vmatprep.subr.bf16.mxu1 %v16355_v52 }
 0x92d   :  { %7177 = vmatpush1.bf16.msra.mxu0 %v16364_v13  ;;  %7218 = vmatpush1.bf16.msra.mxu1 %v16369_v36 }
 0x92e   :  { %7178 = vmatprep.subr.bf16.mxu0 %v16381_v0  ;;  %7219 = vmatprep.subr.bf16.mxu1 %v16386_v7 }
 0x930   :  { %v6387_v48 = vpop.f32.mrf.mxu0  ;;  %v6428_v3 = vpop.f32.mrf.mxu1 }
 0x931   :  { %v6388_v29 = vadd.f32 %v6387_v48, %v6016_v4  ;;  %7179 = vmatpush1.bf16.msra.mxu0 %v16395_v28  ;;  %7220 = vmatpush1.bf16.msra.mxu1 %v16400_v47 }
 0x932   :  { %v6389_v31 = vpop.f32.mrf.mxu0  ;;  %v6430_v59 = vpop.f32.mrf.mxu1  ;;  %7180 = vmatprep.subr.bf16.mxu0 %v16407_v25  ;;  %7221 = vmatprep.subr.bf16.mxu1 %v16412_v6  ;;  %v16450_v6 = vld [vmem:[%s17918_s10 + $0x68] ss:$16 sps:$4 sm:$0xff]  }
 0x933   :  { %v11091_v51 = vmul.f32 -1.442695, %v6388_v29  ;;  %v6390_v30 = vadd.f32 %v6389_v31, %v6020_v9  ;;  %18265 = vst [vmem:[#allocation22_spill] sm:$0xff] %v16450_v6  ;;  %v16457_v31 = vld [vmem:[%s17918_s10 + $0x44] ss:$16 sps:$4 sm:$0xff]  }
 0x934   :  { %v6391_v4 = vpop.f32.mrf.mxu0  ;;  %v6432_v48 = vpop.f32.mrf.mxu1  ;;  %18266 = vst [vmem:[#allocation35_spill] sm:$0xff] %v16457_v31 }
 0x935   :  { %13134 = vpow2.f32 %v11091_v51  ;;  %v11092_v21 = vmul.f32 -1.442695, %v6390_v30  ;;  %7181 = vmatpush1.bf16.msra.mxu0 %v16421_v41  ;;  %7222 = vmatpush1.bf16.msra.mxu1 %v16426_v5  ;;  %v16462_v51 = vld [vmem:[%s17918_s10 + $0x4c] ss:$16 sps:$4 sm:$0xff]   ;;  %v6028_v30 = vrot.slane %v16374_v43, %v18220_v35  ;;  %v16471_v4 = vld [vmem:[%s17918_s10 + $0x40] ss:$16 sps:$4 sm:$0xff]  }
 0x936   :  { %v6392_v29 = vpop.f32.mrf.mxu0  ;;  %v6433_v9 = vpop.f32.mrf.mxu1  ;;  %7182 = vmatprep.subr.bf16.mxu0 %v16433_v53  ;;  %7223 = vmatprep.subr.bf16.mxu1 %v16438_v63  ;;  %18267 = vst [vmem:[#allocation36_spill] sm:$0xff] %v16462_v51  ;;  %18268 = vst [vmem:[#allocation37_spill] sm:$0xff] %v16471_v4  ;;  %v16476_v48 = vld [vmem:[%s17918_s10 + $0x48] ss:$16 sps:$4 sm:$0xff]  }
 0x937   :  { %13136 = vpow2.f32 %v11092_v21  ;;  %18269 = vst [vmem:[#allocation38_spill] sm:$0xff] %v16476_v48  ;;  %v16483_v21 = vld [vmem:[%s17918_s10 + $0x24] ss:$16 sps:$4 sm:$0xff]   ;;  %v16488_v29 = vld [vmem:[%s17918_s10 + $0x2c] ss:$16 sps:$4 sm:$0xff]   ;;  %v6431_v9 = vadd.f32 %v6430_v59, %v6028_v30 }
 0x938   :  { %18270 = vst [vmem:[#allocation39_spill] sm:$0xff] %v16483_v21  ;;  %18271 = vst [vmem:[#allocation40_spill] sm:$0xff] %v16488_v29  ;;  %v16509_v59 = vld [vmem:[%s17918_s10 + $0x4] ss:$16 sps:$4 sm:$0xff]   ;;  %v16514_v30 = vld [vmem:[%s17918_s10 + $0xc] ss:$16 sps:$4 sm:$0xff]  }
 0x939   :  { %7183 = vmatpush1.bf16.msra.mxu0 %v16445_v55  ;;  %7224 = vmatpush1.bf16.msra.mxu1 %v16450_v6  ;;  %v6024_v6 = vrot.slane %v16374_v43, %v18225_v18  ;;  %18274 = vst [vmem:[#allocation43_spill] sm:$0xff] %v16514_v30  ;;  %v16521_v43 = vld [vmem:[%s17918_s10] ss:$16 sps:$4 sm:$0xff]   ;;  %v16526_v18 = vld [vmem:[%s17918_s10 + $0x8] ss:$16 sps:$4 sm:$0xff]  }
 0x93a   :  { %7184 = vmatprep.subr.bf16.mxu0 %v16457_v31  ;;  %7225 = vmatprep.subr.bf16.mxu1 %v16462_v51  ;;  %v16495_v31 = vld [vmem:[%s17918_s10 + $0x20] ss:$16 sps:$4 sm:$0xff]   ;;  %v16500_v51 = vld [vmem:[%s17918_s10 + $0x28] ss:$16 sps:$4 sm:$0xff]   ;;  %18275 = vst [vmem:[#allocation44_spill] sm:$0xff] %v16521_v43  ;;  %18276 = vst [vmem:[#allocation45_spill] sm:$0xff] %v16526_v18 }
 0x93b   :  { %18272 = vst [vmem:[#allocation41_spill] sm:$0xff] %v16495_v31  ;;  %18273 = vst [vmem:[#allocation42_spill] sm:$0xff] %v16500_v51 }
 0x93d   :  { %7185 = vmatpush1.bf16.msra.mxu0 %v16471_v4  ;;  %7226 = vmatpush1.bf16.msra.mxu1 %v16476_v48  ;;  %v11093_v48 = vmul.f32 -1.442695, %v6431_v9  ;;  %v16533_v9 = vld [vmem:[%s17918_s10 + $0x1e4] ss:$16 sps:$4 sm:$0xff]  }
 0x93e   :  { %7186 = vmatprep.subr.bf16.mxu0 %v16483_v21  ;;  %7227 = vmatprep.subr.bf16.mxu1 %v16488_v29  ;;  %v6429_v21 = vadd.f32 %v6428_v3, %v6024_v6  ;;  %18277 = vst [vmem:[#allocation46_spill] sm:$0xff] %v16533_v9  ;;  %v16545_v6 = vld [vmem:[%s17918_s10 + $0x1e0] ss:$16 sps:$4 sm:$0xff]   ;;  %v16550_v3 = vld [vmem:[%s17918_s10 + $0x1e8] ss:$16 sps:$4 sm:$0xff]  }
 0x93f   :  { %13138 = vpow2.f32 %v11093_v48  ;;  %18279 = vst [vmem:[#allocation48_spill] sm:$0xff] %v16545_v6  ;;  %18280 = vst [vmem:[#allocation49_spill] sm:$0xff] %v16550_v3  ;;  %v16569_v48 = vld [vmem:[%s17918_s10 + $0x1c0] ss:$16 sps:$4 sm:$0xff]  }
 0x940   :  { %18283 = vst [vmem:[#allocation52_spill] sm:$0xff] %v16569_v48 }
 0x941   :  { %7187 = vmatpush1.bf16.msra.mxu0 %v16495_v31  ;;  %7228 = vmatpush1.bf16.msra.mxu1 %v16500_v51  ;;  %v16538_v51 = vld [vmem:[%s17918_s10 + $0x1ec] ss:$16 sps:$4 sm:$0xff]  }
 0x942   :  { %v13135_v29 = vpop.eup %13134  ;;  %7188 = vmatprep.subr.bf16.mxu0 %v16509_v59  ;;  %7229 = vmatprep.subr.bf16.mxu1 %v16514_v30  ;;  %18278 = vst [vmem:[#allocation47_spill] sm:$0xff] %v16538_v51 }
 0x943   :  { %v6438_v31 = vadd.f32 1.0, %v13135_v29  ;;  %v16586_v29 = vld [vmem:[%s17918_s10 + $0x1ac] ss:$16 sps:$4 sm:$0xff]  }
 0x944   :  { %v13137_v4 = vpop.eup %13136  ;;  %18286 = vst [vmem:[#allocation55_spill] sm:$0xff] %v16586_v29 }
 0x945   :  { %13140 = vrcp.f32 %v6438_v31  ;;  %v6444_v55 = vadd.f32 1.0, %v13137_v4  ;;  %7189 = vmatpush1.bf16.msra.mxu0 %v16521_v43  ;;  %7230 = vmatpush1.bf16.msra.mxu1 %v16526_v18  ;;  %v16557_v31 = vld [vmem:[%s17918_s10 + $0x1c4] ss:$16 sps:$4 sm:$0xff]   ;;  %v16562_v4 = vld [vmem:[%s17918_s10 + $0x1cc] ss:$16 sps:$4 sm:$0xff]  }
 0x946   :  { %13142 = vtanh.f32 %v6429_v21  ;;  %7190 = vmatprep.subr.bf16.mxu0 %v16533_v9  ;;  %7231 = vmatprep.subr.bf16.mxu1 %v16538_v51  ;;  %18281 = vst [vmem:[#allocation50_spill] sm:$0xff] %v16557_v31  ;;  %18282 = vst [vmem:[#allocation51_spill] sm:$0xff] %v16562_v4  ;;  %v16574_v21 = vld [vmem:[%s17918_s10 + $0x1c8] ss:$16 sps:$4 sm:$0xff]  }
 0x947   :  { %13144 = vrcp.f32 %v6444_v55  ;;  %18284 = vst [vmem:[#allocation53_spill] sm:$0xff] %v16574_v21  ;;  %v16581_v55 = vld [vmem:[%s17918_s10 + $0x1a4] ss:$16 sps:$4 sm:$0xff]  }
 0x948   :  { %18285 = vst [vmem:[#allocation54_spill] sm:$0xff] %v16581_v55 }
 0x949   :  { %7191 = vmatpush2.bf16.msra.mxu0 %v16545_v6  ;;  %7232 = vmatpush2.bf16.msra.mxu1 %v16550_v3 }
 0x94a   :  { %7192 = vmatprep.subr.bf16.mxu0 %v16557_v31  ;;  %7233 = vmatprep.subr.bf16.mxu1 %v16562_v4  ;;  %v16593_v31 = vld [vmem:[%s17918_s10 + $0x1a0] ss:$16 sps:$4 sm:$0xff]   ;;  %v16598_v4 = vld [vmem:[%s17918_s10 + $0x1a8] ss:$16 sps:$4 sm:$0xff]  }
 0x94b   :  { %18287 = vst [vmem:[#allocation56_spill] sm:$0xff] %v16593_v31  ;;  %18288 = vst [vmem:[#allocation57_spill] sm:$0xff] %v16598_v4 }
 0x94c   :  { %v13139_v3 = vpop.eup %13138 }
 0x94d   :  { %7193 = vmatpush2.bf16.msra.mxu0 %v16569_v48  ;;  %7234 = vmatpush2.bf16.msra.mxu1 %v16574_v21  ;;  %v16605_v48 = vld [vmem:[%s17918_s10 + $0x184] ss:$16 sps:$4 sm:$0xff]   ;;  %v16610_v21 = vld [vmem:[%s17918_s10 + $0x18c] ss:$16 sps:$4 sm:$0xff]   ;;  %v6451_v18 = vadd.f32 1.0, %v13139_v3 }
 0x94e   :  { %7194 = vmatprep.subr.bf16.mxu0 %v16581_v55  ;;  %7235 = vmatprep.subr.bf16.mxu1 %v16586_v29  ;;  %18289 = vst [vmem:[#allocation58_spill] sm:$0xff] %v16605_v48  ;;  %18290 = vst [vmem:[#allocation59_spill] sm:$0xff] %v16610_v21  ;;  %v16617_v55 = vld [vmem:[%s17918_s10 + $0x180] ss:$16 sps:$4 sm:$0xff]   ;;  %v16622_v29 = vld [vmem:[%s17918_s10 + $0x188] ss:$16 sps:$4 sm:$0xff]  }
 0x94f   :  { %13146 = vrcp.f32 %v6451_v18  ;;  %v16673_v3 = vld [vmem:[%s17918_s10 + $0x148] ss:$16 sps:$4 sm:$0xff]   ;;  %v16681_v18 = vld [vmem:[%s17918_s10 + $0x124] ss:$16 sps:$4 sm:$0xff]  }
 0x950   :  { %18295 = vst [vmem:[#allocation64_spill] sm:$0xff] %v16673_v3  ;;  %18296 = vst [vmem:[#allocation4_spill] sm:$0xff] %v16681_v18 }
 0x951   :  { %7195 = vmatpush2.bf16.msra.mxu0 %v16593_v31  ;;  %7236 = vmatpush2.bf16.msra.mxu1 %v16598_v4  ;;  %v16629_v31 = vld [vmem:[%s17918_s10 + $0x164] ss:$16 sps:$4 sm:$0xff]   ;;  %v16634_v4 = vld [vmem:[%s17918_s10 + $0x16c] ss:$16 sps:$4 sm:$0xff]  }
 0x952   :  { %v13141_v6 = vpop.eup %13140  ;;  %7196 = vmatprep.subr.bf16.mxu0 %v16605_v48  ;;  %7237 = vmatprep.subr.bf16.mxu1 %v16610_v21  ;;  %v16642_v21 = vld [vmem:[%s17918_s10 + $0x160] ss:$16 sps:$4 sm:$0xff]   ;;  %v16647_v48 = vld [vmem:[%s17918_s10 + $0x168] ss:$16 sps:$4 sm:$0xff]  }
 0x953   :  { %v13143_v51 = vpop.eup %13142  ;;  %18291 = vst [vmem:[#allocation60_spill] sm:$0xff] %v16647_v48 }
 0x954   :  { %v13145_v9 = vpop.eup %13144  ;;  %v6455_v43 = vmul.f32 %v13143_v51, %v13141_v6  ;;  %v16659_v51 = vld [vmem:[%s17918_s10 + $0x14c] ss:$16 sps:$4 sm:$0xff]   ;;  %v16668_v6 = vld [vmem:[%s17918_s10 + $0x140] ss:$16 sps:$4 sm:$0xff]  }
 0x955   :  { %v6454_v30 = vmul.f32 %v13145_v9, %v16126_v14  ;;  %7197 = vmatpush2.bf16.msra.mxu0 %v16617_v55  ;;  %7238 = vmatpush2.bf16.msra.mxu1 %v16622_v29  ;;  %v16654_v14 = vld [vmem:[%s17918_s10 + $0x144] ss:$16 sps:$4 sm:$0xff]   ;;  %18293 = vst [vmem:[#allocation62_spill] sm:$0xff] %v16659_v51  ;;  %18294 = vst [vmem:[#allocation63_spill] sm:$0xff] %v16668_v6 }
 0x956   :  { %7198 = vmatprep.subr.bf16.mxu0 %v16629_v31  ;;  %7239 = vmatprep.subr.bf16.mxu1 %v16634_v4  ;;  %18292 = vst [vmem:[#allocation61_spill] sm:$0xff] %v16654_v14 }
 0x957   :  { %v16661_v9 = vadd.f32 %v6455_v43, %v6454_v30  ;;  %v16686_v30 = vld [vmem:[%s17918_s10 + $0x12c] ss:$16 sps:$4 sm:$0xff]   ;;  %v16693_v43 = vld [vmem:[%s17918_s10 + $0x120] ss:$16 sps:$4 sm:$0xff]  }
 0x958   :  { %18297 = vst [vmem:[#allocation5_spill] sm:$0xff] %v16686_v30  ;;  %18298 = vst [vmem:[#allocation21_spill] sm:$0xff] %v16693_v43 }
 0x959   :  { %7199 = vmatpush2.bf16.msra.mxu0 %v16642_v21  ;;  %7240 = vmatpush2.bf16.msra.mxu1 %v16647_v48  ;;  %13148 = vtanh.f32 %v16661_v9 }
 0x95a   :  { %7200 = vmatprep.subr.bf16.mxu0 %v16654_v14  ;;  %7241 = vmatprep.subr.bf16.mxu1 %v16659_v51  ;;  %v16698_v51 = vld [vmem:[%s17918_s10 + $0x128] ss:$16 sps:$4 sm:$0xff]  }
 0x95b   :  { %18299 = vst [vmem:[#allocation20_spill] sm:$0xff] %v16698_v51 }
 0x95c   :  { %v13147_v14 = vpop.eup %13146 }
 0x95d   :  { %7201 = vmatpush2.bf16.msra.mxu0 %v16668_v6  ;;  %7242 = vmatpush2.bf16.msra.mxu1 %v16673_v3  ;;  %v16705_v6 = vld [vmem:[%s17918_s10 + $0x104] ss:$16 sps:$4 sm:$0xff]   ;;  %v16710_v3 = vld [vmem:[%s17918_s10 + $0x10c] ss:$16 sps:$4 sm:$0xff]  }
 0x95e   :  { %7202 = vmatprep.subr.bf16.mxu0 %v16681_v18  ;;  %7243 = vmatprep.subr.bf16.mxu1 %v16686_v30  ;;  %v16717_v18 = vld [vmem:[%s17918_s10 + $0x100] ss:$16 sps:$4 sm:$0xff]   ;;  %v16722_v30 = vld [vmem:[%s17918_s10 + $0x108] ss:$16 sps:$4 sm:$0xff]  }
 0x961   :  { %7203 = vmatpush2.bf16.msra.mxu0 %v16693_v43  ;;  %7244 = vmatpush2.bf16.msra.mxu1 %v16698_v51 }
 0x962   :  { %7204 = vmatprep.subr.bf16.mxu0 %v16705_v6  ;;  %7245 = vmatprep.subr.bf16.mxu1 %v16710_v3 }
 0x965   :  { %7205 = vmatpush2.bf16.msra.mxu0 %v16717_v18  ;;  %7246 = vmatpush2.bf16.msra.mxu1 %v16722_v30 }
 0x966   :  { %v13149_v51 = vpop.eup %13148  ;;  %7519 = vmatprep.subr.bf16.mxu1 %v16158_v22  ;;  %v16752_v22 = vld [vmem:[%s17914_s8 + $0xe4] ss:$16 sps:$4 sm:$0xff]  }
 0x967   :  { %v16729_v43 = vmul.f32 %v13149_v51, %v13147_v14  ;;  %7478 = vmatprep.subr.bf16.mxu0 %v16752_v22 }
 0x969   :  { %18300 = vst [vmem:[#allocation65_spill] sm:$0xff] %v16729_v43  ;;  %v6767_v48 = vpack.c.bf16 %v16729_v43, %v16729_v43  ;;  %v17190_v43 = vld [vmem:[%s17918_s10 + $0x68] ss:$16 sps:$4 sm:$0xff]  }
 0x96b   :  { %7206 = vmatprep.mubr.bf16.mxu0 %v6767_v48  ;;  %7247 = vmatprep.mubr.bf16.mxu1 %v6767_v48 }
 0x96c   :  { %7207 = vmatmul.mubr.bf16.vlgmr.msra.gmra.mxu0 %v16345_v27  ;;  %7248 = vmatmul.mubr.bf16.vlgmr.msra.gmra.mxu1 %v16345_v27 }
 0x96d   :  { %7520 = vmatpush1.bf16.msra.mxu1 %v16163_v15  ;;  %7510 = vmatprep.mubr.bf16.mxu0 %v18170_v46  ;;  %v16757_v15 = vld [vmem:[%s17914_s8 + $0xe0] ss:$16 sps:$4 sm:$0xff]  }
 0x96e   :  { %7521 = vmatprep.subr.bf16.mxu1 %v16175_v50  ;;  %7551 = vmatprep.mubr.bf16.mxu1 %v18170_v46  ;;  %v16783_v50 = vld [vmem:[%s17914_s8 + $0x20] ss:$16 sps:$4 sm:$0xff]  }
 0x96f   :  { %7479 = vmatpush1.bf16.msra.mxu0 %v16757_v15 }
 0x970   :  { %7480 = vmatprep.subr.bf16.mxu0 %v16170_v33  ;;  %v16777_v33 = vld [vmem:[%s17914_s8 + $0x24] ss:$16 sps:$4 sm:$0xff]  }
 0x971   :  { %7522 = vmatpush1.bf16.msra.mxu1 %v16185_v16  ;;  %v16795_v16 = vld [vmem:[%s17914_s8] ss:$16 sps:$4 sm:$0xff]  }
 0x972   :  { %7523 = vmatprep.subr.bf16.mxu1 %v16199_v57 }
 0x973   :  { %7481 = vmatpush1.bf16.msra.mxu0 %v16180_v54  ;;  %v16789_v54 = vld [vmem:[%s17914_s8 + $0x4] ss:$16 sps:$4 sm:$0xff]  }
 0x974   :  { %7482 = vmatprep.subr.bf16.mxu0 %v16194_v61 }
 0x975   :  { %7524 = vmatpush1.bf16.msra.mxu1 %v16209_v20 }
 0x976   :  { %7525 = vmatprep.subr.bf16.mxu1 %v16223_v60 }
 0x977   :  { %7483 = vmatpush1.bf16.msra.mxu0 %v16204_v62  ;;  %v18301_v62 = vld [vmem:[#allocation10_spill] sm:$0xff] }
 0x978   :  { %7484 = vmatprep.subr.bf16.mxu0 %v16218_v34 }
 0x979   :  { %7526 = vmatpush1.bf16.msra.mxu1 %v16233_v56  ;;  %v18302_v56 = vld [vmem:[#allocation11_spill] sm:$0xff] }
 0x97a   :  { %7527 = vmatprep.subr.bf16.mxu1 %v16257_v44 }
 0x97b   :  { %7485 = vmatpush1.bf16.msra.mxu0 %v16228_v40 }
 0x97c   :  { %7486 = vmatprep.subr.bf16.mxu0 %v16240_v17 }
 0x97d   :  { %7528 = vmatpush1.bf16.msra.mxu1 %v16252_v42 }
 0x97e   :  { %7529 = vmatprep.subr.bf16.mxu1 %v16268_v37 }
 0x97f   :  { %7487 = vmatpush1.bf16.msra.mxu0 %v16247_v32 }
 0x980   :  { %7488 = vmatprep.subr.bf16.mxu0 %v16263_v49 }
 0x981   :  { %7530 = vmatpush1.bf16.msra.mxu1 %v16281_v8 }
 0x982   :  { %7531 = vmatprep.subr.bf16.mxu1 %v16288_v12  ;;  %v18304_v12 = vld [vmem:[#allocation26_spill] sm:$0xff] }
 0x983   :  { %7489 = vmatpush1.bf16.msra.mxu0 %v16276_v19  ;;  %v18303_v19 = vld [vmem:[#allocation27_spill] sm:$0xff] }
 0x984   :  { %7490 = vmatprep.subr.bf16.mxu0 %v16777_v33 }
 0x985   :  { %7532 = vmatpush1.bf16.msra.mxu1 %v16295_v11 }
 0x986   :  { %7533 = vmatprep.subr.bf16.mxu1 %v16302_v23 }
 0x987   :  { %7491 = vmatpush1.bf16.msra.mxu0 %v16783_v50 }
 0x988   :  { %7492 = vmatprep.subr.bf16.mxu0 %v16789_v54 }
 0x989   :  { %7534 = vmatpush1.bf16.msra.mxu1 %v16309_v2 }
 0x98a   :  { %8036 = vmatprep.subr.bf16.mxu1 %v16323_v10 }
 0x98b   :  { %7493 = vmatpush1.bf16.msra.mxu0 %v16795_v16 }
 0x98c   :  { %7995 = vmatprep.subr.bf16.mxu0 %v16318_v1 }
 0x9e8   :  { %v6691_v61 = vpop.f32.mrf.mxu0  ;;  %v6732_v57 = vpop.f32.mrf.mxu1 }
 0x9e9   :  { %v6739_v20 = vadd.f32 %v6691_v61, %v18301_v62  ;;  %v6741_v11 = vadd.f32 %v6732_v57, %v18304_v12  ;;  %v18308_v12 = vld [vmem:[#allocation35_spill] sm:$0xff] }
 0x9ea   :  { %v6693_v34 = vpop.f32.mrf.mxu0  ;;  %v6734_v60 = vpop.f32.mrf.mxu1 }
 0x9eb   :  { %v11126_v40 = vmul.f32 -1.442695, %v6739_v20  ;;  %v6740_v17 = vadd.f32 %v6693_v34, %v18302_v56  ;;  %v6742_v8 = vadd.f32 %v6734_v60, %v18303_v19  ;;  %v18306_v19 = vld [vmem:[#allocation23_spill] sm:$0xff] }
 0x9ec   :  { %v6695_v32 = vpop.f32.mrf.mxu0  ;;  %v6736_v42 = vpop.f32.mrf.mxu1 }
 0x9ed   :  { %13150 = vpow2.f32 %v11126_v40  ;;  %v11127_v44 = vmul.f32 -1.442695, %v6740_v17  ;;  %v11128_v23 = vmul.f32 -1.442695, %v6742_v8  ;;  %v18307_v8 = vld [vmem:[#allocation22_spill] sm:$0xff] }
 0x9ee   :  { %v6696_v49 = vpop.f32.mrf.mxu0  ;;  %v6737_v37 = vpop.f32.mrf.mxu1 }
 0x9ef   :  { %13152 = vpow2.f32 %v11127_v44 }
 0x9f0   :  { %13154 = vtanh.f32 %v6741_v11  ;;  %v18310_v11 = vld [vmem:[#allocation37_spill] sm:$0xff] }
 0x9f1   :  { %13156 = vpow2.f32 %v11128_v23  ;;  %v18311_v23 = vld [vmem:[#allocation38_spill] sm:$0xff] }
 0x9fa   :  { %v13151_v2 = vpop.eup %13150 }
 0x9fb   :  { %v6746_v1 = vadd.f32 1.0, %v13151_v2  ;;  %v18314_v2 = vld [vmem:[#allocation18_spill] sm:$0xff] }
 0x9fc   :  { %v13153_v10 = vpop.eup %13152 }
 0x9fd   :  { %13158 = vrcp.f32 %v6746_v1  ;;  %v6752_v27 = vadd.f32 1.0, %v13153_v10  ;;  %v13155_v48 = vpop.eup %13154 }
 0x9fe   :  { %v13157_v14 = vpop.eup %13156 }
 0x9ff   :  { %13160 = vrcp.f32 %v6752_v27  ;;  %v6759_v20 = vadd.f32 1.0, %v13157_v14  ;;  %v18315_v27 = vld [vmem:[#allocation41_spill] sm:$0xff]  ;;  %v18317_v14 = vld [vmem:[#allocation43_spill] sm:$0xff] }
 0xa01   :  { %13162 = vrcp.f32 %v6759_v20 }
 0xa0a   :  { %v13159_v51 = vpop.eup %13158 }
 0xa0b   :  { %v6763_v61 = vmul.f32 %v13159_v51, %v13155_v48  ;;  %v18316_v48 = vld [vmem:[#allocation42_spill] sm:$0xff] }
 0xa0c   :  { %v13161_v62 = vpop.eup %13160 }
 0xa0d   :  { %v6762_v34 = vmul.f32 %v13161_v62, %v16332_v39  ;;  %v6832_v39 = vld [vmem:[%s17919_s11] sm:$0xf] }
 0xa0e   :  { %v13163_v57 = vpop.eup %13162  ;;  %v6837_v32 = vrot.slane %v6832_v39, %v14703_v26  ;;  %v6845_v1 = vrot.slane %v6832_v39, %v18314_v2 }
 0xa0f   :  { %v16805_v60 = vadd.f32 %v6763_v61, %v6762_v34  ;;  %v18318_v34 = vld [vmem:[#allocation44_spill] sm:$0xff] }
 0xa11   :  { %13164 = vtanh.f32 %v16805_v60 }
 0xa1e   :  { %v13165_v40 = vpop.eup %13164 }
 0xa1f   :  { %v6766_v56 = vmul.f32 %v13165_v40, %v13163_v57  ;;  %v18319_v57 = vld [vmem:[#allocation45_spill] sm:$0xff] }
 0xa21   :  { %v16808_v17 = vpack.c.bf16 %v6766_v56, %v6766_v56  ;;  %v18320_v56 = vld [vmem:[#allocation46_spill] sm:$0xff] }
 0xa23   :  { %7511 = vmatmul.mubr.bf16.vlgmr.msra.gmra.mxu0 %v16808_v17  ;;  %7552 = vmatmul.mubr.bf16.vlgmr.msra.gmra.mxu1 %v16808_v17 }
 0xa24   :  { %7996 = vmatpush1.bf16.msra.mxu0 %v16338_v45  ;;  %8037 = vmatpush1.bf16.msra.mxu1 %v16343_v24  ;;  %v6841_v45 = vrot.slane %v6832_v39, %v14715_v58 }
 0xa25   :  { %7997 = vmatprep.subr.bf16.mxu0 %v16350_v38  ;;  %8038 = vmatprep.subr.bf16.mxu1 %v16355_v52 }
 0xa28   :  { %7998 = vmatpush1.bf16.msra.mxu0 %v16364_v13  ;;  %8039 = vmatpush1.bf16.msra.mxu1 %v16369_v36  ;;  %v18305_v13 = vld [vmem:[#allocation7_spill] sm:$0xff] }
 0xa29   :  { %7999 = vmatprep.subr.bf16.mxu0 %v16381_v0  ;;  %8040 = vmatprep.subr.bf16.mxu1 %v16386_v7 }
 0xa2c   :  { %v7208_v24 = vpop.f32.mrf.mxu0  ;;  %v7249_v38 = vpop.f32.mrf.mxu1  ;;  %8000 = vmatpush1.bf16.msra.mxu0 %v16395_v28  ;;  %8041 = vmatpush1.bf16.msra.mxu1 %v16400_v47 }
 0xa2d   :  { %v7209_v52 = vadd.f32 %v7208_v24, %v6837_v32  ;;  %8001 = vmatprep.subr.bf16.mxu0 %v16407_v25  ;;  %8042 = vmatprep.subr.bf16.mxu1 %v18305_v13  ;;  %v6849_v25 = vrot.slane %v6832_v39, %v18220_v35  ;;  %v7250_v61 = vadd.f32 %v7249_v38, %v6845_v1  ;;  %v18321_v39 = vld [vmem:[#allocation47_spill] sm:$0xff]  ;;  %v18323_v32 = vld [vmem:[#allocation49_spill] sm:$0xff]  ;;  %v18326_v38 = vld [vmem:[#allocation52_spill] sm:$0xff] }
 0xa2e   :  { %v7210_v36 = vpop.f32.mrf.mxu0  ;;  %v7251_v42 = vpop.f32.mrf.mxu1  ;;  %v18325_v24 = vld [vmem:[#allocation51_spill] sm:$0xff]  ;;  %v18328_v13 = vld [vmem:[#allocation54_spill] sm:$0xff] }
 0xa2f   :  { %v11193_v44 = vmul.f32 -1.442695, %v7209_v52  ;;  %v7211_v49 = vadd.f32 %v7210_v36, %v6841_v45  ;;  %v18324_v45 = vld [vmem:[#allocation50_spill] sm:$0xff]  ;;  %v18327_v52 = vld [vmem:[#allocation53_spill] sm:$0xff]  ;;  %v18329_v36 = vld [vmem:[#allocation55_spill] sm:$0xff] }
 0xa30   :  { %v7212_v0 = vpop.f32.mrf.mxu0  ;;  %v7253_v37 = vpop.f32.mrf.mxu1  ;;  %8002 = vmatpush1.bf16.msra.mxu0 %v16421_v41  ;;  %8043 = vmatpush1.bf16.msra.mxu1 %v16426_v5  ;;  %v18309_v41 = vld [vmem:[#allocation36_spill] sm:$0xff]  ;;  %v7252_v5 = vadd.f32 %v7251_v42, %v6849_v25 }
 0xa31   :  { %13166 = vpow2.f32 %v11193_v44  ;;  %v11194_v7 = vmul.f32 -1.442695, %v7211_v49  ;;  %8003 = vmatprep.subr.bf16.mxu0 %v16433_v53  ;;  %8044 = vmatprep.subr.bf16.mxu1 %v16438_v63  ;;  %v18312_v53 = vld [vmem:[#allocation39_spill] sm:$0xff]  ;;  %v18313_v63 = vld [vmem:[#allocation40_spill] sm:$0xff]  ;;  %v18331_v44 = vld [vmem:[#allocation57_spill] sm:$0xff] }
 0xa32   :  { %v7213_v28 = vpop.f32.mrf.mxu0  ;;  %v7254_v47 = vpop.f32.mrf.mxu1  ;;  %v11195_v10 = vmul.f32 -1.442695, %v7252_v5  ;;  %v18330_v42 = vld [vmem:[#allocation56_spill] sm:$0xff]  ;;  %v18332_v0 = vld [vmem:[#allocation58_spill] sm:$0xff]  ;;  %v18333_v37 = vld [vmem:[#allocation59_spill] sm:$0xff] }
 0xa33   :  { %13168 = vpow2.f32 %v11194_v7  ;;  %v18335_v5 = vld [vmem:[#allocation61_spill] sm:$0xff] }
 0xa34   :  { %8004 = vmatpush1.bf16.msra.mxu0 %v18306_v19  ;;  %8045 = vmatpush1.bf16.msra.mxu1 %v18307_v8  ;;  %13170 = vpow2.f32 %v11195_v10  ;;  %v16939_v10 = vld [vmem:[%s17914_s8 + $0xac] ss:$16 sps:$4 sm:$0xff]  }
 0xa35   :  { %8005 = vmatprep.subr.bf16.mxu0 %v18308_v12  ;;  %8046 = vmatprep.subr.bf16.mxu1 %v18309_v41  ;;  %v18334_v41 = vld [vmem:[#allocation60_spill] sm:$0xff] }
 0xa38   :  { %8006 = vmatpush1.bf16.msra.mxu0 %v18310_v11  ;;  %8047 = vmatpush1.bf16.msra.mxu1 %v18311_v23  ;;  %v18336_v11 = vld [vmem:[#allocation62_spill] sm:$0xff]  ;;  %v18342_v23 = vld [vmem:[#allocation20_spill] sm:$0xff] }
 0xa39   :  { %8007 = vmatprep.subr.bf16.mxu0 %v18312_v53  ;;  %8048 = vmatprep.subr.bf16.mxu1 %v18313_v63 }
 0xa3c   :  { %8008 = vmatpush1.bf16.msra.mxu0 %v18315_v27  ;;  %8049 = vmatpush1.bf16.msra.mxu1 %v18316_v48  ;;  %v16944_v27 = vld [vmem:[%s17914_s8 + $0xa0] ss:$16 sps:$4 sm:$0xff]   ;;  %v16949_v48 = vld [vmem:[%s17914_s8 + $0xa8] ss:$16 sps:$4 sm:$0xff]  }
 0xa3d   :  { %8009 = vmatprep.subr.bf16.mxu0 %v16509_v59  ;;  %8050 = vmatprep.subr.bf16.mxu1 %v18317_v14  ;;  %v18322_v59 = vld [vmem:[#allocation48_spill] sm:$0xff] }
 0xa3e   :  { %v13167_v51 = vpop.eup %13166  ;;  %v16958_v14 = vld [vmem:[%s17914_s8 + $0x84] ss:$16 sps:$4 sm:$0xff]  }
 0xa3f   :  { %v7259_v62 = vadd.f32 1.0, %v13167_v51  ;;  %v16963_v51 = vld [vmem:[%s17914_s8 + $0x8c] ss:$16 sps:$4 sm:$0xff]  }
 0xa40   :  { %v13169_v20 = vpop.eup %13168  ;;  %8010 = vmatpush1.bf16.msra.mxu0 %v18318_v34  ;;  %8051 = vmatpush1.bf16.msra.mxu1 %v18319_v57  ;;  %v16987_v34 = vld [vmem:[%s17914_s8 + $0x60] ss:$16 sps:$4 sm:$0xff]   ;;  %v16992_v57 = vld [vmem:[%s17914_s8 + $0x68] ss:$16 sps:$4 sm:$0xff]  }
 0xa41   :  { %13172 = vrcp.f32 %v7259_v62  ;;  %v7265_v40 = vadd.f32 1.0, %v13169_v20  ;;  %8011 = vmatprep.subr.bf16.mxu0 %v18320_v56  ;;  %8052 = vmatprep.subr.bf16.mxu1 %v18321_v39  ;;  %v13171_v49 = vpop.eup %13170  ;;  %v16973_v62 = vld [vmem:[%s17914_s8 + $0x88] ss:$16 sps:$4 sm:$0xff]   ;;  %v16980_v20 = vld [vmem:[%s17914_s8 + $0x64] ss:$16 sps:$4 sm:$0xff]  }
 0xa42   :  { %13174 = vtanh.f32 %v7250_v61  ;;  %v7272_v25 = vadd.f32 1.0, %v13171_v49  ;;  %v16968_v61 = vld [vmem:[%s17914_s8 + $0x80] ss:$16 sps:$4 sm:$0xff]   ;;  %v17003_v56 = vld [vmem:[%s17914_s8 + $0x44] ss:$16 sps:$4 sm:$0xff]  }
 0xa43   :  { %13176 = vrcp.f32 %v7265_v40  ;;  %v16997_v40 = vld [vmem:[%s17914_s8 + $0x6c] ss:$16 sps:$4 sm:$0xff]  }
 0xa44   :  { %8012 = vmatpush2.bf16.msra.mxu0 %v18322_v59  ;;  %8053 = vmatpush2.bf16.msra.mxu1 %v18323_v32  ;;  %13178 = vrcp.f32 %v7272_v25  ;;  %v17008_v39 = vld [vmem:[%s17914_s8 + $0x4c] ss:$16 sps:$4 sm:$0xff]   ;;  %v17016_v59 = vld [vmem:[%s17914_s8 + $0x40] ss:$16 sps:$4 sm:$0xff]   ;;  %v17021_v32 = vld [vmem:[%s17914_s8 + $0x48] ss:$16 sps:$4 sm:$0xff]  }
 0xa45   :  { %8013 = vmatprep.subr.bf16.mxu0 %v18324_v45  ;;  %8054 = vmatprep.subr.bf16.mxu1 %v18325_v24  ;;  %v17028_v45 = vld [vmem:[%s17914_s8 + $0x2c] ss:$16 sps:$4 sm:$0xff]   ;;  %v17035_v24 = vld [vmem:[%s17914_s8 + $0x28] ss:$16 sps:$4 sm:$0xff]  }
 0xa48   :  { %8014 = vmatpush2.bf16.msra.mxu0 %v18326_v38  ;;  %8055 = vmatpush2.bf16.msra.mxu1 %v18327_v52  ;;  %v17042_v38 = vld [vmem:[%s17914_s8 + $0xc] ss:$16 sps:$4 sm:$0xff]   ;;  %v17049_v52 = vld [vmem:[%s17914_s8 + $0x8] ss:$16 sps:$4 sm:$0xff]  }
 0xa49   :  { %8015 = vmatprep.subr.bf16.mxu0 %v18328_v13  ;;  %8056 = vmatprep.subr.bf16.mxu1 %v18329_v36  ;;  %v18344_v36 = vld [vmem:[#allocation12_spill] sm:$0xff] }
 0xa4c   :  { %8016 = vmatpush2.bf16.msra.mxu0 %v18330_v42  ;;  %8057 = vmatpush2.bf16.msra.mxu1 %v18331_v44 }
 0xa4d   :  { %8017 = vmatprep.subr.bf16.mxu0 %v18332_v0  ;;  %8058 = vmatprep.subr.bf16.mxu1 %v18333_v37  ;;  %v18345_v0 = vld [vmem:[#allocation13_spill] sm:$0xff] }
 0xa4e   :  { %v13173_v7 = vpop.eup %13172 }
 0xa4f   :  { %v13175_v28 = vpop.eup %13174 }
 0xa50   :  { %v13177_v47 = vpop.eup %13176  ;;  %8018 = vmatpush2.bf16.msra.mxu0 %v16617_v55  ;;  %8059 = vmatpush2.bf16.msra.mxu1 %v16622_v29  ;;  %v7276_v19 = vmul.f32 %v13175_v28, %v13173_v7  ;;  %v18337_v55 = vld [vmem:[#allocation63_spill] sm:$0xff]  ;;  %v18338_v29 = vld [vmem:[#allocation64_spill] sm:$0xff] }
 0xa51   :  { %v7275_v8 = vmul.f32 %v13177_v47, %v16661_v9  ;;  %8019 = vmatprep.subr.bf16.mxu0 %v16629_v31  ;;  %8060 = vmatprep.subr.bf16.mxu1 %v16634_v4  ;;  %v18339_v31 = vld [vmem:[#allocation4_spill] sm:$0xff]  ;;  %v18340_v4 = vld [vmem:[#allocation5_spill] sm:$0xff] }
 0xa52   :  { %v18341_v9 = vld [vmem:[#allocation21_spill] sm:$0xff] }
 0xa53   :  { %v16868_v12 = vadd.f32 %v7276_v19, %v7275_v8  ;;  %v18346_v8 = vld [vmem:[#allocation29_spill] sm:$0xff] }
 0xa54   :  { %8020 = vmatpush2.bf16.msra.mxu0 %v16642_v21  ;;  %8061 = vmatpush2.bf16.msra.mxu1 %v18334_v41  ;;  %v13179_v21 = vpop.eup %13178 }
 0xa55   :  { %8021 = vmatprep.subr.bf16.mxu0 %v18335_v5  ;;  %8062 = vmatprep.subr.bf16.mxu1 %v18336_v11  ;;  %13180 = vtanh.f32 %v16868_v12  ;;  %v18347_v5 = vld [vmem:[#allocation28_spill] sm:$0xff] }
 0xa58   :  { %8022 = vmatpush2.bf16.msra.mxu0 %v18337_v55  ;;  %8063 = vmatpush2.bf16.msra.mxu1 %v18338_v29 }
 0xa59   :  { %8023 = vmatprep.subr.bf16.mxu0 %v18339_v31  ;;  %8064 = vmatprep.subr.bf16.mxu1 %v18340_v4 }
 0xa5c   :  { %8024 = vmatpush2.bf16.msra.mxu0 %v18341_v9  ;;  %8065 = vmatpush2.bf16.msra.mxu1 %v18342_v23 }
 0xa5d   :  { %8025 = vmatprep.subr.bf16.mxu0 %v16705_v6  ;;  %8066 = vmatprep.subr.bf16.mxu1 %v16710_v3  ;;  %v16898_v6 = vld [vmem:[%s17914_s8 + $0xec] ss:$16 sps:$4 sm:$0xff]   ;;  %v16903_v3 = vld [vmem:[%s17914_s8 + $0xe8] ss:$16 sps:$4 sm:$0xff]  }
 0xa60   :  { %8026 = vmatpush2.bf16.msra.mxu0 %v16717_v18  ;;  %8067 = vmatpush2.bf16.msra.mxu1 %v16722_v30  ;;  %v16910_v18 = vld [vmem:[%s17914_s8 + $0xc4] ss:$16 sps:$4 sm:$0xff]   ;;  %v16915_v30 = vld [vmem:[%s17914_s8 + $0xcc] ss:$16 sps:$4 sm:$0xff]  }
 0xa61   :  { %8299 = vmatprep.subr.bf16.mxu0 %v16752_v22  ;;  %8340 = vmatprep.subr.bf16.mxu1 %v16898_v6  ;;  %v16920_v22 = vld [vmem:[%s17914_s8 + $0xc0] ss:$16 sps:$4 sm:$0xff]  }
 0xa62   :  { %v13181_v53 = vpop.eup %13180 }
 0xa63   :  { %v16886_v63 = vmul.f32 %v13181_v53, %v13179_v21 }
 0xa65   :  { %18343 = vst [vmem:[#allocation66_spill] sm:$0xff] %v16886_v63  ;;  %v7588_v1 = vpack.c.bf16 %v16886_v63, %v16886_v63  ;;  %v17185_v63 = vld [vmem:[%s17918_s10 + $0x60] ss:$16 sps:$4 sm:$0xff]  }
 0xa67   :  { %8027 = vmatprep.mubr.bf16.mxu0 %v7588_v1  ;;  %8068 = vmatprep.mubr.bf16.mxu1 %v7588_v1 }
 0xa68   :  { %8028 = vmatmul.mubr.bf16.vlgmr.msra.gmra.mxu0 %v16808_v17  ;;  %8069 = vmatmul.mubr.bf16.vlgmr.msra.gmra.mxu1 %v16808_v17  ;;  %v16934_v17 = vld [vmem:[%s17914_s8 + $0xa4] ss:$16 sps:$4 sm:$0xff]  }
 0xa69   :  { %8300 = vmatpush1.bf16.msra.mxu0 %v16757_v15  ;;  %8331 = vmatprep.mubr.bf16.mxu0 %v18170_v46  ;;  %v16925_v15 = vld [vmem:[%s17914_s8 + $0xc8] ss:$16 sps:$4 sm:$0xff]  }
 0xa6a   :  { %8372 = vmatprep.mubr.bf16.mxu1 %v18170_v46  ;;  %8341 = vmatpush1.bf16.msra.mxu1 %v16903_v3 }
 0xa6b   :  { %8301 = vmatprep.subr.bf16.mxu0 %v16910_v18  ;;  %8342 = vmatprep.subr.bf16.mxu1 %v16915_v30 }
 0xa6d   :  { %8302 = vmatpush1.bf16.msra.mxu0 %v16920_v22 }
 0xa6e   :  { %8343 = vmatpush1.bf16.msra.mxu1 %v16925_v15  ;;  %8303 = vmatprep.subr.bf16.mxu0 %v16934_v17 }
 0xa6f   :  { %8344 = vmatprep.subr.bf16.mxu1 %v16939_v10 }
 0xa71   :  { %8304 = vmatpush1.bf16.msra.mxu0 %v16944_v27 }
 0xa72   :  { %8345 = vmatpush1.bf16.msra.mxu1 %v16949_v48  ;;  %8305 = vmatprep.subr.bf16.mxu0 %v16958_v14 }
 0xa73   :  { %8346 = vmatprep.subr.bf16.mxu1 %v16963_v51 }
 0xa75   :  { %8306 = vmatpush1.bf16.msra.mxu0 %v16968_v61 }
 0xa76   :  { %8347 = vmatpush1.bf16.msra.mxu1 %v16973_v62  ;;  %8307 = vmatprep.subr.bf16.mxu0 %v16980_v20 }
 0xa77   :  { %8348 = vmatprep.subr.bf16.mxu1 %v16997_v40 }
 0xa79   :  { %8308 = vmatpush1.bf16.msra.mxu0 %v16987_v34 }
 0xa7a   :  { %8349 = vmatpush1.bf16.msra.mxu1 %v16992_v57  ;;  %8309 = vmatprep.subr.bf16.mxu0 %v17003_v56 }
 0xa7b   :  { %8350 = vmatprep.subr.bf16.mxu1 %v17008_v39 }
 0xa7d   :  { %8310 = vmatpush1.bf16.msra.mxu0 %v17016_v59 }
 0xa7e   :  { %8351 = vmatpush1.bf16.msra.mxu1 %v17021_v32  ;;  %8311 = vmatprep.subr.bf16.mxu0 %v16777_v33  ;;  %v17058_v33 = vld [vmem:[%s17918_s10 + $0xe4] ss:$16 sps:$4 sm:$0xff]  }
 0xa7f   :  { %8352 = vmatprep.subr.bf16.mxu1 %v17028_v45 }
 0xa81   :  { %8312 = vmatpush1.bf16.msra.mxu0 %v16783_v50  ;;  %v17063_v50 = vld [vmem:[%s17918_s10 + $0xec] ss:$16 sps:$4 sm:$0xff]  }
 0xa82   :  { %8353 = vmatpush1.bf16.msra.mxu1 %v17035_v24  ;;  %8313 = vmatprep.subr.bf16.mxu0 %v16789_v54 }
 0xa83   :  { %8354 = vmatprep.subr.bf16.mxu1 %v17042_v38 }
 0xa85   :  { %8314 = vmatpush1.bf16.msra.mxu0 %v16795_v16 }
 0xa86   :  { %8355 = vmatpush1.bf16.msra.mxu1 %v17049_v52  ;;  %8816 = vmatprep.subr.bf16.mxu0 %v17058_v33 }
 0xa87   :  { %8857 = vmatprep.subr.bf16.mxu1 %v17063_v50 }
 0xae3   :  { %v7512_v54 = vpop.f32.mrf.mxu0  ;;  %v7553_v13 = vpop.f32.mrf.mxu1 }
 0xae4   :  { %v7560_v16 = vadd.f32 %v7512_v54, %v18344_v36  ;;  %v7562_v11 = vadd.f32 %v7553_v13, %v18347_v5  ;;  %v17133_v5 = vld [vmem:[%s17918_s10 + $0xa0] ss:$16 sps:$4 sm:$0xff]  }
 0xae5   :  { %v7514_v42 = vpop.f32.mrf.mxu0  ;;  %v7555_v44 = vpop.f32.mrf.mxu1 }
 0xae6   :  { %v11228_v49 = vmul.f32 -1.442695, %v7560_v16  ;;  %v7561_v37 = vadd.f32 %v7514_v42, %v18345_v0  ;;  %v7563_v41 = vadd.f32 %v7555_v44, %v18346_v8  ;;  %v17078_v0 = vld [vmem:[%s17918_s10 + $0xe0] ss:$16 sps:$4 sm:$0xff]   ;;  %v17121_v8 = vld [vmem:[%s17918_s10 + $0xac] ss:$16 sps:$4 sm:$0xff]  }
 0xae7   :  { %v7516_v7 = vpop.f32.mrf.mxu0  ;;  %v7557_v28 = vpop.f32.mrf.mxu1 }
 0xae8   :  { %13182 = vpow2.f32 %v11228_v49  ;;  %v11229_v47 = vmul.f32 -1.442695, %v7561_v37  ;;  %v11230_v55 = vmul.f32 -1.442695, %v7563_v41  ;;  %v17083_v37 = vld [vmem:[%s17918_s10 + $0xe8] ss:$16 sps:$4 sm:$0xff]  }
 0xae9   :  { %v7517_v25 = vpop.f32.mrf.mxu0  ;;  %v7558_v19 = vpop.f32.mrf.mxu1  ;;  %v17095_v28 = vld [vmem:[%s17918_s10 + $0xcc] ss:$16 sps:$4 sm:$0xff]   ;;  %v17126_v41 = vld [vmem:[%s17919_s11] sm:$0xf] }
 0xaea   :  { %13184 = vpow2.f32 %v11229_v47  ;;  %v17104_v47 = vld [vmem:[%s17918_s10 + $0xc0] ss:$16 sps:$4 sm:$0xff]   ;;  %v17109_v25 = vld [vmem:[%s17918_s10 + $0xc8] ss:$16 sps:$4 sm:$0xff]   ;;  %v17116_v19 = vld [vmem:[%s17918_s10 + $0xa4] ss:$16 sps:$4 sm:$0xff]  }
 0xaeb   :  { %13186 = vtanh.f32 %v7562_v11  ;;  %v17138_v11 = vld [vmem:[%s17918_s10 + $0xa8] ss:$16 sps:$4 sm:$0xff]  }
 0xaec   :  { %13188 = vpow2.f32 %v11230_v55  ;;  %v17145_v55 = vld [vmem:[%s17918_s10 + $0x84] ss:$16 sps:$4 sm:$0xff]  }
 0xaf5   :  { %v13183_v29 = vpop.eup %13182 }
 0xaf6   :  { %v7567_v31 = vadd.f32 1.0, %v13183_v29  ;;  %v17150_v29 = vld [vmem:[%s17918_s10 + $0x8c] ss:$16 sps:$4 sm:$0xff]  }
 0xaf7   :  { %v13185_v4 = vpop.eup %13184  ;;  %18348 = vst [vmem:[#allocation8_spill] sm:$0xff] %v17150_v29 }
 0xaf8   :  { %13190 = vrcp.f32 %v7567_v31  ;;  %v7573_v9 = vadd.f32 1.0, %v13185_v4  ;;  %v13187_v23 = vpop.eup %13186  ;;  %v7658_v31 = vrot.slane %v17126_v41, %v14703_v26  ;;  %v7662_v4 = vrot.slane %v17126_v41, %v14715_v58 }
 0xaf9   :  { %v13189_v21 = vpop.eup %13188 }
 0xafa   :  { %13192 = vrcp.f32 %v7573_v9  ;;  %v7580_v36 = vadd.f32 1.0, %v13189_v21  ;;  %v17161_v9 = vld [vmem:[%s17918_s10 + $0x80] ss:$16 sps:$4 sm:$0xff]  }
 0xafc   :  { %13194 = vrcp.f32 %v7580_v36 }
 0xb05   :  { %v13191_v53 = vpop.eup %13190 }
 0xb06   :  { %v7584_v1 = vmul.f32 %v13191_v53, %v13187_v23  ;;  %v17166_v23 = vld [vmem:[%s17918_s10 + $0x88] ss:$16 sps:$4 sm:$0xff]  }
 0xb07   :  { %v13193_v54 = vpop.eup %13192  ;;  %18349 = vst [vmem:[#allocation9_spill] sm:$0xff] %v17166_v23 }
 0xb08   :  { %v7583_v16 = vmul.f32 %v13193_v54, %v16805_v60  ;;  %v17090_v60 = vld [vmem:[%s17918_s10 + $0xc4] ss:$16 sps:$4 sm:$0xff]   ;;  %v17178_v54 = vld [vmem:[%s17918_s10 + $0x6c] ss:$16 sps:$4 sm:$0xff]  }
 0xb09   :  { %v13195_v13 = vpop.eup %13194 }
 0xb0a   :  { %v17072_v42 = vadd.f32 %v7584_v1, %v7583_v16  ;;  %v17173_v1 = vld [vmem:[%s17918_s10 + $0x64] ss:$16 sps:$4 sm:$0xff]  }
 0xb0c   :  { %13196 = vtanh.f32 %v17072_v42 }
 0xb19   :  { %v13197_v44 = vpop.eup %13196 }
 0xb1a   :  { %v7587_v49 = vmul.f32 %v13197_v44, %v13195_v13 }
 0xb1c   :  { %v17085_v7 = vpack.c.bf16 %v7587_v49, %v7587_v49 }
 0xb1e   :  { %8332 = vmatmul.mubr.bf16.vlgmr.msra.gmra.mxu0 %v17085_v7  ;;  %8373 = vmatmul.mubr.bf16.vlgmr.msra.gmra.mxu1 %v17085_v7 }
 0xb1f   :  { %8817 = vmatpush1.bf16.msra.mxu0 %v17078_v0  ;;  %8858 = vmatpush1.bf16.msra.mxu1 %v17083_v37 }
 0xb20   :  { %8818 = vmatprep.subr.bf16.mxu0 %v17090_v60  ;;  %8859 = vmatprep.subr.bf16.mxu1 %v17095_v28 }
 0xb23   :  { %8819 = vmatpush1.bf16.msra.mxu0 %v17104_v47  ;;  %8860 = vmatpush1.bf16.msra.mxu1 %v17109_v25 }
 0xb24   :  { %8820 = vmatprep.subr.bf16.mxu0 %v17116_v19  ;;  %8861 = vmatprep.subr.bf16.mxu1 %v17121_v8 }
 0xb27   :  { %8821 = vmatpush1.bf16.msra.mxu0 %v17133_v5  ;;  %8862 = vmatpush1.bf16.msra.mxu1 %v17138_v11 }
 0xb28   :  { %v8029_v21 = vpop.f32.mrf.mxu0  ;;  %v8070_v53 = vpop.f32.mrf.mxu1  ;;  %8822 = vmatprep.subr.bf16.mxu0 %v17145_v55  ;;  %8863 = vmatprep.subr.bf16.mxu1 %v17150_v29 }
 0xb29   :  { %v8030_v36 = vadd.f32 %v8029_v21, %v7658_v31  ;;  %v17202_v21 = vld [vmem:[%s17918_s10 + $0x4c] ss:$16 sps:$4 sm:$0xff]  }
 0xb2a   :  { %v8031_v16 = vpop.f32.mrf.mxu0  ;;  %v8072_v13 = vpop.f32.mrf.mxu1  ;;  %18351 = vst [vmem:[#allocation24_spill] sm:$0xff] %v17202_v21 }
 0xb2b   :  { %v11295_v44 = vmul.f32 -1.442695, %v8030_v36  ;;  %v8032_v49 = vadd.f32 %v8031_v16, %v7662_v4  ;;  %8823 = vmatpush1.bf16.msra.mxu0 %v17161_v9  ;;  %8864 = vmatpush1.bf16.msra.mxu1 %v17166_v23  ;;  %v17197_v4 = vld [vmem:[%s17918_s10 + $0x44] ss:$16 sps:$4 sm:$0xff]  }
 0xb2c   :  { %v8033_v29 = vpop.f32.mrf.mxu0  ;;  %v8074_v31 = vpop.f32.mrf.mxu1  ;;  %8824 = vmatprep.subr.bf16.mxu0 %v17173_v1  ;;  %8865 = vmatprep.subr.bf16.mxu1 %v17178_v54  ;;  %18350 = vst [vmem:[#allocation25_spill] sm:$0xff] %v17197_v4 }
 0xb2d   :  { %13198 = vpow2.f32 %v11295_v44  ;;  %v11296_v36 = vmul.f32 -1.442695, %v8032_v49  ;;  %v17209_v29 = vld [vmem:[%s17918_s10 + $0x40] ss:$16 sps:$4 sm:$0xff]   ;;  %v17214_v31 = vld [vmem:[%s17918_s10 + $0x48] ss:$16 sps:$4 sm:$0xff]   ;;  %v7670_v44 = vrot.slane %v17126_v41, %v18220_v35 }
 0xb2e   :  { %v8034_v16 = vpop.f32.mrf.mxu0  ;;  %v8075_v23 = vpop.f32.mrf.mxu1  ;;  %18352 = vst [vmem:[#allocation10_spill] sm:$0xff] %v17209_v29  ;;  %18353 = vst [vmem:[#allocation11_spill] sm:$0xff] %v17214_v31  ;;  %v17228_v49 = vld [vmem:[%s17918_s10 + $0x2c] ss:$16 sps:$4 sm:$0xff]  }
 0xb2f   :  { %13200 = vpow2.f32 %v11296_v36  ;;  %8825 = vmatpush1.bf16.msra.mxu0 %v17185_v63  ;;  %8866 = vmatpush1.bf16.msra.mxu1 %v17190_v43  ;;  %v17223_v23 = vld [vmem:[%s17918_s10 + $0x24] ss:$16 sps:$4 sm:$0xff]   ;;  %18355 = vst [vmem:[#allocation26_spill] sm:$0xff] %v17228_v49  ;;  %v17235_v36 = vld [vmem:[%s17918_s10 + $0x20] ss:$16 sps:$4 sm:$0xff]   ;;  %v8073_v35 = vadd.f32 %v8072_v13, %v7670_v44 }
 0xb30   :  { %8826 = vmatprep.subr.bf16.mxu0 %v17197_v4  ;;  %8867 = vmatprep.subr.bf16.mxu1 %v17202_v21  ;;  %18354 = vst [vmem:[#allocation27_spill] sm:$0xff] %v17223_v23  ;;  %18356 = vst [vmem:[#allocation7_spill] sm:$0xff] %v17235_v36  ;;  %v17240_v16 = vld [vmem:[%s17918_s10 + $0x28] ss:$16 sps:$4 sm:$0xff]   ;;  %v7666_v21 = vrot.slane %v17126_v41, %v18314_v2  ;;  %v17261_v13 = vld [vmem:[%s17918_s10] ss:$16 sps:$4 sm:$0xff]  }
 0xb31   :  { %18357 = vst [vmem:[#allocation23_spill] sm:$0xff] %v17240_v16  ;;  %18360 = vst [vmem:[#allocation36_spill] sm:$0xff] %v17261_v13  ;;  %v17266_v44 = vld [vmem:[%s17918_s10 + $0x8] ss:$16 sps:$4 sm:$0xff]   ;;  %v17273_v41 = vld [vmem:[%s17918_s10 + $0x1e4] ss:$16 sps:$4 sm:$0xff]  }
 0xb32   :  { %18361 = vst [vmem:[#allocation37_spill] sm:$0xff] %v17266_v44  ;;  %18362 = vst [vmem:[#allocation38_spill] sm:$0xff] %v17273_v41  ;;  %v8071_v2 = vadd.f32 %v8070_v53, %v7666_v21  ;;  %v17297_v53 = vld [vmem:[%s17918_s10 + $0x1c4] ss:$16 sps:$4 sm:$0xff]   ;;  %v17302_v21 = vld [vmem:[%s17918_s10 + $0x1cc] ss:$16 sps:$4 sm:$0xff]  }
 0xb33   :  { %8827 = vmatpush1.bf16.msra.mxu0 %v17209_v29  ;;  %8868 = vmatpush1.bf16.msra.mxu1 %v17214_v31  ;;  %v17247_v29 = vld [vmem:[%s17918_s10 + $0x4] ss:$16 sps:$4 sm:$0xff]   ;;  %v17252_v31 = vld [vmem:[%s17918_s10 + $0xc] ss:$16 sps:$4 sm:$0xff]   ;;  %18366 = vst [vmem:[#allocation42_spill] sm:$0xff] %v17297_v53  ;;  %18367 = vst [vmem:[#allocation43_spill] sm:$0xff] %v17302_v21 }
 0xb34   :  { %8828 = vmatprep.subr.bf16.mxu0 %v17223_v23  ;;  %8869 = vmatprep.subr.bf16.mxu1 %v17228_v49  ;;  %18358 = vst [vmem:[#allocation22_spill] sm:$0xff] %v17247_v29  ;;  %18359 = vst [vmem:[#allocation35_spill] sm:$0xff] %v17252_v31  ;;  %v11297_v49 = vmul.f32 -1.442695, %v8073_v35  ;;  %v17285_v35 = vld [vmem:[%s17918_s10 + $0x1e0] ss:$16 sps:$4 sm:$0xff]  }
 0xb35   :  { %18364 = vst [vmem:[#allocation40_spill] sm:$0xff] %v17285_v35 }
 0xb36   :  { %13202 = vpow2.f32 %v11297_v49  ;;  %v17309_v49 = vld [vmem:[%s17918_s10 + $0x1c0] ss:$16 sps:$4 sm:$0xff]  }
 0xb37   :  { %8829 = vmatpush1.bf16.msra.mxu0 %v17235_v36  ;;  %8870 = vmatpush1.bf16.msra.mxu1 %v17240_v16  ;;  %v17278_v16 = vld [vmem:[%s17918_s10 + $0x1ec] ss:$16 sps:$4 sm:$0xff]   ;;  %18368 = vst [vmem:[#allocation44_spill] sm:$0xff] %v17309_v49 }
 0xb38   :  { %8830 = vmatprep.subr.bf16.mxu0 %v17247_v29  ;;  %8871 = vmatprep.subr.bf16.mxu1 %v17252_v31  ;;  %18363 = vst [vmem:[#allocation39_spill] sm:$0xff] %v17278_v16  ;;  %v17290_v31 = vld [vmem:[%s17918_s10 + $0x1e8] ss:$16 sps:$4 sm:$0xff]  }
 0xb39   :  { %18365 = vst [vmem:[#allocation41_spill] sm:$0xff] %v17290_v31 }
 0xb3a   :  { %v13199_v36 = vpop.eup %13198 }
 0xb3b   :  { %v8080_v23 = vadd.f32 1.0, %v13199_v36  ;;  %8831 = vmatpush1.bf16.msra.mxu0 %v17261_v13  ;;  %8872 = vmatpush1.bf16.msra.mxu1 %v17266_v44 }
 0xb3c   :  { %v13201_v29 = vpop.eup %13200  ;;  %8832 = vmatprep.subr.bf16.mxu0 %v17273_v41  ;;  %8873 = vmatprep.subr.bf16.mxu1 %v17278_v16  ;;  %v17314_v16 = vld [vmem:[%s17918_s10 + $0x1c8] ss:$16 sps:$4 sm:$0xff]  }
 0xb3d   :  { %13204 = vrcp.f32 %v8080_v23  ;;  %v8086_v36 = vadd.f32 1.0, %v13201_v29  ;;  %18369 = vst [vmem:[#allocation45_spill] sm:$0xff] %v17314_v16  ;;  %v17326_v29 = vld [vmem:[%s17918_s10 + $0x1ac] ss:$16 sps:$4 sm:$0xff]   ;;  %v17333_v23 = vld [vmem:[%s17918_s10 + $0x1a0] ss:$16 sps:$4 sm:$0xff]  }
 0xb3e   :  { %13206 = vtanh.f32 %v8071_v2  ;;  %v17321_v2 = vld [vmem:[%s17918_s10 + $0x1a4] ss:$16 sps:$4 sm:$0xff]   ;;  %18371 = vst [vmem:[#allocation47_spill] sm:$0xff] %v17326_v29  ;;  %18372 = vst [vmem:[#allocation48_spill] sm:$0xff] %v17333_v23 }
 0xb3f   :  { %13208 = vrcp.f32 %v8086_v36  ;;  %8833 = vmatpush2.bf16.msra.mxu0 %v17285_v35  ;;  %8874 = vmatpush2.bf16.msra.mxu1 %v17290_v31  ;;  %18370 = vst [vmem:[#allocation46_spill] sm:$0xff] %v17321_v2  ;;  %v17338_v36 = vld [vmem:[%s17918_s10 + $0x1a8] ss:$16 sps:$4 sm:$0xff]  }
 0xb40   :  { %8834 = vmatprep.subr.bf16.mxu0 %v17297_v53  ;;  %8875 = vmatprep.subr.bf16.mxu1 %v17302_v21  ;;  %18373 = vst [vmem:[#allocation49_spill] sm:$0xff] %v17338_v36 }
 0xb43   :  { %8835 = vmatpush2.bf16.msra.mxu0 %v17309_v49  ;;  %8876 = vmatpush2.bf16.msra.mxu1 %v17314_v16  ;;  %v17345_v49 = vld [vmem:[%s17918_s10 + $0x184] ss:$16 sps:$4 sm:$0xff]   ;;  %v17350_v16 = vld [vmem:[%s17918_s10 + $0x18c] ss:$16 sps:$4 sm:$0xff]   ;;  %v13203_v21 = vpop.eup %13202 }
 0xb44   :  { %8836 = vmatprep.subr.bf16.mxu0 %v17321_v2  ;;  %8877 = vmatprep.subr.bf16.mxu1 %v17326_v29  ;;  %18374 = vst [vmem:[#allocation50_spill] sm:$0xff] %v17345_v49  ;;  %18375 = vst [vmem:[#allocation51_spill] sm:$0xff] %v17350_v16  ;;  %v17357_v2 = vld [vmem:[%s17918_s10 + $0x180] ss:$16 sps:$4 sm:$0xff]   ;;  %v17362_v29 = vld [vmem:[%s17918_s10 + $0x188] ss:$16 sps:$4 sm:$0xff]  }
 0xb45   :  { %18376 = vst [vmem:[#allocation52_spill] sm:$0xff] %v17357_v2  ;;  %18377 = vst [vmem:[#allocation53_spill] sm:$0xff] %v17362_v29  ;;  %v8093_v41 = vadd.f32 1.0, %v13203_v21  ;;  %v17408_v21 = vld [vmem:[%s17918_s10 + $0x140] ss:$16 sps:$4 sm:$0xff]  }
 0xb47   :  { %8837 = vmatpush2.bf16.msra.mxu0 %v17333_v23  ;;  %8878 = vmatpush2.bf16.msra.mxu1 %v17338_v36  ;;  %v17369_v23 = vld [vmem:[%s17918_s10 + $0x164] ss:$16 sps:$4 sm:$0xff]   ;;  %v17374_v36 = vld [vmem:[%s17918_s10 + $0x16c] ss:$16 sps:$4 sm:$0xff]   ;;  %13210 = vrcp.f32 %v8093_v41 }
 0xb48   :  { %8838 = vmatprep.subr.bf16.mxu0 %v17345_v49  ;;  %8879 = vmatprep.subr.bf16.mxu1 %v17350_v16  ;;  %18378 = vst [vmem:[#allocation54_spill] sm:$0xff] %v17374_v36  ;;  %v17381_v16 = vld [vmem:[%s17918_s10 + $0x160] ss:$16 sps:$4 sm:$0xff]   ;;  %v17386_v49 = vld [vmem:[%s17918_s10 + $0x168] ss:$16 sps:$4 sm:$0xff]  }
 0xb49   :  { %v17445_v41 = vld [vmem:[%s17918_s10 + $0x104] ss:$16 sps:$4 sm:$0xff]  }
 0xb4a   :  { %v13205_v53 = vpop.eup %13204 }
 0xb4b   :  { %v13207_v31 = vpop.eup %13206  ;;  %8839 = vmatpush2.bf16.msra.mxu0 %v17357_v2  ;;  %8880 = vmatpush2.bf16.msra.mxu1 %v17362_v29  ;;  %v17393_v29 = vld [vmem:[%s17918_s10 + $0x144] ss:$16 sps:$4 sm:$0xff]   ;;  %v17398_v2 = vld [vmem:[%s17918_s10 + $0x14c] ss:$16 sps:$4 sm:$0xff]  }
 0xb4c   :  { %v13209_v35 = vpop.eup %13208  ;;  %8840 = vmatprep.subr.bf16.mxu0 %v17369_v23  ;;  %8881 = vmatprep.subr.bf16.mxu1 %v17374_v36  ;;  %v8097_v44 = vmul.f32 %v13207_v31, %v13205_v53  ;;  %v17413_v36 = vld [vmem:[%s17918_s10 + $0x148] ss:$16 sps:$4 sm:$0xff]   ;;  %v17425_v31 = vld [vmem:[%s17918_s10 + $0x12c] ss:$16 sps:$4 sm:$0xff]   ;;  %v17457_v53 = vld [vmem:[%s17918_s10 + $0x100] ss:$16 sps:$4 sm:$0xff]  }
 0xb4d   :  { %v8096_v13 = vmul.f32 %v13209_v35, %v16868_v12  ;;  %18379 = vst [vmem:[#allocation55_spill] sm:$0xff] %v17413_v36  ;;  %v17420_v12 = vld [vmem:[%s17918_s10 + $0x124] ss:$16 sps:$4 sm:$0xff]   ;;  %18381 = vst [vmem:[#allocation57_spill] sm:$0xff] %v17425_v31  ;;  %v17450_v35 = vld [vmem:[%s17918_s10 + $0x10c] ss:$16 sps:$4 sm:$0xff]  }
 0xb4e   :  { %18380 = vst [vmem:[#allocation56_spill] sm:$0xff] %v17420_v12 }
 0xb4f   :  { %v17401_v4 = vadd.f32 %v8097_v44, %v8096_v13  ;;  %8841 = vmatpush2.bf16.msra.mxu0 %v17381_v16  ;;  %8882 = vmatpush2.bf16.msra.mxu1 %v17386_v49  ;;  %v17433_v13 = vld [vmem:[%s17918_s10 + $0x120] ss:$16 sps:$4 sm:$0xff]   ;;  %v17438_v44 = vld [vmem:[%s17918_s10 + $0x128] ss:$16 sps:$4 sm:$0xff]  }
 0xb50   :  { %8842 = vmatprep.subr.bf16.mxu0 %v17393_v29  ;;  %8883 = vmatprep.subr.bf16.mxu1 %v17398_v2  ;;  %18382 = vst [vmem:[#allocation58_spill] sm:$0xff] %v17433_v13  ;;  %18383 = vst [vmem:[#allocation59_spill] sm:$0xff] %v17438_v44 }
 0xb51   :  { %13212 = vtanh.f32 %v17401_v4 }
 0xb53   :  { %8843 = vmatpush2.bf16.msra.mxu0 %v17408_v21  ;;  %8884 = vmatpush2.bf16.msra.mxu1 %v17413_v36 }
 0xb54   :  { %8844 = vmatprep.subr.bf16.mxu0 %v17420_v12  ;;  %8885 = vmatprep.subr.bf16.mxu1 %v17425_v31  ;;  %v17462_v31 = vld [vmem:[%s17918_s10 + $0x108] ss:$16 sps:$4 sm:$0xff]  }
 0xb57   :  { %8845 = vmatpush2.bf16.msra.mxu0 %v17433_v13  ;;  %8886 = vmatpush2.bf16.msra.mxu1 %v17438_v44  ;;  %v13211_v44 = vpop.eup %13210 }
 0xb58   :  { %8846 = vmatprep.subr.bf16.mxu0 %v17445_v41  ;;  %8887 = vmatprep.subr.bf16.mxu1 %v17450_v35 }
 0xb5b   :  { %8847 = vmatpush2.bf16.msra.mxu0 %v17457_v53  ;;  %8888 = vmatpush2.bf16.msra.mxu1 %v17462_v31 }
 0xb5c   :  { %9161 = vmatprep.subr.bf16.mxu1 %v16898_v6  ;;  %v12893_v6 = vld [vmem:[%s17914_s8 + $0xe0] ss:$16 sps:$4 sm:$0xff]  }
 0xb5e   :  { %v13213_v13 = vpop.eup %13212 }
 0xb5f   :  { %v17469_v12 = vmul.f32 %v13213_v13, %v13211_v44 }
 0xb61   :  { %v8409_v36 = vpack.c.bf16 %v17469_v12, %v17469_v12 }
 0xb63   :  { %8848 = vmatprep.mubr.bf16.mxu0 %v8409_v36  ;;  %8889 = vmatprep.mubr.bf16.mxu1 %v8409_v36 }
 0xb64   :  { %8849 = vmatmul.mubr.bf16.vlgmr.msra.gmra.mxu0 %v17085_v7  ;;  %8890 = vmatmul.mubr.bf16.vlgmr.msra.gmra.mxu1 %v17085_v7 }
 0xb65   :  { %9162 = vmatpush1.bf16.msra.mxu1 %v16903_v3  ;;  %9152 = vmatprep.mubr.bf16.mxu0 %v18170_v46  ;;  %v12898_v3 = vld [vmem:[%s17914_s8 + $0x24] ss:$16 sps:$4 sm:$0xff]  }
 0xb66   :  { %9163 = vmatprep.subr.bf16.mxu1 %v16915_v30  ;;  %9193 = vmatprep.mubr.bf16.mxu1 %v18170_v46  ;;  %v12895_v46 = vld [vmem:[%s17914_s8 + $0xe4] ss:$16 sps:$4 sm:$0xff]  }
 0xb67   :  { %9120 = vmatprep.subr.bf16.mxu0 %v12895_v46  ;;  %v12901_v30 = vld [vmem:[%s17914_s8 + $0x4] ss:$16 sps:$4 sm:$0xff]  }
 0xb68   :  { %9121 = vmatpush1.bf16.msra.mxu0 %v12893_v6 }
 0xb69   :  { %9164 = vmatpush1.bf16.msra.mxu1 %v16925_v15  ;;  %9122 = vmatprep.subr.bf16.mxu0 %v16910_v18  ;;  %v12896_v18 = vld [vmem:[%s17914_s8 + $0x20] ss:$16 sps:$4 sm:$0xff]  }
 0xb6a   :  { %9165 = vmatprep.subr.bf16.mxu1 %v16939_v10  ;;  %v18384_v10 = vld [vmem:[#allocation14_spill] sm:$0xff] }
 0xb6c   :  { %9123 = vmatpush1.bf16.msra.mxu0 %v16920_v22  ;;  %v12899_v22 = vld [vmem:[%s17914_s8] ss:$16 sps:$4 sm:$0xff]  }
 0xb6d   :  { %9166 = vmatpush1.bf16.msra.mxu1 %v16949_v48  ;;  %9124 = vmatprep.subr.bf16.mxu0 %v16934_v17 }
 0xb6e   :  { %9167 = vmatprep.subr.bf16.mxu1 %v16963_v51 }
 0xb70   :  { %9125 = vmatpush1.bf16.msra.mxu0 %v16944_v27 }
 0xb71   :  { %9168 = vmatpush1.bf16.msra.mxu1 %v16973_v62  ;;  %9126 = vmatprep.subr.bf16.mxu0 %v16958_v14 }
 0xb72   :  { %9169 = vmatprep.subr.bf16.mxu1 %v16997_v40 }
 0xb74   :  { %9127 = vmatpush1.bf16.msra.mxu0 %v16968_v61  ;;  %v18385_v61 = vld [vmem:[#allocation15_spill] sm:$0xff] }
 0xb75   :  { %9170 = vmatpush1.bf16.msra.mxu1 %v16992_v57  ;;  %9128 = vmatprep.subr.bf16.mxu0 %v16980_v20 }
 0xb76   :  { %9171 = vmatprep.subr.bf16.mxu1 %v17008_v39  ;;  %v18386_v39 = vld [vmem:[#allocation31_spill] sm:$0xff] }
 0xb78   :  { %9129 = vmatpush1.bf16.msra.mxu0 %v16987_v34 }
 0xb79   :  { %9172 = vmatpush1.bf16.msra.mxu1 %v17021_v32  ;;  %9130 = vmatprep.subr.bf16.mxu0 %v17003_v56  ;;  %v18387_v32 = vld [vmem:[#allocation30_spill] sm:$0xff] }
 0xb7a   :  { %9173 = vmatprep.subr.bf16.mxu1 %v17028_v45 }
 0xb7c   :  { %9131 = vmatpush1.bf16.msra.mxu0 %v17016_v59 }
 0xb7d   :  { %9174 = vmatpush1.bf16.msra.mxu1 %v17035_v24  ;;  %9132 = vmatprep.subr.bf16.mxu0 %v12898_v3 }
 0xb7e   :  { %9175 = vmatprep.subr.bf16.mxu1 %v17042_v38 }
 0xb80   :  { %9133 = vmatpush1.bf16.msra.mxu0 %v12896_v18 }
 0xb81   :  { %9176 = vmatpush1.bf16.msra.mxu1 %v17049_v52  ;;  %9134 = vmatprep.subr.bf16.mxu0 %v12901_v30 }
 0xb82   :  { %9678 = vmatprep.subr.bf16.mxu1 %v17063_v50 }
 0xb84   :  { %9135 = vmatpush1.bf16.msra.mxu0 %v12899_v22 }
 0xb85   :  { %9637 = vmatprep.subr.bf16.mxu0 %v17058_v33 }
 0xbde   :  { %v8333_v15 = vpop.f32.mrf.mxu0  ;;  %v8374_v17 = vpop.f32.mrf.mxu1 }
 0xbdf   :  { %v8381_v27 = vadd.f32 %v8333_v15, %v18384_v10  ;;  %v8383_v45 = vadd.f32 %v8374_v17, %v18387_v32  ;;  %v18401_v32 = vld [vmem:[#allocation35_spill] sm:$0xff] }
 0xbe0   :  { %v8335_v48 = vpop.f32.mrf.mxu0  ;;  %v8376_v14 = vpop.f32.mrf.mxu1 }
 0xbe1   :  { %v11330_v51 = vmul.f32 -1.442695, %v8381_v27  ;;  %v8382_v62 = vadd.f32 %v8335_v48, %v18385_v61  ;;  %v8384_v59 = vadd.f32 %v8376_v14, %v18386_v39  ;;  %v18391_v61 = vld [vmem:[#allocation24_spill] sm:$0xff]  ;;  %v18398_v39 = vld [vmem:[#allocation7_spill] sm:$0xff] }
 0xbe2   :  { %v8337_v20 = vpop.f32.mrf.mxu0  ;;  %v8378_v34 = vpop.f32.mrf.mxu1 }
 0xbe3   :  { %13214 = vpow2.f32 %v11330_v51  ;;  %v11331_v57 = vmul.f32 -1.442695, %v8382_v62  ;;  %v11332_v24 = vmul.f32 -1.442695, %v8384_v59  ;;  %v18392_v62 = vld [vmem:[#allocation19_spill] sm:$0xff]  ;;  %v18400_v59 = vld [vmem:[#allocation22_spill] sm:$0xff] }
 0xbe4   :  { %v8338_v40 = vpop.f32.mrf.mxu0  ;;  %v8379_v56 = vpop.f32.mrf.mxu1  ;;  %v18395_v34 = vld [vmem:[#allocation27_spill] sm:$0xff] }
 0xbe5   :  { %13216 = vpow2.f32 %v11331_v57  ;;  %v18396_v57 = vld [vmem:[#allocation26_spill] sm:$0xff] }
 0xbe6   :  { %13218 = vtanh.f32 %v8383_v45  ;;  %v18397_v56 = vld [vmem:[#allocation18_spill] sm:$0xff] }
 0xbe7   :  { %13220 = vpow2.f32 %v11332_v24 }
 0xbf0   :  { %v13215_v38 = vpop.eup %13214 }
 0xbf1   :  { %v8388_v52 = vadd.f32 1.0, %v13215_v38 }
 0xbf2   :  { %v13217_v33 = vpop.eup %13216 }
 0xbf3   :  { %13222 = vrcp.f32 %v8388_v52  ;;  %v8394_v50 = vadd.f32 1.0, %v13217_v33  ;;  %v13219_v7 = vpop.eup %13218  ;;  %v18402_v52 = vld [vmem:[#allocation36_spill] sm:$0xff]  ;;  %v18403_v33 = vld [vmem:[#allocation37_spill] sm:$0xff] }
 0xbf4   :  { %v13221_v36 = vpop.eup %13220 }
 0xbf5   :  { %13224 = vrcp.f32 %v8394_v50  ;;  %v8401_v6 = vadd.f32 1.0, %v13221_v36  ;;  %v18405_v36 = vld [vmem:[#allocation39_spill] sm:$0xff] }
 0xbf7   :  { %13226 = vrcp.f32 %v8401_v6  ;;  %v18407_v6 = vld [vmem:[#allocation41_spill] sm:$0xff] }
 0xc00   :  { %v13223_v13 = vpop.eup %13222 }
 0xc01   :  { %v8405_v44 = vmul.f32 %v13223_v13, %v13219_v7  ;;  %v18404_v7 = vld [vmem:[#allocation38_spill] sm:$0xff] }
 0xc02   :  { %v13225_v46 = vpop.eup %13224 }
 0xc03   :  { %v8404_v3 = vmul.f32 %v13225_v46, %v17072_v42  ;;  %v8474_v42 = vld [vmem:[%s17919_s11] sm:$0xf] }
 0xc04   :  { %v13227_v30 = vpop.eup %13226  ;;  %v8491_v20 = vrot.slane %v8474_v42, %v18392_v62  ;;  %v18406_v46 = vld [vmem:[#allocation40_spill] sm:$0xff] }
 0xc05   :  { %v17527_v18 = vadd.f32 %v8405_v44, %v8404_v3  ;;  %v18408_v3 = vld [vmem:[#allocation42_spill] sm:$0xff] }
 0xc07   :  { %13228 = vtanh.f32 %v17527_v18 }
 0xc14   :  { %v13229_v22 = vpop.eup %13228 }
 0xc15   :  { %v8408_v15 = vmul.f32 %v13229_v22, %v13227_v30  ;;  %v18409_v30 = vld [vmem:[#allocation43_spill] sm:$0xff]  ;;  %v18410_v22 = vld [vmem:[#allocation44_spill] sm:$0xff] }
 0xc17   :  { %v17530_v17 = vpack.c.bf16 %v8408_v15, %v8408_v15  ;;  %v18411_v15 = vld [vmem:[#allocation45_spill] sm:$0xff] }
 0xc19   :  { %9153 = vmatmul.mubr.bf16.vlgmr.msra.gmra.mxu0 %v17530_v17  ;;  %9194 = vmatmul.mubr.bf16.vlgmr.msra.gmra.mxu1 %v17530_v17 }
 0xc1a   :  { %9638 = vmatpush1.bf16.msra.mxu0 %v17078_v0  ;;  %9679 = vmatpush1.bf16.msra.mxu1 %v17083_v37  ;;  %v8479_v0 = vrot.slane %v8474_v42, %v14703_v26  ;;  %v8483_v37 = vrot.slane %v8474_v42, %v14715_v58 }
 0xc1b   :  { %9639 = vmatprep.subr.bf16.mxu0 %v17090_v60  ;;  %9680 = vmatprep.subr.bf16.mxu1 %v17095_v28  ;;  %v18388_v60 = vld [vmem:[#allocation8_spill] sm:$0xff] }
 0xc1e   :  { %9640 = vmatpush1.bf16.msra.mxu0 %v17104_v47  ;;  %9681 = vmatpush1.bf16.msra.mxu1 %v17109_v25 }
 0xc1f   :  { %9641 = vmatprep.subr.bf16.mxu0 %v17116_v19  ;;  %9682 = vmatprep.subr.bf16.mxu1 %v17121_v8  ;;  %v18389_v19 = vld [vmem:[#allocation9_spill] sm:$0xff] }
 0xc22   :  { %9642 = vmatpush1.bf16.msra.mxu0 %v17133_v5  ;;  %9683 = vmatpush1.bf16.msra.mxu1 %v17138_v11 }
 0xc23   :  { %9643 = vmatprep.subr.bf16.mxu0 %v17145_v55  ;;  %9684 = vmatprep.subr.bf16.mxu1 %v18388_v60  ;;  %v18415_v60 = vld [vmem:[#allocation49_spill] sm:$0xff] }
 0xc24   :  { %v8850_v28 = vpop.f32.mrf.mxu0  ;;  %v8891_v47 = vpop.f32.mrf.mxu1 }
 0xc25   :  { %v8851_v10 = vadd.f32 %v8850_v28, %v8479_v0  ;;  %v18413_v0 = vld [vmem:[#allocation47_spill] sm:$0xff]  ;;  %v18416_v28 = vld [vmem:[#allocation50_spill] sm:$0xff] }
 0xc26   :  { %v8852_v25 = vpop.f32.mrf.mxu0  ;;  %v8893_v27 = vpop.f32.mrf.mxu1  ;;  %9644 = vmatpush1.bf16.msra.mxu0 %v17161_v9  ;;  %9685 = vmatpush1.bf16.msra.mxu1 %v18389_v19  ;;  %v18390_v9 = vld [vmem:[#allocation25_spill] sm:$0xff] }
 0xc27   :  { %v11397_v8 = vmul.f32 -1.442695, %v8851_v10  ;;  %v8853_v48 = vadd.f32 %v8852_v25, %v8483_v37  ;;  %9645 = vmatprep.subr.bf16.mxu0 %v17173_v1  ;;  %9686 = vmatprep.subr.bf16.mxu1 %v17178_v54  ;;  %v18393_v1 = vld [vmem:[#allocation10_spill] sm:$0xff]  ;;  %v18394_v54 = vld [vmem:[#allocation11_spill] sm:$0xff]  ;;  %v8894_v40 = vadd.f32 %v8893_v27, %v8491_v20  ;;  %v18414_v37 = vld [vmem:[#allocation48_spill] sm:$0xff] }
 0xc28   :  { %v8854_v5 = vpop.f32.mrf.mxu0  ;;  %v8895_v11 = vpop.f32.mrf.mxu1  ;;  %v18418_v27 = vld [vmem:[#allocation52_spill] sm:$0xff]  ;;  %v18419_v19 = vld [vmem:[#allocation53_spill] sm:$0xff] }
 0xc29   :  { %13230 = vpow2.f32 %v11397_v8  ;;  %v11398_v55 = vmul.f32 -1.442695, %v8853_v48  ;;  %v11399_v45 = vmul.f32 -1.442695, %v8894_v40  ;;  %v18420_v48 = vld [vmem:[#allocation54_spill] sm:$0xff] }
 0xc2a   :  { %v8855_v14 = vpop.f32.mrf.mxu0  ;;  %v8896_v51 = vpop.f32.mrf.mxu1  ;;  %9646 = vmatpush1.bf16.msra.mxu0 %v17185_v63  ;;  %9687 = vmatpush1.bf16.msra.mxu1 %v17190_v43  ;;  %v8487_v63 = vrot.slane %v8474_v42, %v18397_v56  ;;  %v18399_v43 = vld [vmem:[#allocation23_spill] sm:$0xff]  ;;  %v18412_v42 = vld [vmem:[#allocation46_spill] sm:$0xff] }
 0xc2b   :  { %13232 = vpow2.f32 %v11398_v55  ;;  %9647 = vmatprep.subr.bf16.mxu0 %v18390_v9  ;;  %9688 = vmatprep.subr.bf16.mxu1 %v18391_v61  ;;  %v18422_v9 = vld [vmem:[#allocation56_spill] sm:$0xff]  ;;  %v12919_v40 = vld [vmem:[%s17918_s10 + $0xac] ss:$16 sps:$4 sm:$0xff]  }
 0xc2c   :  { %v8892_v38 = vadd.f32 %v8891_v47, %v8487_v63  ;;  %13234 = vpow2.f32 %v11399_v45  ;;  %v18417_v47 = vld [vmem:[#allocation51_spill] sm:$0xff]  ;;  %v12908_v20 = vld [vmem:[%s17918_s10 + $0xc0] ss:$16 sps:$4 sm:$0xff]   ;;  %v12928_v45 = vld [vmem:[%s17918_s10 + $0x64] ss:$16 sps:$4 sm:$0xff]  }
 0xc2d   :  { %v12917_v63 = vld [vmem:[%s17918_s10 + $0xa8] ss:$16 sps:$4 sm:$0xff]  }
 0xc2e   :  { %9648 = vmatpush1.bf16.msra.mxu0 %v18393_v1  ;;  %9689 = vmatpush1.bf16.msra.mxu1 %v18394_v54  ;;  %v12913_v1 = vld [vmem:[%s17918_s10 + $0xcc] ss:$16 sps:$4 sm:$0xff]   ;;  %v12911_v54 = vld [vmem:[%s17918_s10 + $0xc8] ss:$16 sps:$4 sm:$0xff]  }
 0xc2f   :  { %9649 = vmatprep.subr.bf16.mxu0 %v18395_v34  ;;  %9690 = vmatprep.subr.bf16.mxu1 %v18396_v57  ;;  %v12916_v34 = vld [vmem:[%s17918_s10 + $0xa4] ss:$16 sps:$4 sm:$0xff]   ;;  %v12914_v57 = vld [vmem:[%s17918_s10 + $0xa0] ss:$16 sps:$4 sm:$0xff]  }
 0xc32   :  { %9650 = vmatpush1.bf16.msra.mxu0 %v18398_v39  ;;  %9691 = vmatpush1.bf16.msra.mxu1 %v18399_v43  ;;  %v12922_v39 = vld [vmem:[%s17918_s10 + $0x84] ss:$16 sps:$4 sm:$0xff]   ;;  %v12920_v43 = vld [vmem:[%s17918_s10 + $0x80] ss:$16 sps:$4 sm:$0xff]  }
 0xc33   :  { %9651 = vmatprep.subr.bf16.mxu0 %v18400_v59  ;;  %9692 = vmatprep.subr.bf16.mxu1 %v18401_v32  ;;  %v12925_v59 = vld [vmem:[%s17918_s10 + $0x8c] ss:$16 sps:$4 sm:$0xff]   ;;  %v12923_v32 = vld [vmem:[%s17918_s10 + $0x88] ss:$16 sps:$4 sm:$0xff]  }
 0xc36   :  { %v13231_v24 = vpop.eup %13230  ;;  %9652 = vmatpush1.bf16.msra.mxu0 %v18402_v52  ;;  %9693 = vmatpush1.bf16.msra.mxu1 %v18403_v33  ;;  %v12929_v52 = vld [vmem:[%s17918_s10 + $0x68] ss:$16 sps:$4 sm:$0xff]   ;;  %v12934_v33 = vld [vmem:[%s17918_s10 + $0x44] ss:$16 sps:$4 sm:$0xff]  }
 0xc37   :  { %v8901_v50 = vadd.f32 1.0, %v13231_v24  ;;  %9653 = vmatprep.subr.bf16.mxu0 %v18404_v7  ;;  %9694 = vmatprep.subr.bf16.mxu1 %v18405_v36  ;;  %v12926_v24 = vld [vmem:[%s17918_s10 + $0x60] ss:$16 sps:$4 sm:$0xff]   ;;  %v12937_v7 = vld [vmem:[%s17918_s10 + $0x4c] ss:$16 sps:$4 sm:$0xff]  }
 0xc38   :  { %v13233_v13 = vpop.eup %13232  ;;  %v12935_v36 = vld [vmem:[%s17918_s10 + $0x48] ss:$16 sps:$4 sm:$0xff]  }
 0xc39   :  { %13236 = vrcp.f32 %v8901_v50  ;;  %v8907_v44 = vadd.f32 1.0, %v13233_v13  ;;  %v13235_v10 = vpop.eup %13234  ;;  %v12932_v50 = vld [vmem:[%s17918_s10 + $0x40] ss:$16 sps:$4 sm:$0xff]   ;;  %v12940_v13 = vld [vmem:[%s17918_s10 + $0x24] ss:$16 sps:$4 sm:$0xff]  }
 0xc3a   :  { %13238 = vtanh.f32 %v8892_v38  ;;  %9654 = vmatpush2.bf16.msra.mxu0 %v18406_v46  ;;  %9695 = vmatpush2.bf16.msra.mxu1 %v18407_v6  ;;  %v8914_v11 = vadd.f32 1.0, %v13235_v10  ;;  %v12931_v38 = vld [vmem:[%s17918_s10 + $0x6c] ss:$16 sps:$4 sm:$0xff]   ;;  %v12941_v6 = vld [vmem:[%s17918_s10 + $0x28] ss:$16 sps:$4 sm:$0xff]  }
 0xc3b   :  { %13240 = vrcp.f32 %v8907_v44  ;;  %9655 = vmatprep.subr.bf16.mxu0 %v18408_v3  ;;  %9696 = vmatprep.subr.bf16.mxu1 %v18409_v30  ;;  %v12938_v44 = vld [vmem:[%s17918_s10 + $0x20] ss:$16 sps:$4 sm:$0xff]   ;;  %v12943_v46 = vld [vmem:[%s17918_s10 + $0x2c] ss:$16 sps:$4 sm:$0xff]   ;;  %v12946_v3 = vld [vmem:[%s17918_s10 + $0x4] ss:$16 sps:$4 sm:$0xff]  }
 0xc3c   :  { %13242 = vrcp.f32 %v8914_v11  ;;  %v12944_v30 = vld [vmem:[%s17918_s10] ss:$16 sps:$4 sm:$0xff]   ;;  %v12961_v10 = vld [vmem:[%s17918_s10 + $0x1cc] ss:$16 sps:$4 sm:$0xff]  }
 0xc3d   :  { %v12968_v11 = vld [vmem:[%s17918_s10 + $0x180] ss:$16 sps:$4 sm:$0xff]  }
 0xc3e   :  { %9656 = vmatpush2.bf16.msra.mxu0 %v18410_v22  ;;  %9697 = vmatpush2.bf16.msra.mxu1 %v18411_v15  ;;  %v12949_v22 = vld [vmem:[%s17918_s10 + $0xc] ss:$16 sps:$4 sm:$0xff]   ;;  %v12947_v15 = vld [vmem:[%s17918_s10 + $0x8] ss:$16 sps:$4 sm:$0xff]  }
 0xc3f   :  { %9657 = vmatprep.subr.bf16.mxu0 %v18412_v42  ;;  %9698 = vmatprep.subr.bf16.mxu1 %v18413_v0  ;;  %v12952_v42 = vld [vmem:[%s17918_s10 + $0x1e4] ss:$16 sps:$4 sm:$0xff]   ;;  %v12950_v0 = vld [vmem:[%s17918_s10 + $0x1e0] ss:$16 sps:$4 sm:$0xff]  }
 0xc42   :  { %9658 = vmatpush2.bf16.msra.mxu0 %v18414_v37  ;;  %9699 = vmatpush2.bf16.msra.mxu1 %v18415_v60  ;;  %v12955_v37 = vld [vmem:[%s17918_s10 + $0x1ec] ss:$16 sps:$4 sm:$0xff]   ;;  %v12953_v60 = vld [vmem:[%s17918_s10 + $0x1e8] ss:$16 sps:$4 sm:$0xff]  }
 0xc43   :  { %9659 = vmatprep.subr.bf16.mxu0 %v18416_v28  ;;  %9700 = vmatprep.subr.bf16.mxu1 %v18417_v47  ;;  %v12958_v28 = vld [vmem:[%s17918_s10 + $0x1c4] ss:$16 sps:$4 sm:$0xff]   ;;  %v12956_v47 = vld [vmem:[%s17918_s10 + $0x1c0] ss:$16 sps:$4 sm:$0xff]  }
 0xc46   :  { %v13237_v25 = vpop.eup %13236  ;;  %9660 = vmatpush2.bf16.msra.mxu0 %v18418_v27  ;;  %9701 = vmatpush2.bf16.msra.mxu1 %v18419_v19  ;;  %v12964_v27 = vld [vmem:[%s17918_s10 + $0x1a4] ss:$16 sps:$4 sm:$0xff]   ;;  %v12962_v19 = vld [vmem:[%s17918_s10 + $0x1a0] ss:$16 sps:$4 sm:$0xff]  }
 0xc47   :  { %v13239_v8 = vpop.eup %13238  ;;  %9661 = vmatprep.subr.bf16.mxu0 %v17369_v23  ;;  %9702 = vmatprep.subr.bf16.mxu1 %v18420_v48  ;;  %v18421_v23 = vld [vmem:[#allocation55_spill] sm:$0xff] }
 0xc48   :  { %v13241_v5 = vpop.eup %13240  ;;  %v8918_v55 = vmul.f32 %v13239_v8, %v13237_v25  ;;  %v12959_v25 = vld [vmem:[%s17918_s10 + $0x1c8] ss:$16 sps:$4 sm:$0xff]   ;;  %v12967_v8 = vld [vmem:[%s17918_s10 + $0x1ac] ss:$16 sps:$4 sm:$0xff]  }
 0xc49   :  { %v8917_v14 = vmul.f32 %v13241_v5, %v17401_v4  ;;  %v18423_v4 = vld [vmem:[#allocation57_spill] sm:$0xff]  ;;  %v12970_v5 = vld [vmem:[%s17918_s10 + $0x184] ss:$16 sps:$4 sm:$0xff]  }
 0xc4a   :  { %9662 = vmatpush2.bf16.msra.mxu0 %v17381_v16  ;;  %9703 = vmatpush2.bf16.msra.mxu1 %v17386_v49  ;;  %v18424_v16 = vld [vmem:[#allocation58_spill] sm:$0xff]  ;;  %v18425_v49 = vld [vmem:[#allocation59_spill] sm:$0xff] }
 0xc4b   :  { %v17592_v51 = vadd.f32 %v8918_v55, %v8917_v14  ;;  %9663 = vmatprep.subr.bf16.mxu0 %v17393_v29  ;;  %9704 = vmatprep.subr.bf16.mxu1 %v17398_v2  ;;  %v13243_v2 = vpop.eup %13242  ;;  %v12965_v48 = vld [vmem:[%s17918_s10 + $0x1a8] ss:$16 sps:$4 sm:$0xff]   ;;  %v12973_v14 = vld [vmem:[%s17918_s10 + $0x18c] ss:$16 sps:$4 sm:$0xff]  }
 0xc4c   :  { %v12971_v55 = vld [vmem:[%s17918_s10 + $0x188] ss:$16 sps:$4 sm:$0xff]  }
 0xc4d   :  { %13244 = vtanh.f32 %v17592_v51 }
 0xc4e   :  { %9664 = vmatpush2.bf16.msra.mxu0 %v17408_v21  ;;  %9705 = vmatpush2.bf16.msra.mxu1 %v18421_v23  ;;  %v12976_v23 = vld [vmem:[%s17918_s10 + $0x164] ss:$16 sps:$4 sm:$0xff]  }
 0xc4f   :  { %9665 = vmatprep.subr.bf16.mxu0 %v18422_v9  ;;  %9706 = vmatprep.subr.bf16.mxu1 %v18423_v4  ;;  %v12974_v9 = vld [vmem:[%s17918_s10 + $0x160] ss:$16 sps:$4 sm:$0xff]   ;;  %v12979_v4 = vld [vmem:[%s17918_s10 + $0x16c] ss:$16 sps:$4 sm:$0xff]  }
 0xc52   :  { %9666 = vmatpush2.bf16.msra.mxu0 %v18424_v16  ;;  %9707 = vmatpush2.bf16.msra.mxu1 %v18425_v49  ;;  %v12977_v16 = vld [vmem:[%s17918_s10 + $0x168] ss:$16 sps:$4 sm:$0xff]   ;;  %v12982_v49 = vld [vmem:[%s17918_s10 + $0x144] ss:$16 sps:$4 sm:$0xff]  }
 0xc53   :  { %9667 = vmatprep.subr.bf16.mxu0 %v17445_v41  ;;  %9708 = vmatprep.subr.bf16.mxu1 %v17450_v35  ;;  %v12902_v41 = vld [vmem:[%s17918_s10 + $0xe0] ss:$16 sps:$4 sm:$0xff]   ;;  %v12905_v35 = vld [vmem:[%s17918_s10 + $0xe8] ss:$16 sps:$4 sm:$0xff]  }
 0xc56   :  { %9668 = vmatpush2.bf16.msra.mxu0 %v17457_v53  ;;  %9709 = vmatpush2.bf16.msra.mxu1 %v17462_v31  ;;  %v12904_v31 = vld [vmem:[%s17918_s10 + $0xe4] ss:$16 sps:$4 sm:$0xff]   ;;  %v12907_v53 = vld [vmem:[%s17918_s10 + $0xec] ss:$16 sps:$4 sm:$0xff]  }
 0xc57   :  { %10152 = vmatprep.subr.bf16.mxu0 %v12904_v31  ;;  %10193 = vmatprep.subr.bf16.mxu1 %v12907_v53  ;;  %v12991_v31 = vld [vmem:[%s17918_s10 + $0x12c] ss:$16 sps:$4 sm:$0xff]   ;;  %v12989_v53 = vld [vmem:[%s17918_s10 + $0x128] ss:$16 sps:$4 sm:$0xff]  }
 0xc5a   :  { %v13245_v29 = vpop.eup %13244 }
 0xc5b   :  { %v17607_v21 = vmul.f32 %v13245_v29, %v13243_v2  ;;  %v12985_v2 = vld [vmem:[%s17918_s10 + $0x14c] ss:$16 sps:$4 sm:$0xff]   ;;  %v12980_v29 = vld [vmem:[%s17918_s10 + $0x140] ss:$16 sps:$4 sm:$0xff]  }
 0xc5d   :  { %v9230_v61 = vpack.c.bf16 %v17607_v21, %v17607_v21 }
 0xc5f   :  { %9669 = vmatprep.mubr.bf16.mxu0 %v9230_v61  ;;  %9710 = vmatprep.mubr.bf16.mxu1 %v9230_v61  ;;  %v12983_v61 = vld [vmem:[%s17918_s10 + $0x148] ss:$16 sps:$4 sm:$0xff]  }
 0xc60   :  { %9670 = vmatmul.mubr.bf16.vlgmr.msra.gmra.mxu0 %v17530_v17  ;;  %9711 = vmatmul.mubr.bf16.vlgmr.msra.gmra.mxu1 %v17530_v17  ;;  %v12910_v17 = vld [vmem:[%s17918_s10 + $0xc4] ss:$16 sps:$4 sm:$0xff]  }
 0xc61   :  { %10153 = vmatpush1.bf16.msra.mxu0 %v12902_v41  ;;  %10194 = vmatpush1.bf16.msra.mxu1 %v12905_v35  ;;  %v12988_v41 = vld [vmem:[%s17918_s10 + $0x124] ss:$16 sps:$4 sm:$0xff]   ;;  %v12986_v35 = vld [vmem:[%s17918_s10 + $0x120] ss:$16 sps:$4 sm:$0xff]  }
 0xc62   :  { %10154 = vmatprep.subr.bf16.mxu0 %v12910_v17  ;;  %10195 = vmatprep.subr.bf16.mxu1 %v12913_v1  ;;  %v12994_v17 = vld [vmem:[%s17918_s10 + $0x104] ss:$16 sps:$4 sm:$0xff]   ;;  %v12992_v1 = vld [vmem:[%s17918_s10 + $0x100] ss:$16 sps:$4 sm:$0xff]  }
 0xc65   :  { %10155 = vmatpush1.bf16.msra.mxu0 %v12908_v20  ;;  %10196 = vmatpush1.bf16.msra.mxu1 %v12911_v54  ;;  %v12997_v20 = vld [vmem:[%s17918_s10 + $0x10c] ss:$16 sps:$4 sm:$0xff]   ;;  %v12995_v54 = vld [vmem:[%s17918_s10 + $0x108] ss:$16 sps:$4 sm:$0xff]  }
 0xc66   :  { %10156 = vmatprep.subr.bf16.mxu0 %v12916_v34  ;;  %10197 = vmatprep.subr.bf16.mxu1 %v12919_v40  ;;  %v18426_v40 = vld [vmem:[#allocation16_spill] sm:$0xff] }
 0xc69   :  { %10157 = vmatpush1.bf16.msra.mxu0 %v12914_v57  ;;  %10198 = vmatpush1.bf16.msra.mxu1 %v12917_v63 }
 0xc6a   :  { %10158 = vmatprep.subr.bf16.mxu0 %v12922_v39  ;;  %10199 = vmatprep.subr.bf16.mxu1 %v12925_v59  ;;  %v18427_v39 = vld [vmem:[#allocation32_spill] sm:$0xff]  ;;  %v18428_v59 = vmov 0.0  }
 0xc6d   :  { %10159 = vmatpush1.bf16.msra.mxu0 %v12920_v43  ;;  %10200 = vmatpush1.bf16.msra.mxu1 %v12923_v32 }
 0xc6e   :  { %10160 = vmatprep.subr.bf16.mxu0 %v12928_v45  ;;  %10201 = vmatprep.subr.bf16.mxu1 %v12931_v38  ;;  %v18429_v38 = vld [vmem:[#allocation17_spill] sm:$0xff] }
 0xc71   :  { %10161 = vmatpush1.bf16.msra.mxu0 %v12926_v24  ;;  %10202 = vmatpush1.bf16.msra.mxu1 %v12929_v52 }
 0xc72   :  { %10162 = vmatprep.subr.bf16.mxu0 %v12934_v33  ;;  %10203 = vmatprep.subr.bf16.mxu1 %v12937_v7  ;;  %v18430_v33 = vld [vmem:[#allocation33_spill] sm:$0xff] }
 0xc75   :  { %10163 = vmatpush1.bf16.msra.mxu0 %v12932_v50  ;;  %10204 = vmatpush1.bf16.msra.mxu1 %v12935_v36 }
 0xc76   :  { %10164 = vmatprep.subr.bf16.mxu0 %v12940_v13  ;;  %10205 = vmatprep.subr.bf16.mxu1 %v12943_v46 }
 0xc79   :  { %10165 = vmatpush1.bf16.msra.mxu0 %v12938_v44  ;;  %10206 = vmatpush1.bf16.msra.mxu1 %v12941_v6 }
 0xc7a   :  { %10166 = vmatprep.subr.bf16.mxu0 %v12946_v3  ;;  %10207 = vmatprep.subr.bf16.mxu1 %v12949_v22 }
 0xc7d   :  { %10167 = vmatpush1.bf16.msra.mxu0 %v12944_v30  ;;  %10208 = vmatpush1.bf16.msra.mxu1 %v12947_v15 }
 0xc7e   :  { %10168 = vmatprep.subr.bf16.mxu0 %v12952_v42  ;;  %10209 = vmatprep.subr.bf16.mxu1 %v12955_v37 }
 0xc81   :  { %10169 = vmatpush2.bf16.msra.mxu0 %v12950_v0  ;;  %10210 = vmatpush2.bf16.msra.mxu1 %v12953_v60 }
 0xc82   :  { %10170 = vmatprep.subr.bf16.mxu0 %v12958_v28  ;;  %10211 = vmatprep.subr.bf16.mxu1 %v12961_v10 }
 0xc85   :  { %10171 = vmatpush2.bf16.msra.mxu0 %v12956_v47  ;;  %10212 = vmatpush2.bf16.msra.mxu1 %v12959_v25 }
 0xc86   :  { %10172 = vmatprep.subr.bf16.mxu0 %v12964_v27  ;;  %10213 = vmatprep.subr.bf16.mxu1 %v12967_v8 }
 0xc89   :  { %10173 = vmatpush2.bf16.msra.mxu0 %v12962_v19  ;;  %10214 = vmatpush2.bf16.msra.mxu1 %v12965_v48  ;;  %v9295_v48 = vld [vmem:[%s17919_s11] sm:$0xf] }
 0xc8a   :  { %10174 = vmatprep.subr.bf16.mxu0 %v12970_v5  ;;  %10215 = vmatprep.subr.bf16.mxu1 %v12973_v14  ;;  %v9300_v5 = vrot.slane %v9295_v48, %v14703_v26 }
 0xc8d   :  { %10175 = vmatpush2.bf16.msra.mxu0 %v12968_v11  ;;  %10216 = vmatpush2.bf16.msra.mxu1 %v12971_v55  ;;  %v9304_v11 = vrot.slane %v9295_v48, %v14715_v58 }
 0xc8e   :  { %10176 = vmatprep.subr.bf16.mxu0 %v12976_v23  ;;  %10217 = vmatprep.subr.bf16.mxu1 %v12979_v4 }
 0xc91   :  { %10177 = vmatpush2.bf16.msra.mxu0 %v12974_v9  ;;  %10218 = vmatpush2.bf16.msra.mxu1 %v12977_v16 }
 0xc92   :  { %10178 = vmatprep.subr.bf16.mxu0 %v12982_v49  ;;  %10219 = vmatprep.subr.bf16.mxu1 %v12985_v2 }
 0xc95   :  { %10179 = vmatpush2.bf16.msra.mxu0 %v12980_v29  ;;  %10220 = vmatpush2.bf16.msra.mxu1 %v12983_v61 }
 0xc96   :  { %10180 = vmatprep.subr.bf16.mxu0 %v12988_v41  ;;  %10221 = vmatprep.subr.bf16.mxu1 %v12991_v31  ;;  %v9312_v31 = vrot.slane %v9295_v48, %v18392_v62 }
 0xc99   :  { %10181 = vmatpush2.bf16.msra.mxu0 %v12986_v35  ;;  %10222 = vmatpush2.bf16.msra.mxu1 %v12989_v53  ;;  %v9308_v53 = vrot.slane %v9295_v48, %v18397_v56 }
 0xc9a   :  { %10182 = vmatprep.subr.bf16.mxu0 %v12994_v17  ;;  %10223 = vmatprep.subr.bf16.mxu1 %v12997_v20 }
 0xc9d   :  { %10183 = vmatpush2.bf16.msra.mxu0 %v12992_v1  ;;  %10224 = vmatpush2.bf16.msra.mxu1 %v12995_v54 }
 0xc9e   :  { %12098 = vmatprep.subr.bf16.mxu0 %v18428_v59 }
 0xcd9   :  { %v9154_v34 = vpop.f32.mrf.mxu0  ;;  %v9195_v57 = vpop.f32.mrf.mxu1 }
 0xcda   :  { %v9202_v63 = vadd.f32 %v9154_v34, %v18426_v40  ;;  %v9204_v43 = vadd.f32 %v9195_v57, %v18427_v39 }
 0xcdb   :  { %v9156_v32 = vpop.f32.mrf.mxu0  ;;  %v9197_v45 = vpop.f32.mrf.mxu1 }
 0xcdc   :  { %v11432_v24 = vmul.f32 -1.442695, %v9202_v63  ;;  %v9203_v52 = vadd.f32 %v9156_v32, %v18429_v38  ;;  %v9205_v50 = vadd.f32 %v9197_v45, %v18430_v33 }
 0xcdd   :  { %v9158_v7 = vpop.f32.mrf.mxu0  ;;  %v9199_v36 = vpop.f32.mrf.mxu1 }
 0xcde   :  { %13246 = vpow2.f32 %v11432_v24  ;;  %v11433_v13 = vmul.f32 -1.442695, %v9203_v52  ;;  %v11434_v6 = vmul.f32 -1.442695, %v9205_v50  ;;  %v12998_v36 = vld [vmem:[%s17920_s12 + $0x38] sm:$0xff]  }
 0xcdf   :  { %v9159_v44 = vpop.f32.mrf.mxu0  ;;  %v9200_v46 = vpop.f32.mrf.mxu1 }
 0xce0   :  { %13248 = vpow2.f32 %v11433_v13  ;;  %v13000_v44 = vld [vmem:[%s17920_s12 + $0x28] sm:$0xff]   ;;  %v13001_v46 = vld [vmem:[%s17920_s12 + $0x20] sm:$0xff]  }
 0xce1   :  { %13250 = vtanh.f32 %v9204_v43 }
 0xce2   :  { %13252 = vpow2.f32 %v11434_v6  ;;  %v13002_v6 = vld [vmem:[%s17920_s12 + $0x18] sm:$0xff]  }
 0xceb   :  { %v13247_v3 = vpop.eup %13246 }
 0xcec   :  { %v9209_v30 = vadd.f32 1.0, %v13247_v3  ;;  %v13003_v3 = vld [vmem:[%s17920_s12 + $0x10] sm:$0xff]  }
 0xced   :  { %v13249_v22 = vpop.eup %13248 }
 0xcee   :  { %13254 = vrcp.f32 %v9209_v30  ;;  %v9215_v15 = vadd.f32 1.0, %v13249_v22  ;;  %v13251_v42 = vpop.eup %13250  ;;  %v13004_v30 = vld [vmem:[%s17920_s12 + $0x8] sm:$0xff]   ;;  %v13005_v22 = vld [vmem:[%s17920_s12] sm:$0xff]  }
 0xcef   :  { %v13253_v0 = vpop.eup %13252 }
 0xcf0   :  { %13256 = vrcp.f32 %v9215_v15  ;;  %v9222_v47 = vadd.f32 1.0, %v13253_v0  ;;  %v18431_v15 = vld [vmem:[#allocation34_spill] sm:$0xff] }
 0xcf2   :  { %13258 = vrcp.f32 %v9222_v47  ;;  %v18435_v47 = vld [vmem:[#allocation66_spill] sm:$0xff] }
 0xcfb   :  { %v13255_v37 = vpop.eup %13254 }
 0xcfc   :  { %v9226_v60 = vmul.f32 %v13255_v37, %v13251_v42  ;;  %v18432_v42 = vld [vmem:[#allocation67_spill] sm:$0xff]  ;;  %v18433_v37 = vld [vmem:[#allocation6_spill] sm:$0xff] }
 0xcfd   :  { %v13257_v28 = vpop.eup %13256  ;;  %v10268_v0 = vpack.c.bf16 %v18432_v42, %v18431_v15 }
 0xcfe   :  { %v9225_v10 = vmul.f32 %v13257_v28, %v17527_v18 }
 0xcff   :  { %v13259_v27 = vpop.eup %13258 }
 0xd00   :  { %v9227_v25 = vadd.f32 %v9226_v60, %v9225_v10  ;;  %v18434_v60 = vld [vmem:[#allocation65_spill] sm:$0xff]  ;;  %v10270_v10 = vpack.c.bf16 %v17469_v12, %v18435_v47 }
 0xd01   :  { %v10269_v28 = vpack.c.bf16 %v18434_v60, %v18433_v37 }
 0xd02   :  { %13260 = vtanh.f32 %v9227_v25 }
 0xd0f   :  { %v13261_v19 = vpop.eup %13260 }
 0xd10   :  { %v9229_v8 = vmul.f32 %v13261_v19, %v13259_v27  ;;  %v9810_v27 = vld [vmem:[%s17919_s11] sm:$0xf] }
 0xd11   :  { %v9815_v19 = vrot.slane %v9810_v27, %v14703_v26  ;;  %v9823_v26 = vrot.slane %v9810_v27, %v18397_v56 }
 0xd12   :  { %v9744_v13 = vpack.c.bf16 %v9229_v8, %v9229_v8  ;;  %v9819_v8 = vrot.slane %v9810_v27, %v14715_v58 }
 0xd20   :  { %v9671_v55 = vpop.f32.mrf.mxu0  ;;  %v9712_v14 = vpop.f32.mrf.mxu1 }
 0xd21   :  { %v9672_v23 = vadd.f32 %v9671_v55, %v9300_v5  ;;  %v9713_v1 = vadd.f32 %v9712_v14, %v9308_v53 }
 0xd22   :  { %v9673_v9 = vpop.f32.mrf.mxu0  ;;  %v9714_v4 = vpop.f32.mrf.mxu1 }
 0xd23   :  { %v11499_v18 = vmul.f32 -1.442695, %v9672_v23  ;;  %v9674_v16 = vadd.f32 %v9673_v9, %v9304_v11  ;;  %v9715_v35 = vadd.f32 %v9714_v4, %v9312_v31 }
 0xd24   :  { %v9675_v49 = vpop.f32.mrf.mxu0  ;;  %v9716_v2 = vpop.f32.mrf.mxu1 }
 0xd25   :  { %13262 = vpow2.f32 %v11499_v18  ;;  %v11500_v29 = vmul.f32 -1.442695, %v9674_v16  ;;  %v11501_v17 = vmul.f32 -1.442695, %v9715_v35  ;;  %v9827_v16 = vrot.slane %v9810_v27, %v18392_v62  ;;  %v11569_v35 = vld [vmem:[%s17921_s13] ss:$0 sm:$0xff] }
 0xd26   :  { %v9676_v61 = vpop.f32.mrf.mxu0  ;;  %v9717_v41 = vpop.f32.mrf.mxu1 }
 0xd27   :  { %13264 = vpow2.f32 %v11500_v29 }
 0xd28   :  { %13266 = vpow2.f32 %v11501_v17 }
 0xd32   :  { %v13263_v20 = vpop.eup %13262 }
 0xd33   :  { %v9722_v54 = vadd.f32 1.0, %v13263_v20 }
 0xd34   :  { %v13265_v34 = vpop.eup %13264 }
 0xd35   :  { %13268 = vrcp.f32 %v9722_v54  ;;  %v9728_v57 = vadd.f32 1.0, %v13265_v34  ;;  %v13267_v40 = vpop.eup %13266 }
 0xd36   :  { %13270 = vtanh.f32 %v9713_v1  ;;  %v9735_v32 = vadd.f32 1.0, %v13267_v40 }
 0xd37   :  { %13272 = vrcp.f32 %v9728_v57 }
 0xd38   :  { %13274 = vrcp.f32 %v9735_v32 }
 0xd42   :  { %v13269_v63 = vpop.eup %13268 }
 0xd43   :  { %v13271_v39 = vpop.eup %13270 }
 0xd44   :  { %v13273_v43 = vpop.eup %13272  ;;  %v9739_v45 = vmul.f32 %v13271_v39, %v13269_v63 }
 0xd45   :  { %v9738_v24 = vmul.f32 %v13273_v43, %v17592_v51  ;;  %v13275_v52 = vpop.eup %13274  ;;  %v12999_v51 = vld [vmem:[%s17920_s12 + $0x30] sm:$0xff]  }
 0xd47   :  { %v17819_v38 = vadd.f32 %v9739_v45, %v9738_v24 }
 0xd49   :  { %13276 = vtanh.f32 %v17819_v38 }
 0xd56   :  { %v13277_v33 = vpop.eup %13276 }
 0xd57   :  { %v9742_v50 = vmul.f32 %v13277_v33, %v13275_v52 }
 0xd59   :  { %v9745_v7 = vpack.c.bf16 %v9742_v50, %v9742_v50  ;;  %v10271_v25 = vpack.c.bf16 %v9742_v50, %v17607_v21 }
 0xd5b   :  { %10184 = vmatprep.mubr.bf16.mxu0 %v9745_v7  ;;  %10225 = vmatprep.mubr.bf16.mxu1 %v9745_v7 }
 0xd5c   :  { %10185 = vmatmul.mubr.bf16.vlgmr.msra.gmra.mxu0 %v9744_v13  ;;  %10226 = vmatmul.mubr.bf16.vlgmr.msra.gmra.mxu1 %v9744_v13 }
 0xd5d   :  { %12099 = vmatpush3.bf16.msra.mxu0 %v12998_v36  ;;  %12114 = vmatprep.mubr.msk.bf16.mxu0 %vm13324_vm1, %v18428_v59 }
 0xd5e   :  { %12100 = vmatprep.subr.bf16.mxu0 %v18428_v59 }
 0xd61   :  { %12101 = vmatpush3.bf16.msra.mxu0 %v12999_v51 }
 0xd62   :  { %12102 = vmatprep.subr.bf16.mxu0 %v18428_v59 }
 0xd65   :  { %12103 = vmatpush3.bf16.msra.mxu0 %v13000_v44 }
 0xd66   :  { %12104 = vmatprep.subr.bf16.mxu0 %v18428_v59 }
 0xd69   :  { %12105 = vmatpush3.bf16.msra.mxu0 %v13001_v46 }
 0xd6a   :  { %12106 = vmatprep.subr.bf16.mxu0 %v18428_v59 }
 0xd6d   :  { %12107 = vmatpush3.bf16.msra.mxu0 %v13002_v6 }
 0xd6e   :  { %12108 = vmatprep.subr.bf16.mxu0 %v18428_v59 }
 0xd71   :  { %12109 = vmatpush3.bf16.msra.mxu0 %v13003_v3 }
 0xd72   :  { %12110 = vmatprep.subr.bf16.mxu0 %v18428_v59 }
 0xd75   :  { %12111 = vmatpush3.bf16.msra.mxu0 %v13004_v30 }
 0xd76   :  { %12112 = vmatprep.subr.bf16.mxu0 %v18428_v59 }
 0xd79   :  { %12113 = vmatpush3.bf16.msra.mxu0 %v13005_v22 }
 0xd7c   :  { %12115 = vmatmul.mubr.bf16.vlgmr.msra.gmra.mxu0 %v10268_v0 }
 0xd7d   :  { %12118 = vmatprep.mubr.msk.bf16.mxu0 %vm13324_vm1, %v18428_v59 }
 0xd84   :  { %12119 = vmatmul.mubr.bf16.gmra.mxu0 %v10269_v28 }
 0xd85   :  { %12122 = vmatprep.mubr.msk.bf16.mxu0 %vm13324_vm1, %v18428_v59 }
 0xd8c   :  { %12123 = vmatmul.mubr.bf16.gmra.mxu0 %v10270_v10 }
 0xd8d   :  { %12126 = vmatprep.mubr.msk.bf16.mxu0 %vm13324_vm1, %v18428_v59 }
 0xd94   :  { %12127 = vmatmul.mubr.bf16.gmra.mxu0 %v10271_v25 }
 0xd95   :  { %12130 = vmatprep.mubr.msk.bf16.mxu0 %vm13324_vm1, %v18428_v59 }
 0xe1c   :  { %v10186_v48 = vpop.f32.mrf.mxu0  ;;  %v10227_v12 = vpop.f32.mrf.mxu1 }
 0xe1d   :  { %v10187_v5 = vadd.f32 %v10186_v48, %v9815_v19  ;;  %v10228_v29 = vadd.f32 %v10227_v12, %v9823_v26 }
 0xe1e   :  { %v10188_v11 = vpop.f32.mrf.mxu0  ;;  %v10229_v55 = vpop.f32.mrf.mxu1 }
 0xe1f   :  { %v11566_v14 = vmul.f32 -1.442695, %v10187_v5  ;;  %v10189_v23 = vadd.f32 %v10188_v11, %v9819_v8  ;;  %v10230_v49 = vadd.f32 %v10229_v55, %v9827_v16 }
 0xe20   :  { %v10190_v21 = vpop.f32.mrf.mxu0  ;;  %v10231_v9 = vpop.f32.mrf.mxu1 }
 0xe21   :  { %13278 = vpow2.f32 %v11566_v14  ;;  %v11567_v4 = vmul.f32 -1.442695, %v10189_v23  ;;  %v11568_v58 = vmul.f32 -1.442695, %v10230_v49 }
 0xe22   :  { %v10191_v59 = vpop.f32.mrf.mxu0  ;;  %v10232_v18 = vpop.f32.mrf.mxu1 }
 0xe23   :  { %13280 = vpow2.f32 %v11567_v4 }
 0xe24   :  { %13282 = vpow2.f32 %v11568_v58 }
 0xe2e   :  { %v13279_v2 = vpop.eup %13278 }
 0xe2f   :  { %v10237_v61 = vadd.f32 1.0, %v13279_v2 }
 0xe30   :  { %v13281_v41 = vpop.eup %13280 }
 0xe31   :  { %13284 = vrcp.f32 %v10237_v61  ;;  %v10243_v31 = vadd.f32 1.0, %v13281_v41  ;;  %v13283_v17 = vpop.eup %13282 }
 0xe32   :  { %13286 = vtanh.f32 %v10228_v29  ;;  %v10250_v34 = vadd.f32 1.0, %v13283_v17 }
 0xe33   :  { %13288 = vrcp.f32 %v10243_v31 }
 0xe34   :  { %13290 = vrcp.f32 %v10250_v34 }
 0xe3c   :  { %v10378_v53 = vpop.f32.mrf.mxu0 }
 0xe3d   :  { %v10379_v62 = vadd.f32 %v11569_v35, %v10378_v53 }
 0xe3e   :  { %v13285_v20 = vpop.eup %13284  ;;  %v12116_v1 = vpop.f32.mrf.mxu0 }
 0xe3f   :  { %v13287_v56 = vpop.eup %13286  ;;  %10416 = vst [vmem:[%s17922_s14] sm:$0xff] %v10379_v62 }
 0xe40   :  { %v13289_v54 = vpop.eup %13288  ;;  %v10381_v57 = vpop.f32.mrf.mxu0  ;;  %v10254_v40 = vmul.f32 %v13287_v56, %v13285_v20 }
 0xe41   :  { %v10253_v63 = vmul.f32 %v13289_v54, %v17819_v38  ;;  %v10382_v39 = vadd.f32 %v11569_v35, %v10381_v57  ;;  %v13291_v44 = vpop.eup %13290 }
 0xe42   :  { %v12117_v43 = vpop.f32.mrf.mxu0 }
 0xe43   :  { %v10255_v32 = vadd.f32 %v10254_v40, %v10253_v63  ;;  %10417 = vst [vmem:[%s17922_s14 + $0x8] sm:$0xff] %v10382_v39 }
 0xe44   :  { %v10386_v45 = vpop.f32.mrf.mxu0 }
 0xe45   :  { %v10387_v24 = vadd.f32 %v11569_v35, %v10386_v45  ;;  %13292 = vtanh.f32 %v10255_v32 }
 0xe46   :  { %v12120_v52 = vpop.f32.mrf.mxu0 }
 0xe47   :  { %10418 = vst [vmem:[%s17922_s14 + $0x10] sm:$0xff] %v10387_v24 }
 0xe48   :  { %v10389_v33 = vpop.f32.mrf.mxu0 }
 0xe49   :  { %v10390_v50 = vadd.f32 %v11569_v35, %v10389_v33 }
 0xe4a   :  { %v12121_v7 = vpop.f32.mrf.mxu0 }
 0xe4b   :  { %10419 = vst [vmem:[%s17922_s14 + $0x18] sm:$0xff] %v10390_v50 }
 0xe4c   :  { %v10394_v38 = vpop.f32.mrf.mxu0 }
 0xe4d   :  { %v10395_v36 = vadd.f32 %v11569_v35, %v10394_v38 }
 0xe4e   :  { %v12124_v13 = vpop.f32.mrf.mxu0 }
 0xe4f   :  { %10420 = vst [vmem:[%s17922_s14 + $0x20] sm:$0xff] %v10395_v36 }
 0xe50   :  { %v10397_v51 = vpop.f32.mrf.mxu0 }
 0xe51   :  { %v10398_v46 = vadd.f32 %v11569_v35, %v10397_v51 }
 0xe52   :  { %v13293_v6 = vpop.eup %13292  ;;  %v12125_v3 = vpop.f32.mrf.mxu0 }
 0xe53   :  { %10421 = vst [vmem:[%s17922_s14 + $0x28] sm:$0xff] %v10398_v46  ;;  %v10257_v30 = vmul.f32 %v13293_v6, %v13291_v44 }
 0xe54   :  { %v10402_v22 = vpop.f32.mrf.mxu0 }
 0xe55   :  { %v10403_v15 = vadd.f32 %v11569_v35, %v10402_v22  ;;  %v10272_v42 = vpack.c.bf16 %v10257_v30, %v10257_v30 }
 0xe56   :  { %v12128_v0 = vpop.f32.mrf.mxu0 }
 0xe57   :  { %10422 = vst [vmem:[%s17922_s14 + $0x30] sm:$0xff] %v10403_v15  ;;  %12131 = vmatmul.mubr.bf16.gmra.mxu0 %v10272_v42 }
 0xe58   :  { %v10405_v37 = vpop.f32.mrf.mxu0 }
 0xe59   :  { %v10406_v60 = vadd.f32 %v11569_v35, %v10405_v37 }
 0xe5a   :  { %v12129_v28 = vpop.f32.mrf.mxu0 }
 0xe5b   :  { %10423 = vst [vmem:[%s17922_s14 + $0x38] sm:$0xff] %v10406_v60 }
 0xf17   :  { %v10410_v47 = vpop.f32.mrf.mxu0 }
 0xf18   :  { %v10411_v10 = vadd.f32 %v11569_v35, %v10410_v47 }
 0xf19   :  { %v12132_v25 = vpop.f32.mrf.mxu0 }
 0xf1a   :  { %10424 = vst [vmem:[%s17922_s14 + $0x40] sm:$0xff] %v10411_v10 }
 0xf1b   :  { %v10413_v27 = vpop.f32.mrf.mxu0 }
 0xf1d   :  { %v12133_v19 = vpop.f32.mrf.mxu0 }

</bundles_post_ra>
